<compile_context>
chip_gen: v6e
topology: v6e:2x2x1
jax: 0.10.0
libtpu: 0.0.40
codegen_flags: <defaults>
</compile_context>

<pallas_src>
import math

import numpy as np
import jax
import jax.numpy as jnp
from jax.experimental import pallas as pl
from jax.experimental.pallas import tpu as pltpu

# ---------------------------------------------------------------------------
# Config (small, deterministic synthetic model)
# ---------------------------------------------------------------------------
B = 2            # batch
S_SRC = 8        # source sequence length
S_TGT = 8        # target sequence length
D_MODEL = 32     # model width
N_HEADS = 4
D_HEAD = D_MODEL // N_HEADS
D_FF = 64
N_LAYERS = 2
VOCAB_SRC = 16
VOCAB_TGT = 16
LN_EPS = 1e-5                      # nn.LayerNorm default (biased variance)
SCALE = 1.0 / math.sqrt(D_HEAD)

LANES = 128                        # lane-dense packing width
VOCAB_PAD = 128                    # generator vocab padded to full lanes
NEG = -1e9                         # additive mask value (masked_fill analogue)

BS_SRC = B * S_SRC
BS_TGT = B * S_TGT


# ---------------------------------------------------------------------------
# Static packed-weight layout: name -> (row_offset, rows, cols)
# (all offsets padded to multiples of 8 sublanes; everything starts at lane 0)
# ---------------------------------------------------------------------------
def _round8(n):
    return ((n + 7) // 8) * 8


def _build_layout():
    layout = {}
    off = 0

    def reg(name, rows, cols):
        nonlocal off
        layout[name] = (off, rows, cols)
        off += _round8(rows)

    def reg_attn(pfx):
        for nm in ("q", "k", "v"):
            reg(pfx + "w" + nm, N_HEADS * D_MODEL, D_HEAD)   # head-major blocks
            reg(pfx + "b" + nm, N_HEADS, D_HEAD)
        reg(pfx + "wo", D_MODEL, D_MODEL)
        reg(pfx + "bo", 1, D_MODEL)

    for l in range(N_LAYERS):
        reg(f"e{l}_ln1", 2, D_MODEL)
        reg_attn(f"e{l}_")
        reg(f"e{l}_ln2", 2, D_MODEL)
        reg(f"e{l}_w1", D_MODEL, D_FF)
        reg(f"e{l}_b1", 1, D_FF)
        reg(f"e{l}_w2", D_FF, D_MODEL)
        reg(f"e{l}_b2", 1, D_MODEL)
    reg("e_lnf", 2, D_MODEL)

    for l in range(N_LAYERS):
        reg(f"d{l}_ln1", 2, D_MODEL)
        reg_attn(f"d{l}_s")          # decoder self-attention
        reg(f"d{l}_ln2", 2, D_MODEL)
        reg_attn(f"d{l}_c")          # decoder cross-attention
        reg(f"d{l}_ln3", 2, D_MODEL)
        reg(f"d{l}_w1", D_MODEL, D_FF)
        reg(f"d{l}_b1", 1, D_FF)
        reg(f"d{l}_w2", D_FF, D_MODEL)
        reg(f"d{l}_b2", 1, D_MODEL)
    reg("d_lnf", 2, D_MODEL)

    reg("g_w", D_MODEL, VOCAB_PAD)
    reg("g_b", 1, VOCAB_PAD)
    return layout, off


_LAYOUT, _W_ROWS = _build_layout()

# Packed per-call data buffer layout (rows; every item starts at lane 0)
_D_SRC = 0
_D_TGT = _D_SRC + BS_SRC
_D_EB = _D_TGT + BS_TGT        # encoder self-attention bias   (BS_SRC, BS_SRC)
_D_DB = _D_EB + BS_SRC         # decoder self-attention bias   (BS_TGT, BS_TGT)
_D_CB = _D_DB + BS_TGT         # decoder cross-attention bias  (BS_TGT, BS_SRC)
_D_ROWS = _D_CB + BS_TGT       # 80 rows


# ---------------------------------------------------------------------------
# The single fused Pallas kernel: whole transformer forward, VMEM-resident
# ---------------------------------------------------------------------------
def _transformer_kernel(data_ref, w_ref, out_ref):
    # ---- static carve-outs from the packed weight buffer -------------------
    def full(name):
        off, r, c = _LAYOUT[name]
        return w_ref[off:off + r, 0:c]

    def head_w(name, h):                       # (D_MODEL, D_HEAD), lane 0
        off, _, _ = _LAYOUT[name]
        base = off + h * D_MODEL
        return w_ref[base:base + D_MODEL, 0:D_HEAD]

    def head_b(name, h):                       # (1, D_HEAD)
        off, _, _ = _LAYOUT[name]
        return w_ref[off + h:off + h + 1, 0:D_HEAD]

    # ---- building blocks (traced inline; all in vregs / VMEM) --------------
    def layer_norm(x, name):
        off, _, c = _LAYOUT[name]
        g = w_ref[off:off + 1, 0:c]
        b = w_ref[off + 1:off + 2, 0:c]
        mean = jnp.mean(x, axis=-1, keepdims=True)
        var = jnp.mean(jnp.square(x - mean), axis=-1, keepdims=True)
        return (x - mean) * jax.lax.rsqrt(var + LN_EPS) * g + b

    def attention(xq, xkv, pfx, bias):
        # xq: (Nq, D_MODEL), xkv: (Nk, D_MODEL), bias: (Nq, Nk) additive
        # (block-diagonal over batch + user mask).  All heads at lane 0; the
        # head merge is folded into per-head Wo row-blocks (no lane concat).
        wo_off, _, _ = _LAYOUT[pfx + "wo"]
        out = None
        for h in range(N_HEADS):
            q = jnp.dot(xq, head_w(pfx + "wq", h),
                        preferred_element_type=jnp.float32) + head_b(pfx + "bq", h)
            k = jnp.dot(xkv, head_w(pfx + "wk", h),
                        preferred_element_type=jnp.float32) + head_b(pfx + "bk", h)
            v = jnp.dot(xkv, head_w(pfx + "wv", h),
                        preferred_element_type=jnp.float32) + head_b(pfx + "bv", h)
            s = jax.lax.dot_general(q, k, (((1,), (1,)), ((), ())),
                                    preferred_element_type=jnp.float32) * SCALE + bias
            s = s - jnp.max(s, axis=-1, keepdims=True)
            e = jnp.exp(s)
            p = e / jnp.sum(e, axis=-1, keepdims=True)        # exact softmax
            o = jnp.dot(p, v, preferred_element_type=jnp.float32)      # (Nq, Dh)
            wo_h = w_ref[wo_off + h * D_HEAD:wo_off + (h + 1) * D_HEAD, 0:D_MODEL]
            c = jnp.dot(o, wo_h, preferred_element_type=jnp.float32)   # (Nq, D)
            out = c if out is None else out + c
        return out + full(pfx + "bo")

    def ffn(x, pfx):
        h = jnp.maximum(
            jnp.dot(x, full(pfx + "w1"), preferred_element_type=jnp.float32)
            + full(pfx + "b1"), 0.0)
        return (jnp.dot(h, full(pfx + "w2"), preferred_element_type=jnp.float32)
                + full(pfx + "b2"))

    # ---- inputs (single packed data buffer) ---------------------------------
    enc_bias = data_ref[_D_EB:_D_EB + BS_SRC, 0:BS_SRC]
    dec_bias = data_ref[_D_DB:_D_DB + BS_TGT, 0:BS_TGT]
    cross_bias = data_ref[_D_CB:_D_CB + BS_TGT, 0:BS_SRC]

    # ---- encoder -------------------------------------------------------------
    x = data_ref[_D_SRC:_D_SRC + BS_SRC, 0:D_MODEL]
    for l in range(N_LAYERS):
        pfx = f"e{l}_"
        h = layer_norm(x, pfx + "ln1")
        x = x + attention(h, h, pfx, enc_bias)
        h = layer_norm(x, pfx + "ln2")
        x = x + ffn(h, pfx)
    memory = layer_norm(x, "e_lnf")

    # ---- decoder -------------------------------------------------------------
    y = data_ref[_D_TGT:_D_TGT + BS_TGT, 0:D_MODEL]
    for l in range(N_LAYERS):
        pfx = f"d{l}_"
        h = layer_norm(y, pfx + "ln1")
        y = y + attention(h, h, pfx + "s", dec_bias)
        h = layer_norm(y, pfx + "ln2")
        y = y + attention(h, memory, pfx + "c", cross_bias)
        h = layer_norm(y, pfx + "ln3")
        y = y + ffn(h, pfx)
    y = layer_norm(y, "d_lnf")

    # ---- generator: Linear + log_softmax over the lane-dense padded vocab ---
    # Padded bias columns are -1e9, so they contribute 0 to the lse and the
    # real 16 columns are exactly the reference log_softmax.
    logits = (jnp.dot(y, full("g_w"), preferred_element_type=jnp.float32)
              + full("g_b"))
    m = jnp.max(logits, axis=-1, keepdims=True)
    sh = logits - m
    lse = jnp.log(jnp.sum(jnp.exp(sh), axis=-1, keepdims=True))
    out_ref[...] = sh - lse                       # (BS_TGT, 128) unmasked store


# ---------------------------------------------------------------------------
# Plain-JAX glue (embedding gather, positional encoding, mask -> bias packing)
# ---------------------------------------------------------------------------
def _positional_encoding(max_len, d_model):
    pos = np.arange(max_len, dtype=np.float32)[:, None]
    div = np.exp(np.arange(0, d_model, 2, dtype=np.float32)
                 * -(math.log(10000.0) / d_model))
    pe = np.zeros((max_len, d_model), dtype=np.float32)
    pe[:, 0::2] = np.sin(pos * div)
    pe[:, 1::2] = np.cos(pos * div)
    return jnp.asarray(pe)


def _lane_pad(a):
    return jnp.pad(a, ((0, 0), (0, LANES - a.shape[1])))


def _block_diag_bias(per_batch):
    """(B, Sq, Sk) per-batch additive bias -> (B*Sq, B*Sk) with -1e9 off-block.

    Folds the batch loop into one matmul per head: cross-batch attention is
    suppressed by the bias exactly like masked positions.
    """
    Bn, Sq, Sk = per_batch.shape
    same = jnp.eye(Bn, dtype=bool)[:, None, :, None]            # (B,1,B,1)
    big = jnp.where(same, per_batch[:, :, None, :], NEG)        # (B,Sq,B,Sk)
    return big.reshape(Bn * Sq, Bn * Sk).astype(jnp.float32)


def _embed(tokens, table, pe, seq):
    # Embedding lookup (gather) + sinusoidal positional encoding.
    # Dropout is identity in eval mode.
    return (jnp.take(table, tokens, axis=0) * math.sqrt(D_MODEL)
            + pe[:seq][None])


def transformer_forward(params, src, tgt, src_mask, tgt_mask):
    pe = params["pos_enc"]
    src_x = _embed(src, params["src_table"], pe, S_SRC).reshape(BS_SRC, D_MODEL)
    tgt_x = _embed(tgt, params["tgt_table"], pe, S_TGT).reshape(BS_TGT, D_MODEL)

    # Additive attention bias (0 keep / -1e9 drop).  Same effect as
    # masked_fill(mask == 0, -1e9) for mask patterns without fully-masked rows.
    src_add = jnp.where(src_mask[:, 0, :, :] != 0, 0.0, NEG).astype(jnp.float32)
    tgt_add = jnp.where(tgt_mask[:, 0] != 0, 0.0, NEG).astype(jnp.float32)

    enc_bias = _block_diag_bias(jnp.broadcast_to(src_add, (B, S_SRC, S_SRC)))
    dec_bias = _block_diag_bias(tgt_add)
    cross_bias = _block_diag_bias(jnp.broadcast_to(src_add, (B, S_TGT, S_SRC)))

    # One lane-dense (80, 128) data buffer: activations + all attention biases
    # -> exactly one input DMA for per-call data.
    data = jnp.concatenate(
        [_lane_pad(src_x), _lane_pad(tgt_x),
         _lane_pad(enc_bias), _lane_pad(dec_bias), _lane_pad(cross_bias)],
        axis=0)

    out = pl.pallas_call(
        _transformer_kernel,
        out_shape=jax.ShapeDtypeStruct((BS_TGT, VOCAB_PAD), jnp.float32),
        # grid=(): one invocation, whole-array VMEM blocks (2 inputs, 1 output).
        in_specs=[pl.BlockSpec(memory_space=pltpu.MemorySpace.VMEM),
                  pl.BlockSpec(memory_space=pltpu.MemorySpace.VMEM)],
        out_specs=pl.BlockSpec(memory_space=pltpu.MemorySpace.VMEM),
    )(data, params["w_packed"])

    return out[:, :VOCAB_TGT].reshape(B, S_TGT, VOCAB_TGT)


# ---------------------------------------------------------------------------
# Deterministic parameter init -> single packed lane-dense weight buffer
# ---------------------------------------------------------------------------
def _glorot(key, shape):
    fan_in, fan_out = shape
    lim = math.sqrt(6.0 / (fan_in + fan_out))
    return np.asarray(jax.random.uniform(key, shape, jnp.float32, -lim, lim))


def init_params(key):
    k_w, k_src, k_tgt = jax.random.split(key, 3)
    keys = iter(jax.random.split(k_w, 64))

    def nk():
        return next(keys)

    pd = {}

    def add_ln(name):
        pd[name] = np.stack([np.ones(D_MODEL, np.float32),
                             np.zeros(D_MODEL, np.float32)])

    def add_attn(pfx):
        for nm in ("q", "k", "v"):
            w = _glorot(nk(), (D_MODEL, D_MODEL))            # (in, out)
            # head-major repack: head h = columns h*Dh:(h+1)*Dh of the full
            # projection, stored as sublane-stacked (H*D_MODEL, D_HEAD) blocks.
            pd[pfx + "w" + nm] = (w.reshape(D_MODEL, N_HEADS, D_HEAD)
                                   .transpose(1, 0, 2)
                                   .reshape(N_HEADS * D_MODEL, D_HEAD))
            pd[pfx + "b" + nm] = np.zeros((N_HEADS, D_HEAD), np.float32)
        pd[pfx + "wo"] = _glorot(nk(), (D_MODEL, D_MODEL))
        pd[pfx + "bo"] = np.zeros((1, D_MODEL), np.float32)

    def add_ffn(pfx):
        pd[pfx + "w1"] = _glorot(nk(), (D_MODEL, D_FF))
        pd[pfx + "b1"] = np.zeros((1, D_FF), np.float32)
        pd[pfx + "w2"] = _glorot(nk(), (D_FF, D_MODEL))
        pd[pfx + "b2"] = np.zeros((1, D_MODEL), np.float32)

    for l in range(N_LAYERS):
        add_ln(f"e{l}_ln1"); add_attn(f"e{l}_")
        add_ln(f"e{l}_ln2"); add_ffn(f"e{l}_")
    add_ln("e_lnf")
    for l in range(N_LAYERS):
        add_ln(f"d{l}_ln1"); add_attn(f"d{l}_s")
        add_ln(f"d{l}_ln2"); add_attn(f"d{l}_c")
        add_ln(f"d{l}_ln3"); add_ffn(f"d{l}_")
    add_ln("d_lnf")

    # Generator padded to 128 lanes; padded bias columns -1e9 so the in-kernel
    # log_softmax over 128 lanes equals the reference log_softmax over 16.
    g_w = _glorot(nk(), (D_MODEL, VOCAB_TGT))
    g_w_p = np.zeros((D_MODEL, VOCAB_PAD), np.float32)
    g_w_p[:, :VOCAB_TGT] = g_w
    g_b_p = np.full((1, VOCAB_PAD), NEG, np.float32)
    g_b_p[:, :VOCAB_TGT] = 0.0
    pd["g_w"] = g_w_p
    pd["g_b"] = g_b_p

    # Pack everything into one lane-dense buffer (single VMEM input DMA).
    buf = np.zeros((_W_ROWS, LANES), np.float32)
    for name, (off, r, c) in _LAYOUT.items():
        buf[off:off + r, :c] = np.asarray(pd[name], np.float32).reshape(r, c)

    return {
        "w_packed": jnp.asarray(buf),
        "src_table": jax.random.normal(k_src, (VOCAB_SRC, D_MODEL), jnp.float32) * 0.1,
        "tgt_table": jax.random.normal(k_tgt, (VOCAB_TGT, D_MODEL), jnp.float32) * 0.1,
        "pos_enc": _positional_encoding(64, D_MODEL),
    }


# ---------------------------------------------------------------------------
if __name__ == "__main__":
    root = jax.random.PRNGKey(0)
    pkey, skey, tkey = jax.random.split(root, 3)

    params = init_params(pkey)

    src = jax.random.randint(skey, (B, S_SRC), 0, VOCAB_SRC, dtype=jnp.int32)
    tgt = jax.random.randint(tkey, (B, S_TGT), 0, VOCAB_TGT, dtype=jnp.int32)
    # src_mask: no padding -> all ones; tgt_mask: causal (subsequent) mask.
    src_mask = jnp.ones((B, 1, 1, S_SRC), jnp.float32)
    causal = jnp.tril(jnp.ones((S_TGT, S_TGT), jnp.float32))
    tgt_mask = jnp.broadcast_to(causal[None, None], (B, 1, S_TGT, S_TGT))

    fwd = jax.jit(transformer_forward)
    out = jax.block_until_ready(fwd(params, src, tgt, src_mask, tgt_mask))

    assert out.shape == (B, S_TGT, VOCAB_TGT)
    # log_softmax rows must sum to ~1 in prob space
    assert bool(jnp.allclose(jnp.exp(out).sum(-1), 1.0, atol=1e-4))
    print("KERNEL_OK")
</pallas_src>

<mosaic_0001>
module attributes {stable_mosaic.version = 11 : i64} {
  func.func @_transformer_kernel(%arg0: memref<80x128xf32, #tpu.memory_space<vmem>>, %arg1: memref<3272x128xf32, #tpu.memory_space<vmem>>, %arg2: memref<16x128xf32, #tpu.memory_space<vmem>>) attributes {dimension_semantics = [], scalar_prefetch = 0 : i64, scratch_operands = 0 : i64, tpu.core_type = #tpu.core_type<tc>} {
    %c32 = arith.constant 32 : index
    %c0 = arith.constant 0 : index
    %0 = vector.load %arg0[%c32, %c0] : memref<80x128xf32, #tpu.memory_space<vmem>>, vector<16x16xf32>
    %c48 = arith.constant 48 : index
    %c0_0 = arith.constant 0 : index
    %1 = vector.load %arg0[%c48, %c0_0] : memref<80x128xf32, #tpu.memory_space<vmem>>, vector<16x16xf32>
    %c64 = arith.constant 64 : index
    %c0_1 = arith.constant 0 : index
    %2 = vector.load %arg0[%c64, %c0_1] : memref<80x128xf32, #tpu.memory_space<vmem>>, vector<16x16xf32>
    %c0_2 = arith.constant 0 : index
    %c0_3 = arith.constant 0 : index
    %3 = vector.load %arg0[%c0_2, %c0_3] : memref<80x128xf32, #tpu.memory_space<vmem>>, vector<16x32xf32>
    %c0_4 = arith.constant 0 : index
    %c0_5 = arith.constant 0 : index
    %4 = vector.load %arg1[%c0_4, %c0_5] : memref<3272x128xf32, #tpu.memory_space<vmem>>, vector<1x32xf32>
    %c1 = arith.constant 1 : index
    %c0_6 = arith.constant 0 : index
    %5 = vector.load %arg1[%c1, %c0_6] : memref<3272x128xf32, #tpu.memory_space<vmem>>, vector<1x32xf32>
    %cst = arith.constant dense<0.000000e+00> : vector<16xf32>
    %6 = vector.multi_reduction <add>, %3, %cst [1] : vector<16x32xf32> to vector<16xf32>
    %7 = vector.shape_cast %6 : vector<16xf32> to vector<16x1xf32>
    %cst_7 = arith.constant 3.200000e+01 : f32
    %8 = vector.broadcast %cst_7 : f32 to vector<16x1xf32>
    %9 = arith.divf %7, %8 : vector<16x1xf32>
    %10 = vector.broadcast %9 : vector<16x1xf32> to vector<16x32xf32>
    %11 = arith.subf %3, %10 : vector<16x32xf32>
    %12 = arith.mulf %11, %11 : vector<16x32xf32>
    %cst_8 = arith.constant dense<0.000000e+00> : vector<16xf32>
    %13 = vector.multi_reduction <add>, %12, %cst_8 [1] : vector<16x32xf32> to vector<16xf32>
    %14 = vector.shape_cast %13 : vector<16xf32> to vector<16x1xf32>
    %cst_9 = arith.constant 3.200000e+01 : f32
    %15 = vector.broadcast %cst_9 : f32 to vector<16x1xf32>
    %16 = arith.divf %14, %15 : vector<16x1xf32>
    %17 = vector.broadcast %9 : vector<16x1xf32> to vector<16x32xf32>
    %18 = arith.subf %3, %17 : vector<16x32xf32>
    %cst_10 = arith.constant 9.99999974E-6 : f32
    %19 = vector.broadcast %cst_10 : f32 to vector<16x1xf32>
    %20 = arith.addf %16, %19 : vector<16x1xf32>
    %21 = math.rsqrt %20 : vector<16x1xf32>
    %22 = vector.broadcast %21 : vector<16x1xf32> to vector<16x32xf32>
    %23 = arith.mulf %18, %22 : vector<16x32xf32>
    %24 = vector.broadcast %4 : vector<1x32xf32> to vector<16x32xf32>
    %25 = arith.mulf %23, %24 : vector<16x32xf32>
    %26 = vector.broadcast %5 : vector<1x32xf32> to vector<16x32xf32>
    %27 = arith.addf %25, %26 : vector<16x32xf32>
    %c8 = arith.constant 8 : index
    %c0_11 = arith.constant 0 : index
    %28 = vector.load %arg1[%c8, %c0_11] : memref<3272x128xf32, #tpu.memory_space<vmem>>, vector<32x8xf32>
    %cst_12 = arith.constant dense<0.000000e+00> : vector<16x8xf32>
    %29 = tpu.matmul %27, %28, %cst_12 {dimension_numbers = #tpu.dot_dimension_numbers<[1], [0], [0], [1], [0, 0, 1, 1], [], []>} : vector<16x32xf32>, vector<32x8xf32>, vector<16x8xf32> -> vector<16x8xf32>
    %c136 = arith.constant 136 : index
    %c0_13 = arith.constant 0 : index
    %30 = vector.load %arg1[%c136, %c0_13] : memref<3272x128xf32, #tpu.memory_space<vmem>>, vector<1x8xf32>
    %31 = vector.broadcast %30 : vector<1x8xf32> to vector<16x8xf32>
    %32 = arith.addf %29, %31 : vector<16x8xf32>
    %c144 = arith.constant 144 : index
    %c0_14 = arith.constant 0 : index
    %33 = vector.load %arg1[%c144, %c0_14] : memref<3272x128xf32, #tpu.memory_space<vmem>>, vector<32x8xf32>
    %cst_15 = arith.constant dense<0.000000e+00> : vector<16x8xf32>
    %34 = tpu.matmul %27, %33, %cst_15 {dimension_numbers = #tpu.dot_dimension_numbers<[1], [0], [0], [1], [0, 0, 1, 1], [], []>} : vector<16x32xf32>, vector<32x8xf32>, vector<16x8xf32> -> vector<16x8xf32>
    %c272 = arith.constant 272 : index
    %c0_16 = arith.constant 0 : index
    %35 = vector.load %arg1[%c272, %c0_16] : memref<3272x128xf32, #tpu.memory_space<vmem>>, vector<1x8xf32>
    %36 = vector.broadcast %35 : vector<1x8xf32> to vector<16x8xf32>
    %37 = arith.addf %34, %36 : vector<16x8xf32>
    %c280 = arith.constant 280 : index
    %c0_17 = arith.constant 0 : index
    %38 = vector.load %arg1[%c280, %c0_17] : memref<3272x128xf32, #tpu.memory_space<vmem>>, vector<32x8xf32>
    %cst_18 = arith.constant dense<0.000000e+00> : vector<16x8xf32>
    %39 = tpu.matmul %27, %38, %cst_18 {dimension_numbers = #tpu.dot_dimension_numbers<[1], [0], [0], [1], [0, 0, 1, 1], [], []>} : vector<16x32xf32>, vector<32x8xf32>, vector<16x8xf32> -> vector<16x8xf32>
    %c408 = arith.constant 408 : index
    %c0_19 = arith.constant 0 : index
    %40 = vector.load %arg1[%c408, %c0_19] : memref<3272x128xf32, #tpu.memory_space<vmem>>, vector<1x8xf32>
    %41 = vector.broadcast %40 : vector<1x8xf32> to vector<16x8xf32>
    %42 = arith.addf %39, %41 : vector<16x8xf32>
    %cst_20 = arith.constant dense<0.000000e+00> : vector<16x16xf32>
    %43 = tpu.matmul %32, %37, %cst_20 {dimension_numbers = #tpu.dot_dimension_numbers<[1], [1], [0], [0], [0, 0, 1, 0], [], []>} : vector<16x8xf32>, vector<16x8xf32>, vector<16x16xf32> -> vector<16x16xf32>
    %cst_21 = arith.constant 0.353553385 : f32
    %44 = vector.broadcast %cst_21 : f32 to vector<16x16xf32>
    %45 = arith.mulf %43, %44 : vector<16x16xf32>
    %46 = arith.addf %45, %0 : vector<16x16xf32>
    %cst_22 = arith.constant dense<0xFF800000> : vector<16xf32>
    %47 = vector.multi_reduction <maximumf>, %46, %cst_22 [1] : vector<16x16xf32> to vector<16xf32>
    %48 = vector.shape_cast %47 : vector<16xf32> to vector<16x1xf32>
    %49 = vector.broadcast %48 : vector<16x1xf32> to vector<16x16xf32>
    %50 = arith.subf %46, %49 : vector<16x16xf32>
    %51 = math.exp %50 : vector<16x16xf32>
    %cst_23 = arith.constant dense<0.000000e+00> : vector<16xf32>
    %52 = vector.multi_reduction <add>, %51, %cst_23 [1] : vector<16x16xf32> to vector<16xf32>
    %53 = vector.shape_cast %52 : vector<16xf32> to vector<16x1xf32>
    %54 = vector.broadcast %53 : vector<16x1xf32> to vector<16x16xf32>
    %55 = arith.divf %51, %54 : vector<16x16xf32>
    %cst_24 = arith.constant dense<0.000000e+00> : vector<16x8xf32>
    %56 = tpu.matmul %55, %42, %cst_24 {dimension_numbers = #tpu.dot_dimension_numbers<[1], [0], [0], [1], [0, 0, 1, 1], [], []>} : vector<16x16xf32>, vector<16x8xf32>, vector<16x8xf32> -> vector<16x8xf32>
    %c416 = arith.constant 416 : index
    %c0_25 = arith.constant 0 : index
    %57 = vector.load %arg1[%c416, %c0_25] : memref<3272x128xf32, #tpu.memory_space<vmem>>, vector<8x32xf32>
    %cst_26 = arith.constant dense<0.000000e+00> : vector<16x32xf32>
    %58 = tpu.matmul %56, %57, %cst_26 {dimension_numbers = #tpu.dot_dimension_numbers<[1], [0], [0], [1], [0, 0, 1, 1], [], []>} : vector<16x8xf32>, vector<8x32xf32>, vector<16x32xf32> -> vector<16x32xf32>
    %c40 = arith.constant 40 : index
    %c0_27 = arith.constant 0 : index
    %59 = vector.load %arg1[%c40, %c0_27] : memref<3272x128xf32, #tpu.memory_space<vmem>>, vector<32x8xf32>
    %cst_28 = arith.constant dense<0.000000e+00> : vector<16x8xf32>
    %60 = tpu.matmul %27, %59, %cst_28 {dimension_numbers = #tpu.dot_dimension_numbers<[1], [0], [0], [1], [0, 0, 1, 1], [], []>} : vector<16x32xf32>, vector<32x8xf32>, vector<16x8xf32> -> vector<16x8xf32>
    %c137 = arith.constant 137 : index
    %c0_29 = arith.constant 0 : index
    %61 = vector.load %arg1[%c137, %c0_29] : memref<3272x128xf32, #tpu.memory_space<vmem>>, vector<1x8xf32>
    %62 = vector.broadcast %61 : vector<1x8xf32> to vector<16x8xf32>
    %63 = arith.addf %60, %62 : vector<16x8xf32>
    %c176 = arith.constant 176 : index
    %c0_30 = arith.constant 0 : index
    %64 = vector.load %arg1[%c176, %c0_30] : memref<3272x128xf32, #tpu.memory_space<vmem>>, vector<32x8xf32>
    %cst_31 = arith.constant dense<0.000000e+00> : vector<16x8xf32>
    %65 = tpu.matmul %27, %64, %cst_31 {dimension_numbers = #tpu.dot_dimension_numbers<[1], [0], [0], [1], [0, 0, 1, 1], [], []>} : vector<16x32xf32>, vector<32x8xf32>, vector<16x8xf32> -> vector<16x8xf32>
    %c273 = arith.constant 273 : index
    %c0_32 = arith.constant 0 : index
    %66 = vector.load %arg1[%c273, %c0_32] : memref<3272x128xf32, #tpu.memory_space<vmem>>, vector<1x8xf32>
    %67 = vector.broadcast %66 : vector<1x8xf32> to vector<16x8xf32>
    %68 = arith.addf %65, %67 : vector<16x8xf32>
    %c312 = arith.constant 312 : index
    %c0_33 = arith.constant 0 : index
    %69 = vector.load %arg1[%c312, %c0_33] : memref<3272x128xf32, #tpu.memory_space<vmem>>, vector<32x8xf32>
    %cst_34 = arith.constant dense<0.000000e+00> : vector<16x8xf32>
    %70 = tpu.matmul %27, %69, %cst_34 {dimension_numbers = #tpu.dot_dimension_numbers<[1], [0], [0], [1], [0, 0, 1, 1], [], []>} : vector<16x32xf32>, vector<32x8xf32>, vector<16x8xf32> -> vector<16x8xf32>
    %c409 = arith.constant 409 : index
    %c0_35 = arith.constant 0 : index
    %71 = vector.load %arg1[%c409, %c0_35] : memref<3272x128xf32, #tpu.memory_space<vmem>>, vector<1x8xf32>
    %72 = vector.broadcast %71 : vector<1x8xf32> to vector<16x8xf32>
    %73 = arith.addf %70, %72 : vector<16x8xf32>
    %cst_36 = arith.constant dense<0.000000e+00> : vector<16x16xf32>
    %74 = tpu.matmul %63, %68, %cst_36 {dimension_numbers = #tpu.dot_dimension_numbers<[1], [1], [0], [0], [0, 0, 1, 0], [], []>} : vector<16x8xf32>, vector<16x8xf32>, vector<16x16xf32> -> vector<16x16xf32>
    %cst_37 = arith.constant 0.353553385 : f32
    %75 = vector.broadcast %cst_37 : f32 to vector<16x16xf32>
    %76 = arith.mulf %74, %75 : vector<16x16xf32>
    %77 = arith.addf %76, %0 : vector<16x16xf32>
    %cst_38 = arith.constant dense<0xFF800000> : vector<16xf32>
    %78 = vector.multi_reduction <maximumf>, %77, %cst_38 [1] : vector<16x16xf32> to vector<16xf32>
    %79 = vector.shape_cast %78 : vector<16xf32> to vector<16x1xf32>
    %80 = vector.broadcast %79 : vector<16x1xf32> to vector<16x16xf32>
    %81 = arith.subf %77, %80 : vector<16x16xf32>
    %82 = math.exp %81 : vector<16x16xf32>
    %cst_39 = arith.constant dense<0.000000e+00> : vector<16xf32>
    %83 = vector.multi_reduction <add>, %82, %cst_39 [1] : vector<16x16xf32> to vector<16xf32>
    %84 = vector.shape_cast %83 : vector<16xf32> to vector<16x1xf32>
    %85 = vector.broadcast %84 : vector<16x1xf32> to vector<16x16xf32>
    %86 = arith.divf %82, %85 : vector<16x16xf32>
    %cst_40 = arith.constant dense<0.000000e+00> : vector<16x8xf32>
    %87 = tpu.matmul %86, %73, %cst_40 {dimension_numbers = #tpu.dot_dimension_numbers<[1], [0], [0], [1], [0, 0, 1, 1], [], []>} : vector<16x16xf32>, vector<16x8xf32>, vector<16x8xf32> -> vector<16x8xf32>
    %c424 = arith.constant 424 : index
    %c0_41 = arith.constant 0 : index
    %88 = vector.load %arg1[%c424, %c0_41] : memref<3272x128xf32, #tpu.memory_space<vmem>>, vector<8x32xf32>
    %cst_42 = arith.constant dense<0.000000e+00> : vector<16x32xf32>
    %89 = tpu.matmul %87, %88, %cst_42 {dimension_numbers = #tpu.dot_dimension_numbers<[1], [0], [0], [1], [0, 0, 1, 1], [], []>} : vector<16x8xf32>, vector<8x32xf32>, vector<16x32xf32> -> vector<16x32xf32>
    %90 = arith.addf %58, %89 : vector<16x32xf32>
    %c72 = arith.constant 72 : index
    %c0_43 = arith.constant 0 : index
    %91 = vector.load %arg1[%c72, %c0_43] : memref<3272x128xf32, #tpu.memory_space<vmem>>, vector<32x8xf32>
    %cst_44 = arith.constant dense<0.000000e+00> : vector<16x8xf32>
    %92 = tpu.matmul %27, %91, %cst_44 {dimension_numbers = #tpu.dot_dimension_numbers<[1], [0], [0], [1], [0, 0, 1, 1], [], []>} : vector<16x32xf32>, vector<32x8xf32>, vector<16x8xf32> -> vector<16x8xf32>
    %c138 = arith.constant 138 : index
    %c0_45 = arith.constant 0 : index
    %93 = vector.load %arg1[%c138, %c0_45] : memref<3272x128xf32, #tpu.memory_space<vmem>>, vector<1x8xf32>
    %94 = vector.broadcast %93 : vector<1x8xf32> to vector<16x8xf32>
    %95 = arith.addf %92, %94 : vector<16x8xf32>
    %c208 = arith.constant 208 : index
    %c0_46 = arith.constant 0 : index
    %96 = vector.load %arg1[%c208, %c0_46] : memref<3272x128xf32, #tpu.memory_space<vmem>>, vector<32x8xf32>
    %cst_47 = arith.constant dense<0.000000e+00> : vector<16x8xf32>
    %97 = tpu.matmul %27, %96, %cst_47 {dimension_numbers = #tpu.dot_dimension_numbers<[1], [0], [0], [1], [0, 0, 1, 1], [], []>} : vector<16x32xf32>, vector<32x8xf32>, vector<16x8xf32> -> vector<16x8xf32>
    %c274 = arith.constant 274 : index
    %c0_48 = arith.constant 0 : index
    %98 = vector.load %arg1[%c274, %c0_48] : memref<3272x128xf32, #tpu.memory_space<vmem>>, vector<1x8xf32>
    %99 = vector.broadcast %98 : vector<1x8xf32> to vector<16x8xf32>
    %100 = arith.addf %97, %99 : vector<16x8xf32>
    %c344 = arith.constant 344 : index
    %c0_49 = arith.constant 0 : index
    %101 = vector.load %arg1[%c344, %c0_49] : memref<3272x128xf32, #tpu.memory_space<vmem>>, vector<32x8xf32>
    %cst_50 = arith.constant dense<0.000000e+00> : vector<16x8xf32>
    %102 = tpu.matmul %27, %101, %cst_50 {dimension_numbers = #tpu.dot_dimension_numbers<[1], [0], [0], [1], [0, 0, 1, 1], [], []>} : vector<16x32xf32>, vector<32x8xf32>, vector<16x8xf32> -> vector<16x8xf32>
    %c410 = arith.constant 410 : index
    %c0_51 = arith.constant 0 : index
    %103 = vector.load %arg1[%c410, %c0_51] : memref<3272x128xf32, #tpu.memory_space<vmem>>, vector<1x8xf32>
    %104 = vector.broadcast %103 : vector<1x8xf32> to vector<16x8xf32>
    %105 = arith.addf %102, %104 : vector<16x8xf32>
    %cst_52 = arith.constant dense<0.000000e+00> : vector<16x16xf32>
    %106 = tpu.matmul %95, %100, %cst_52 {dimension_numbers = #tpu.dot_dimension_numbers<[1], [1], [0], [0], [0, 0, 1, 0], [], []>} : vector<16x8xf32>, vector<16x8xf32>, vector<16x16xf32> -> vector<16x16xf32>
    %cst_53 = arith.constant 0.353553385 : f32
    %107 = vector.broadcast %cst_53 : f32 to vector<16x16xf32>
    %108 = arith.mulf %106, %107 : vector<16x16xf32>
    %109 = arith.addf %108, %0 : vector<16x16xf32>
    %cst_54 = arith.constant dense<0xFF800000> : vector<16xf32>
    %110 = vector.multi_reduction <maximumf>, %109, %cst_54 [1] : vector<16x16xf32> to vector<16xf32>
    %111 = vector.shape_cast %110 : vector<16xf32> to vector<16x1xf32>
    %112 = vector.broadcast %111 : vector<16x1xf32> to vector<16x16xf32>
    %113 = arith.subf %109, %112 : vector<16x16xf32>
    %114 = math.exp %113 : vector<16x16xf32>
    %cst_55 = arith.constant dense<0.000000e+00> : vector<16xf32>
    %115 = vector.multi_reduction <add>, %114, %cst_55 [1] : vector<16x16xf32> to vector<16xf32>
    %116 = vector.shape_cast %115 : vector<16xf32> to vector<16x1xf32>
    %117 = vector.broadcast %116 : vector<16x1xf32> to vector<16x16xf32>
    %118 = arith.divf %114, %117 : vector<16x16xf32>
    %cst_56 = arith.constant dense<0.000000e+00> : vector<16x8xf32>
    %119 = tpu.matmul %118, %105, %cst_56 {dimension_numbers = #tpu.dot_dimension_numbers<[1], [0], [0], [1], [0, 0, 1, 1], [], []>} : vector<16x16xf32>, vector<16x8xf32>, vector<16x8xf32> -> vector<16x8xf32>
    %c432 = arith.constant 432 : index
    %c0_57 = arith.constant 0 : index
    %120 = vector.load %arg1[%c432, %c0_57] : memref<3272x128xf32, #tpu.memory_space<vmem>>, vector<8x32xf32>
    %cst_58 = arith.constant dense<0.000000e+00> : vector<16x32xf32>
    %121 = tpu.matmul %119, %120, %cst_58 {dimension_numbers = #tpu.dot_dimension_numbers<[1], [0], [0], [1], [0, 0, 1, 1], [], []>} : vector<16x8xf32>, vector<8x32xf32>, vector<16x32xf32> -> vector<16x32xf32>
    %122 = arith.addf %90, %121 : vector<16x32xf32>
    %c104 = arith.constant 104 : index
    %c0_59 = arith.constant 0 : index
    %123 = vector.load %arg1[%c104, %c0_59] : memref<3272x128xf32, #tpu.memory_space<vmem>>, vector<32x8xf32>
    %cst_60 = arith.constant dense<0.000000e+00> : vector<16x8xf32>
    %124 = tpu.matmul %27, %123, %cst_60 {dimension_numbers = #tpu.dot_dimension_numbers<[1], [0], [0], [1], [0, 0, 1, 1], [], []>} : vector<16x32xf32>, vector<32x8xf32>, vector<16x8xf32> -> vector<16x8xf32>
    %c139 = arith.constant 139 : index
    %c0_61 = arith.constant 0 : index
    %125 = vector.load %arg1[%c139, %c0_61] : memref<3272x128xf32, #tpu.memory_space<vmem>>, vector<1x8xf32>
    %126 = vector.broadcast %125 : vector<1x8xf32> to vector<16x8xf32>
    %127 = arith.addf %124, %126 : vector<16x8xf32>
    %c240 = arith.constant 240 : index
    %c0_62 = arith.constant 0 : index
    %128 = vector.load %arg1[%c240, %c0_62] : memref<3272x128xf32, #tpu.memory_space<vmem>>, vector<32x8xf32>
    %cst_63 = arith.constant dense<0.000000e+00> : vector<16x8xf32>
    %129 = tpu.matmul %27, %128, %cst_63 {dimension_numbers = #tpu.dot_dimension_numbers<[1], [0], [0], [1], [0, 0, 1, 1], [], []>} : vector<16x32xf32>, vector<32x8xf32>, vector<16x8xf32> -> vector<16x8xf32>
    %c275 = arith.constant 275 : index
    %c0_64 = arith.constant 0 : index
    %130 = vector.load %arg1[%c275, %c0_64] : memref<3272x128xf32, #tpu.memory_space<vmem>>, vector<1x8xf32>
    %131 = vector.broadcast %130 : vector<1x8xf32> to vector<16x8xf32>
    %132 = arith.addf %129, %131 : vector<16x8xf32>
    %c376 = arith.constant 376 : index
    %c0_65 = arith.constant 0 : index
    %133 = vector.load %arg1[%c376, %c0_65] : memref<3272x128xf32, #tpu.memory_space<vmem>>, vector<32x8xf32>
    %cst_66 = arith.constant dense<0.000000e+00> : vector<16x8xf32>
    %134 = tpu.matmul %27, %133, %cst_66 {dimension_numbers = #tpu.dot_dimension_numbers<[1], [0], [0], [1], [0, 0, 1, 1], [], []>} : vector<16x32xf32>, vector<32x8xf32>, vector<16x8xf32> -> vector<16x8xf32>
    %c411 = arith.constant 411 : index
    %c0_67 = arith.constant 0 : index
    %135 = vector.load %arg1[%c411, %c0_67] : memref<3272x128xf32, #tpu.memory_space<vmem>>, vector<1x8xf32>
    %136 = vector.broadcast %135 : vector<1x8xf32> to vector<16x8xf32>
    %137 = arith.addf %134, %136 : vector<16x8xf32>
    %cst_68 = arith.constant dense<0.000000e+00> : vector<16x16xf32>
    %138 = tpu.matmul %127, %132, %cst_68 {dimension_numbers = #tpu.dot_dimension_numbers<[1], [1], [0], [0], [0, 0, 1, 0], [], []>} : vector<16x8xf32>, vector<16x8xf32>, vector<16x16xf32> -> vector<16x16xf32>
    %cst_69 = arith.constant 0.353553385 : f32
    %139 = vector.broadcast %cst_69 : f32 to vector<16x16xf32>
    %140 = arith.mulf %138, %139 : vector<16x16xf32>
    %141 = arith.addf %140, %0 : vector<16x16xf32>
    %cst_70 = arith.constant dense<0xFF800000> : vector<16xf32>
    %142 = vector.multi_reduction <maximumf>, %141, %cst_70 [1] : vector<16x16xf32> to vector<16xf32>
    %143 = vector.shape_cast %142 : vector<16xf32> to vector<16x1xf32>
    %144 = vector.broadcast %143 : vector<16x1xf32> to vector<16x16xf32>
    %145 = arith.subf %141, %144 : vector<16x16xf32>
    %146 = math.exp %145 : vector<16x16xf32>
    %cst_71 = arith.constant dense<0.000000e+00> : vector<16xf32>
    %147 = vector.multi_reduction <add>, %146, %cst_71 [1] : vector<16x16xf32> to vector<16xf32>
    %148 = vector.shape_cast %147 : vector<16xf32> to vector<16x1xf32>
    %149 = vector.broadcast %148 : vector<16x1xf32> to vector<16x16xf32>
    %150 = arith.divf %146, %149 : vector<16x16xf32>
    %cst_72 = arith.constant dense<0.000000e+00> : vector<16x8xf32>
    %151 = tpu.matmul %150, %137, %cst_72 {dimension_numbers = #tpu.dot_dimension_numbers<[1], [0], [0], [1], [0, 0, 1, 1], [], []>} : vector<16x16xf32>, vector<16x8xf32>, vector<16x8xf32> -> vector<16x8xf32>
    %c440 = arith.constant 440 : index
    %c0_73 = arith.constant 0 : index
    %152 = vector.load %arg1[%c440, %c0_73] : memref<3272x128xf32, #tpu.memory_space<vmem>>, vector<8x32xf32>
    %cst_74 = arith.constant dense<0.000000e+00> : vector<16x32xf32>
    %153 = tpu.matmul %151, %152, %cst_74 {dimension_numbers = #tpu.dot_dimension_numbers<[1], [0], [0], [1], [0, 0, 1, 1], [], []>} : vector<16x8xf32>, vector<8x32xf32>, vector<16x32xf32> -> vector<16x32xf32>
    %154 = arith.addf %122, %153 : vector<16x32xf32>
    %c448 = arith.constant 448 : index
    %c0_75 = arith.constant 0 : index
    %155 = vector.load %arg1[%c448, %c0_75] : memref<3272x128xf32, #tpu.memory_space<vmem>>, vector<1x32xf32>
    %156 = vector.broadcast %155 : vector<1x32xf32> to vector<16x32xf32>
    %157 = arith.addf %154, %156 : vector<16x32xf32>
    %158 = arith.addf %3, %157 : vector<16x32xf32>
    %c456 = arith.constant 456 : index
    %c0_76 = arith.constant 0 : index
    %159 = vector.load %arg1[%c456, %c0_76] : memref<3272x128xf32, #tpu.memory_space<vmem>>, vector<1x32xf32>
    %c457 = arith.constant 457 : index
    %c0_77 = arith.constant 0 : index
    %160 = vector.load %arg1[%c457, %c0_77] : memref<3272x128xf32, #tpu.memory_space<vmem>>, vector<1x32xf32>
    %cst_78 = arith.constant dense<0.000000e+00> : vector<16xf32>
    %161 = vector.multi_reduction <add>, %158, %cst_78 [1] : vector<16x32xf32> to vector<16xf32>
    %162 = vector.shape_cast %161 : vector<16xf32> to vector<16x1xf32>
    %cst_79 = arith.constant 3.200000e+01 : f32
    %163 = vector.broadcast %cst_79 : f32 to vector<16x1xf32>
    %164 = arith.divf %162, %163 : vector<16x1xf32>
    %165 = vector.broadcast %164 : vector<16x1xf32> to vector<16x32xf32>
    %166 = arith.subf %158, %165 : vector<16x32xf32>
    %167 = arith.mulf %166, %166 : vector<16x32xf32>
    %cst_80 = arith.constant dense<0.000000e+00> : vector<16xf32>
    %168 = vector.multi_reduction <add>, %167, %cst_80 [1] : vector<16x32xf32> to vector<16xf32>
    %169 = vector.shape_cast %168 : vector<16xf32> to vector<16x1xf32>
    %cst_81 = arith.constant 3.200000e+01 : f32
    %170 = vector.broadcast %cst_81 : f32 to vector<16x1xf32>
    %171 = arith.divf %169, %170 : vector<16x1xf32>
    %172 = vector.broadcast %164 : vector<16x1xf32> to vector<16x32xf32>
    %173 = arith.subf %158, %172 : vector<16x32xf32>
    %cst_82 = arith.constant 9.99999974E-6 : f32
    %174 = vector.broadcast %cst_82 : f32 to vector<16x1xf32>
    %175 = arith.addf %171, %174 : vector<16x1xf32>
    %176 = math.rsqrt %175 : vector<16x1xf32>
    %177 = vector.broadcast %176 : vector<16x1xf32> to vector<16x32xf32>
    %178 = arith.mulf %173, %177 : vector<16x32xf32>
    %179 = vector.broadcast %159 : vector<1x32xf32> to vector<16x32xf32>
    %180 = arith.mulf %178, %179 : vector<16x32xf32>
    %181 = vector.broadcast %160 : vector<1x32xf32> to vector<16x32xf32>
    %182 = arith.addf %180, %181 : vector<16x32xf32>
    %c464 = arith.constant 464 : index
    %c0_83 = arith.constant 0 : index
    %183 = vector.load %arg1[%c464, %c0_83] : memref<3272x128xf32, #tpu.memory_space<vmem>>, vector<32x64xf32>
    %cst_84 = arith.constant dense<0.000000e+00> : vector<16x64xf32>
    %184 = tpu.matmul %182, %183, %cst_84 {dimension_numbers = #tpu.dot_dimension_numbers<[1], [0], [0], [1], [0, 0, 1, 1], [], []>} : vector<16x32xf32>, vector<32x64xf32>, vector<16x64xf32> -> vector<16x64xf32>
    %c496 = arith.constant 496 : index
    %c0_85 = arith.constant 0 : index
    %185 = vector.load %arg1[%c496, %c0_85] : memref<3272x128xf32, #tpu.memory_space<vmem>>, vector<1x64xf32>
    %186 = vector.broadcast %185 : vector<1x64xf32> to vector<16x64xf32>
    %187 = arith.addf %184, %186 : vector<16x64xf32>
    %cst_86 = arith.constant 0.000000e+00 : f32
    %188 = vector.broadcast %cst_86 : f32 to vector<16x64xf32>
    %189 = arith.maximumf %187, %188 : vector<16x64xf32>
    %c504 = arith.constant 504 : index
    %c0_87 = arith.constant 0 : index
    %190 = vector.load %arg1[%c504, %c0_87] : memref<3272x128xf32, #tpu.memory_space<vmem>>, vector<64x32xf32>
    %cst_88 = arith.constant dense<0.000000e+00> : vector<16x32xf32>
    %191 = tpu.matmul %189, %190, %cst_88 {dimension_numbers = #tpu.dot_dimension_numbers<[1], [0], [0], [1], [0, 0, 1, 1], [], []>} : vector<16x64xf32>, vector<64x32xf32>, vector<16x32xf32> -> vector<16x32xf32>
    %c568 = arith.constant 568 : index
    %c0_89 = arith.constant 0 : index
    %192 = vector.load %arg1[%c568, %c0_89] : memref<3272x128xf32, #tpu.memory_space<vmem>>, vector<1x32xf32>
    %193 = vector.broadcast %192 : vector<1x32xf32> to vector<16x32xf32>
    %194 = arith.addf %191, %193 : vector<16x32xf32>
    %195 = arith.addf %158, %194 : vector<16x32xf32>
    %c576 = arith.constant 576 : index
    %c0_90 = arith.constant 0 : index
    %196 = vector.load %arg1[%c576, %c0_90] : memref<3272x128xf32, #tpu.memory_space<vmem>>, vector<1x32xf32>
    %c577 = arith.constant 577 : index
    %c0_91 = arith.constant 0 : index
    %197 = vector.load %arg1[%c577, %c0_91] : memref<3272x128xf32, #tpu.memory_space<vmem>>, vector<1x32xf32>
    %cst_92 = arith.constant dense<0.000000e+00> : vector<16xf32>
    %198 = vector.multi_reduction <add>, %195, %cst_92 [1] : vector<16x32xf32> to vector<16xf32>
    %199 = vector.shape_cast %198 : vector<16xf32> to vector<16x1xf32>
    %cst_93 = arith.constant 3.200000e+01 : f32
    %200 = vector.broadcast %cst_93 : f32 to vector<16x1xf32>
    %201 = arith.divf %199, %200 : vector<16x1xf32>
    %202 = vector.broadcast %201 : vector<16x1xf32> to vector<16x32xf32>
    %203 = arith.subf %195, %202 : vector<16x32xf32>
    %204 = arith.mulf %203, %203 : vector<16x32xf32>
    %cst_94 = arith.constant dense<0.000000e+00> : vector<16xf32>
    %205 = vector.multi_reduction <add>, %204, %cst_94 [1] : vector<16x32xf32> to vector<16xf32>
    %206 = vector.shape_cast %205 : vector<16xf32> to vector<16x1xf32>
    %cst_95 = arith.constant 3.200000e+01 : f32
    %207 = vector.broadcast %cst_95 : f32 to vector<16x1xf32>
    %208 = arith.divf %206, %207 : vector<16x1xf32>
    %209 = vector.broadcast %201 : vector<16x1xf32> to vector<16x32xf32>
    %210 = arith.subf %195, %209 : vector<16x32xf32>
    %cst_96 = arith.constant 9.99999974E-6 : f32
    %211 = vector.broadcast %cst_96 : f32 to vector<16x1xf32>
    %212 = arith.addf %208, %211 : vector<16x1xf32>
    %213 = math.rsqrt %212 : vector<16x1xf32>
    %214 = vector.broadcast %213 : vector<16x1xf32> to vector<16x32xf32>
    %215 = arith.mulf %210, %214 : vector<16x32xf32>
    %216 = vector.broadcast %196 : vector<1x32xf32> to vector<16x32xf32>
    %217 = arith.mulf %215, %216 : vector<16x32xf32>
    %218 = vector.broadcast %197 : vector<1x32xf32> to vector<16x32xf32>
    %219 = arith.addf %217, %218 : vector<16x32xf32>
    %c584 = arith.constant 584 : index
    %c0_97 = arith.constant 0 : index
    %220 = vector.load %arg1[%c584, %c0_97] : memref<3272x128xf32, #tpu.memory_space<vmem>>, vector<32x8xf32>
    %cst_98 = arith.constant dense<0.000000e+00> : vector<16x8xf32>
    %221 = tpu.matmul %219, %220, %cst_98 {dimension_numbers = #tpu.dot_dimension_numbers<[1], [0], [0], [1], [0, 0, 1, 1], [], []>} : vector<16x32xf32>, vector<32x8xf32>, vector<16x8xf32> -> vector<16x8xf32>
    %c712 = arith.constant 712 : index
    %c0_99 = arith.constant 0 : index
    %222 = vector.load %arg1[%c712, %c0_99] : memref<3272x128xf32, #tpu.memory_space<vmem>>, vector<1x8xf32>
    %223 = vector.broadcast %222 : vector<1x8xf32> to vector<16x8xf32>
    %224 = arith.addf %221, %223 : vector<16x8xf32>
    %c720 = arith.constant 720 : index
    %c0_100 = arith.constant 0 : index
    %225 = vector.load %arg1[%c720, %c0_100] : memref<3272x128xf32, #tpu.memory_space<vmem>>, vector<32x8xf32>
    %cst_101 = arith.constant dense<0.000000e+00> : vector<16x8xf32>
    %226 = tpu.matmul %219, %225, %cst_101 {dimension_numbers = #tpu.dot_dimension_numbers<[1], [0], [0], [1], [0, 0, 1, 1], [], []>} : vector<16x32xf32>, vector<32x8xf32>, vector<16x8xf32> -> vector<16x8xf32>
    %c848 = arith.constant 848 : index
    %c0_102 = arith.constant 0 : index
    %227 = vector.load %arg1[%c848, %c0_102] : memref<3272x128xf32, #tpu.memory_space<vmem>>, vector<1x8xf32>
    %228 = vector.broadcast %227 : vector<1x8xf32> to vector<16x8xf32>
    %229 = arith.addf %226, %228 : vector<16x8xf32>
    %c856 = arith.constant 856 : index
    %c0_103 = arith.constant 0 : index
    %230 = vector.load %arg1[%c856, %c0_103] : memref<3272x128xf32, #tpu.memory_space<vmem>>, vector<32x8xf32>
    %cst_104 = arith.constant dense<0.000000e+00> : vector<16x8xf32>
    %231 = tpu.matmul %219, %230, %cst_104 {dimension_numbers = #tpu.dot_dimension_numbers<[1], [0], [0], [1], [0, 0, 1, 1], [], []>} : vector<16x32xf32>, vector<32x8xf32>, vector<16x8xf32> -> vector<16x8xf32>
    %c984 = arith.constant 984 : index
    %c0_105 = arith.constant 0 : index
    %232 = vector.load %arg1[%c984, %c0_105] : memref<3272x128xf32, #tpu.memory_space<vmem>>, vector<1x8xf32>
    %233 = vector.broadcast %232 : vector<1x8xf32> to vector<16x8xf32>
    %234 = arith.addf %231, %233 : vector<16x8xf32>
    %cst_106 = arith.constant dense<0.000000e+00> : vector<16x16xf32>
    %235 = tpu.matmul %224, %229, %cst_106 {dimension_numbers = #tpu.dot_dimension_numbers<[1], [1], [0], [0], [0, 0, 1, 0], [], []>} : vector<16x8xf32>, vector<16x8xf32>, vector<16x16xf32> -> vector<16x16xf32>
    %cst_107 = arith.constant 0.353553385 : f32
    %236 = vector.broadcast %cst_107 : f32 to vector<16x16xf32>
    %237 = arith.mulf %235, %236 : vector<16x16xf32>
    %238 = arith.addf %237, %0 : vector<16x16xf32>
    %cst_108 = arith.constant dense<0xFF800000> : vector<16xf32>
    %239 = vector.multi_reduction <maximumf>, %238, %cst_108 [1] : vector<16x16xf32> to vector<16xf32>
    %240 = vector.shape_cast %239 : vector<16xf32> to vector<16x1xf32>
    %241 = vector.broadcast %240 : vector<16x1xf32> to vector<16x16xf32>
    %242 = arith.subf %238, %241 : vector<16x16xf32>
    %243 = math.exp %242 : vector<16x16xf32>
    %cst_109 = arith.constant dense<0.000000e+00> : vector<16xf32>
    %244 = vector.multi_reduction <add>, %243, %cst_109 [1] : vector<16x16xf32> to vector<16xf32>
    %245 = vector.shape_cast %244 : vector<16xf32> to vector<16x1xf32>
    %246 = vector.broadcast %245 : vector<16x1xf32> to vector<16x16xf32>
    %247 = arith.divf %243, %246 : vector<16x16xf32>
    %cst_110 = arith.constant dense<0.000000e+00> : vector<16x8xf32>
    %248 = tpu.matmul %247, %234, %cst_110 {dimension_numbers = #tpu.dot_dimension_numbers<[1], [0], [0], [1], [0, 0, 1, 1], [], []>} : vector<16x16xf32>, vector<16x8xf32>, vector<16x8xf32> -> vector<16x8xf32>
    %c992 = arith.constant 992 : index
    %c0_111 = arith.constant 0 : index
    %249 = vector.load %arg1[%c992, %c0_111] : memref<3272x128xf32, #tpu.memory_space<vmem>>, vector<8x32xf32>
    %cst_112 = arith.constant dense<0.000000e+00> : vector<16x32xf32>
    %250 = tpu.matmul %248, %249, %cst_112 {dimension_numbers = #tpu.dot_dimension_numbers<[1], [0], [0], [1], [0, 0, 1, 1], [], []>} : vector<16x8xf32>, vector<8x32xf32>, vector<16x32xf32> -> vector<16x32xf32>
    %c616 = arith.constant 616 : index
    %c0_113 = arith.constant 0 : index
    %251 = vector.load %arg1[%c616, %c0_113] : memref<3272x128xf32, #tpu.memory_space<vmem>>, vector<32x8xf32>
    %cst_114 = arith.constant dense<0.000000e+00> : vector<16x8xf32>
    %252 = tpu.matmul %219, %251, %cst_114 {dimension_numbers = #tpu.dot_dimension_numbers<[1], [0], [0], [1], [0, 0, 1, 1], [], []>} : vector<16x32xf32>, vector<32x8xf32>, vector<16x8xf32> -> vector<16x8xf32>
    %c713 = arith.constant 713 : index
    %c0_115 = arith.constant 0 : index
    %253 = vector.load %arg1[%c713, %c0_115] : memref<3272x128xf32, #tpu.memory_space<vmem>>, vector<1x8xf32>
    %254 = vector.broadcast %253 : vector<1x8xf32> to vector<16x8xf32>
    %255 = arith.addf %252, %254 : vector<16x8xf32>
    %c752 = arith.constant 752 : index
    %c0_116 = arith.constant 0 : index
    %256 = vector.load %arg1[%c752, %c0_116] : memref<3272x128xf32, #tpu.memory_space<vmem>>, vector<32x8xf32>
    %cst_117 = arith.constant dense<0.000000e+00> : vector<16x8xf32>
    %257 = tpu.matmul %219, %256, %cst_117 {dimension_numbers = #tpu.dot_dimension_numbers<[1], [0], [0], [1], [0, 0, 1, 1], [], []>} : vector<16x32xf32>, vector<32x8xf32>, vector<16x8xf32> -> vector<16x8xf32>
    %c849 = arith.constant 849 : index
    %c0_118 = arith.constant 0 : index
    %258 = vector.load %arg1[%c849, %c0_118] : memref<3272x128xf32, #tpu.memory_space<vmem>>, vector<1x8xf32>
    %259 = vector.broadcast %258 : vector<1x8xf32> to vector<16x8xf32>
    %260 = arith.addf %257, %259 : vector<16x8xf32>
    %c888 = arith.constant 888 : index
    %c0_119 = arith.constant 0 : index
    %261 = vector.load %arg1[%c888, %c0_119] : memref<3272x128xf32, #tpu.memory_space<vmem>>, vector<32x8xf32>
    %cst_120 = arith.constant dense<0.000000e+00> : vector<16x8xf32>
    %262 = tpu.matmul %219, %261, %cst_120 {dimension_numbers = #tpu.dot_dimension_numbers<[1], [0], [0], [1], [0, 0, 1, 1], [], []>} : vector<16x32xf32>, vector<32x8xf32>, vector<16x8xf32> -> vector<16x8xf32>
    %c985 = arith.constant 985 : index
    %c0_121 = arith.constant 0 : index
    %263 = vector.load %arg1[%c985, %c0_121] : memref<3272x128xf32, #tpu.memory_space<vmem>>, vector<1x8xf32>
    %264 = vector.broadcast %263 : vector<1x8xf32> to vector<16x8xf32>
    %265 = arith.addf %262, %264 : vector<16x8xf32>
    %cst_122 = arith.constant dense<0.000000e+00> : vector<16x16xf32>
    %266 = tpu.matmul %255, %260, %cst_122 {dimension_numbers = #tpu.dot_dimension_numbers<[1], [1], [0], [0], [0, 0, 1, 0], [], []>} : vector<16x8xf32>, vector<16x8xf32>, vector<16x16xf32> -> vector<16x16xf32>
    %cst_123 = arith.constant 0.353553385 : f32
    %267 = vector.broadcast %cst_123 : f32 to vector<16x16xf32>
    %268 = arith.mulf %266, %267 : vector<16x16xf32>
    %269 = arith.addf %268, %0 : vector<16x16xf32>
    %cst_124 = arith.constant dense<0xFF800000> : vector<16xf32>
    %270 = vector.multi_reduction <maximumf>, %269, %cst_124 [1] : vector<16x16xf32> to vector<16xf32>
    %271 = vector.shape_cast %270 : vector<16xf32> to vector<16x1xf32>
    %272 = vector.broadcast %271 : vector<16x1xf32> to vector<16x16xf32>
    %273 = arith.subf %269, %272 : vector<16x16xf32>
    %274 = math.exp %273 : vector<16x16xf32>
    %cst_125 = arith.constant dense<0.000000e+00> : vector<16xf32>
    %275 = vector.multi_reduction <add>, %274, %cst_125 [1] : vector<16x16xf32> to vector<16xf32>
    %276 = vector.shape_cast %275 : vector<16xf32> to vector<16x1xf32>
    %277 = vector.broadcast %276 : vector<16x1xf32> to vector<16x16xf32>
    %278 = arith.divf %274, %277 : vector<16x16xf32>
    %cst_126 = arith.constant dense<0.000000e+00> : vector<16x8xf32>
    %279 = tpu.matmul %278, %265, %cst_126 {dimension_numbers = #tpu.dot_dimension_numbers<[1], [0], [0], [1], [0, 0, 1, 1], [], []>} : vector<16x16xf32>, vector<16x8xf32>, vector<16x8xf32> -> vector<16x8xf32>
    %c1000 = arith.constant 1000 : index
    %c0_127 = arith.constant 0 : index
    %280 = vector.load %arg1[%c1000, %c0_127] : memref<3272x128xf32, #tpu.memory_space<vmem>>, vector<8x32xf32>
    %cst_128 = arith.constant dense<0.000000e+00> : vector<16x32xf32>
    %281 = tpu.matmul %279, %280, %cst_128 {dimension_numbers = #tpu.dot_dimension_numbers<[1], [0], [0], [1], [0, 0, 1, 1], [], []>} : vector<16x8xf32>, vector<8x32xf32>, vector<16x32xf32> -> vector<16x32xf32>
    %282 = arith.addf %250, %281 : vector<16x32xf32>
    %c648 = arith.constant 648 : index
    %c0_129 = arith.constant 0 : index
    %283 = vector.load %arg1[%c648, %c0_129] : memref<3272x128xf32, #tpu.memory_space<vmem>>, vector<32x8xf32>
    %cst_130 = arith.constant dense<0.000000e+00> : vector<16x8xf32>
    %284 = tpu.matmul %219, %283, %cst_130 {dimension_numbers = #tpu.dot_dimension_numbers<[1], [0], [0], [1], [0, 0, 1, 1], [], []>} : vector<16x32xf32>, vector<32x8xf32>, vector<16x8xf32> -> vector<16x8xf32>
    %c714 = arith.constant 714 : index
    %c0_131 = arith.constant 0 : index
    %285 = vector.load %arg1[%c714, %c0_131] : memref<3272x128xf32, #tpu.memory_space<vmem>>, vector<1x8xf32>
    %286 = vector.broadcast %285 : vector<1x8xf32> to vector<16x8xf32>
    %287 = arith.addf %284, %286 : vector<16x8xf32>
    %c784 = arith.constant 784 : index
    %c0_132 = arith.constant 0 : index
    %288 = vector.load %arg1[%c784, %c0_132] : memref<3272x128xf32, #tpu.memory_space<vmem>>, vector<32x8xf32>
    %cst_133 = arith.constant dense<0.000000e+00> : vector<16x8xf32>
    %289 = tpu.matmul %219, %288, %cst_133 {dimension_numbers = #tpu.dot_dimension_numbers<[1], [0], [0], [1], [0, 0, 1, 1], [], []>} : vector<16x32xf32>, vector<32x8xf32>, vector<16x8xf32> -> vector<16x8xf32>
    %c850 = arith.constant 850 : index
    %c0_134 = arith.constant 0 : index
    %290 = vector.load %arg1[%c850, %c0_134] : memref<3272x128xf32, #tpu.memory_space<vmem>>, vector<1x8xf32>
    %291 = vector.broadcast %290 : vector<1x8xf32> to vector<16x8xf32>
    %292 = arith.addf %289, %291 : vector<16x8xf32>
    %c920 = arith.constant 920 : index
    %c0_135 = arith.constant 0 : index
    %293 = vector.load %arg1[%c920, %c0_135] : memref<3272x128xf32, #tpu.memory_space<vmem>>, vector<32x8xf32>
    %cst_136 = arith.constant dense<0.000000e+00> : vector<16x8xf32>
    %294 = tpu.matmul %219, %293, %cst_136 {dimension_numbers = #tpu.dot_dimension_numbers<[1], [0], [0], [1], [0, 0, 1, 1], [], []>} : vector<16x32xf32>, vector<32x8xf32>, vector<16x8xf32> -> vector<16x8xf32>
    %c986 = arith.constant 986 : index
    %c0_137 = arith.constant 0 : index
    %295 = vector.load %arg1[%c986, %c0_137] : memref<3272x128xf32, #tpu.memory_space<vmem>>, vector<1x8xf32>
    %296 = vector.broadcast %295 : vector<1x8xf32> to vector<16x8xf32>
    %297 = arith.addf %294, %296 : vector<16x8xf32>
    %cst_138 = arith.constant dense<0.000000e+00> : vector<16x16xf32>
    %298 = tpu.matmul %287, %292, %cst_138 {dimension_numbers = #tpu.dot_dimension_numbers<[1], [1], [0], [0], [0, 0, 1, 0], [], []>} : vector<16x8xf32>, vector<16x8xf32>, vector<16x16xf32> -> vector<16x16xf32>
    %cst_139 = arith.constant 0.353553385 : f32
    %299 = vector.broadcast %cst_139 : f32 to vector<16x16xf32>
    %300 = arith.mulf %298, %299 : vector<16x16xf32>
    %301 = arith.addf %300, %0 : vector<16x16xf32>
    %cst_140 = arith.constant dense<0xFF800000> : vector<16xf32>
    %302 = vector.multi_reduction <maximumf>, %301, %cst_140 [1] : vector<16x16xf32> to vector<16xf32>
    %303 = vector.shape_cast %302 : vector<16xf32> to vector<16x1xf32>
    %304 = vector.broadcast %303 : vector<16x1xf32> to vector<16x16xf32>
    %305 = arith.subf %301, %304 : vector<16x16xf32>
    %306 = math.exp %305 : vector<16x16xf32>
    %cst_141 = arith.constant dense<0.000000e+00> : vector<16xf32>
    %307 = vector.multi_reduction <add>, %306, %cst_141 [1] : vector<16x16xf32> to vector<16xf32>
    %308 = vector.shape_cast %307 : vector<16xf32> to vector<16x1xf32>
    %309 = vector.broadcast %308 : vector<16x1xf32> to vector<16x16xf32>
    %310 = arith.divf %306, %309 : vector<16x16xf32>
    %cst_142 = arith.constant dense<0.000000e+00> : vector<16x8xf32>
    %311 = tpu.matmul %310, %297, %cst_142 {dimension_numbers = #tpu.dot_dimension_numbers<[1], [0], [0], [1], [0, 0, 1, 1], [], []>} : vector<16x16xf32>, vector<16x8xf32>, vector<16x8xf32> -> vector<16x8xf32>
    %c1008 = arith.constant 1008 : index
    %c0_143 = arith.constant 0 : index
    %312 = vector.load %arg1[%c1008, %c0_143] : memref<3272x128xf32, #tpu.memory_space<vmem>>, vector<8x32xf32>
    %cst_144 = arith.constant dense<0.000000e+00> : vector<16x32xf32>
    %313 = tpu.matmul %311, %312, %cst_144 {dimension_numbers = #tpu.dot_dimension_numbers<[1], [0], [0], [1], [0, 0, 1, 1], [], []>} : vector<16x8xf32>, vector<8x32xf32>, vector<16x32xf32> -> vector<16x32xf32>
    %314 = arith.addf %282, %313 : vector<16x32xf32>
    %c680 = arith.constant 680 : index
    %c0_145 = arith.constant 0 : index
    %315 = vector.load %arg1[%c680, %c0_145] : memref<3272x128xf32, #tpu.memory_space<vmem>>, vector<32x8xf32>
    %cst_146 = arith.constant dense<0.000000e+00> : vector<16x8xf32>
    %316 = tpu.matmul %219, %315, %cst_146 {dimension_numbers = #tpu.dot_dimension_numbers<[1], [0], [0], [1], [0, 0, 1, 1], [], []>} : vector<16x32xf32>, vector<32x8xf32>, vector<16x8xf32> -> vector<16x8xf32>
    %c715 = arith.constant 715 : index
    %c0_147 = arith.constant 0 : index
    %317 = vector.load %arg1[%c715, %c0_147] : memref<3272x128xf32, #tpu.memory_space<vmem>>, vector<1x8xf32>
    %318 = vector.broadcast %317 : vector<1x8xf32> to vector<16x8xf32>
    %319 = arith.addf %316, %318 : vector<16x8xf32>
    %c816 = arith.constant 816 : index
    %c0_148 = arith.constant 0 : index
    %320 = vector.load %arg1[%c816, %c0_148] : memref<3272x128xf32, #tpu.memory_space<vmem>>, vector<32x8xf32>
    %cst_149 = arith.constant dense<0.000000e+00> : vector<16x8xf32>
    %321 = tpu.matmul %219, %320, %cst_149 {dimension_numbers = #tpu.dot_dimension_numbers<[1], [0], [0], [1], [0, 0, 1, 1], [], []>} : vector<16x32xf32>, vector<32x8xf32>, vector<16x8xf32> -> vector<16x8xf32>
    %c851 = arith.constant 851 : index
    %c0_150 = arith.constant 0 : index
    %322 = vector.load %arg1[%c851, %c0_150] : memref<3272x128xf32, #tpu.memory_space<vmem>>, vector<1x8xf32>
    %323 = vector.broadcast %322 : vector<1x8xf32> to vector<16x8xf32>
    %324 = arith.addf %321, %323 : vector<16x8xf32>
    %c952 = arith.constant 952 : index
    %c0_151 = arith.constant 0 : index
    %325 = vector.load %arg1[%c952, %c0_151] : memref<3272x128xf32, #tpu.memory_space<vmem>>, vector<32x8xf32>
    %cst_152 = arith.constant dense<0.000000e+00> : vector<16x8xf32>
    %326 = tpu.matmul %219, %325, %cst_152 {dimension_numbers = #tpu.dot_dimension_numbers<[1], [0], [0], [1], [0, 0, 1, 1], [], []>} : vector<16x32xf32>, vector<32x8xf32>, vector<16x8xf32> -> vector<16x8xf32>
    %c987 = arith.constant 987 : index
    %c0_153 = arith.constant 0 : index
    %327 = vector.load %arg1[%c987, %c0_153] : memref<3272x128xf32, #tpu.memory_space<vmem>>, vector<1x8xf32>
    %328 = vector.broadcast %327 : vector<1x8xf32> to vector<16x8xf32>
    %329 = arith.addf %326, %328 : vector<16x8xf32>
    %cst_154 = arith.constant dense<0.000000e+00> : vector<16x16xf32>
    %330 = tpu.matmul %319, %324, %cst_154 {dimension_numbers = #tpu.dot_dimension_numbers<[1], [1], [0], [0], [0, 0, 1, 0], [], []>} : vector<16x8xf32>, vector<16x8xf32>, vector<16x16xf32> -> vector<16x16xf32>
    %cst_155 = arith.constant 0.353553385 : f32
    %331 = vector.broadcast %cst_155 : f32 to vector<16x16xf32>
    %332 = arith.mulf %330, %331 : vector<16x16xf32>
    %333 = arith.addf %332, %0 : vector<16x16xf32>
    %cst_156 = arith.constant dense<0xFF800000> : vector<16xf32>
    %334 = vector.multi_reduction <maximumf>, %333, %cst_156 [1] : vector<16x16xf32> to vector<16xf32>
    %335 = vector.shape_cast %334 : vector<16xf32> to vector<16x1xf32>
    %336 = vector.broadcast %335 : vector<16x1xf32> to vector<16x16xf32>
    %337 = arith.subf %333, %336 : vector<16x16xf32>
    %338 = math.exp %337 : vector<16x16xf32>
    %cst_157 = arith.constant dense<0.000000e+00> : vector<16xf32>
    %339 = vector.multi_reduction <add>, %338, %cst_157 [1] : vector<16x16xf32> to vector<16xf32>
    %340 = vector.shape_cast %339 : vector<16xf32> to vector<16x1xf32>
    %341 = vector.broadcast %340 : vector<16x1xf32> to vector<16x16xf32>
    %342 = arith.divf %338, %341 : vector<16x16xf32>
    %cst_158 = arith.constant dense<0.000000e+00> : vector<16x8xf32>
    %343 = tpu.matmul %342, %329, %cst_158 {dimension_numbers = #tpu.dot_dimension_numbers<[1], [0], [0], [1], [0, 0, 1, 1], [], []>} : vector<16x16xf32>, vector<16x8xf32>, vector<16x8xf32> -> vector<16x8xf32>
    %c1016 = arith.constant 1016 : index
    %c0_159 = arith.constant 0 : index
    %344 = vector.load %arg1[%c1016, %c0_159] : memref<3272x128xf32, #tpu.memory_space<vmem>>, vector<8x32xf32>
    %cst_160 = arith.constant dense<0.000000e+00> : vector<16x32xf32>
    %345 = tpu.matmul %343, %344, %cst_160 {dimension_numbers = #tpu.dot_dimension_numbers<[1], [0], [0], [1], [0, 0, 1, 1], [], []>} : vector<16x8xf32>, vector<8x32xf32>, vector<16x32xf32> -> vector<16x32xf32>
    %346 = arith.addf %314, %345 : vector<16x32xf32>
    %c1024 = arith.constant 1024 : index
    %c0_161 = arith.constant 0 : index
    %347 = vector.load %arg1[%c1024, %c0_161] : memref<3272x128xf32, #tpu.memory_space<vmem>>, vector<1x32xf32>
    %348 = vector.broadcast %347 : vector<1x32xf32> to vector<16x32xf32>
    %349 = arith.addf %346, %348 : vector<16x32xf32>
    %350 = arith.addf %195, %349 : vector<16x32xf32>
    %c1032 = arith.constant 1032 : index
    %c0_162 = arith.constant 0 : index
    %351 = vector.load %arg1[%c1032, %c0_162] : memref<3272x128xf32, #tpu.memory_space<vmem>>, vector<1x32xf32>
    %c1033 = arith.constant 1033 : index
    %c0_163 = arith.constant 0 : index
    %352 = vector.load %arg1[%c1033, %c0_163] : memref<3272x128xf32, #tpu.memory_space<vmem>>, vector<1x32xf32>
    %cst_164 = arith.constant dense<0.000000e+00> : vector<16xf32>
    %353 = vector.multi_reduction <add>, %350, %cst_164 [1] : vector<16x32xf32> to vector<16xf32>
    %354 = vector.shape_cast %353 : vector<16xf32> to vector<16x1xf32>
    %cst_165 = arith.constant 3.200000e+01 : f32
    %355 = vector.broadcast %cst_165 : f32 to vector<16x1xf32>
    %356 = arith.divf %354, %355 : vector<16x1xf32>
    %357 = vector.broadcast %356 : vector<16x1xf32> to vector<16x32xf32>
    %358 = arith.subf %350, %357 : vector<16x32xf32>
    %359 = arith.mulf %358, %358 : vector<16x32xf32>
    %cst_166 = arith.constant dense<0.000000e+00> : vector<16xf32>
    %360 = vector.multi_reduction <add>, %359, %cst_166 [1] : vector<16x32xf32> to vector<16xf32>
    %361 = vector.shape_cast %360 : vector<16xf32> to vector<16x1xf32>
    %cst_167 = arith.constant 3.200000e+01 : f32
    %362 = vector.broadcast %cst_167 : f32 to vector<16x1xf32>
    %363 = arith.divf %361, %362 : vector<16x1xf32>
    %364 = vector.broadcast %356 : vector<16x1xf32> to vector<16x32xf32>
    %365 = arith.subf %350, %364 : vector<16x32xf32>
    %cst_168 = arith.constant 9.99999974E-6 : f32
    %366 = vector.broadcast %cst_168 : f32 to vector<16x1xf32>
    %367 = arith.addf %363, %366 : vector<16x1xf32>
    %368 = math.rsqrt %367 : vector<16x1xf32>
    %369 = vector.broadcast %368 : vector<16x1xf32> to vector<16x32xf32>
    %370 = arith.mulf %365, %369 : vector<16x32xf32>
    %371 = vector.broadcast %351 : vector<1x32xf32> to vector<16x32xf32>
    %372 = arith.mulf %370, %371 : vector<16x32xf32>
    %373 = vector.broadcast %352 : vector<1x32xf32> to vector<16x32xf32>
    %374 = arith.addf %372, %373 : vector<16x32xf32>
    %c1040 = arith.constant 1040 : index
    %c0_169 = arith.constant 0 : index
    %375 = vector.load %arg1[%c1040, %c0_169] : memref<3272x128xf32, #tpu.memory_space<vmem>>, vector<32x64xf32>
    %cst_170 = arith.constant dense<0.000000e+00> : vector<16x64xf32>
    %376 = tpu.matmul %374, %375, %cst_170 {dimension_numbers = #tpu.dot_dimension_numbers<[1], [0], [0], [1], [0, 0, 1, 1], [], []>} : vector<16x32xf32>, vector<32x64xf32>, vector<16x64xf32> -> vector<16x64xf32>
    %c1072 = arith.constant 1072 : index
    %c0_171 = arith.constant 0 : index
    %377 = vector.load %arg1[%c1072, %c0_171] : memref<3272x128xf32, #tpu.memory_space<vmem>>, vector<1x64xf32>
    %378 = vector.broadcast %377 : vector<1x64xf32> to vector<16x64xf32>
    %379 = arith.addf %376, %378 : vector<16x64xf32>
    %cst_172 = arith.constant 0.000000e+00 : f32
    %380 = vector.broadcast %cst_172 : f32 to vector<16x64xf32>
    %381 = arith.maximumf %379, %380 : vector<16x64xf32>
    %c1080 = arith.constant 1080 : index
    %c0_173 = arith.constant 0 : index
    %382 = vector.load %arg1[%c1080, %c0_173] : memref<3272x128xf32, #tpu.memory_space<vmem>>, vector<64x32xf32>
    %cst_174 = arith.constant dense<0.000000e+00> : vector<16x32xf32>
    %383 = tpu.matmul %381, %382, %cst_174 {dimension_numbers = #tpu.dot_dimension_numbers<[1], [0], [0], [1], [0, 0, 1, 1], [], []>} : vector<16x64xf32>, vector<64x32xf32>, vector<16x32xf32> -> vector<16x32xf32>
    %c1144 = arith.constant 1144 : index
    %c0_175 = arith.constant 0 : index
    %384 = vector.load %arg1[%c1144, %c0_175] : memref<3272x128xf32, #tpu.memory_space<vmem>>, vector<1x32xf32>
    %385 = vector.broadcast %384 : vector<1x32xf32> to vector<16x32xf32>
    %386 = arith.addf %383, %385 : vector<16x32xf32>
    %387 = arith.addf %350, %386 : vector<16x32xf32>
    %c1152 = arith.constant 1152 : index
    %c0_176 = arith.constant 0 : index
    %388 = vector.load %arg1[%c1152, %c0_176] : memref<3272x128xf32, #tpu.memory_space<vmem>>, vector<1x32xf32>
    %c1153 = arith.constant 1153 : index
    %c0_177 = arith.constant 0 : index
    %389 = vector.load %arg1[%c1153, %c0_177] : memref<3272x128xf32, #tpu.memory_space<vmem>>, vector<1x32xf32>
    %cst_178 = arith.constant dense<0.000000e+00> : vector<16xf32>
    %390 = vector.multi_reduction <add>, %387, %cst_178 [1] : vector<16x32xf32> to vector<16xf32>
    %391 = vector.shape_cast %390 : vector<16xf32> to vector<16x1xf32>
    %cst_179 = arith.constant 3.200000e+01 : f32
    %392 = vector.broadcast %cst_179 : f32 to vector<16x1xf32>
    %393 = arith.divf %391, %392 : vector<16x1xf32>
    %394 = vector.broadcast %393 : vector<16x1xf32> to vector<16x32xf32>
    %395 = arith.subf %387, %394 : vector<16x32xf32>
    %396 = arith.mulf %395, %395 : vector<16x32xf32>
    %cst_180 = arith.constant dense<0.000000e+00> : vector<16xf32>
    %397 = vector.multi_reduction <add>, %396, %cst_180 [1] : vector<16x32xf32> to vector<16xf32>
    %398 = vector.shape_cast %397 : vector<16xf32> to vector<16x1xf32>
    %cst_181 = arith.constant 3.200000e+01 : f32
    %399 = vector.broadcast %cst_181 : f32 to vector<16x1xf32>
    %400 = arith.divf %398, %399 : vector<16x1xf32>
    %401 = vector.broadcast %393 : vector<16x1xf32> to vector<16x32xf32>
    %402 = arith.subf %387, %401 : vector<16x32xf32>
    %cst_182 = arith.constant 9.99999974E-6 : f32
    %403 = vector.broadcast %cst_182 : f32 to vector<16x1xf32>
    %404 = arith.addf %400, %403 : vector<16x1xf32>
    %405 = math.rsqrt %404 : vector<16x1xf32>
    %406 = vector.broadcast %405 : vector<16x1xf32> to vector<16x32xf32>
    %407 = arith.mulf %402, %406 : vector<16x32xf32>
    %408 = vector.broadcast %388 : vector<1x32xf32> to vector<16x32xf32>
    %409 = arith.mulf %407, %408 : vector<16x32xf32>
    %410 = vector.broadcast %389 : vector<1x32xf32> to vector<16x32xf32>
    %411 = arith.addf %409, %410 : vector<16x32xf32>
    %c16 = arith.constant 16 : index
    %c0_183 = arith.constant 0 : index
    %412 = vector.load %arg0[%c16, %c0_183] : memref<80x128xf32, #tpu.memory_space<vmem>>, vector<16x32xf32>
    %c1160 = arith.constant 1160 : index
    %c0_184 = arith.constant 0 : index
    %413 = vector.load %arg1[%c1160, %c0_184] : memref<3272x128xf32, #tpu.memory_space<vmem>>, vector<1x32xf32>
    %c1161 = arith.constant 1161 : index
    %c0_185 = arith.constant 0 : index
    %414 = vector.load %arg1[%c1161, %c0_185] : memref<3272x128xf32, #tpu.memory_space<vmem>>, vector<1x32xf32>
    %cst_186 = arith.constant dense<0.000000e+00> : vector<16xf32>
    %415 = vector.multi_reduction <add>, %412, %cst_186 [1] : vector<16x32xf32> to vector<16xf32>
    %416 = vector.shape_cast %415 : vector<16xf32> to vector<16x1xf32>
    %cst_187 = arith.constant 3.200000e+01 : f32
    %417 = vector.broadcast %cst_187 : f32 to vector<16x1xf32>
    %418 = arith.divf %416, %417 : vector<16x1xf32>
    %419 = vector.broadcast %418 : vector<16x1xf32> to vector<16x32xf32>
    %420 = arith.subf %412, %419 : vector<16x32xf32>
    %421 = arith.mulf %420, %420 : vector<16x32xf32>
    %cst_188 = arith.constant dense<0.000000e+00> : vector<16xf32>
    %422 = vector.multi_reduction <add>, %421, %cst_188 [1] : vector<16x32xf32> to vector<16xf32>
    %423 = vector.shape_cast %422 : vector<16xf32> to vector<16x1xf32>
    %cst_189 = arith.constant 3.200000e+01 : f32
    %424 = vector.broadcast %cst_189 : f32 to vector<16x1xf32>
    %425 = arith.divf %423, %424 : vector<16x1xf32>
    %426 = vector.broadcast %418 : vector<16x1xf32> to vector<16x32xf32>
    %427 = arith.subf %412, %426 : vector<16x32xf32>
    %cst_190 = arith.constant 9.99999974E-6 : f32
    %428 = vector.broadcast %cst_190 : f32 to vector<16x1xf32>
    %429 = arith.addf %425, %428 : vector<16x1xf32>
    %430 = math.rsqrt %429 : vector<16x1xf32>
    %431 = vector.broadcast %430 : vector<16x1xf32> to vector<16x32xf32>
    %432 = arith.mulf %427, %431 : vector<16x32xf32>
    %433 = vector.broadcast %413 : vector<1x32xf32> to vector<16x32xf32>
    %434 = arith.mulf %432, %433 : vector<16x32xf32>
    %435 = vector.broadcast %414 : vector<1x32xf32> to vector<16x32xf32>
    %436 = arith.addf %434, %435 : vector<16x32xf32>
    %c1168 = arith.constant 1168 : index
    %c0_191 = arith.constant 0 : index
    %437 = vector.load %arg1[%c1168, %c0_191] : memref<3272x128xf32, #tpu.memory_space<vmem>>, vector<32x8xf32>
    %cst_192 = arith.constant dense<0.000000e+00> : vector<16x8xf32>
    %438 = tpu.matmul %436, %437, %cst_192 {dimension_numbers = #tpu.dot_dimension_numbers<[1], [0], [0], [1], [0, 0, 1, 1], [], []>} : vector<16x32xf32>, vector<32x8xf32>, vector<16x8xf32> -> vector<16x8xf32>
    %c1296 = arith.constant 1296 : index
    %c0_193 = arith.constant 0 : index
    %439 = vector.load %arg1[%c1296, %c0_193] : memref<3272x128xf32, #tpu.memory_space<vmem>>, vector<1x8xf32>
    %440 = vector.broadcast %439 : vector<1x8xf32> to vector<16x8xf32>
    %441 = arith.addf %438, %440 : vector<16x8xf32>
    %c1304 = arith.constant 1304 : index
    %c0_194 = arith.constant 0 : index
    %442 = vector.load %arg1[%c1304, %c0_194] : memref<3272x128xf32, #tpu.memory_space<vmem>>, vector<32x8xf32>
    %cst_195 = arith.constant dense<0.000000e+00> : vector<16x8xf32>
    %443 = tpu.matmul %436, %442, %cst_195 {dimension_numbers = #tpu.dot_dimension_numbers<[1], [0], [0], [1], [0, 0, 1, 1], [], []>} : vector<16x32xf32>, vector<32x8xf32>, vector<16x8xf32> -> vector<16x8xf32>
    %c1432 = arith.constant 1432 : index
    %c0_196 = arith.constant 0 : index
    %444 = vector.load %arg1[%c1432, %c0_196] : memref<3272x128xf32, #tpu.memory_space<vmem>>, vector<1x8xf32>
    %445 = vector.broadcast %444 : vector<1x8xf32> to vector<16x8xf32>
    %446 = arith.addf %443, %445 : vector<16x8xf32>
    %c1440 = arith.constant 1440 : index
    %c0_197 = arith.constant 0 : index
    %447 = vector.load %arg1[%c1440, %c0_197] : memref<3272x128xf32, #tpu.memory_space<vmem>>, vector<32x8xf32>
    %cst_198 = arith.constant dense<0.000000e+00> : vector<16x8xf32>
    %448 = tpu.matmul %436, %447, %cst_198 {dimension_numbers = #tpu.dot_dimension_numbers<[1], [0], [0], [1], [0, 0, 1, 1], [], []>} : vector<16x32xf32>, vector<32x8xf32>, vector<16x8xf32> -> vector<16x8xf32>
    %c1568 = arith.constant 1568 : index
    %c0_199 = arith.constant 0 : index
    %449 = vector.load %arg1[%c1568, %c0_199] : memref<3272x128xf32, #tpu.memory_space<vmem>>, vector<1x8xf32>
    %450 = vector.broadcast %449 : vector<1x8xf32> to vector<16x8xf32>
    %451 = arith.addf %448, %450 : vector<16x8xf32>
    %cst_200 = arith.constant dense<0.000000e+00> : vector<16x16xf32>
    %452 = tpu.matmul %441, %446, %cst_200 {dimension_numbers = #tpu.dot_dimension_numbers<[1], [1], [0], [0], [0, 0, 1, 0], [], []>} : vector<16x8xf32>, vector<16x8xf32>, vector<16x16xf32> -> vector<16x16xf32>
    %cst_201 = arith.constant 0.353553385 : f32
    %453 = vector.broadcast %cst_201 : f32 to vector<16x16xf32>
    %454 = arith.mulf %452, %453 : vector<16x16xf32>
    %455 = arith.addf %454, %1 : vector<16x16xf32>
    %cst_202 = arith.constant dense<0xFF800000> : vector<16xf32>
    %456 = vector.multi_reduction <maximumf>, %455, %cst_202 [1] : vector<16x16xf32> to vector<16xf32>
    %457 = vector.shape_cast %456 : vector<16xf32> to vector<16x1xf32>
    %458 = vector.broadcast %457 : vector<16x1xf32> to vector<16x16xf32>
    %459 = arith.subf %455, %458 : vector<16x16xf32>
    %460 = math.exp %459 : vector<16x16xf32>
    %cst_203 = arith.constant dense<0.000000e+00> : vector<16xf32>
    %461 = vector.multi_reduction <add>, %460, %cst_203 [1] : vector<16x16xf32> to vector<16xf32>
    %462 = vector.shape_cast %461 : vector<16xf32> to vector<16x1xf32>
    %463 = vector.broadcast %462 : vector<16x1xf32> to vector<16x16xf32>
    %464 = arith.divf %460, %463 : vector<16x16xf32>
    %cst_204 = arith.constant dense<0.000000e+00> : vector<16x8xf32>
    %465 = tpu.matmul %464, %451, %cst_204 {dimension_numbers = #tpu.dot_dimension_numbers<[1], [0], [0], [1], [0, 0, 1, 1], [], []>} : vector<16x16xf32>, vector<16x8xf32>, vector<16x8xf32> -> vector<16x8xf32>
    %c1576 = arith.constant 1576 : index
    %c0_205 = arith.constant 0 : index
    %466 = vector.load %arg1[%c1576, %c0_205] : memref<3272x128xf32, #tpu.memory_space<vmem>>, vector<8x32xf32>
    %cst_206 = arith.constant dense<0.000000e+00> : vector<16x32xf32>
    %467 = tpu.matmul %465, %466, %cst_206 {dimension_numbers = #tpu.dot_dimension_numbers<[1], [0], [0], [1], [0, 0, 1, 1], [], []>} : vector<16x8xf32>, vector<8x32xf32>, vector<16x32xf32> -> vector<16x32xf32>
    %c1200 = arith.constant 1200 : index
    %c0_207 = arith.constant 0 : index
    %468 = vector.load %arg1[%c1200, %c0_207] : memref<3272x128xf32, #tpu.memory_space<vmem>>, vector<32x8xf32>
    %cst_208 = arith.constant dense<0.000000e+00> : vector<16x8xf32>
    %469 = tpu.matmul %436, %468, %cst_208 {dimension_numbers = #tpu.dot_dimension_numbers<[1], [0], [0], [1], [0, 0, 1, 1], [], []>} : vector<16x32xf32>, vector<32x8xf32>, vector<16x8xf32> -> vector<16x8xf32>
    %c1297 = arith.constant 1297 : index
    %c0_209 = arith.constant 0 : index
    %470 = vector.load %arg1[%c1297, %c0_209] : memref<3272x128xf32, #tpu.memory_space<vmem>>, vector<1x8xf32>
    %471 = vector.broadcast %470 : vector<1x8xf32> to vector<16x8xf32>
    %472 = arith.addf %469, %471 : vector<16x8xf32>
    %c1336 = arith.constant 1336 : index
    %c0_210 = arith.constant 0 : index
    %473 = vector.load %arg1[%c1336, %c0_210] : memref<3272x128xf32, #tpu.memory_space<vmem>>, vector<32x8xf32>
    %cst_211 = arith.constant dense<0.000000e+00> : vector<16x8xf32>
    %474 = tpu.matmul %436, %473, %cst_211 {dimension_numbers = #tpu.dot_dimension_numbers<[1], [0], [0], [1], [0, 0, 1, 1], [], []>} : vector<16x32xf32>, vector<32x8xf32>, vector<16x8xf32> -> vector<16x8xf32>
    %c1433 = arith.constant 1433 : index
    %c0_212 = arith.constant 0 : index
    %475 = vector.load %arg1[%c1433, %c0_212] : memref<3272x128xf32, #tpu.memory_space<vmem>>, vector<1x8xf32>
    %476 = vector.broadcast %475 : vector<1x8xf32> to vector<16x8xf32>
    %477 = arith.addf %474, %476 : vector<16x8xf32>
    %c1472 = arith.constant 1472 : index
    %c0_213 = arith.constant 0 : index
    %478 = vector.load %arg1[%c1472, %c0_213] : memref<3272x128xf32, #tpu.memory_space<vmem>>, vector<32x8xf32>
    %cst_214 = arith.constant dense<0.000000e+00> : vector<16x8xf32>
    %479 = tpu.matmul %436, %478, %cst_214 {dimension_numbers = #tpu.dot_dimension_numbers<[1], [0], [0], [1], [0, 0, 1, 1], [], []>} : vector<16x32xf32>, vector<32x8xf32>, vector<16x8xf32> -> vector<16x8xf32>
    %c1569 = arith.constant 1569 : index
    %c0_215 = arith.constant 0 : index
    %480 = vector.load %arg1[%c1569, %c0_215] : memref<3272x128xf32, #tpu.memory_space<vmem>>, vector<1x8xf32>
    %481 = vector.broadcast %480 : vector<1x8xf32> to vector<16x8xf32>
    %482 = arith.addf %479, %481 : vector<16x8xf32>
    %cst_216 = arith.constant dense<0.000000e+00> : vector<16x16xf32>
    %483 = tpu.matmul %472, %477, %cst_216 {dimension_numbers = #tpu.dot_dimension_numbers<[1], [1], [0], [0], [0, 0, 1, 0], [], []>} : vector<16x8xf32>, vector<16x8xf32>, vector<16x16xf32> -> vector<16x16xf32>
    %cst_217 = arith.constant 0.353553385 : f32
    %484 = vector.broadcast %cst_217 : f32 to vector<16x16xf32>
    %485 = arith.mulf %483, %484 : vector<16x16xf32>
    %486 = arith.addf %485, %1 : vector<16x16xf32>
    %cst_218 = arith.constant dense<0xFF800000> : vector<16xf32>
    %487 = vector.multi_reduction <maximumf>, %486, %cst_218 [1] : vector<16x16xf32> to vector<16xf32>
    %488 = vector.shape_cast %487 : vector<16xf32> to vector<16x1xf32>
    %489 = vector.broadcast %488 : vector<16x1xf32> to vector<16x16xf32>
    %490 = arith.subf %486, %489 : vector<16x16xf32>
    %491 = math.exp %490 : vector<16x16xf32>
    %cst_219 = arith.constant dense<0.000000e+00> : vector<16xf32>
    %492 = vector.multi_reduction <add>, %491, %cst_219 [1] : vector<16x16xf32> to vector<16xf32>
    %493 = vector.shape_cast %492 : vector<16xf32> to vector<16x1xf32>
    %494 = vector.broadcast %493 : vector<16x1xf32> to vector<16x16xf32>
    %495 = arith.divf %491, %494 : vector<16x16xf32>
    %cst_220 = arith.constant dense<0.000000e+00> : vector<16x8xf32>
    %496 = tpu.matmul %495, %482, %cst_220 {dimension_numbers = #tpu.dot_dimension_numbers<[1], [0], [0], [1], [0, 0, 1, 1], [], []>} : vector<16x16xf32>, vector<16x8xf32>, vector<16x8xf32> -> vector<16x8xf32>
    %c1584 = arith.constant 1584 : index
    %c0_221 = arith.constant 0 : index
    %497 = vector.load %arg1[%c1584, %c0_221] : memref<3272x128xf32, #tpu.memory_space<vmem>>, vector<8x32xf32>
    %cst_222 = arith.constant dense<0.000000e+00> : vector<16x32xf32>
    %498 = tpu.matmul %496, %497, %cst_222 {dimension_numbers = #tpu.dot_dimension_numbers<[1], [0], [0], [1], [0, 0, 1, 1], [], []>} : vector<16x8xf32>, vector<8x32xf32>, vector<16x32xf32> -> vector<16x32xf32>
    %499 = arith.addf %467, %498 : vector<16x32xf32>
    %c1232 = arith.constant 1232 : index
    %c0_223 = arith.constant 0 : index
    %500 = vector.load %arg1[%c1232, %c0_223] : memref<3272x128xf32, #tpu.memory_space<vmem>>, vector<32x8xf32>
    %cst_224 = arith.constant dense<0.000000e+00> : vector<16x8xf32>
    %501 = tpu.matmul %436, %500, %cst_224 {dimension_numbers = #tpu.dot_dimension_numbers<[1], [0], [0], [1], [0, 0, 1, 1], [], []>} : vector<16x32xf32>, vector<32x8xf32>, vector<16x8xf32> -> vector<16x8xf32>
    %c1298 = arith.constant 1298 : index
    %c0_225 = arith.constant 0 : index
    %502 = vector.load %arg1[%c1298, %c0_225] : memref<3272x128xf32, #tpu.memory_space<vmem>>, vector<1x8xf32>
    %503 = vector.broadcast %502 : vector<1x8xf32> to vector<16x8xf32>
    %504 = arith.addf %501, %503 : vector<16x8xf32>
    %c1368 = arith.constant 1368 : index
    %c0_226 = arith.constant 0 : index
    %505 = vector.load %arg1[%c1368, %c0_226] : memref<3272x128xf32, #tpu.memory_space<vmem>>, vector<32x8xf32>
    %cst_227 = arith.constant dense<0.000000e+00> : vector<16x8xf32>
    %506 = tpu.matmul %436, %505, %cst_227 {dimension_numbers = #tpu.dot_dimension_numbers<[1], [0], [0], [1], [0, 0, 1, 1], [], []>} : vector<16x32xf32>, vector<32x8xf32>, vector<16x8xf32> -> vector<16x8xf32>
    %c1434 = arith.constant 1434 : index
    %c0_228 = arith.constant 0 : index
    %507 = vector.load %arg1[%c1434, %c0_228] : memref<3272x128xf32, #tpu.memory_space<vmem>>, vector<1x8xf32>
    %508 = vector.broadcast %507 : vector<1x8xf32> to vector<16x8xf32>
    %509 = arith.addf %506, %508 : vector<16x8xf32>
    %c1504 = arith.constant 1504 : index
    %c0_229 = arith.constant 0 : index
    %510 = vector.load %arg1[%c1504, %c0_229] : memref<3272x128xf32, #tpu.memory_space<vmem>>, vector<32x8xf32>
    %cst_230 = arith.constant dense<0.000000e+00> : vector<16x8xf32>
    %511 = tpu.matmul %436, %510, %cst_230 {dimension_numbers = #tpu.dot_dimension_numbers<[1], [0], [0], [1], [0, 0, 1, 1], [], []>} : vector<16x32xf32>, vector<32x8xf32>, vector<16x8xf32> -> vector<16x8xf32>
    %c1570 = arith.constant 1570 : index
    %c0_231 = arith.constant 0 : index
    %512 = vector.load %arg1[%c1570, %c0_231] : memref<3272x128xf32, #tpu.memory_space<vmem>>, vector<1x8xf32>
    %513 = vector.broadcast %512 : vector<1x8xf32> to vector<16x8xf32>
    %514 = arith.addf %511, %513 : vector<16x8xf32>
    %cst_232 = arith.constant dense<0.000000e+00> : vector<16x16xf32>
    %515 = tpu.matmul %504, %509, %cst_232 {dimension_numbers = #tpu.dot_dimension_numbers<[1], [1], [0], [0], [0, 0, 1, 0], [], []>} : vector<16x8xf32>, vector<16x8xf32>, vector<16x16xf32> -> vector<16x16xf32>
    %cst_233 = arith.constant 0.353553385 : f32
    %516 = vector.broadcast %cst_233 : f32 to vector<16x16xf32>
    %517 = arith.mulf %515, %516 : vector<16x16xf32>
    %518 = arith.addf %517, %1 : vector<16x16xf32>
    %cst_234 = arith.constant dense<0xFF800000> : vector<16xf32>
    %519 = vector.multi_reduction <maximumf>, %518, %cst_234 [1] : vector<16x16xf32> to vector<16xf32>
    %520 = vector.shape_cast %519 : vector<16xf32> to vector<16x1xf32>
    %521 = vector.broadcast %520 : vector<16x1xf32> to vector<16x16xf32>
    %522 = arith.subf %518, %521 : vector<16x16xf32>
    %523 = math.exp %522 : vector<16x16xf32>
    %cst_235 = arith.constant dense<0.000000e+00> : vector<16xf32>
    %524 = vector.multi_reduction <add>, %523, %cst_235 [1] : vector<16x16xf32> to vector<16xf32>
    %525 = vector.shape_cast %524 : vector<16xf32> to vector<16x1xf32>
    %526 = vector.broadcast %525 : vector<16x1xf32> to vector<16x16xf32>
    %527 = arith.divf %523, %526 : vector<16x16xf32>
    %cst_236 = arith.constant dense<0.000000e+00> : vector<16x8xf32>
    %528 = tpu.matmul %527, %514, %cst_236 {dimension_numbers = #tpu.dot_dimension_numbers<[1], [0], [0], [1], [0, 0, 1, 1], [], []>} : vector<16x16xf32>, vector<16x8xf32>, vector<16x8xf32> -> vector<16x8xf32>
    %c1592 = arith.constant 1592 : index
    %c0_237 = arith.constant 0 : index
    %529 = vector.load %arg1[%c1592, %c0_237] : memref<3272x128xf32, #tpu.memory_space<vmem>>, vector<8x32xf32>
    %cst_238 = arith.constant dense<0.000000e+00> : vector<16x32xf32>
    %530 = tpu.matmul %528, %529, %cst_238 {dimension_numbers = #tpu.dot_dimension_numbers<[1], [0], [0], [1], [0, 0, 1, 1], [], []>} : vector<16x8xf32>, vector<8x32xf32>, vector<16x32xf32> -> vector<16x32xf32>
    %531 = arith.addf %499, %530 : vector<16x32xf32>
    %c1264 = arith.constant 1264 : index
    %c0_239 = arith.constant 0 : index
    %532 = vector.load %arg1[%c1264, %c0_239] : memref<3272x128xf32, #tpu.memory_space<vmem>>, vector<32x8xf32>
    %cst_240 = arith.constant dense<0.000000e+00> : vector<16x8xf32>
    %533 = tpu.matmul %436, %532, %cst_240 {dimension_numbers = #tpu.dot_dimension_numbers<[1], [0], [0], [1], [0, 0, 1, 1], [], []>} : vector<16x32xf32>, vector<32x8xf32>, vector<16x8xf32> -> vector<16x8xf32>
    %c1299 = arith.constant 1299 : index
    %c0_241 = arith.constant 0 : index
    %534 = vector.load %arg1[%c1299, %c0_241] : memref<3272x128xf32, #tpu.memory_space<vmem>>, vector<1x8xf32>
    %535 = vector.broadcast %534 : vector<1x8xf32> to vector<16x8xf32>
    %536 = arith.addf %533, %535 : vector<16x8xf32>
    %c1400 = arith.constant 1400 : index
    %c0_242 = arith.constant 0 : index
    %537 = vector.load %arg1[%c1400, %c0_242] : memref<3272x128xf32, #tpu.memory_space<vmem>>, vector<32x8xf32>
    %cst_243 = arith.constant dense<0.000000e+00> : vector<16x8xf32>
    %538 = tpu.matmul %436, %537, %cst_243 {dimension_numbers = #tpu.dot_dimension_numbers<[1], [0], [0], [1], [0, 0, 1, 1], [], []>} : vector<16x32xf32>, vector<32x8xf32>, vector<16x8xf32> -> vector<16x8xf32>
    %c1435 = arith.constant 1435 : index
    %c0_244 = arith.constant 0 : index
    %539 = vector.load %arg1[%c1435, %c0_244] : memref<3272x128xf32, #tpu.memory_space<vmem>>, vector<1x8xf32>
    %540 = vector.broadcast %539 : vector<1x8xf32> to vector<16x8xf32>
    %541 = arith.addf %538, %540 : vector<16x8xf32>
    %c1536 = arith.constant 1536 : index
    %c0_245 = arith.constant 0 : index
    %542 = vector.load %arg1[%c1536, %c0_245] : memref<3272x128xf32, #tpu.memory_space<vmem>>, vector<32x8xf32>
    %cst_246 = arith.constant dense<0.000000e+00> : vector<16x8xf32>
    %543 = tpu.matmul %436, %542, %cst_246 {dimension_numbers = #tpu.dot_dimension_numbers<[1], [0], [0], [1], [0, 0, 1, 1], [], []>} : vector<16x32xf32>, vector<32x8xf32>, vector<16x8xf32> -> vector<16x8xf32>
    %c1571 = arith.constant 1571 : index
    %c0_247 = arith.constant 0 : index
    %544 = vector.load %arg1[%c1571, %c0_247] : memref<3272x128xf32, #tpu.memory_space<vmem>>, vector<1x8xf32>
    %545 = vector.broadcast %544 : vector<1x8xf32> to vector<16x8xf32>
    %546 = arith.addf %543, %545 : vector<16x8xf32>
    %cst_248 = arith.constant dense<0.000000e+00> : vector<16x16xf32>
    %547 = tpu.matmul %536, %541, %cst_248 {dimension_numbers = #tpu.dot_dimension_numbers<[1], [1], [0], [0], [0, 0, 1, 0], [], []>} : vector<16x8xf32>, vector<16x8xf32>, vector<16x16xf32> -> vector<16x16xf32>
    %cst_249 = arith.constant 0.353553385 : f32
    %548 = vector.broadcast %cst_249 : f32 to vector<16x16xf32>
    %549 = arith.mulf %547, %548 : vector<16x16xf32>
    %550 = arith.addf %549, %1 : vector<16x16xf32>
    %cst_250 = arith.constant dense<0xFF800000> : vector<16xf32>
    %551 = vector.multi_reduction <maximumf>, %550, %cst_250 [1] : vector<16x16xf32> to vector<16xf32>
    %552 = vector.shape_cast %551 : vector<16xf32> to vector<16x1xf32>
    %553 = vector.broadcast %552 : vector<16x1xf32> to vector<16x16xf32>
    %554 = arith.subf %550, %553 : vector<16x16xf32>
    %555 = math.exp %554 : vector<16x16xf32>
    %cst_251 = arith.constant dense<0.000000e+00> : vector<16xf32>
    %556 = vector.multi_reduction <add>, %555, %cst_251 [1] : vector<16x16xf32> to vector<16xf32>
    %557 = vector.shape_cast %556 : vector<16xf32> to vector<16x1xf32>
    %558 = vector.broadcast %557 : vector<16x1xf32> to vector<16x16xf32>
    %559 = arith.divf %555, %558 : vector<16x16xf32>
    %cst_252 = arith.constant dense<0.000000e+00> : vector<16x8xf32>
    %560 = tpu.matmul %559, %546, %cst_252 {dimension_numbers = #tpu.dot_dimension_numbers<[1], [0], [0], [1], [0, 0, 1, 1], [], []>} : vector<16x16xf32>, vector<16x8xf32>, vector<16x8xf32> -> vector<16x8xf32>
    %c1600 = arith.constant 1600 : index
    %c0_253 = arith.constant 0 : index
    %561 = vector.load %arg1[%c1600, %c0_253] : memref<3272x128xf32, #tpu.memory_space<vmem>>, vector<8x32xf32>
    %cst_254 = arith.constant dense<0.000000e+00> : vector<16x32xf32>
    %562 = tpu.matmul %560, %561, %cst_254 {dimension_numbers = #tpu.dot_dimension_numbers<[1], [0], [0], [1], [0, 0, 1, 1], [], []>} : vector<16x8xf32>, vector<8x32xf32>, vector<16x32xf32> -> vector<16x32xf32>
    %563 = arith.addf %531, %562 : vector<16x32xf32>
    %c1608 = arith.constant 1608 : index
    %c0_255 = arith.constant 0 : index
    %564 = vector.load %arg1[%c1608, %c0_255] : memref<3272x128xf32, #tpu.memory_space<vmem>>, vector<1x32xf32>
    %565 = vector.broadcast %564 : vector<1x32xf32> to vector<16x32xf32>
    %566 = arith.addf %563, %565 : vector<16x32xf32>
    %567 = arith.addf %412, %566 : vector<16x32xf32>
    %c1616 = arith.constant 1616 : index
    %c0_256 = arith.constant 0 : index
    %568 = vector.load %arg1[%c1616, %c0_256] : memref<3272x128xf32, #tpu.memory_space<vmem>>, vector<1x32xf32>
    %c1617 = arith.constant 1617 : index
    %c0_257 = arith.constant 0 : index
    %569 = vector.load %arg1[%c1617, %c0_257] : memref<3272x128xf32, #tpu.memory_space<vmem>>, vector<1x32xf32>
    %cst_258 = arith.constant dense<0.000000e+00> : vector<16xf32>
    %570 = vector.multi_reduction <add>, %567, %cst_258 [1] : vector<16x32xf32> to vector<16xf32>
    %571 = vector.shape_cast %570 : vector<16xf32> to vector<16x1xf32>
    %cst_259 = arith.constant 3.200000e+01 : f32
    %572 = vector.broadcast %cst_259 : f32 to vector<16x1xf32>
    %573 = arith.divf %571, %572 : vector<16x1xf32>
    %574 = vector.broadcast %573 : vector<16x1xf32> to vector<16x32xf32>
    %575 = arith.subf %567, %574 : vector<16x32xf32>
    %576 = arith.mulf %575, %575 : vector<16x32xf32>
    %cst_260 = arith.constant dense<0.000000e+00> : vector<16xf32>
    %577 = vector.multi_reduction <add>, %576, %cst_260 [1] : vector<16x32xf32> to vector<16xf32>
    %578 = vector.shape_cast %577 : vector<16xf32> to vector<16x1xf32>
    %cst_261 = arith.constant 3.200000e+01 : f32
    %579 = vector.broadcast %cst_261 : f32 to vector<16x1xf32>
    %580 = arith.divf %578, %579 : vector<16x1xf32>
    %581 = vector.broadcast %573 : vector<16x1xf32> to vector<16x32xf32>
    %582 = arith.subf %567, %581 : vector<16x32xf32>
    %cst_262 = arith.constant 9.99999974E-6 : f32
    %583 = vector.broadcast %cst_262 : f32 to vector<16x1xf32>
    %584 = arith.addf %580, %583 : vector<16x1xf32>
    %585 = math.rsqrt %584 : vector<16x1xf32>
    %586 = vector.broadcast %585 : vector<16x1xf32> to vector<16x32xf32>
    %587 = arith.mulf %582, %586 : vector<16x32xf32>
    %588 = vector.broadcast %568 : vector<1x32xf32> to vector<16x32xf32>
    %589 = arith.mulf %587, %588 : vector<16x32xf32>
    %590 = vector.broadcast %569 : vector<1x32xf32> to vector<16x32xf32>
    %591 = arith.addf %589, %590 : vector<16x32xf32>
    %c1624 = arith.constant 1624 : index
    %c0_263 = arith.constant 0 : index
    %592 = vector.load %arg1[%c1624, %c0_263] : memref<3272x128xf32, #tpu.memory_space<vmem>>, vector<32x8xf32>
    %cst_264 = arith.constant dense<0.000000e+00> : vector<16x8xf32>
    %593 = tpu.matmul %591, %592, %cst_264 {dimension_numbers = #tpu.dot_dimension_numbers<[1], [0], [0], [1], [0, 0, 1, 1], [], []>} : vector<16x32xf32>, vector<32x8xf32>, vector<16x8xf32> -> vector<16x8xf32>
    %c1752 = arith.constant 1752 : index
    %c0_265 = arith.constant 0 : index
    %594 = vector.load %arg1[%c1752, %c0_265] : memref<3272x128xf32, #tpu.memory_space<vmem>>, vector<1x8xf32>
    %595 = vector.broadcast %594 : vector<1x8xf32> to vector<16x8xf32>
    %596 = arith.addf %593, %595 : vector<16x8xf32>
    %c1760 = arith.constant 1760 : index
    %c0_266 = arith.constant 0 : index
    %597 = vector.load %arg1[%c1760, %c0_266] : memref<3272x128xf32, #tpu.memory_space<vmem>>, vector<32x8xf32>
    %cst_267 = arith.constant dense<0.000000e+00> : vector<16x8xf32>
    %598 = tpu.matmul %411, %597, %cst_267 {dimension_numbers = #tpu.dot_dimension_numbers<[1], [0], [0], [1], [0, 0, 1, 1], [], []>} : vector<16x32xf32>, vector<32x8xf32>, vector<16x8xf32> -> vector<16x8xf32>
    %c1888 = arith.constant 1888 : index
    %c0_268 = arith.constant 0 : index
    %599 = vector.load %arg1[%c1888, %c0_268] : memref<3272x128xf32, #tpu.memory_space<vmem>>, vector<1x8xf32>
    %600 = vector.broadcast %599 : vector<1x8xf32> to vector<16x8xf32>
    %601 = arith.addf %598, %600 : vector<16x8xf32>
    %c1896 = arith.constant 1896 : index
    %c0_269 = arith.constant 0 : index
    %602 = vector.load %arg1[%c1896, %c0_269] : memref<3272x128xf32, #tpu.memory_space<vmem>>, vector<32x8xf32>
    %cst_270 = arith.constant dense<0.000000e+00> : vector<16x8xf32>
    %603 = tpu.matmul %411, %602, %cst_270 {dimension_numbers = #tpu.dot_dimension_numbers<[1], [0], [0], [1], [0, 0, 1, 1], [], []>} : vector<16x32xf32>, vector<32x8xf32>, vector<16x8xf32> -> vector<16x8xf32>
    %c2024 = arith.constant 2024 : index
    %c0_271 = arith.constant 0 : index
    %604 = vector.load %arg1[%c2024, %c0_271] : memref<3272x128xf32, #tpu.memory_space<vmem>>, vector<1x8xf32>
    %605 = vector.broadcast %604 : vector<1x8xf32> to vector<16x8xf32>
    %606 = arith.addf %603, %605 : vector<16x8xf32>
    %cst_272 = arith.constant dense<0.000000e+00> : vector<16x16xf32>
    %607 = tpu.matmul %596, %601, %cst_272 {dimension_numbers = #tpu.dot_dimension_numbers<[1], [1], [0], [0], [0, 0, 1, 0], [], []>} : vector<16x8xf32>, vector<16x8xf32>, vector<16x16xf32> -> vector<16x16xf32>
    %cst_273 = arith.constant 0.353553385 : f32
    %608 = vector.broadcast %cst_273 : f32 to vector<16x16xf32>
    %609 = arith.mulf %607, %608 : vector<16x16xf32>
    %610 = arith.addf %609, %2 : vector<16x16xf32>
    %cst_274 = arith.constant dense<0xFF800000> : vector<16xf32>
    %611 = vector.multi_reduction <maximumf>, %610, %cst_274 [1] : vector<16x16xf32> to vector<16xf32>
    %612 = vector.shape_cast %611 : vector<16xf32> to vector<16x1xf32>
    %613 = vector.broadcast %612 : vector<16x1xf32> to vector<16x16xf32>
    %614 = arith.subf %610, %613 : vector<16x16xf32>
    %615 = math.exp %614 : vector<16x16xf32>
    %cst_275 = arith.constant dense<0.000000e+00> : vector<16xf32>
    %616 = vector.multi_reduction <add>, %615, %cst_275 [1] : vector<16x16xf32> to vector<16xf32>
    %617 = vector.shape_cast %616 : vector<16xf32> to vector<16x1xf32>
    %618 = vector.broadcast %617 : vector<16x1xf32> to vector<16x16xf32>
    %619 = arith.divf %615, %618 : vector<16x16xf32>
    %cst_276 = arith.constant dense<0.000000e+00> : vector<16x8xf32>
    %620 = tpu.matmul %619, %606, %cst_276 {dimension_numbers = #tpu.dot_dimension_numbers<[1], [0], [0], [1], [0, 0, 1, 1], [], []>} : vector<16x16xf32>, vector<16x8xf32>, vector<16x8xf32> -> vector<16x8xf32>
    %c2032 = arith.constant 2032 : index
    %c0_277 = arith.constant 0 : index
    %621 = vector.load %arg1[%c2032, %c0_277] : memref<3272x128xf32, #tpu.memory_space<vmem>>, vector<8x32xf32>
    %cst_278 = arith.constant dense<0.000000e+00> : vector<16x32xf32>
    %622 = tpu.matmul %620, %621, %cst_278 {dimension_numbers = #tpu.dot_dimension_numbers<[1], [0], [0], [1], [0, 0, 1, 1], [], []>} : vector<16x8xf32>, vector<8x32xf32>, vector<16x32xf32> -> vector<16x32xf32>
    %c1656 = arith.constant 1656 : index
    %c0_279 = arith.constant 0 : index
    %623 = vector.load %arg1[%c1656, %c0_279] : memref<3272x128xf32, #tpu.memory_space<vmem>>, vector<32x8xf32>
    %cst_280 = arith.constant dense<0.000000e+00> : vector<16x8xf32>
    %624 = tpu.matmul %591, %623, %cst_280 {dimension_numbers = #tpu.dot_dimension_numbers<[1], [0], [0], [1], [0, 0, 1, 1], [], []>} : vector<16x32xf32>, vector<32x8xf32>, vector<16x8xf32> -> vector<16x8xf32>
    %c1753 = arith.constant 1753 : index
    %c0_281 = arith.constant 0 : index
    %625 = vector.load %arg1[%c1753, %c0_281] : memref<3272x128xf32, #tpu.memory_space<vmem>>, vector<1x8xf32>
    %626 = vector.broadcast %625 : vector<1x8xf32> to vector<16x8xf32>
    %627 = arith.addf %624, %626 : vector<16x8xf32>
    %c1792 = arith.constant 1792 : index
    %c0_282 = arith.constant 0 : index
    %628 = vector.load %arg1[%c1792, %c0_282] : memref<3272x128xf32, #tpu.memory_space<vmem>>, vector<32x8xf32>
    %cst_283 = arith.constant dense<0.000000e+00> : vector<16x8xf32>
    %629 = tpu.matmul %411, %628, %cst_283 {dimension_numbers = #tpu.dot_dimension_numbers<[1], [0], [0], [1], [0, 0, 1, 1], [], []>} : vector<16x32xf32>, vector<32x8xf32>, vector<16x8xf32> -> vector<16x8xf32>
    %c1889 = arith.constant 1889 : index
    %c0_284 = arith.constant 0 : index
    %630 = vector.load %arg1[%c1889, %c0_284] : memref<3272x128xf32, #tpu.memory_space<vmem>>, vector<1x8xf32>
    %631 = vector.broadcast %630 : vector<1x8xf32> to vector<16x8xf32>
    %632 = arith.addf %629, %631 : vector<16x8xf32>
    %c1928 = arith.constant 1928 : index
    %c0_285 = arith.constant 0 : index
    %633 = vector.load %arg1[%c1928, %c0_285] : memref<3272x128xf32, #tpu.memory_space<vmem>>, vector<32x8xf32>
    %cst_286 = arith.constant dense<0.000000e+00> : vector<16x8xf32>
    %634 = tpu.matmul %411, %633, %cst_286 {dimension_numbers = #tpu.dot_dimension_numbers<[1], [0], [0], [1], [0, 0, 1, 1], [], []>} : vector<16x32xf32>, vector<32x8xf32>, vector<16x8xf32> -> vector<16x8xf32>
    %c2025 = arith.constant 2025 : index
    %c0_287 = arith.constant 0 : index
    %635 = vector.load %arg1[%c2025, %c0_287] : memref<3272x128xf32, #tpu.memory_space<vmem>>, vector<1x8xf32>
    %636 = vector.broadcast %635 : vector<1x8xf32> to vector<16x8xf32>
    %637 = arith.addf %634, %636 : vector<16x8xf32>
    %cst_288 = arith.constant dense<0.000000e+00> : vector<16x16xf32>
    %638 = tpu.matmul %627, %632, %cst_288 {dimension_numbers = #tpu.dot_dimension_numbers<[1], [1], [0], [0], [0, 0, 1, 0], [], []>} : vector<16x8xf32>, vector<16x8xf32>, vector<16x16xf32> -> vector<16x16xf32>
    %cst_289 = arith.constant 0.353553385 : f32
    %639 = vector.broadcast %cst_289 : f32 to vector<16x16xf32>
    %640 = arith.mulf %638, %639 : vector<16x16xf32>
    %641 = arith.addf %640, %2 : vector<16x16xf32>
    %cst_290 = arith.constant dense<0xFF800000> : vector<16xf32>
    %642 = vector.multi_reduction <maximumf>, %641, %cst_290 [1] : vector<16x16xf32> to vector<16xf32>
    %643 = vector.shape_cast %642 : vector<16xf32> to vector<16x1xf32>
    %644 = vector.broadcast %643 : vector<16x1xf32> to vector<16x16xf32>
    %645 = arith.subf %641, %644 : vector<16x16xf32>
    %646 = math.exp %645 : vector<16x16xf32>
    %cst_291 = arith.constant dense<0.000000e+00> : vector<16xf32>
    %647 = vector.multi_reduction <add>, %646, %cst_291 [1] : vector<16x16xf32> to vector<16xf32>
    %648 = vector.shape_cast %647 : vector<16xf32> to vector<16x1xf32>
    %649 = vector.broadcast %648 : vector<16x1xf32> to vector<16x16xf32>
    %650 = arith.divf %646, %649 : vector<16x16xf32>
    %cst_292 = arith.constant dense<0.000000e+00> : vector<16x8xf32>
    %651 = tpu.matmul %650, %637, %cst_292 {dimension_numbers = #tpu.dot_dimension_numbers<[1], [0], [0], [1], [0, 0, 1, 1], [], []>} : vector<16x16xf32>, vector<16x8xf32>, vector<16x8xf32> -> vector<16x8xf32>
    %c2040 = arith.constant 2040 : index
    %c0_293 = arith.constant 0 : index
    %652 = vector.load %arg1[%c2040, %c0_293] : memref<3272x128xf32, #tpu.memory_space<vmem>>, vector<8x32xf32>
    %cst_294 = arith.constant dense<0.000000e+00> : vector<16x32xf32>
    %653 = tpu.matmul %651, %652, %cst_294 {dimension_numbers = #tpu.dot_dimension_numbers<[1], [0], [0], [1], [0, 0, 1, 1], [], []>} : vector<16x8xf32>, vector<8x32xf32>, vector<16x32xf32> -> vector<16x32xf32>
    %654 = arith.addf %622, %653 : vector<16x32xf32>
    %c1688 = arith.constant 1688 : index
    %c0_295 = arith.constant 0 : index
    %655 = vector.load %arg1[%c1688, %c0_295] : memref<3272x128xf32, #tpu.memory_space<vmem>>, vector<32x8xf32>
    %cst_296 = arith.constant dense<0.000000e+00> : vector<16x8xf32>
    %656 = tpu.matmul %591, %655, %cst_296 {dimension_numbers = #tpu.dot_dimension_numbers<[1], [0], [0], [1], [0, 0, 1, 1], [], []>} : vector<16x32xf32>, vector<32x8xf32>, vector<16x8xf32> -> vector<16x8xf32>
    %c1754 = arith.constant 1754 : index
    %c0_297 = arith.constant 0 : index
    %657 = vector.load %arg1[%c1754, %c0_297] : memref<3272x128xf32, #tpu.memory_space<vmem>>, vector<1x8xf32>
    %658 = vector.broadcast %657 : vector<1x8xf32> to vector<16x8xf32>
    %659 = arith.addf %656, %658 : vector<16x8xf32>
    %c1824 = arith.constant 1824 : index
    %c0_298 = arith.constant 0 : index
    %660 = vector.load %arg1[%c1824, %c0_298] : memref<3272x128xf32, #tpu.memory_space<vmem>>, vector<32x8xf32>
    %cst_299 = arith.constant dense<0.000000e+00> : vector<16x8xf32>
    %661 = tpu.matmul %411, %660, %cst_299 {dimension_numbers = #tpu.dot_dimension_numbers<[1], [0], [0], [1], [0, 0, 1, 1], [], []>} : vector<16x32xf32>, vector<32x8xf32>, vector<16x8xf32> -> vector<16x8xf32>
    %c1890 = arith.constant 1890 : index
    %c0_300 = arith.constant 0 : index
    %662 = vector.load %arg1[%c1890, %c0_300] : memref<3272x128xf32, #tpu.memory_space<vmem>>, vector<1x8xf32>
    %663 = vector.broadcast %662 : vector<1x8xf32> to vector<16x8xf32>
    %664 = arith.addf %661, %663 : vector<16x8xf32>
    %c1960 = arith.constant 1960 : index
    %c0_301 = arith.constant 0 : index
    %665 = vector.load %arg1[%c1960, %c0_301] : memref<3272x128xf32, #tpu.memory_space<vmem>>, vector<32x8xf32>
    %cst_302 = arith.constant dense<0.000000e+00> : vector<16x8xf32>
    %666 = tpu.matmul %411, %665, %cst_302 {dimension_numbers = #tpu.dot_dimension_numbers<[1], [0], [0], [1], [0, 0, 1, 1], [], []>} : vector<16x32xf32>, vector<32x8xf32>, vector<16x8xf32> -> vector<16x8xf32>
    %c2026 = arith.constant 2026 : index
    %c0_303 = arith.constant 0 : index
    %667 = vector.load %arg1[%c2026, %c0_303] : memref<3272x128xf32, #tpu.memory_space<vmem>>, vector<1x8xf32>
    %668 = vector.broadcast %667 : vector<1x8xf32> to vector<16x8xf32>
    %669 = arith.addf %666, %668 : vector<16x8xf32>
    %cst_304 = arith.constant dense<0.000000e+00> : vector<16x16xf32>
    %670 = tpu.matmul %659, %664, %cst_304 {dimension_numbers = #tpu.dot_dimension_numbers<[1], [1], [0], [0], [0, 0, 1, 0], [], []>} : vector<16x8xf32>, vector<16x8xf32>, vector<16x16xf32> -> vector<16x16xf32>
    %cst_305 = arith.constant 0.353553385 : f32
    %671 = vector.broadcast %cst_305 : f32 to vector<16x16xf32>
    %672 = arith.mulf %670, %671 : vector<16x16xf32>
    %673 = arith.addf %672, %2 : vector<16x16xf32>
    %cst_306 = arith.constant dense<0xFF800000> : vector<16xf32>
    %674 = vector.multi_reduction <maximumf>, %673, %cst_306 [1] : vector<16x16xf32> to vector<16xf32>
    %675 = vector.shape_cast %674 : vector<16xf32> to vector<16x1xf32>
    %676 = vector.broadcast %675 : vector<16x1xf32> to vector<16x16xf32>
    %677 = arith.subf %673, %676 : vector<16x16xf32>
    %678 = math.exp %677 : vector<16x16xf32>
    %cst_307 = arith.constant dense<0.000000e+00> : vector<16xf32>
    %679 = vector.multi_reduction <add>, %678, %cst_307 [1] : vector<16x16xf32> to vector<16xf32>
    %680 = vector.shape_cast %679 : vector<16xf32> to vector<16x1xf32>
    %681 = vector.broadcast %680 : vector<16x1xf32> to vector<16x16xf32>
    %682 = arith.divf %678, %681 : vector<16x16xf32>
    %cst_308 = arith.constant dense<0.000000e+00> : vector<16x8xf32>
    %683 = tpu.matmul %682, %669, %cst_308 {dimension_numbers = #tpu.dot_dimension_numbers<[1], [0], [0], [1], [0, 0, 1, 1], [], []>} : vector<16x16xf32>, vector<16x8xf32>, vector<16x8xf32> -> vector<16x8xf32>
    %c2048 = arith.constant 2048 : index
    %c0_309 = arith.constant 0 : index
    %684 = vector.load %arg1[%c2048, %c0_309] : memref<3272x128xf32, #tpu.memory_space<vmem>>, vector<8x32xf32>
    %cst_310 = arith.constant dense<0.000000e+00> : vector<16x32xf32>
    %685 = tpu.matmul %683, %684, %cst_310 {dimension_numbers = #tpu.dot_dimension_numbers<[1], [0], [0], [1], [0, 0, 1, 1], [], []>} : vector<16x8xf32>, vector<8x32xf32>, vector<16x32xf32> -> vector<16x32xf32>
    %686 = arith.addf %654, %685 : vector<16x32xf32>
    %c1720 = arith.constant 1720 : index
    %c0_311 = arith.constant 0 : index
    %687 = vector.load %arg1[%c1720, %c0_311] : memref<3272x128xf32, #tpu.memory_space<vmem>>, vector<32x8xf32>
    %cst_312 = arith.constant dense<0.000000e+00> : vector<16x8xf32>
    %688 = tpu.matmul %591, %687, %cst_312 {dimension_numbers = #tpu.dot_dimension_numbers<[1], [0], [0], [1], [0, 0, 1, 1], [], []>} : vector<16x32xf32>, vector<32x8xf32>, vector<16x8xf32> -> vector<16x8xf32>
    %c1755 = arith.constant 1755 : index
    %c0_313 = arith.constant 0 : index
    %689 = vector.load %arg1[%c1755, %c0_313] : memref<3272x128xf32, #tpu.memory_space<vmem>>, vector<1x8xf32>
    %690 = vector.broadcast %689 : vector<1x8xf32> to vector<16x8xf32>
    %691 = arith.addf %688, %690 : vector<16x8xf32>
    %c1856 = arith.constant 1856 : index
    %c0_314 = arith.constant 0 : index
    %692 = vector.load %arg1[%c1856, %c0_314] : memref<3272x128xf32, #tpu.memory_space<vmem>>, vector<32x8xf32>
    %cst_315 = arith.constant dense<0.000000e+00> : vector<16x8xf32>
    %693 = tpu.matmul %411, %692, %cst_315 {dimension_numbers = #tpu.dot_dimension_numbers<[1], [0], [0], [1], [0, 0, 1, 1], [], []>} : vector<16x32xf32>, vector<32x8xf32>, vector<16x8xf32> -> vector<16x8xf32>
    %c1891 = arith.constant 1891 : index
    %c0_316 = arith.constant 0 : index
    %694 = vector.load %arg1[%c1891, %c0_316] : memref<3272x128xf32, #tpu.memory_space<vmem>>, vector<1x8xf32>
    %695 = vector.broadcast %694 : vector<1x8xf32> to vector<16x8xf32>
    %696 = arith.addf %693, %695 : vector<16x8xf32>
    %c1992 = arith.constant 1992 : index
    %c0_317 = arith.constant 0 : index
    %697 = vector.load %arg1[%c1992, %c0_317] : memref<3272x128xf32, #tpu.memory_space<vmem>>, vector<32x8xf32>
    %cst_318 = arith.constant dense<0.000000e+00> : vector<16x8xf32>
    %698 = tpu.matmul %411, %697, %cst_318 {dimension_numbers = #tpu.dot_dimension_numbers<[1], [0], [0], [1], [0, 0, 1, 1], [], []>} : vector<16x32xf32>, vector<32x8xf32>, vector<16x8xf32> -> vector<16x8xf32>
    %c2027 = arith.constant 2027 : index
    %c0_319 = arith.constant 0 : index
    %699 = vector.load %arg1[%c2027, %c0_319] : memref<3272x128xf32, #tpu.memory_space<vmem>>, vector<1x8xf32>
    %700 = vector.broadcast %699 : vector<1x8xf32> to vector<16x8xf32>
    %701 = arith.addf %698, %700 : vector<16x8xf32>
    %cst_320 = arith.constant dense<0.000000e+00> : vector<16x16xf32>
    %702 = tpu.matmul %691, %696, %cst_320 {dimension_numbers = #tpu.dot_dimension_numbers<[1], [1], [0], [0], [0, 0, 1, 0], [], []>} : vector<16x8xf32>, vector<16x8xf32>, vector<16x16xf32> -> vector<16x16xf32>
    %cst_321 = arith.constant 0.353553385 : f32
    %703 = vector.broadcast %cst_321 : f32 to vector<16x16xf32>
    %704 = arith.mulf %702, %703 : vector<16x16xf32>
    %705 = arith.addf %704, %2 : vector<16x16xf32>
    %cst_322 = arith.constant dense<0xFF800000> : vector<16xf32>
    %706 = vector.multi_reduction <maximumf>, %705, %cst_322 [1] : vector<16x16xf32> to vector<16xf32>
    %707 = vector.shape_cast %706 : vector<16xf32> to vector<16x1xf32>
    %708 = vector.broadcast %707 : vector<16x1xf32> to vector<16x16xf32>
    %709 = arith.subf %705, %708 : vector<16x16xf32>
    %710 = math.exp %709 : vector<16x16xf32>
    %cst_323 = arith.constant dense<0.000000e+00> : vector<16xf32>
    %711 = vector.multi_reduction <add>, %710, %cst_323 [1] : vector<16x16xf32> to vector<16xf32>
    %712 = vector.shape_cast %711 : vector<16xf32> to vector<16x1xf32>
    %713 = vector.broadcast %712 : vector<16x1xf32> to vector<16x16xf32>
    %714 = arith.divf %710, %713 : vector<16x16xf32>
    %cst_324 = arith.constant dense<0.000000e+00> : vector<16x8xf32>
    %715 = tpu.matmul %714, %701, %cst_324 {dimension_numbers = #tpu.dot_dimension_numbers<[1], [0], [0], [1], [0, 0, 1, 1], [], []>} : vector<16x16xf32>, vector<16x8xf32>, vector<16x8xf32> -> vector<16x8xf32>
    %c2056 = arith.constant 2056 : index
    %c0_325 = arith.constant 0 : index
    %716 = vector.load %arg1[%c2056, %c0_325] : memref<3272x128xf32, #tpu.memory_space<vmem>>, vector<8x32xf32>
    %cst_326 = arith.constant dense<0.000000e+00> : vector<16x32xf32>
    %717 = tpu.matmul %715, %716, %cst_326 {dimension_numbers = #tpu.dot_dimension_numbers<[1], [0], [0], [1], [0, 0, 1, 1], [], []>} : vector<16x8xf32>, vector<8x32xf32>, vector<16x32xf32> -> vector<16x32xf32>
    %718 = arith.addf %686, %717 : vector<16x32xf32>
    %c2064 = arith.constant 2064 : index
    %c0_327 = arith.constant 0 : index
    %719 = vector.load %arg1[%c2064, %c0_327] : memref<3272x128xf32, #tpu.memory_space<vmem>>, vector<1x32xf32>
    %720 = vector.broadcast %719 : vector<1x32xf32> to vector<16x32xf32>
    %721 = arith.addf %718, %720 : vector<16x32xf32>
    %722 = arith.addf %567, %721 : vector<16x32xf32>
    %c2072 = arith.constant 2072 : index
    %c0_328 = arith.constant 0 : index
    %723 = vector.load %arg1[%c2072, %c0_328] : memref<3272x128xf32, #tpu.memory_space<vmem>>, vector<1x32xf32>
    %c2073 = arith.constant 2073 : index
    %c0_329 = arith.constant 0 : index
    %724 = vector.load %arg1[%c2073, %c0_329] : memref<3272x128xf32, #tpu.memory_space<vmem>>, vector<1x32xf32>
    %cst_330 = arith.constant dense<0.000000e+00> : vector<16xf32>
    %725 = vector.multi_reduction <add>, %722, %cst_330 [1] : vector<16x32xf32> to vector<16xf32>
    %726 = vector.shape_cast %725 : vector<16xf32> to vector<16x1xf32>
    %cst_331 = arith.constant 3.200000e+01 : f32
    %727 = vector.broadcast %cst_331 : f32 to vector<16x1xf32>
    %728 = arith.divf %726, %727 : vector<16x1xf32>
    %729 = vector.broadcast %728 : vector<16x1xf32> to vector<16x32xf32>
    %730 = arith.subf %722, %729 : vector<16x32xf32>
    %731 = arith.mulf %730, %730 : vector<16x32xf32>
    %cst_332 = arith.constant dense<0.000000e+00> : vector<16xf32>
    %732 = vector.multi_reduction <add>, %731, %cst_332 [1] : vector<16x32xf32> to vector<16xf32>
    %733 = vector.shape_cast %732 : vector<16xf32> to vector<16x1xf32>
    %cst_333 = arith.constant 3.200000e+01 : f32
    %734 = vector.broadcast %cst_333 : f32 to vector<16x1xf32>
    %735 = arith.divf %733, %734 : vector<16x1xf32>
    %736 = vector.broadcast %728 : vector<16x1xf32> to vector<16x32xf32>
    %737 = arith.subf %722, %736 : vector<16x32xf32>
    %cst_334 = arith.constant 9.99999974E-6 : f32
    %738 = vector.broadcast %cst_334 : f32 to vector<16x1xf32>
    %739 = arith.addf %735, %738 : vector<16x1xf32>
    %740 = math.rsqrt %739 : vector<16x1xf32>
    %741 = vector.broadcast %740 : vector<16x1xf32> to vector<16x32xf32>
    %742 = arith.mulf %737, %741 : vector<16x32xf32>
    %743 = vector.broadcast %723 : vector<1x32xf32> to vector<16x32xf32>
    %744 = arith.mulf %742, %743 : vector<16x32xf32>
    %745 = vector.broadcast %724 : vector<1x32xf32> to vector<16x32xf32>
    %746 = arith.addf %744, %745 : vector<16x32xf32>
    %c2080 = arith.constant 2080 : index
    %c0_335 = arith.constant 0 : index
    %747 = vector.load %arg1[%c2080, %c0_335] : memref<3272x128xf32, #tpu.memory_space<vmem>>, vector<32x64xf32>
    %cst_336 = arith.constant dense<0.000000e+00> : vector<16x64xf32>
    %748 = tpu.matmul %746, %747, %cst_336 {dimension_numbers = #tpu.dot_dimension_numbers<[1], [0], [0], [1], [0, 0, 1, 1], [], []>} : vector<16x32xf32>, vector<32x64xf32>, vector<16x64xf32> -> vector<16x64xf32>
    %c2112 = arith.constant 2112 : index
    %c0_337 = arith.constant 0 : index
    %749 = vector.load %arg1[%c2112, %c0_337] : memref<3272x128xf32, #tpu.memory_space<vmem>>, vector<1x64xf32>
    %750 = vector.broadcast %749 : vector<1x64xf32> to vector<16x64xf32>
    %751 = arith.addf %748, %750 : vector<16x64xf32>
    %cst_338 = arith.constant 0.000000e+00 : f32
    %752 = vector.broadcast %cst_338 : f32 to vector<16x64xf32>
    %753 = arith.maximumf %751, %752 : vector<16x64xf32>
    %c2120 = arith.constant 2120 : index
    %c0_339 = arith.constant 0 : index
    %754 = vector.load %arg1[%c2120, %c0_339] : memref<3272x128xf32, #tpu.memory_space<vmem>>, vector<64x32xf32>
    %cst_340 = arith.constant dense<0.000000e+00> : vector<16x32xf32>
    %755 = tpu.matmul %753, %754, %cst_340 {dimension_numbers = #tpu.dot_dimension_numbers<[1], [0], [0], [1], [0, 0, 1, 1], [], []>} : vector<16x64xf32>, vector<64x32xf32>, vector<16x32xf32> -> vector<16x32xf32>
    %c2184 = arith.constant 2184 : index
    %c0_341 = arith.constant 0 : index
    %756 = vector.load %arg1[%c2184, %c0_341] : memref<3272x128xf32, #tpu.memory_space<vmem>>, vector<1x32xf32>
    %757 = vector.broadcast %756 : vector<1x32xf32> to vector<16x32xf32>
    %758 = arith.addf %755, %757 : vector<16x32xf32>
    %759 = arith.addf %722, %758 : vector<16x32xf32>
    %c2192 = arith.constant 2192 : index
    %c0_342 = arith.constant 0 : index
    %760 = vector.load %arg1[%c2192, %c0_342] : memref<3272x128xf32, #tpu.memory_space<vmem>>, vector<1x32xf32>
    %c2193 = arith.constant 2193 : index
    %c0_343 = arith.constant 0 : index
    %761 = vector.load %arg1[%c2193, %c0_343] : memref<3272x128xf32, #tpu.memory_space<vmem>>, vector<1x32xf32>
    %cst_344 = arith.constant dense<0.000000e+00> : vector<16xf32>
    %762 = vector.multi_reduction <add>, %759, %cst_344 [1] : vector<16x32xf32> to vector<16xf32>
    %763 = vector.shape_cast %762 : vector<16xf32> to vector<16x1xf32>
    %cst_345 = arith.constant 3.200000e+01 : f32
    %764 = vector.broadcast %cst_345 : f32 to vector<16x1xf32>
    %765 = arith.divf %763, %764 : vector<16x1xf32>
    %766 = vector.broadcast %765 : vector<16x1xf32> to vector<16x32xf32>
    %767 = arith.subf %759, %766 : vector<16x32xf32>
    %768 = arith.mulf %767, %767 : vector<16x32xf32>
    %cst_346 = arith.constant dense<0.000000e+00> : vector<16xf32>
    %769 = vector.multi_reduction <add>, %768, %cst_346 [1] : vector<16x32xf32> to vector<16xf32>
    %770 = vector.shape_cast %769 : vector<16xf32> to vector<16x1xf32>
    %cst_347 = arith.constant 3.200000e+01 : f32
    %771 = vector.broadcast %cst_347 : f32 to vector<16x1xf32>
    %772 = arith.divf %770, %771 : vector<16x1xf32>
    %773 = vector.broadcast %765 : vector<16x1xf32> to vector<16x32xf32>
    %774 = arith.subf %759, %773 : vector<16x32xf32>
    %cst_348 = arith.constant 9.99999974E-6 : f32
    %775 = vector.broadcast %cst_348 : f32 to vector<16x1xf32>
    %776 = arith.addf %772, %775 : vector<16x1xf32>
    %777 = math.rsqrt %776 : vector<16x1xf32>
    %778 = vector.broadcast %777 : vector<16x1xf32> to vector<16x32xf32>
    %779 = arith.mulf %774, %778 : vector<16x32xf32>
    %780 = vector.broadcast %760 : vector<1x32xf32> to vector<16x32xf32>
    %781 = arith.mulf %779, %780 : vector<16x32xf32>
    %782 = vector.broadcast %761 : vector<1x32xf32> to vector<16x32xf32>
    %783 = arith.addf %781, %782 : vector<16x32xf32>
    %c2200 = arith.constant 2200 : index
    %c0_349 = arith.constant 0 : index
    %784 = vector.load %arg1[%c2200, %c0_349] : memref<3272x128xf32, #tpu.memory_space<vmem>>, vector<32x8xf32>
    %cst_350 = arith.constant dense<0.000000e+00> : vector<16x8xf32>
    %785 = tpu.matmul %783, %784, %cst_350 {dimension_numbers = #tpu.dot_dimension_numbers<[1], [0], [0], [1], [0, 0, 1, 1], [], []>} : vector<16x32xf32>, vector<32x8xf32>, vector<16x8xf32> -> vector<16x8xf32>
    %c2328 = arith.constant 2328 : index
    %c0_351 = arith.constant 0 : index
    %786 = vector.load %arg1[%c2328, %c0_351] : memref<3272x128xf32, #tpu.memory_space<vmem>>, vector<1x8xf32>
    %787 = vector.broadcast %786 : vector<1x8xf32> to vector<16x8xf32>
    %788 = arith.addf %785, %787 : vector<16x8xf32>
    %c2336 = arith.constant 2336 : index
    %c0_352 = arith.constant 0 : index
    %789 = vector.load %arg1[%c2336, %c0_352] : memref<3272x128xf32, #tpu.memory_space<vmem>>, vector<32x8xf32>
    %cst_353 = arith.constant dense<0.000000e+00> : vector<16x8xf32>
    %790 = tpu.matmul %783, %789, %cst_353 {dimension_numbers = #tpu.dot_dimension_numbers<[1], [0], [0], [1], [0, 0, 1, 1], [], []>} : vector<16x32xf32>, vector<32x8xf32>, vector<16x8xf32> -> vector<16x8xf32>
    %c2464 = arith.constant 2464 : index
    %c0_354 = arith.constant 0 : index
    %791 = vector.load %arg1[%c2464, %c0_354] : memref<3272x128xf32, #tpu.memory_space<vmem>>, vector<1x8xf32>
    %792 = vector.broadcast %791 : vector<1x8xf32> to vector<16x8xf32>
    %793 = arith.addf %790, %792 : vector<16x8xf32>
    %c2472 = arith.constant 2472 : index
    %c0_355 = arith.constant 0 : index
    %794 = vector.load %arg1[%c2472, %c0_355] : memref<3272x128xf32, #tpu.memory_space<vmem>>, vector<32x8xf32>
    %cst_356 = arith.constant dense<0.000000e+00> : vector<16x8xf32>
    %795 = tpu.matmul %783, %794, %cst_356 {dimension_numbers = #tpu.dot_dimension_numbers<[1], [0], [0], [1], [0, 0, 1, 1], [], []>} : vector<16x32xf32>, vector<32x8xf32>, vector<16x8xf32> -> vector<16x8xf32>
    %c2600 = arith.constant 2600 : index
    %c0_357 = arith.constant 0 : index
    %796 = vector.load %arg1[%c2600, %c0_357] : memref<3272x128xf32, #tpu.memory_space<vmem>>, vector<1x8xf32>
    %797 = vector.broadcast %796 : vector<1x8xf32> to vector<16x8xf32>
    %798 = arith.addf %795, %797 : vector<16x8xf32>
    %cst_358 = arith.constant dense<0.000000e+00> : vector<16x16xf32>
    %799 = tpu.matmul %788, %793, %cst_358 {dimension_numbers = #tpu.dot_dimension_numbers<[1], [1], [0], [0], [0, 0, 1, 0], [], []>} : vector<16x8xf32>, vector<16x8xf32>, vector<16x16xf32> -> vector<16x16xf32>
    %cst_359 = arith.constant 0.353553385 : f32
    %800 = vector.broadcast %cst_359 : f32 to vector<16x16xf32>
    %801 = arith.mulf %799, %800 : vector<16x16xf32>
    %802 = arith.addf %801, %1 : vector<16x16xf32>
    %cst_360 = arith.constant dense<0xFF800000> : vector<16xf32>
    %803 = vector.multi_reduction <maximumf>, %802, %cst_360 [1] : vector<16x16xf32> to vector<16xf32>
    %804 = vector.shape_cast %803 : vector<16xf32> to vector<16x1xf32>
    %805 = vector.broadcast %804 : vector<16x1xf32> to vector<16x16xf32>
    %806 = arith.subf %802, %805 : vector<16x16xf32>
    %807 = math.exp %806 : vector<16x16xf32>
    %cst_361 = arith.constant dense<0.000000e+00> : vector<16xf32>
    %808 = vector.multi_reduction <add>, %807, %cst_361 [1] : vector<16x16xf32> to vector<16xf32>
    %809 = vector.shape_cast %808 : vector<16xf32> to vector<16x1xf32>
    %810 = vector.broadcast %809 : vector<16x1xf32> to vector<16x16xf32>
    %811 = arith.divf %807, %810 : vector<16x16xf32>
    %cst_362 = arith.constant dense<0.000000e+00> : vector<16x8xf32>
    %812 = tpu.matmul %811, %798, %cst_362 {dimension_numbers = #tpu.dot_dimension_numbers<[1], [0], [0], [1], [0, 0, 1, 1], [], []>} : vector<16x16xf32>, vector<16x8xf32>, vector<16x8xf32> -> vector<16x8xf32>
    %c2608 = arith.constant 2608 : index
    %c0_363 = arith.constant 0 : index
    %813 = vector.load %arg1[%c2608, %c0_363] : memref<3272x128xf32, #tpu.memory_space<vmem>>, vector<8x32xf32>
    %cst_364 = arith.constant dense<0.000000e+00> : vector<16x32xf32>
    %814 = tpu.matmul %812, %813, %cst_364 {dimension_numbers = #tpu.dot_dimension_numbers<[1], [0], [0], [1], [0, 0, 1, 1], [], []>} : vector<16x8xf32>, vector<8x32xf32>, vector<16x32xf32> -> vector<16x32xf32>
    %c2232 = arith.constant 2232 : index
    %c0_365 = arith.constant 0 : index
    %815 = vector.load %arg1[%c2232, %c0_365] : memref<3272x128xf32, #tpu.memory_space<vmem>>, vector<32x8xf32>
    %cst_366 = arith.constant dense<0.000000e+00> : vector<16x8xf32>
    %816 = tpu.matmul %783, %815, %cst_366 {dimension_numbers = #tpu.dot_dimension_numbers<[1], [0], [0], [1], [0, 0, 1, 1], [], []>} : vector<16x32xf32>, vector<32x8xf32>, vector<16x8xf32> -> vector<16x8xf32>
    %c2329 = arith.constant 2329 : index
    %c0_367 = arith.constant 0 : index
    %817 = vector.load %arg1[%c2329, %c0_367] : memref<3272x128xf32, #tpu.memory_space<vmem>>, vector<1x8xf32>
    %818 = vector.broadcast %817 : vector<1x8xf32> to vector<16x8xf32>
    %819 = arith.addf %816, %818 : vector<16x8xf32>
    %c2368 = arith.constant 2368 : index
    %c0_368 = arith.constant 0 : index
    %820 = vector.load %arg1[%c2368, %c0_368] : memref<3272x128xf32, #tpu.memory_space<vmem>>, vector<32x8xf32>
    %cst_369 = arith.constant dense<0.000000e+00> : vector<16x8xf32>
    %821 = tpu.matmul %783, %820, %cst_369 {dimension_numbers = #tpu.dot_dimension_numbers<[1], [0], [0], [1], [0, 0, 1, 1], [], []>} : vector<16x32xf32>, vector<32x8xf32>, vector<16x8xf32> -> vector<16x8xf32>
    %c2465 = arith.constant 2465 : index
    %c0_370 = arith.constant 0 : index
    %822 = vector.load %arg1[%c2465, %c0_370] : memref<3272x128xf32, #tpu.memory_space<vmem>>, vector<1x8xf32>
    %823 = vector.broadcast %822 : vector<1x8xf32> to vector<16x8xf32>
    %824 = arith.addf %821, %823 : vector<16x8xf32>
    %c2504 = arith.constant 2504 : index
    %c0_371 = arith.constant 0 : index
    %825 = vector.load %arg1[%c2504, %c0_371] : memref<3272x128xf32, #tpu.memory_space<vmem>>, vector<32x8xf32>
    %cst_372 = arith.constant dense<0.000000e+00> : vector<16x8xf32>
    %826 = tpu.matmul %783, %825, %cst_372 {dimension_numbers = #tpu.dot_dimension_numbers<[1], [0], [0], [1], [0, 0, 1, 1], [], []>} : vector<16x32xf32>, vector<32x8xf32>, vector<16x8xf32> -> vector<16x8xf32>
    %c2601 = arith.constant 2601 : index
    %c0_373 = arith.constant 0 : index
    %827 = vector.load %arg1[%c2601, %c0_373] : memref<3272x128xf32, #tpu.memory_space<vmem>>, vector<1x8xf32>
    %828 = vector.broadcast %827 : vector<1x8xf32> to vector<16x8xf32>
    %829 = arith.addf %826, %828 : vector<16x8xf32>
    %cst_374 = arith.constant dense<0.000000e+00> : vector<16x16xf32>
    %830 = tpu.matmul %819, %824, %cst_374 {dimension_numbers = #tpu.dot_dimension_numbers<[1], [1], [0], [0], [0, 0, 1, 0], [], []>} : vector<16x8xf32>, vector<16x8xf32>, vector<16x16xf32> -> vector<16x16xf32>
    %cst_375 = arith.constant 0.353553385 : f32
    %831 = vector.broadcast %cst_375 : f32 to vector<16x16xf32>
    %832 = arith.mulf %830, %831 : vector<16x16xf32>
    %833 = arith.addf %832, %1 : vector<16x16xf32>
    %cst_376 = arith.constant dense<0xFF800000> : vector<16xf32>
    %834 = vector.multi_reduction <maximumf>, %833, %cst_376 [1] : vector<16x16xf32> to vector<16xf32>
    %835 = vector.shape_cast %834 : vector<16xf32> to vector<16x1xf32>
    %836 = vector.broadcast %835 : vector<16x1xf32> to vector<16x16xf32>
    %837 = arith.subf %833, %836 : vector<16x16xf32>
    %838 = math.exp %837 : vector<16x16xf32>
    %cst_377 = arith.constant dense<0.000000e+00> : vector<16xf32>
    %839 = vector.multi_reduction <add>, %838, %cst_377 [1] : vector<16x16xf32> to vector<16xf32>
    %840 = vector.shape_cast %839 : vector<16xf32> to vector<16x1xf32>
    %841 = vector.broadcast %840 : vector<16x1xf32> to vector<16x16xf32>
    %842 = arith.divf %838, %841 : vector<16x16xf32>
    %cst_378 = arith.constant dense<0.000000e+00> : vector<16x8xf32>
    %843 = tpu.matmul %842, %829, %cst_378 {dimension_numbers = #tpu.dot_dimension_numbers<[1], [0], [0], [1], [0, 0, 1, 1], [], []>} : vector<16x16xf32>, vector<16x8xf32>, vector<16x8xf32> -> vector<16x8xf32>
    %c2616 = arith.constant 2616 : index
    %c0_379 = arith.constant 0 : index
    %844 = vector.load %arg1[%c2616, %c0_379] : memref<3272x128xf32, #tpu.memory_space<vmem>>, vector<8x32xf32>
    %cst_380 = arith.constant dense<0.000000e+00> : vector<16x32xf32>
    %845 = tpu.matmul %843, %844, %cst_380 {dimension_numbers = #tpu.dot_dimension_numbers<[1], [0], [0], [1], [0, 0, 1, 1], [], []>} : vector<16x8xf32>, vector<8x32xf32>, vector<16x32xf32> -> vector<16x32xf32>
    %846 = arith.addf %814, %845 : vector<16x32xf32>
    %c2264 = arith.constant 2264 : index
    %c0_381 = arith.constant 0 : index
    %847 = vector.load %arg1[%c2264, %c0_381] : memref<3272x128xf32, #tpu.memory_space<vmem>>, vector<32x8xf32>
    %cst_382 = arith.constant dense<0.000000e+00> : vector<16x8xf32>
    %848 = tpu.matmul %783, %847, %cst_382 {dimension_numbers = #tpu.dot_dimension_numbers<[1], [0], [0], [1], [0, 0, 1, 1], [], []>} : vector<16x32xf32>, vector<32x8xf32>, vector<16x8xf32> -> vector<16x8xf32>
    %c2330 = arith.constant 2330 : index
    %c0_383 = arith.constant 0 : index
    %849 = vector.load %arg1[%c2330, %c0_383] : memref<3272x128xf32, #tpu.memory_space<vmem>>, vector<1x8xf32>
    %850 = vector.broadcast %849 : vector<1x8xf32> to vector<16x8xf32>
    %851 = arith.addf %848, %850 : vector<16x8xf32>
    %c2400 = arith.constant 2400 : index
    %c0_384 = arith.constant 0 : index
    %852 = vector.load %arg1[%c2400, %c0_384] : memref<3272x128xf32, #tpu.memory_space<vmem>>, vector<32x8xf32>
    %cst_385 = arith.constant dense<0.000000e+00> : vector<16x8xf32>
    %853 = tpu.matmul %783, %852, %cst_385 {dimension_numbers = #tpu.dot_dimension_numbers<[1], [0], [0], [1], [0, 0, 1, 1], [], []>} : vector<16x32xf32>, vector<32x8xf32>, vector<16x8xf32> -> vector<16x8xf32>
    %c2466 = arith.constant 2466 : index
    %c0_386 = arith.constant 0 : index
    %854 = vector.load %arg1[%c2466, %c0_386] : memref<3272x128xf32, #tpu.memory_space<vmem>>, vector<1x8xf32>
    %855 = vector.broadcast %854 : vector<1x8xf32> to vector<16x8xf32>
    %856 = arith.addf %853, %855 : vector<16x8xf32>
    %c2536 = arith.constant 2536 : index
    %c0_387 = arith.constant 0 : index
    %857 = vector.load %arg1[%c2536, %c0_387] : memref<3272x128xf32, #tpu.memory_space<vmem>>, vector<32x8xf32>
    %cst_388 = arith.constant dense<0.000000e+00> : vector<16x8xf32>
    %858 = tpu.matmul %783, %857, %cst_388 {dimension_numbers = #tpu.dot_dimension_numbers<[1], [0], [0], [1], [0, 0, 1, 1], [], []>} : vector<16x32xf32>, vector<32x8xf32>, vector<16x8xf32> -> vector<16x8xf32>
    %c2602 = arith.constant 2602 : index
    %c0_389 = arith.constant 0 : index
    %859 = vector.load %arg1[%c2602, %c0_389] : memref<3272x128xf32, #tpu.memory_space<vmem>>, vector<1x8xf32>
    %860 = vector.broadcast %859 : vector<1x8xf32> to vector<16x8xf32>
    %861 = arith.addf %858, %860 : vector<16x8xf32>
    %cst_390 = arith.constant dense<0.000000e+00> : vector<16x16xf32>
    %862 = tpu.matmul %851, %856, %cst_390 {dimension_numbers = #tpu.dot_dimension_numbers<[1], [1], [0], [0], [0, 0, 1, 0], [], []>} : vector<16x8xf32>, vector<16x8xf32>, vector<16x16xf32> -> vector<16x16xf32>
    %cst_391 = arith.constant 0.353553385 : f32
    %863 = vector.broadcast %cst_391 : f32 to vector<16x16xf32>
    %864 = arith.mulf %862, %863 : vector<16x16xf32>
    %865 = arith.addf %864, %1 : vector<16x16xf32>
    %cst_392 = arith.constant dense<0xFF800000> : vector<16xf32>
    %866 = vector.multi_reduction <maximumf>, %865, %cst_392 [1] : vector<16x16xf32> to vector<16xf32>
    %867 = vector.shape_cast %866 : vector<16xf32> to vector<16x1xf32>
    %868 = vector.broadcast %867 : vector<16x1xf32> to vector<16x16xf32>
    %869 = arith.subf %865, %868 : vector<16x16xf32>
    %870 = math.exp %869 : vector<16x16xf32>
    %cst_393 = arith.constant dense<0.000000e+00> : vector<16xf32>
    %871 = vector.multi_reduction <add>, %870, %cst_393 [1] : vector<16x16xf32> to vector<16xf32>
    %872 = vector.shape_cast %871 : vector<16xf32> to vector<16x1xf32>
    %873 = vector.broadcast %872 : vector<16x1xf32> to vector<16x16xf32>
    %874 = arith.divf %870, %873 : vector<16x16xf32>
    %cst_394 = arith.constant dense<0.000000e+00> : vector<16x8xf32>
    %875 = tpu.matmul %874, %861, %cst_394 {dimension_numbers = #tpu.dot_dimension_numbers<[1], [0], [0], [1], [0, 0, 1, 1], [], []>} : vector<16x16xf32>, vector<16x8xf32>, vector<16x8xf32> -> vector<16x8xf32>
    %c2624 = arith.constant 2624 : index
    %c0_395 = arith.constant 0 : index
    %876 = vector.load %arg1[%c2624, %c0_395] : memref<3272x128xf32, #tpu.memory_space<vmem>>, vector<8x32xf32>
    %cst_396 = arith.constant dense<0.000000e+00> : vector<16x32xf32>
    %877 = tpu.matmul %875, %876, %cst_396 {dimension_numbers = #tpu.dot_dimension_numbers<[1], [0], [0], [1], [0, 0, 1, 1], [], []>} : vector<16x8xf32>, vector<8x32xf32>, vector<16x32xf32> -> vector<16x32xf32>
    %878 = arith.addf %846, %877 : vector<16x32xf32>
    %c2296 = arith.constant 2296 : index
    %c0_397 = arith.constant 0 : index
    %879 = vector.load %arg1[%c2296, %c0_397] : memref<3272x128xf32, #tpu.memory_space<vmem>>, vector<32x8xf32>
    %cst_398 = arith.constant dense<0.000000e+00> : vector<16x8xf32>
    %880 = tpu.matmul %783, %879, %cst_398 {dimension_numbers = #tpu.dot_dimension_numbers<[1], [0], [0], [1], [0, 0, 1, 1], [], []>} : vector<16x32xf32>, vector<32x8xf32>, vector<16x8xf32> -> vector<16x8xf32>
    %c2331 = arith.constant 2331 : index
    %c0_399 = arith.constant 0 : index
    %881 = vector.load %arg1[%c2331, %c0_399] : memref<3272x128xf32, #tpu.memory_space<vmem>>, vector<1x8xf32>
    %882 = vector.broadcast %881 : vector<1x8xf32> to vector<16x8xf32>
    %883 = arith.addf %880, %882 : vector<16x8xf32>
    %c2432 = arith.constant 2432 : index
    %c0_400 = arith.constant 0 : index
    %884 = vector.load %arg1[%c2432, %c0_400] : memref<3272x128xf32, #tpu.memory_space<vmem>>, vector<32x8xf32>
    %cst_401 = arith.constant dense<0.000000e+00> : vector<16x8xf32>
    %885 = tpu.matmul %783, %884, %cst_401 {dimension_numbers = #tpu.dot_dimension_numbers<[1], [0], [0], [1], [0, 0, 1, 1], [], []>} : vector<16x32xf32>, vector<32x8xf32>, vector<16x8xf32> -> vector<16x8xf32>
    %c2467 = arith.constant 2467 : index
    %c0_402 = arith.constant 0 : index
    %886 = vector.load %arg1[%c2467, %c0_402] : memref<3272x128xf32, #tpu.memory_space<vmem>>, vector<1x8xf32>
    %887 = vector.broadcast %886 : vector<1x8xf32> to vector<16x8xf32>
    %888 = arith.addf %885, %887 : vector<16x8xf32>
    %c2568 = arith.constant 2568 : index
    %c0_403 = arith.constant 0 : index
    %889 = vector.load %arg1[%c2568, %c0_403] : memref<3272x128xf32, #tpu.memory_space<vmem>>, vector<32x8xf32>
    %cst_404 = arith.constant dense<0.000000e+00> : vector<16x8xf32>
    %890 = tpu.matmul %783, %889, %cst_404 {dimension_numbers = #tpu.dot_dimension_numbers<[1], [0], [0], [1], [0, 0, 1, 1], [], []>} : vector<16x32xf32>, vector<32x8xf32>, vector<16x8xf32> -> vector<16x8xf32>
    %c2603 = arith.constant 2603 : index
    %c0_405 = arith.constant 0 : index
    %891 = vector.load %arg1[%c2603, %c0_405] : memref<3272x128xf32, #tpu.memory_space<vmem>>, vector<1x8xf32>
    %892 = vector.broadcast %891 : vector<1x8xf32> to vector<16x8xf32>
    %893 = arith.addf %890, %892 : vector<16x8xf32>
    %cst_406 = arith.constant dense<0.000000e+00> : vector<16x16xf32>
    %894 = tpu.matmul %883, %888, %cst_406 {dimension_numbers = #tpu.dot_dimension_numbers<[1], [1], [0], [0], [0, 0, 1, 0], [], []>} : vector<16x8xf32>, vector<16x8xf32>, vector<16x16xf32> -> vector<16x16xf32>
    %cst_407 = arith.constant 0.353553385 : f32
    %895 = vector.broadcast %cst_407 : f32 to vector<16x16xf32>
    %896 = arith.mulf %894, %895 : vector<16x16xf32>
    %897 = arith.addf %896, %1 : vector<16x16xf32>
    %cst_408 = arith.constant dense<0xFF800000> : vector<16xf32>
    %898 = vector.multi_reduction <maximumf>, %897, %cst_408 [1] : vector<16x16xf32> to vector<16xf32>
    %899 = vector.shape_cast %898 : vector<16xf32> to vector<16x1xf32>
    %900 = vector.broadcast %899 : vector<16x1xf32> to vector<16x16xf32>
    %901 = arith.subf %897, %900 : vector<16x16xf32>
    %902 = math.exp %901 : vector<16x16xf32>
    %cst_409 = arith.constant dense<0.000000e+00> : vector<16xf32>
    %903 = vector.multi_reduction <add>, %902, %cst_409 [1] : vector<16x16xf32> to vector<16xf32>
    %904 = vector.shape_cast %903 : vector<16xf32> to vector<16x1xf32>
    %905 = vector.broadcast %904 : vector<16x1xf32> to vector<16x16xf32>
    %906 = arith.divf %902, %905 : vector<16x16xf32>
    %cst_410 = arith.constant dense<0.000000e+00> : vector<16x8xf32>
    %907 = tpu.matmul %906, %893, %cst_410 {dimension_numbers = #tpu.dot_dimension_numbers<[1], [0], [0], [1], [0, 0, 1, 1], [], []>} : vector<16x16xf32>, vector<16x8xf32>, vector<16x8xf32> -> vector<16x8xf32>
    %c2632 = arith.constant 2632 : index
    %c0_411 = arith.constant 0 : index
    %908 = vector.load %arg1[%c2632, %c0_411] : memref<3272x128xf32, #tpu.memory_space<vmem>>, vector<8x32xf32>
    %cst_412 = arith.constant dense<0.000000e+00> : vector<16x32xf32>
    %909 = tpu.matmul %907, %908, %cst_412 {dimension_numbers = #tpu.dot_dimension_numbers<[1], [0], [0], [1], [0, 0, 1, 1], [], []>} : vector<16x8xf32>, vector<8x32xf32>, vector<16x32xf32> -> vector<16x32xf32>
    %910 = arith.addf %878, %909 : vector<16x32xf32>
    %c2640 = arith.constant 2640 : index
    %c0_413 = arith.constant 0 : index
    %911 = vector.load %arg1[%c2640, %c0_413] : memref<3272x128xf32, #tpu.memory_space<vmem>>, vector<1x32xf32>
    %912 = vector.broadcast %911 : vector<1x32xf32> to vector<16x32xf32>
    %913 = arith.addf %910, %912 : vector<16x32xf32>
    %914 = arith.addf %759, %913 : vector<16x32xf32>
    %c2648 = arith.constant 2648 : index
    %c0_414 = arith.constant 0 : index
    %915 = vector.load %arg1[%c2648, %c0_414] : memref<3272x128xf32, #tpu.memory_space<vmem>>, vector<1x32xf32>
    %c2649 = arith.constant 2649 : index
    %c0_415 = arith.constant 0 : index
    %916 = vector.load %arg1[%c2649, %c0_415] : memref<3272x128xf32, #tpu.memory_space<vmem>>, vector<1x32xf32>
    %cst_416 = arith.constant dense<0.000000e+00> : vector<16xf32>
    %917 = vector.multi_reduction <add>, %914, %cst_416 [1] : vector<16x32xf32> to vector<16xf32>
    %918 = vector.shape_cast %917 : vector<16xf32> to vector<16x1xf32>
    %cst_417 = arith.constant 3.200000e+01 : f32
    %919 = vector.broadcast %cst_417 : f32 to vector<16x1xf32>
    %920 = arith.divf %918, %919 : vector<16x1xf32>
    %921 = vector.broadcast %920 : vector<16x1xf32> to vector<16x32xf32>
    %922 = arith.subf %914, %921 : vector<16x32xf32>
    %923 = arith.mulf %922, %922 : vector<16x32xf32>
    %cst_418 = arith.constant dense<0.000000e+00> : vector<16xf32>
    %924 = vector.multi_reduction <add>, %923, %cst_418 [1] : vector<16x32xf32> to vector<16xf32>
    %925 = vector.shape_cast %924 : vector<16xf32> to vector<16x1xf32>
    %cst_419 = arith.constant 3.200000e+01 : f32
    %926 = vector.broadcast %cst_419 : f32 to vector<16x1xf32>
    %927 = arith.divf %925, %926 : vector<16x1xf32>
    %928 = vector.broadcast %920 : vector<16x1xf32> to vector<16x32xf32>
    %929 = arith.subf %914, %928 : vector<16x32xf32>
    %cst_420 = arith.constant 9.99999974E-6 : f32
    %930 = vector.broadcast %cst_420 : f32 to vector<16x1xf32>
    %931 = arith.addf %927, %930 : vector<16x1xf32>
    %932 = math.rsqrt %931 : vector<16x1xf32>
    %933 = vector.broadcast %932 : vector<16x1xf32> to vector<16x32xf32>
    %934 = arith.mulf %929, %933 : vector<16x32xf32>
    %935 = vector.broadcast %915 : vector<1x32xf32> to vector<16x32xf32>
    %936 = arith.mulf %934, %935 : vector<16x32xf32>
    %937 = vector.broadcast %916 : vector<1x32xf32> to vector<16x32xf32>
    %938 = arith.addf %936, %937 : vector<16x32xf32>
    %c2656 = arith.constant 2656 : index
    %c0_421 = arith.constant 0 : index
    %939 = vector.load %arg1[%c2656, %c0_421] : memref<3272x128xf32, #tpu.memory_space<vmem>>, vector<32x8xf32>
    %cst_422 = arith.constant dense<0.000000e+00> : vector<16x8xf32>
    %940 = tpu.matmul %938, %939, %cst_422 {dimension_numbers = #tpu.dot_dimension_numbers<[1], [0], [0], [1], [0, 0, 1, 1], [], []>} : vector<16x32xf32>, vector<32x8xf32>, vector<16x8xf32> -> vector<16x8xf32>
    %c2784 = arith.constant 2784 : index
    %c0_423 = arith.constant 0 : index
    %941 = vector.load %arg1[%c2784, %c0_423] : memref<3272x128xf32, #tpu.memory_space<vmem>>, vector<1x8xf32>
    %942 = vector.broadcast %941 : vector<1x8xf32> to vector<16x8xf32>
    %943 = arith.addf %940, %942 : vector<16x8xf32>
    %c2792 = arith.constant 2792 : index
    %c0_424 = arith.constant 0 : index
    %944 = vector.load %arg1[%c2792, %c0_424] : memref<3272x128xf32, #tpu.memory_space<vmem>>, vector<32x8xf32>
    %cst_425 = arith.constant dense<0.000000e+00> : vector<16x8xf32>
    %945 = tpu.matmul %411, %944, %cst_425 {dimension_numbers = #tpu.dot_dimension_numbers<[1], [0], [0], [1], [0, 0, 1, 1], [], []>} : vector<16x32xf32>, vector<32x8xf32>, vector<16x8xf32> -> vector<16x8xf32>
    %c2920 = arith.constant 2920 : index
    %c0_426 = arith.constant 0 : index
    %946 = vector.load %arg1[%c2920, %c0_426] : memref<3272x128xf32, #tpu.memory_space<vmem>>, vector<1x8xf32>
    %947 = vector.broadcast %946 : vector<1x8xf32> to vector<16x8xf32>
    %948 = arith.addf %945, %947 : vector<16x8xf32>
    %c2928 = arith.constant 2928 : index
    %c0_427 = arith.constant 0 : index
    %949 = vector.load %arg1[%c2928, %c0_427] : memref<3272x128xf32, #tpu.memory_space<vmem>>, vector<32x8xf32>
    %cst_428 = arith.constant dense<0.000000e+00> : vector<16x8xf32>
    %950 = tpu.matmul %411, %949, %cst_428 {dimension_numbers = #tpu.dot_dimension_numbers<[1], [0], [0], [1], [0, 0, 1, 1], [], []>} : vector<16x32xf32>, vector<32x8xf32>, vector<16x8xf32> -> vector<16x8xf32>
    %c3056 = arith.constant 3056 : index
    %c0_429 = arith.constant 0 : index
    %951 = vector.load %arg1[%c3056, %c0_429] : memref<3272x128xf32, #tpu.memory_space<vmem>>, vector<1x8xf32>
    %952 = vector.broadcast %951 : vector<1x8xf32> to vector<16x8xf32>
    %953 = arith.addf %950, %952 : vector<16x8xf32>
    %cst_430 = arith.constant dense<0.000000e+00> : vector<16x16xf32>
    %954 = tpu.matmul %943, %948, %cst_430 {dimension_numbers = #tpu.dot_dimension_numbers<[1], [1], [0], [0], [0, 0, 1, 0], [], []>} : vector<16x8xf32>, vector<16x8xf32>, vector<16x16xf32> -> vector<16x16xf32>
    %cst_431 = arith.constant 0.353553385 : f32
    %955 = vector.broadcast %cst_431 : f32 to vector<16x16xf32>
    %956 = arith.mulf %954, %955 : vector<16x16xf32>
    %957 = arith.addf %956, %2 : vector<16x16xf32>
    %cst_432 = arith.constant dense<0xFF800000> : vector<16xf32>
    %958 = vector.multi_reduction <maximumf>, %957, %cst_432 [1] : vector<16x16xf32> to vector<16xf32>
    %959 = vector.shape_cast %958 : vector<16xf32> to vector<16x1xf32>
    %960 = vector.broadcast %959 : vector<16x1xf32> to vector<16x16xf32>
    %961 = arith.subf %957, %960 : vector<16x16xf32>
    %962 = math.exp %961 : vector<16x16xf32>
    %cst_433 = arith.constant dense<0.000000e+00> : vector<16xf32>
    %963 = vector.multi_reduction <add>, %962, %cst_433 [1] : vector<16x16xf32> to vector<16xf32>
    %964 = vector.shape_cast %963 : vector<16xf32> to vector<16x1xf32>
    %965 = vector.broadcast %964 : vector<16x1xf32> to vector<16x16xf32>
    %966 = arith.divf %962, %965 : vector<16x16xf32>
    %cst_434 = arith.constant dense<0.000000e+00> : vector<16x8xf32>
    %967 = tpu.matmul %966, %953, %cst_434 {dimension_numbers = #tpu.dot_dimension_numbers<[1], [0], [0], [1], [0, 0, 1, 1], [], []>} : vector<16x16xf32>, vector<16x8xf32>, vector<16x8xf32> -> vector<16x8xf32>
    %c3064 = arith.constant 3064 : index
    %c0_435 = arith.constant 0 : index
    %968 = vector.load %arg1[%c3064, %c0_435] : memref<3272x128xf32, #tpu.memory_space<vmem>>, vector<8x32xf32>
    %cst_436 = arith.constant dense<0.000000e+00> : vector<16x32xf32>
    %969 = tpu.matmul %967, %968, %cst_436 {dimension_numbers = #tpu.dot_dimension_numbers<[1], [0], [0], [1], [0, 0, 1, 1], [], []>} : vector<16x8xf32>, vector<8x32xf32>, vector<16x32xf32> -> vector<16x32xf32>
    %c2688 = arith.constant 2688 : index
    %c0_437 = arith.constant 0 : index
    %970 = vector.load %arg1[%c2688, %c0_437] : memref<3272x128xf32, #tpu.memory_space<vmem>>, vector<32x8xf32>
    %cst_438 = arith.constant dense<0.000000e+00> : vector<16x8xf32>
    %971 = tpu.matmul %938, %970, %cst_438 {dimension_numbers = #tpu.dot_dimension_numbers<[1], [0], [0], [1], [0, 0, 1, 1], [], []>} : vector<16x32xf32>, vector<32x8xf32>, vector<16x8xf32> -> vector<16x8xf32>
    %c2785 = arith.constant 2785 : index
    %c0_439 = arith.constant 0 : index
    %972 = vector.load %arg1[%c2785, %c0_439] : memref<3272x128xf32, #tpu.memory_space<vmem>>, vector<1x8xf32>
    %973 = vector.broadcast %972 : vector<1x8xf32> to vector<16x8xf32>
    %974 = arith.addf %971, %973 : vector<16x8xf32>
    %c2824 = arith.constant 2824 : index
    %c0_440 = arith.constant 0 : index
    %975 = vector.load %arg1[%c2824, %c0_440] : memref<3272x128xf32, #tpu.memory_space<vmem>>, vector<32x8xf32>
    %cst_441 = arith.constant dense<0.000000e+00> : vector<16x8xf32>
    %976 = tpu.matmul %411, %975, %cst_441 {dimension_numbers = #tpu.dot_dimension_numbers<[1], [0], [0], [1], [0, 0, 1, 1], [], []>} : vector<16x32xf32>, vector<32x8xf32>, vector<16x8xf32> -> vector<16x8xf32>
    %c2921 = arith.constant 2921 : index
    %c0_442 = arith.constant 0 : index
    %977 = vector.load %arg1[%c2921, %c0_442] : memref<3272x128xf32, #tpu.memory_space<vmem>>, vector<1x8xf32>
    %978 = vector.broadcast %977 : vector<1x8xf32> to vector<16x8xf32>
    %979 = arith.addf %976, %978 : vector<16x8xf32>
    %c2960 = arith.constant 2960 : index
    %c0_443 = arith.constant 0 : index
    %980 = vector.load %arg1[%c2960, %c0_443] : memref<3272x128xf32, #tpu.memory_space<vmem>>, vector<32x8xf32>
    %cst_444 = arith.constant dense<0.000000e+00> : vector<16x8xf32>
    %981 = tpu.matmul %411, %980, %cst_444 {dimension_numbers = #tpu.dot_dimension_numbers<[1], [0], [0], [1], [0, 0, 1, 1], [], []>} : vector<16x32xf32>, vector<32x8xf32>, vector<16x8xf32> -> vector<16x8xf32>
    %c3057 = arith.constant 3057 : index
    %c0_445 = arith.constant 0 : index
    %982 = vector.load %arg1[%c3057, %c0_445] : memref<3272x128xf32, #tpu.memory_space<vmem>>, vector<1x8xf32>
    %983 = vector.broadcast %982 : vector<1x8xf32> to vector<16x8xf32>
    %984 = arith.addf %981, %983 : vector<16x8xf32>
    %cst_446 = arith.constant dense<0.000000e+00> : vector<16x16xf32>
    %985 = tpu.matmul %974, %979, %cst_446 {dimension_numbers = #tpu.dot_dimension_numbers<[1], [1], [0], [0], [0, 0, 1, 0], [], []>} : vector<16x8xf32>, vector<16x8xf32>, vector<16x16xf32> -> vector<16x16xf32>
    %cst_447 = arith.constant 0.353553385 : f32
    %986 = vector.broadcast %cst_447 : f32 to vector<16x16xf32>
    %987 = arith.mulf %985, %986 : vector<16x16xf32>
    %988 = arith.addf %987, %2 : vector<16x16xf32>
    %cst_448 = arith.constant dense<0xFF800000> : vector<16xf32>
    %989 = vector.multi_reduction <maximumf>, %988, %cst_448 [1] : vector<16x16xf32> to vector<16xf32>
    %990 = vector.shape_cast %989 : vector<16xf32> to vector<16x1xf32>
    %991 = vector.broadcast %990 : vector<16x1xf32> to vector<16x16xf32>
    %992 = arith.subf %988, %991 : vector<16x16xf32>
    %993 = math.exp %992 : vector<16x16xf32>
    %cst_449 = arith.constant dense<0.000000e+00> : vector<16xf32>
    %994 = vector.multi_reduction <add>, %993, %cst_449 [1] : vector<16x16xf32> to vector<16xf32>
    %995 = vector.shape_cast %994 : vector<16xf32> to vector<16x1xf32>
    %996 = vector.broadcast %995 : vector<16x1xf32> to vector<16x16xf32>
    %997 = arith.divf %993, %996 : vector<16x16xf32>
    %cst_450 = arith.constant dense<0.000000e+00> : vector<16x8xf32>
    %998 = tpu.matmul %997, %984, %cst_450 {dimension_numbers = #tpu.dot_dimension_numbers<[1], [0], [0], [1], [0, 0, 1, 1], [], []>} : vector<16x16xf32>, vector<16x8xf32>, vector<16x8xf32> -> vector<16x8xf32>
    %c3072 = arith.constant 3072 : index
    %c0_451 = arith.constant 0 : index
    %999 = vector.load %arg1[%c3072, %c0_451] : memref<3272x128xf32, #tpu.memory_space<vmem>>, vector<8x32xf32>
    %cst_452 = arith.constant dense<0.000000e+00> : vector<16x32xf32>
    %1000 = tpu.matmul %998, %999, %cst_452 {dimension_numbers = #tpu.dot_dimension_numbers<[1], [0], [0], [1], [0, 0, 1, 1], [], []>} : vector<16x8xf32>, vector<8x32xf32>, vector<16x32xf32> -> vector<16x32xf32>
    %1001 = arith.addf %969, %1000 : vector<16x32xf32>
    %c2720 = arith.constant 2720 : index
    %c0_453 = arith.constant 0 : index
    %1002 = vector.load %arg1[%c2720, %c0_453] : memref<3272x128xf32, #tpu.memory_space<vmem>>, vector<32x8xf32>
    %cst_454 = arith.constant dense<0.000000e+00> : vector<16x8xf32>
    %1003 = tpu.matmul %938, %1002, %cst_454 {dimension_numbers = #tpu.dot_dimension_numbers<[1], [0], [0], [1], [0, 0, 1, 1], [], []>} : vector<16x32xf32>, vector<32x8xf32>, vector<16x8xf32> -> vector<16x8xf32>
    %c2786 = arith.constant 2786 : index
    %c0_455 = arith.constant 0 : index
    %1004 = vector.load %arg1[%c2786, %c0_455] : memref<3272x128xf32, #tpu.memory_space<vmem>>, vector<1x8xf32>
    %1005 = vector.broadcast %1004 : vector<1x8xf32> to vector<16x8xf32>
    %1006 = arith.addf %1003, %1005 : vector<16x8xf32>
    %c2856 = arith.constant 2856 : index
    %c0_456 = arith.constant 0 : index
    %1007 = vector.load %arg1[%c2856, %c0_456] : memref<3272x128xf32, #tpu.memory_space<vmem>>, vector<32x8xf32>
    %cst_457 = arith.constant dense<0.000000e+00> : vector<16x8xf32>
    %1008 = tpu.matmul %411, %1007, %cst_457 {dimension_numbers = #tpu.dot_dimension_numbers<[1], [0], [0], [1], [0, 0, 1, 1], [], []>} : vector<16x32xf32>, vector<32x8xf32>, vector<16x8xf32> -> vector<16x8xf32>
    %c2922 = arith.constant 2922 : index
    %c0_458 = arith.constant 0 : index
    %1009 = vector.load %arg1[%c2922, %c0_458] : memref<3272x128xf32, #tpu.memory_space<vmem>>, vector<1x8xf32>
    %1010 = vector.broadcast %1009 : vector<1x8xf32> to vector<16x8xf32>
    %1011 = arith.addf %1008, %1010 : vector<16x8xf32>
    %c2992 = arith.constant 2992 : index
    %c0_459 = arith.constant 0 : index
    %1012 = vector.load %arg1[%c2992, %c0_459] : memref<3272x128xf32, #tpu.memory_space<vmem>>, vector<32x8xf32>
    %cst_460 = arith.constant dense<0.000000e+00> : vector<16x8xf32>
    %1013 = tpu.matmul %411, %1012, %cst_460 {dimension_numbers = #tpu.dot_dimension_numbers<[1], [0], [0], [1], [0, 0, 1, 1], [], []>} : vector<16x32xf32>, vector<32x8xf32>, vector<16x8xf32> -> vector<16x8xf32>
    %c3058 = arith.constant 3058 : index
    %c0_461 = arith.constant 0 : index
    %1014 = vector.load %arg1[%c3058, %c0_461] : memref<3272x128xf32, #tpu.memory_space<vmem>>, vector<1x8xf32>
    %1015 = vector.broadcast %1014 : vector<1x8xf32> to vector<16x8xf32>
    %1016 = arith.addf %1013, %1015 : vector<16x8xf32>
    %cst_462 = arith.constant dense<0.000000e+00> : vector<16x16xf32>
    %1017 = tpu.matmul %1006, %1011, %cst_462 {dimension_numbers = #tpu.dot_dimension_numbers<[1], [1], [0], [0], [0, 0, 1, 0], [], []>} : vector<16x8xf32>, vector<16x8xf32>, vector<16x16xf32> -> vector<16x16xf32>
    %cst_463 = arith.constant 0.353553385 : f32
    %1018 = vector.broadcast %cst_463 : f32 to vector<16x16xf32>
    %1019 = arith.mulf %1017, %1018 : vector<16x16xf32>
    %1020 = arith.addf %1019, %2 : vector<16x16xf32>
    %cst_464 = arith.constant dense<0xFF800000> : vector<16xf32>
    %1021 = vector.multi_reduction <maximumf>, %1020, %cst_464 [1] : vector<16x16xf32> to vector<16xf32>
    %1022 = vector.shape_cast %1021 : vector<16xf32> to vector<16x1xf32>
    %1023 = vector.broadcast %1022 : vector<16x1xf32> to vector<16x16xf32>
    %1024 = arith.subf %1020, %1023 : vector<16x16xf32>
    %1025 = math.exp %1024 : vector<16x16xf32>
    %cst_465 = arith.constant dense<0.000000e+00> : vector<16xf32>
    %1026 = vector.multi_reduction <add>, %1025, %cst_465 [1] : vector<16x16xf32> to vector<16xf32>
    %1027 = vector.shape_cast %1026 : vector<16xf32> to vector<16x1xf32>
    %1028 = vector.broadcast %1027 : vector<16x1xf32> to vector<16x16xf32>
    %1029 = arith.divf %1025, %1028 : vector<16x16xf32>
    %cst_466 = arith.constant dense<0.000000e+00> : vector<16x8xf32>
    %1030 = tpu.matmul %1029, %1016, %cst_466 {dimension_numbers = #tpu.dot_dimension_numbers<[1], [0], [0], [1], [0, 0, 1, 1], [], []>} : vector<16x16xf32>, vector<16x8xf32>, vector<16x8xf32> -> vector<16x8xf32>
    %c3080 = arith.constant 3080 : index
    %c0_467 = arith.constant 0 : index
    %1031 = vector.load %arg1[%c3080, %c0_467] : memref<3272x128xf32, #tpu.memory_space<vmem>>, vector<8x32xf32>
    %cst_468 = arith.constant dense<0.000000e+00> : vector<16x32xf32>
    %1032 = tpu.matmul %1030, %1031, %cst_468 {dimension_numbers = #tpu.dot_dimension_numbers<[1], [0], [0], [1], [0, 0, 1, 1], [], []>} : vector<16x8xf32>, vector<8x32xf32>, vector<16x32xf32> -> vector<16x32xf32>
    %1033 = arith.addf %1001, %1032 : vector<16x32xf32>
    %c2752 = arith.constant 2752 : index
    %c0_469 = arith.constant 0 : index
    %1034 = vector.load %arg1[%c2752, %c0_469] : memref<3272x128xf32, #tpu.memory_space<vmem>>, vector<32x8xf32>
    %cst_470 = arith.constant dense<0.000000e+00> : vector<16x8xf32>
    %1035 = tpu.matmul %938, %1034, %cst_470 {dimension_numbers = #tpu.dot_dimension_numbers<[1], [0], [0], [1], [0, 0, 1, 1], [], []>} : vector<16x32xf32>, vector<32x8xf32>, vector<16x8xf32> -> vector<16x8xf32>
    %c2787 = arith.constant 2787 : index
    %c0_471 = arith.constant 0 : index
    %1036 = vector.load %arg1[%c2787, %c0_471] : memref<3272x128xf32, #tpu.memory_space<vmem>>, vector<1x8xf32>
    %1037 = vector.broadcast %1036 : vector<1x8xf32> to vector<16x8xf32>
    %1038 = arith.addf %1035, %1037 : vector<16x8xf32>
    %c2888 = arith.constant 2888 : index
    %c0_472 = arith.constant 0 : index
    %1039 = vector.load %arg1[%c2888, %c0_472] : memref<3272x128xf32, #tpu.memory_space<vmem>>, vector<32x8xf32>
    %cst_473 = arith.constant dense<0.000000e+00> : vector<16x8xf32>
    %1040 = tpu.matmul %411, %1039, %cst_473 {dimension_numbers = #tpu.dot_dimension_numbers<[1], [0], [0], [1], [0, 0, 1, 1], [], []>} : vector<16x32xf32>, vector<32x8xf32>, vector<16x8xf32> -> vector<16x8xf32>
    %c2923 = arith.constant 2923 : index
    %c0_474 = arith.constant 0 : index
    %1041 = vector.load %arg1[%c2923, %c0_474] : memref<3272x128xf32, #tpu.memory_space<vmem>>, vector<1x8xf32>
    %1042 = vector.broadcast %1041 : vector<1x8xf32> to vector<16x8xf32>
    %1043 = arith.addf %1040, %1042 : vector<16x8xf32>
    %c3024 = arith.constant 3024 : index
    %c0_475 = arith.constant 0 : index
    %1044 = vector.load %arg1[%c3024, %c0_475] : memref<3272x128xf32, #tpu.memory_space<vmem>>, vector<32x8xf32>
    %cst_476 = arith.constant dense<0.000000e+00> : vector<16x8xf32>
    %1045 = tpu.matmul %411, %1044, %cst_476 {dimension_numbers = #tpu.dot_dimension_numbers<[1], [0], [0], [1], [0, 0, 1, 1], [], []>} : vector<16x32xf32>, vector<32x8xf32>, vector<16x8xf32> -> vector<16x8xf32>
    %c3059 = arith.constant 3059 : index
    %c0_477 = arith.constant 0 : index
    %1046 = vector.load %arg1[%c3059, %c0_477] : memref<3272x128xf32, #tpu.memory_space<vmem>>, vector<1x8xf32>
    %1047 = vector.broadcast %1046 : vector<1x8xf32> to vector<16x8xf32>
    %1048 = arith.addf %1045, %1047 : vector<16x8xf32>
    %cst_478 = arith.constant dense<0.000000e+00> : vector<16x16xf32>
    %1049 = tpu.matmul %1038, %1043, %cst_478 {dimension_numbers = #tpu.dot_dimension_numbers<[1], [1], [0], [0], [0, 0, 1, 0], [], []>} : vector<16x8xf32>, vector<16x8xf32>, vector<16x16xf32> -> vector<16x16xf32>
    %cst_479 = arith.constant 0.353553385 : f32
    %1050 = vector.broadcast %cst_479 : f32 to vector<16x16xf32>
    %1051 = arith.mulf %1049, %1050 : vector<16x16xf32>
    %1052 = arith.addf %1051, %2 : vector<16x16xf32>
    %cst_480 = arith.constant dense<0xFF800000> : vector<16xf32>
    %1053 = vector.multi_reduction <maximumf>, %1052, %cst_480 [1] : vector<16x16xf32> to vector<16xf32>
    %1054 = vector.shape_cast %1053 : vector<16xf32> to vector<16x1xf32>
    %1055 = vector.broadcast %1054 : vector<16x1xf32> to vector<16x16xf32>
    %1056 = arith.subf %1052, %1055 : vector<16x16xf32>
    %1057 = math.exp %1056 : vector<16x16xf32>
    %cst_481 = arith.constant dense<0.000000e+00> : vector<16xf32>
    %1058 = vector.multi_reduction <add>, %1057, %cst_481 [1] : vector<16x16xf32> to vector<16xf32>
    %1059 = vector.shape_cast %1058 : vector<16xf32> to vector<16x1xf32>
    %1060 = vector.broadcast %1059 : vector<16x1xf32> to vector<16x16xf32>
    %1061 = arith.divf %1057, %1060 : vector<16x16xf32>
    %cst_482 = arith.constant dense<0.000000e+00> : vector<16x8xf32>
    %1062 = tpu.matmul %1061, %1048, %cst_482 {dimension_numbers = #tpu.dot_dimension_numbers<[1], [0], [0], [1], [0, 0, 1, 1], [], []>} : vector<16x16xf32>, vector<16x8xf32>, vector<16x8xf32> -> vector<16x8xf32>
    %c3088 = arith.constant 3088 : index
    %c0_483 = arith.constant 0 : index
    %1063 = vector.load %arg1[%c3088, %c0_483] : memref<3272x128xf32, #tpu.memory_space<vmem>>, vector<8x32xf32>
    %cst_484 = arith.constant dense<0.000000e+00> : vector<16x32xf32>
    %1064 = tpu.matmul %1062, %1063, %cst_484 {dimension_numbers = #tpu.dot_dimension_numbers<[1], [0], [0], [1], [0, 0, 1, 1], [], []>} : vector<16x8xf32>, vector<8x32xf32>, vector<16x32xf32> -> vector<16x32xf32>
    %1065 = arith.addf %1033, %1064 : vector<16x32xf32>
    %c3096 = arith.constant 3096 : index
    %c0_485 = arith.constant 0 : index
    %1066 = vector.load %arg1[%c3096, %c0_485] : memref<3272x128xf32, #tpu.memory_space<vmem>>, vector<1x32xf32>
    %1067 = vector.broadcast %1066 : vector<1x32xf32> to vector<16x32xf32>
    %1068 = arith.addf %1065, %1067 : vector<16x32xf32>
    %1069 = arith.addf %914, %1068 : vector<16x32xf32>
    %c3104 = arith.constant 3104 : index
    %c0_486 = arith.constant 0 : index
    %1070 = vector.load %arg1[%c3104, %c0_486] : memref<3272x128xf32, #tpu.memory_space<vmem>>, vector<1x32xf32>
    %c3105 = arith.constant 3105 : index
    %c0_487 = arith.constant 0 : index
    %1071 = vector.load %arg1[%c3105, %c0_487] : memref<3272x128xf32, #tpu.memory_space<vmem>>, vector<1x32xf32>
    %cst_488 = arith.constant dense<0.000000e+00> : vector<16xf32>
    %1072 = vector.multi_reduction <add>, %1069, %cst_488 [1] : vector<16x32xf32> to vector<16xf32>
    %1073 = vector.shape_cast %1072 : vector<16xf32> to vector<16x1xf32>
    %cst_489 = arith.constant 3.200000e+01 : f32
    %1074 = vector.broadcast %cst_489 : f32 to vector<16x1xf32>
    %1075 = arith.divf %1073, %1074 : vector<16x1xf32>
    %1076 = vector.broadcast %1075 : vector<16x1xf32> to vector<16x32xf32>
    %1077 = arith.subf %1069, %1076 : vector<16x32xf32>
    %1078 = arith.mulf %1077, %1077 : vector<16x32xf32>
    %cst_490 = arith.constant dense<0.000000e+00> : vector<16xf32>
    %1079 = vector.multi_reduction <add>, %1078, %cst_490 [1] : vector<16x32xf32> to vector<16xf32>
    %1080 = vector.shape_cast %1079 : vector<16xf32> to vector<16x1xf32>
    %cst_491 = arith.constant 3.200000e+01 : f32
    %1081 = vector.broadcast %cst_491 : f32 to vector<16x1xf32>
    %1082 = arith.divf %1080, %1081 : vector<16x1xf32>
    %1083 = vector.broadcast %1075 : vector<16x1xf32> to vector<16x32xf32>
    %1084 = arith.subf %1069, %1083 : vector<16x32xf32>
    %cst_492 = arith.constant 9.99999974E-6 : f32
    %1085 = vector.broadcast %cst_492 : f32 to vector<16x1xf32>
    %1086 = arith.addf %1082, %1085 : vector<16x1xf32>
    %1087 = math.rsqrt %1086 : vector<16x1xf32>
    %1088 = vector.broadcast %1087 : vector<16x1xf32> to vector<16x32xf32>
    %1089 = arith.mulf %1084, %1088 : vector<16x32xf32>
    %1090 = vector.broadcast %1070 : vector<1x32xf32> to vector<16x32xf32>
    %1091 = arith.mulf %1089, %1090 : vector<16x32xf32>
    %1092 = vector.broadcast %1071 : vector<1x32xf32> to vector<16x32xf32>
    %1093 = arith.addf %1091, %1092 : vector<16x32xf32>
    %c3112 = arith.constant 3112 : index
    %c0_493 = arith.constant 0 : index
    %1094 = vector.load %arg1[%c3112, %c0_493] : memref<3272x128xf32, #tpu.memory_space<vmem>>, vector<32x64xf32>
    %cst_494 = arith.constant dense<0.000000e+00> : vector<16x64xf32>
    %1095 = tpu.matmul %1093, %1094, %cst_494 {dimension_numbers = #tpu.dot_dimension_numbers<[1], [0], [0], [1], [0, 0, 1, 1], [], []>} : vector<16x32xf32>, vector<32x64xf32>, vector<16x64xf32> -> vector<16x64xf32>
    %c3144 = arith.constant 3144 : index
    %c0_495 = arith.constant 0 : index
    %1096 = vector.load %arg1[%c3144, %c0_495] : memref<3272x128xf32, #tpu.memory_space<vmem>>, vector<1x64xf32>
    %1097 = vector.broadcast %1096 : vector<1x64xf32> to vector<16x64xf32>
    %1098 = arith.addf %1095, %1097 : vector<16x64xf32>
    %cst_496 = arith.constant 0.000000e+00 : f32
    %1099 = vector.broadcast %cst_496 : f32 to vector<16x64xf32>
    %1100 = arith.maximumf %1098, %1099 : vector<16x64xf32>
    %c3152 = arith.constant 3152 : index
    %c0_497 = arith.constant 0 : index
    %1101 = vector.load %arg1[%c3152, %c0_497] : memref<3272x128xf32, #tpu.memory_space<vmem>>, vector<64x32xf32>
    %cst_498 = arith.constant dense<0.000000e+00> : vector<16x32xf32>
    %1102 = tpu.matmul %1100, %1101, %cst_498 {dimension_numbers = #tpu.dot_dimension_numbers<[1], [0], [0], [1], [0, 0, 1, 1], [], []>} : vector<16x64xf32>, vector<64x32xf32>, vector<16x32xf32> -> vector<16x32xf32>
    %c3216 = arith.constant 3216 : index
    %c0_499 = arith.constant 0 : index
    %1103 = vector.load %arg1[%c3216, %c0_499] : memref<3272x128xf32, #tpu.memory_space<vmem>>, vector<1x32xf32>
    %1104 = vector.broadcast %1103 : vector<1x32xf32> to vector<16x32xf32>
    %1105 = arith.addf %1102, %1104 : vector<16x32xf32>
    %1106 = arith.addf %1069, %1105 : vector<16x32xf32>
    %c3224 = arith.constant 3224 : index
    %c0_500 = arith.constant 0 : index
    %1107 = vector.load %arg1[%c3224, %c0_500] : memref<3272x128xf32, #tpu.memory_space<vmem>>, vector<1x32xf32>
    %c3225 = arith.constant 3225 : index
    %c0_501 = arith.constant 0 : index
    %1108 = vector.load %arg1[%c3225, %c0_501] : memref<3272x128xf32, #tpu.memory_space<vmem>>, vector<1x32xf32>
    %cst_502 = arith.constant dense<0.000000e+00> : vector<16xf32>
    %1109 = vector.multi_reduction <add>, %1106, %cst_502 [1] : vector<16x32xf32> to vector<16xf32>
    %1110 = vector.shape_cast %1109 : vector<16xf32> to vector<16x1xf32>
    %cst_503 = arith.constant 3.200000e+01 : f32
    %1111 = vector.broadcast %cst_503 : f32 to vector<16x1xf32>
    %1112 = arith.divf %1110, %1111 : vector<16x1xf32>
    %1113 = vector.broadcast %1112 : vector<16x1xf32> to vector<16x32xf32>
    %1114 = arith.subf %1106, %1113 : vector<16x32xf32>
    %1115 = arith.mulf %1114, %1114 : vector<16x32xf32>
    %cst_504 = arith.constant dense<0.000000e+00> : vector<16xf32>
    %1116 = vector.multi_reduction <add>, %1115, %cst_504 [1] : vector<16x32xf32> to vector<16xf32>
    %1117 = vector.shape_cast %1116 : vector<16xf32> to vector<16x1xf32>
    %cst_505 = arith.constant 3.200000e+01 : f32
    %1118 = vector.broadcast %cst_505 : f32 to vector<16x1xf32>
    %1119 = arith.divf %1117, %1118 : vector<16x1xf32>
    %1120 = vector.broadcast %1112 : vector<16x1xf32> to vector<16x32xf32>
    %1121 = arith.subf %1106, %1120 : vector<16x32xf32>
    %cst_506 = arith.constant 9.99999974E-6 : f32
    %1122 = vector.broadcast %cst_506 : f32 to vector<16x1xf32>
    %1123 = arith.addf %1119, %1122 : vector<16x1xf32>
    %1124 = math.rsqrt %1123 : vector<16x1xf32>
    %1125 = vector.broadcast %1124 : vector<16x1xf32> to vector<16x32xf32>
    %1126 = arith.mulf %1121, %1125 : vector<16x32xf32>
    %1127 = vector.broadcast %1107 : vector<1x32xf32> to vector<16x32xf32>
    %1128 = arith.mulf %1126, %1127 : vector<16x32xf32>
    %1129 = vector.broadcast %1108 : vector<1x32xf32> to vector<16x32xf32>
    %1130 = arith.addf %1128, %1129 : vector<16x32xf32>
    %c3232 = arith.constant 3232 : index
    %c0_507 = arith.constant 0 : index
    %1131 = vector.load %arg1[%c3232, %c0_507] : memref<3272x128xf32, #tpu.memory_space<vmem>>, vector<32x128xf32>
    %cst_508 = arith.constant dense<0.000000e+00> : vector<16x128xf32>
    %1132 = tpu.matmul %1130, %1131, %cst_508 {dimension_numbers = #tpu.dot_dimension_numbers<[1], [0], [0], [1], [0, 0, 1, 1], [], []>} : vector<16x32xf32>, vector<32x128xf32>, vector<16x128xf32> -> vector<16x128xf32>
    %c3264 = arith.constant 3264 : index
    %c0_509 = arith.constant 0 : index
    %1133 = vector.load %arg1[%c3264, %c0_509] : memref<3272x128xf32, #tpu.memory_space<vmem>>, vector<1x128xf32>
    %1134 = vector.broadcast %1133 : vector<1x128xf32> to vector<16x128xf32>
    %1135 = arith.addf %1132, %1134 : vector<16x128xf32>
    %cst_510 = arith.constant dense<0xFF800000> : vector<16xf32>
    %1136 = vector.multi_reduction <maximumf>, %1135, %cst_510 [1] : vector<16x128xf32> to vector<16xf32>
    %1137 = vector.shape_cast %1136 : vector<16xf32> to vector<16x1xf32>
    %1138 = vector.broadcast %1137 : vector<16x1xf32> to vector<16x128xf32>
    %1139 = arith.subf %1135, %1138 : vector<16x128xf32>
    %1140 = math.exp %1139 : vector<16x128xf32>
    %cst_511 = arith.constant dense<0.000000e+00> : vector<16xf32>
    %1141 = vector.multi_reduction <add>, %1140, %cst_511 [1] : vector<16x128xf32> to vector<16xf32>
    %1142 = vector.shape_cast %1141 : vector<16xf32> to vector<16x1xf32>
    %1143 = math.log %1142 : vector<16x1xf32>
    %1144 = vector.broadcast %1143 : vector<16x1xf32> to vector<16x128xf32>
    %1145 = arith.subf %1139, %1144 : vector<16x128xf32>
    %c0_512 = arith.constant 0 : index
    %c0_513 = arith.constant 0 : index
    %1146 = vector.load %arg2[%c0_512, %c0_513] : memref<16x128xf32, #tpu.memory_space<vmem>>, vector<16x128xf32>
    tpu.vector_store %arg2[%c0_512, %c0_513], %1145 {strides = array<i32>} : memref<16x128xf32, #tpu.memory_space<vmem>>, vector<16x128xf32>,
    return
  }
}

</mosaic_0001>

<bundles_post_ra>
// kernel: transformer_forward.1
= control target key start
LH: loop header
LB: loop body
LE: loop exit
PB: predicated region body
PF: predicated region fallthrough
CT: control target
= control target key end

     0   :  { %7 = vsyncpa [#allocation3], 0  ;;  %s17072_s9 = smov [#allocation2]   ;;  %s18143_s0 = inlined_call_operand.vmem [shape: f32[80,128], index: 0, kind: input, shape index: {}]   ;;  %s18144_s1 = inlined_call_operand.hbm [shape: f32[3272,128], index: 1, kind: input, shape index: {}]   ;;  %s18145_s2 = inlined_call_operand.vmem [shape: f32[16,128], index: 2, kind: output, shape index: {}]  }
   0x1   :  { %s15_s10 = sshll.u32 %s17072_s9, 4  ;;  %s16_s10 = int_to_ptr.vmem [resolvable:$true] %s15_s10 }
   0x2   :  { %s17058_s11 = scalar_lea.vmem %s16_s10, 52352  ;;  %p17063_p1 = scmp.lt.s32.totalorder %s16_s10, %s16_s10 }
   0x3   :  { %p17059_p0 = scmp.ne.s32.totalorder %s16_s10, %s17058_s11  ;;  %p17064_p2 = scmp.lt.s32.totalorder %s17058_s11, %s17058_s11 }
   0x5   :  { %p17065_p3 = por %p17064_p2, %p17063_p1 }
   0x7   :  { %p17066_p4 = pnand %p17065_p3, %p17059_p0 }
   0x9   :  { %17069 = shalt.err (!%p17066_p4)
}
   0xa   :  { %s17073_s12 = smov 128   ;;  %s17074_s13 = smov 8  }
   0xb   :  { %21 = dma.hbm_to_vmem [thread:$0]  %s18144_s1, 52352, %s16_s10, [#allocation3], %s17073_s12, %s17073_s12, %s17074_s13  }
   0xc   :  { %17070 = dma.done.wait [#allocation3], 52352  }
   0xd   :  { %17071 = vsyncadd [#allocation3], 4294914944  ;;  %vm35_vm0 = vcmask 261120   ;;  %v17096_v0 = vld [vmem:[%s18143_s0] sm:$0xff]  ;;  %v17101_v1 = vld [vmem:[%s18143_s0 + $0x8] sm:$0xff]  ;;  %vm333_vm1 = vcmask 64512  }
   0xe   :  { %v36_v2 = vsel %vm35_vm0, %v17096_v0, 0.0  ;;  %v39_v3 = vsel %vm35_vm0, %v17101_v1, 0.0  ;;  %v78_v14 = vld [vmem:[#allocation2 + $0x20] sm:$0xff]  ;;  %v168_v15 = vld [vmem:[#allocation2 + $0xa8] sm:$0xff]  ;;  %v77_v16 = vld [vmem:[#allocation2 + $0x18] sm:$0xff]  ;;  %vm425_vm2 = vcmask 130048  }
   0xf   :  { %37 = vadd.xlane.f32.xlu0 %v36_v2  ;;  %15412 = vmatprep.subr.mxu0 %v78_v14  ;;  %v167_v17 = vld [vmem:[#allocation2 + $0xa0] sm:$0xff]  ;;  %v76_v18 = vld [vmem:[#allocation2 + $0x10] sm:$0xff]  ;;  %v166_v19 = vld [vmem:[#allocation2 + $0x98] sm:$0xff]  ;;  %vm2353_vm3 = vcmask 523264  }
  0x10   :  { %15413 = vmatpush3.msra.mxu0 %v78_v14  ;;  %15423 = vmatprep.subr.mxu1 %v168_v15  ;;  %v75_v20 = vld [vmem:[#allocation2 + $0x8] sm:$0xff]  ;;  %v165_v21 = vld [vmem:[#allocation2 + $0x90] sm:$0xff]  ;;  %v14181_v30 = vld [vmem:[#allocation2] ss:$0 sm:$0xff] }
  0x11   :  { %15414 = vmatprep.subr.mxu0 %v77_v16  ;;  %15424 = vmatpush3.msra.mxu1 %v168_v15  ;;  %v252_v22 = vld [vmem:[#allocation2 + $0x130] sm:$0xff]  ;;  %v14182_v32 = vld [vmem:[#allocation2 + $0x1] ss:$0 sm:$0xff]  ;;  %v251_v39 = vld [vmem:[#allocation2 + $0x128] sm:$0xff] }
  0x12   :  { %15415 = vmatpush3.msra.mxu0 %v77_v16  ;;  %15425 = vmatprep.subr.mxu1 %v167_v17  ;;  %v250_v40 = vld [vmem:[#allocation2 + $0x120] sm:$0xff]  ;;  %v249_v41 = vld [vmem:[#allocation2 + $0x118] sm:$0xff]  ;;  %v14186_v42 = vld [vmem:[#allocation2 + $0x110] ss:$0 sm:$0xff] }
  0x13   :  { %40 = vadd.xlane.f32.xlu0 %v39_v3  ;;  %15416 = vmatprep.subr.mxu0 %v76_v18  ;;  %v14183_v46 = vld [vmem:[#allocation2 + $0x88] ss:$0 sm:$0xff]  ;;  %v14189_v51 = vld [vmem:[#allocation2 + $0x198] ss:$0 sm:$0xff]  ;;  %v533_v52 = vld [vmem:[#allocation2 + $0x40] sm:$0xff] }
  0x14   :  { %15426 = vmatpush3.msra.mxu1 %v167_v17  ;;  %15417 = vmatpush3.msra.mxu0 %v76_v18  ;;  %v532_v58 = vld [vmem:[#allocation2 + $0x38] sm:$0xff]  ;;  %v531_v59 = vld [vmem:[#allocation2 + $0x30] sm:$0xff]  ;;  %v530_v60 = vld [vmem:[#allocation2 + $0x28] sm:$0xff] }
  0x15   :  { %15427 = vmatprep.subr.mxu1 %v166_v19  ;;  %15418 = vmatprep.subr.mxu0 %v75_v20  ;;  %v701_v61 = vld [vmem:[#allocation2 + $0x150] sm:$0xff]  ;;  %v700_v62 = vld [vmem:[#allocation2 + $0x148] sm:$0xff]  ;;  %v699_v63 = vld [vmem:[#allocation2 + $0x140] sm:$0xff] }
  0x16   :  { %15428 = vmatpush3.msra.mxu1 %v166_v19  ;;  %15419 = vmatpush3.msra.mxu0 %v75_v20  ;;  %v698_v2 = vld [vmem:[#allocation2 + $0x138] sm:$0xff] }
  0x17   :  { %15429 = vmatprep.subr.mxu1 %v165_v21  ;;  %15434 = vmatprep.subr.mxu0 %v252_v22  ;;  %v14204_v17 = vld [vmem:[#allocation2 + $0x199] ss:$0 sm:$0xff] }
  0x18   :  { %15430 = vmatpush3.msra.mxu1 %v165_v21 }
  0x98   :  { %v38_v4 = vpop.xlane.xlu0 %37 }
  0x99   :  { %v43_v5 = vmul.f32 0.03125, %v38_v4  ;;  %v17144_v4 = vld [vmem:[%s18143_s0 + $0x28] sm:$0xff] }
  0x9b   :  { %v45_v6 = vsub.f32 %v17096_v0, %v43_v5 }
  0x9c   :  { %v41_v7 = vpop.xlane.xlu0 %40 }
  0x9d   :  { %v44_v8 = vmul.f32 0.03125, %v41_v7  ;;  %v47_v9 = vmul.f32 %v45_v6, %v45_v6  ;;  %v17149_v7 = vld [vmem:[%s18143_s0 + $0x20] sm:$0xff] }
  0x9f   :  { %v46_v10 = vsub.f32 %v17101_v1, %v44_v8  ;;  %v49_v11 = vsel %vm35_vm0, %v47_v9, 0.0 }
  0xa0   :  { %50 = vadd.xlane.f32.xlu1 %v49_v11 }
  0xa1   :  { %v48_v12 = vmul.f32 %v46_v10, %v46_v10 }
  0xa3   :  { %v52_v13 = vsel %vm35_vm0, %v48_v12, 0.0  ;;  %v14198_v12 = vld [vmem:[#allocation2 + $0x89] ss:$0 sm:$0xff] }
  0xa4   :  { %53 = vadd.xlane.f32.xlu1 %v52_v13 }
 0x129   :  { %v51_v23 = vpop.xlane.xlu1 %50 }
 0x12a   :  { %v55_v24 = vmul.f32 0.03125, %v51_v23 }
 0x12c   :  { %v57_v25 = vadd.f32 1e-05, %v55_v24 }
 0x12d   :  { %v54_v26 = vpop.xlane.xlu1 %53 }
 0x12e   :  { %16794 = vrsqrt.f32 %v57_v25  ;;  %v56_v27 = vmul.f32 0.03125, %v54_v26 }
 0x130   :  { %v58_v28 = vadd.f32 1e-05, %v56_v27 }
 0x132   :  { %16796 = vrsqrt.f32 %v58_v28 }
 0x13b   :  { %v16795_v29 = vpop.eup %16794 }
 0x13c   :  { %v61_v31 = vmul.f32 %v16795_v29, %v45_v6 }
 0x13e   :  { %v67_v33 = vmul.f32 %v14181_v30, %v61_v31 }
 0x13f   :  { %v16797_v34 = vpop.eup %16796 }
 0x140   :  { %v17111_v35 = vadd.f32 %v14182_v32, %v67_v33  ;;  %v62_v36 = vmul.f32 %v16797_v34, %v46_v10 }
 0x142   :  { %v68_v37 = vmul.f32 %v14181_v30, %v62_v36  ;;  %15420 = vmatprep.mubr.msk.f32.mxu0 %vm35_vm0, %v17111_v35  ;;  %15431 = vmatprep.mubr.msk.f32.mxu1 %vm35_vm0, %v17111_v35 }
 0x144   :  { %v17117_v38 = vadd.f32 %v14182_v32, %v68_v37  ;;  %v617_v32 = vld [vmem:[#allocation2 + $0xc8] sm:$0xff] }
 0x146   :  { %15421 = vmatmul.mubr.msk.f32.vlgmr.msra.gmra.mxu0 %vm35_vm0, %v17117_v38  ;;  %15432 = vmatmul.mubr.msk.f32.vlgmr.msra.gmra.mxu1 %vm35_vm0, %v17117_v38 }
 0x147   :  { %15435 = vmatpush3.msra.mxu0 %v252_v22  ;;  %15442 = vmatprep.mubr.msk.f32.mxu0 %vm35_vm0, %v17111_v35 }
 0x148   :  { %15436 = vmatprep.subr.mxu0 %v251_v39 }
 0x149   :  { %15437 = vmatpush3.msra.mxu0 %v251_v39 }
 0x14a   :  { %15438 = vmatprep.subr.mxu0 %v250_v40 }
 0x14b   :  { %15439 = vmatpush3.msra.mxu0 %v250_v40 }
 0x14c   :  { %15440 = vmatprep.subr.mxu0 %v249_v41 }
 0x14d   :  { %15441 = vmatpush3.msra.mxu0 %v249_v41  ;;  %v616_v41 = vld [vmem:[#allocation2 + $0xc0] sm:$0xff] }
 0x14e   :  { %15443 = vmatmul.mubr.msk.f32.vlgmr.msra.gmra.mxu0 %vm35_vm0, %v17117_v38 }
 0x206   :  { %v15422_v43 = vpop.f32.mrf.mxu0  ;;  %v15433_v44 = vpop.f32.mrf.mxu1 }
 0x207   :  { %v246_v45 = vadd.f32 %v15433_v44, %v14186_v42  ;;  %v162_v54 = vadd.f32 %v15422_v43, %v14183_v46  ;;  %v614_v43 = vld [vmem:[#allocation2 + $0xb0] sm:$0xff] }
 0x208   :  { %v156_v47 = vpop.f32.mrf.mxu0  ;;  %v240_v48 = vpop.f32.mrf.mxu1 }
 0x209   :  { %v157_v49 = vadd.f32 %v14183_v46, %v156_v47  ;;  %v241_v50 = vadd.f32 %v14186_v42, %v240_v48  ;;  %15445 = vmatprep.subr.msk.mxu1 %vm333_vm1, %v246_v45  ;;  %v615_v42 = vld [vmem:[#allocation2 + $0xb8] sm:$0xff]  ;;  %v14201_v47 = vld [vmem:[#allocation2 + $0x111] ss:$0 sm:$0xff] }
 0x20a   :  { %15446 = vmatpush3.xpose.msk.msra.mxu1 %vm333_vm1, %v246_v45 }
 0x20b   :  { %15447 = vmatprep.subr.msk.mxu1 %vm333_vm1, %v241_v50  ;;  %15449 = vmatprep.mubr.msk.f32.mxu1 %vm333_vm1, %v157_v49 }
 0x20e   :  { %v15444_v53 = vpop.f32.mrf.mxu0  ;;  %15448 = vmatpush3.xpose.msk.msra.mxu1 %vm333_vm1, %v241_v50 }
 0x20f   :  { %v330_v55 = vadd.f32 %v15444_v53, %v14189_v51  ;;  %15459 = vmatprep.subr.mxu1 %v533_v52 }
 0x210   :  { %v324_v56 = vpop.f32.mrf.mxu0 }
 0x211   :  { %v325_v57 = vadd.f32 %v14189_v51, %v324_v56  ;;  %15452 = vmatprep.subr.mxu0 %v330_v55  ;;  %15450 = vmatmul.mubr.msk.f32.vlgmr.msra.gmra.mxu1 %vm333_vm1, %v162_v54 }
 0x212   :  { %15453 = vmatpush3.msra.mxu0 %v330_v55  ;;  %15460 = vmatpush3.msra.mxu1 %v533_v52 }
 0x213   :  { %15454 = vmatprep.subr.mxu0 %v325_v57  ;;  %15467 = vmatprep.mubr.msk.f32.mxu1 %vm35_vm0, %v17111_v35 }
 0x214   :  { %15455 = vmatpush3.msra.mxu0 %v325_v57  ;;  %15461 = vmatprep.subr.mxu1 %v532_v58 }
 0x215   :  { %15462 = vmatpush3.msra.mxu1 %v532_v58  ;;  %15470 = vmatprep.subr.mxu0 %v617_v32 }
 0x216   :  { %15463 = vmatprep.subr.mxu1 %v531_v59 }
 0x217   :  { %15464 = vmatpush3.msra.mxu1 %v531_v59 }
 0x218   :  { %15465 = vmatprep.subr.mxu1 %v530_v60 }
 0x219   :  { %15466 = vmatpush3.msra.mxu1 %v530_v60 }
 0x21a   :  { %15468 = vmatmul.mubr.msk.f32.vlgmr.msra.gmra.mxu1 %vm35_vm0, %v17117_v38  ;;  %15481 = vmatprep.subr.mxu1 %v701_v61 }
 0x21b   :  { %15482 = vmatpush3.msra.mxu1 %v701_v61  ;;  %15489 = vmatprep.mubr.msk.f32.mxu1 %vm35_vm0, %v17111_v35 }
 0x21c   :  { %15483 = vmatprep.subr.mxu1 %v700_v62 }
 0x21d   :  { %15484 = vmatpush3.msra.mxu1 %v700_v62 }
 0x21e   :  { %15485 = vmatprep.subr.mxu1 %v699_v63 }
 0x21f   :  { %15486 = vmatpush3.msra.mxu1 %v699_v63 }
 0x220   :  { %15487 = vmatprep.subr.mxu1 %v698_v2 }
 0x221   :  { %15488 = vmatpush3.msra.mxu1 %v698_v2 }
 0x222   :  { %15490 = vmatmul.mubr.msk.f32.vlgmr.msra.gmra.mxu1 %vm35_vm0, %v17117_v38 }
 0x2d1   :  { %v15451_v3 = vpop.f32.mrf.mxu1 }
 0x2d2   :  { %v422_v5 = vmul.f32 0.35355338, %v15451_v3 }
 0x2d3   :  { %v412_v6 = vpop.f32.mrf.mxu1 }
 0x2d4   :  { %v421_v8 = vmul.f32 0.35355338, %v412_v6  ;;  %v424_v9 = vadd.f32 %v422_v5, %v17144_v4 }
 0x2d6   :  { %v429_v10 = vsel %vm425_vm2, %v424_v9, -inf  ;;  %v423_v11 = vadd.f32 %v421_v8, %v17149_v7 }
 0x2d7   :  { %430 = vmax.xlane.f32.xlu1 %v429_v10  ;;  %v529_v10 = vld [vmem:[#allocation2 + $0x1a0] sm:$0xff] }
 0x2d8   :  { %v426_v13 = vsel %vm425_vm2, %v423_v11, -inf }
 0x2d9   :  { %427 = vmax.xlane.f32.xlu0 %v426_v13 }
 0x2da   :  { %v15469_v14 = vpop.f32.mrf.mxu1 }
 0x2db   :  { %v611_v15 = vadd.f32 %v15469_v14, %v14198_v12 }
 0x2dc   :  { %v605_v16 = vpop.f32.mrf.mxu1 }
 0x2dd   :  { %v606_v44 = vadd.f32 %v14198_v12, %v605_v16 }
 0x2e2   :  { %v15491_v18 = vpop.f32.mrf.mxu1 }
 0x2e3   :  { %v779_v19 = vadd.f32 %v15491_v18, %v14204_v17  ;;  %v1226_v18 = vld [vmem:[#allocation2 + $0xe8] sm:$0xff] }
 0x2e4   :  { %v773_v20 = vpop.f32.mrf.mxu1 }
 0x2e5   :  { %v774_v21 = vadd.f32 %v14204_v17, %v773_v20  ;;  %15499 = vmatprep.subr.mxu1 %v779_v19  ;;  %v1224_v20 = vld [vmem:[#allocation2 + $0xd8] sm:$0xff] }
 0x2e6   :  { %15500 = vmatpush3.msra.mxu1 %v779_v19  ;;  %v1225_v19 = vld [vmem:[#allocation2 + $0xe0] sm:$0xff] }
 0x2e7   :  { %15501 = vmatprep.subr.mxu1 %v774_v21 }
 0x2e8   :  { %15502 = vmatpush3.msra.mxu1 %v774_v21  ;;  %v1223_v21 = vld [vmem:[#allocation2 + $0xd0] sm:$0xff] }
 0x2e9   :  { %15511 = vmatprep.subr.mxu1 %v529_v10 }
 0x360   :  { %v431_v22 = vpop.xlane.xlu1 %430 }
 0x361   :  { %v433_v23 = vsub.f32 %v424_v9, %v431_v22  ;;  %v1142_v22 = vld [vmem:[#allocation2 + $0x60] sm:$0xff] }
 0x362   :  { %v428_v24 = vpop.xlane.xlu0 %427 }
 0x363   :  { %v436_v25 = vmul.f32 1.442695, %v433_v23  ;;  %v432_v26 = vsub.f32 %v423_v11, %v428_v24  ;;  %v976_v11 = vld [vmem:[#allocation2 + $0x1a8] sm:$0xff] }
 0x365   :  { %16798 = vpow2.f32 %v436_v25  ;;  %v434_v27 = vmul.f32 1.442695, %v432_v26  ;;  %v1141_v25 = vld [vmem:[#allocation2 + $0x58] sm:$0xff]  ;;  %v1140_v26 = vld [vmem:[#allocation2 + $0x50] sm:$0xff] }
 0x367   :  { %16800 = vpow2.f32 %v434_v27 }
 0x372   :  { %v16799_v28 = vpop.eup %16798 }
 0x373   :  { %v441_v29 = vsel %vm425_vm2, %v16799_v28, 0.0 }
 0x374   :  { %v16801_v30 = vpop.eup %16800  ;;  %442 = vadd.xlane.f32.xlu1 %v441_v29  ;;  %v1310_v29 = vld [vmem:[#allocation2 + $0x170] sm:$0xff] }
 0x375   :  { %v438_v31 = vsel %vm425_vm2, %v16801_v30, 0.0 }
 0x376   :  { %439 = vadd.xlane.f32.xlu0 %v438_v31  ;;  %v14220_v31 = vld [vmem:[#allocation2 + $0x112] ss:$0 sm:$0xff] }
 0x3fd   :  { %v443_v33 = vpop.xlane.xlu1 %442 }
 0x3fe   :  { %16802 = vrcp.f32 %v443_v33 }
 0x3ff   :  { %v440_v34 = vpop.xlane.xlu0 %439 }
 0x400   :  { %16804 = vrcp.f32 %v440_v34 }
 0x40b   :  { %v16803_v36 = vpop.eup %16802 }
 0x40c   :  { %v447_v40 = vmul.f32 %v16803_v36, %v16799_v28  ;;  %v1139_v28 = vld [vmem:[#allocation2 + $0x48] sm:$0xff]  ;;  %v1308_v36 = vld [vmem:[#allocation2 + $0x160] sm:$0xff] }
 0x40d   :  { %v16805_v37 = vpop.eup %16804 }
 0x40e   :  { %v445_v39 = vmul.f32 %v16805_v37, %v16801_v30 }
 0x410   :  { %15456 = vmatprep.mubr.msk.f32.mxu0 %vm425_vm2, %v445_v39 }
 0x411   :  { %15457 = vmatmul.mubr.msk.f32.vlgmr.msra.gmra.mxu0 %vm425_vm2, %v447_v40  ;;  %v1307_v40 = vld [vmem:[#allocation2 + $0x158] sm:$0xff] }
 0x412   :  { %15471 = vmatpush3.msra.mxu0 %v617_v32  ;;  %15478 = vmatprep.mubr.msk.f32.mxu0 %vm35_vm0, %v17111_v35  ;;  %v1309_v32 = vld [vmem:[#allocation2 + $0x168] sm:$0xff] }
 0x413   :  { %15472 = vmatprep.subr.mxu0 %v616_v41 }
 0x414   :  { %15473 = vmatpush3.msra.mxu0 %v616_v41 }
 0x415   :  { %15474 = vmatprep.subr.mxu0 %v615_v42 }
 0x416   :  { %15475 = vmatpush3.msra.mxu0 %v615_v42 }
 0x417   :  { %15476 = vmatprep.subr.mxu0 %v614_v43 }
 0x418   :  { %15477 = vmatpush3.msra.mxu0 %v614_v43 }
 0x419   :  { %15479 = vmatmul.mubr.msk.f32.vlgmr.msra.gmra.mxu0 %vm35_vm0, %v17117_v38 }
 0x41a   :  { %15496 = vmatprep.mubr.msk.f32.mxu0 %vm333_vm1, %v606_v44  ;;  %v14217_v44 = vld [vmem:[#allocation2 + $0x8a] ss:$0 sm:$0xff] }
 0x4d1   :  { %v15458_v45 = vpop.f32.mrf.mxu0 }
 0x4d3   :  { %v520_v46 = vpop.f32.mrf.mxu0 }
 0x4d9   :  { %v15480_v48 = vpop.f32.mrf.mxu0 }
 0x4da   :  { %v695_v49 = vadd.f32 %v15480_v48, %v14201_v47  ;;  %v14223_v48 = vld [vmem:[#allocation2 + $0x19a] ss:$0 sm:$0xff] }
 0x4db   :  { %v689_v50 = vpop.f32.mrf.mxu0 }
 0x4dc   :  { %v690_v51 = vadd.f32 %v14201_v47, %v689_v50  ;;  %15492 = vmatprep.subr.msk.mxu0 %vm333_vm1, %v695_v49 }
 0x4dd   :  { %15493 = vmatpush3.xpose.msk.msra.mxu0 %vm333_vm1, %v695_v49 }
 0x4de   :  { %15494 = vmatprep.subr.msk.mxu0 %vm333_vm1, %v690_v51 }
 0x4e1   :  { %15495 = vmatpush3.xpose.msk.msra.mxu0 %vm333_vm1, %v690_v51 }
 0x4e2   :  { %15506 = vmatprep.subr.mxu0 %v976_v11 }
 0x4e4   :  { %15497 = vmatmul.mubr.msk.f32.vlgmr.msra.gmra.mxu0 %vm333_vm1, %v611_v15 }
 0x4e5   :  { %15507 = vmatpush3.msra.mxu0 %v976_v11  ;;  %v1672_v11 = vld [vmem:[#allocation2 + $0x80] sm:$0xff] }
 0x4e6   :  { %15516 = vmatprep.subr.mxu0 %v1142_v22 }
 0x5a4   :  { %v15498_v52 = vpop.f32.mrf.mxu0 }
 0x5a5   :  { %v870_v53 = vmul.f32 0.35355338, %v15498_v52 }
 0x5a6   :  { %v860_v54 = vpop.f32.mrf.mxu0 }
 0x5a7   :  { %v869_v55 = vmul.f32 0.35355338, %v860_v54  ;;  %v872_v56 = vadd.f32 %v870_v53, %v17144_v4 }
 0x5a9   :  { %v876_v57 = vsel %vm425_vm2, %v872_v56, -inf  ;;  %v871_v58 = vadd.f32 %v869_v55, %v17149_v7 }
 0x5aa   :  { %877 = vmax.xlane.f32.xlu1 %v876_v57 }
 0x5ab   :  { %v873_v59 = vsel %vm425_vm2, %v871_v58, -inf }
 0x5ac   :  { %874 = vmax.xlane.f32.xlu0 %v873_v59 }
 0x633   :  { %v878_v60 = vpop.xlane.xlu1 %877 }
 0x634   :  { %v880_v61 = vsub.f32 %v872_v56, %v878_v60 }
 0x635   :  { %v875_v62 = vpop.xlane.xlu0 %874 }
 0x636   :  { %v883_v63 = vmul.f32 1.442695, %v880_v61  ;;  %v879_v2 = vsub.f32 %v871_v58, %v875_v62 }
 0x638   :  { %16806 = vpow2.f32 %v883_v63  ;;  %v881_v3 = vmul.f32 1.442695, %v879_v2 }
 0x63a   :  { %16808 = vpow2.f32 %v881_v3 }
 0x645   :  { %v16807_v5 = vpop.eup %16806 }
 0x646   :  { %v888_v6 = vsel %vm425_vm2, %v16807_v5, 0.0 }
 0x647   :  { %v16809_v8 = vpop.eup %16808  ;;  %889 = vadd.xlane.f32.xlu1 %v888_v6 }
 0x648   :  { %v885_v9 = vsel %vm425_vm2, %v16809_v8, 0.0 }
 0x649   :  { %886 = vadd.xlane.f32.xlu0 %v885_v9 }
 0x6d0   :  { %v890_v12 = vpop.xlane.xlu1 %889 }
 0x6d1   :  { %16810 = vrcp.f32 %v890_v12  ;;  %v1585_v12 = vld [vmem:[#allocation2 + $0x1b0] sm:$0xff] }
 0x6d2   :  { %v887_v13 = vpop.xlane.xlu0 %886 }
 0x6d3   :  { %16812 = vrcp.f32 %v887_v13 }
 0x6de   :  { %v16811_v14 = vpop.eup %16810 }
 0x6df   :  { %v894_v17 = vmul.f32 %v16811_v14, %v16807_v5 }
 0x6e0   :  { %v16813_v15 = vpop.eup %16812 }
 0x6e1   :  { %v892_v16 = vmul.f32 %v16813_v15, %v16809_v8 }
 0x6e3   :  { %15503 = vmatprep.mubr.msk.f32.mxu1 %vm425_vm2, %v892_v16 }
 0x6e4   :  { %15504 = vmatmul.mubr.msk.f32.vlgmr.msra.gmra.mxu1 %vm425_vm2, %v894_v17 }
 0x6e5   :  { %15513 = vmatprep.mubr.msk.f32.mxu1 %vm333_vm1, %v520_v46  ;;  %15512 = vmatpush3.msra.mxu1 %v529_v10 }
 0x6e6   :  { %15527 = vmatprep.subr.mxu1 %v1226_v18 }
 0x6e8   :  { %15514 = vmatmul.mubr.msk.f32.vlgmr.msra.gmra.mxu1 %vm333_vm1, %v15458_v45 }
 0x6e9   :  { %15528 = vmatpush3.msra.mxu1 %v1226_v18  ;;  %15535 = vmatprep.mubr.msk.f32.mxu1 %vm35_vm0, %v17111_v35 }
 0x6ea   :  { %15529 = vmatprep.subr.mxu1 %v1225_v19 }
 0x6eb   :  { %15530 = vmatpush3.msra.mxu1 %v1225_v19  ;;  %v1671_v19 = vld [vmem:[#allocation2 + $0x78] sm:$0xff] }
 0x6ec   :  { %15531 = vmatprep.subr.mxu1 %v1224_v20 }
 0x6ed   :  { %15532 = vmatpush3.msra.mxu1 %v1224_v20  ;;  %v1670_v20 = vld [vmem:[#allocation2 + $0x70] sm:$0xff] }
 0x6ee   :  { %15533 = vmatprep.subr.mxu1 %v1223_v21 }
 0x6ef   :  { %15534 = vmatpush3.msra.mxu1 %v1223_v21  ;;  %v1669_v21 = vld [vmem:[#allocation2 + $0x68] sm:$0xff] }
 0x6f0   :  { %15536 = vmatmul.mubr.msk.f32.vlgmr.msra.gmra.mxu1 %vm35_vm0, %v17117_v38 }
 0x7a4   :  { %v15505_v23 = vpop.f32.mrf.mxu1 }
 0x7a6   :  { %v967_v24 = vpop.f32.mrf.mxu1 }
 0x7a7   :  { %15508 = vmatprep.mubr.msk.f32.mxu0 %vm333_vm1, %v967_v24  ;;  %v1838_v24 = vld [vmem:[#allocation2 + $0x180] sm:$0xff] }
 0x7a8   :  { %15509 = vmatmul.mubr.msk.f32.vlgmr.msra.gmra.mxu0 %vm333_vm1, %v15505_v23  ;;  %v17187_v27 = vpop.f32.mrf.mxu1  ;;  %v1839_v23 = vld [vmem:[#allocation2 + $0x188] sm:$0xff] }
 0x7a9   :  { %15517 = vmatpush3.msra.mxu0 %v1142_v22  ;;  %15524 = vmatprep.mubr.msk.f32.mxu0 %vm35_vm0, %v17111_v35  ;;  %v1840_v22 = vld [vmem:[#allocation2 + $0x190] sm:$0xff] }
 0x7aa   :  { %15518 = vmatprep.subr.mxu0 %v1141_v25  ;;  %v17189_v30 = vpop.f32.mrf.mxu1 }
 0x7ab   :  { %15519 = vmatpush3.msra.mxu0 %v1141_v25  ;;  %v1837_v25 = vld [vmem:[#allocation2 + $0x178] sm:$0xff] }
 0x7ac   :  { %15520 = vmatprep.subr.mxu0 %v1140_v26 }
 0x7ad   :  { %15521 = vmatpush3.msra.mxu0 %v1140_v26  ;;  %v1756_v26 = vld [vmem:[#allocation2 + $0x108] sm:$0xff] }
 0x7ae   :  { %15522 = vmatprep.subr.mxu0 %v1139_v28 }
 0x7af   :  { %15523 = vmatpush3.msra.mxu0 %v1139_v28 }
 0x7b0   :  { %15525 = vmatmul.mubr.msk.f32.vlgmr.msra.gmra.mxu0 %vm35_vm0, %v17117_v38  ;;  %v15537_v33 = vpop.f32.mrf.mxu1  ;;  %15538 = vmatprep.subr.mxu0 %v1310_v29 }
 0x7b1   :  { %v1304_v34 = vadd.f32 %v15537_v33, %v14220_v31  ;;  %15539 = vmatpush3.msra.mxu0 %v1310_v29  ;;  %15546 = vmatprep.mubr.msk.f32.mxu0 %vm35_vm0, %v17111_v35  ;;  %v14234_v33 = vld [vmem:[#allocation2 + $0x8b] ss:$0 sm:$0xff] }
 0x7b2   :  { %v1298_v37 = vpop.f32.mrf.mxu1  ;;  %15540 = vmatprep.subr.mxu0 %v1309_v32 }
 0x7b3   :  { %v1299_v39 = vadd.f32 %v14220_v31, %v1298_v37  ;;  %15541 = vmatpush3.msra.mxu0 %v1309_v32  ;;  %15549 = vmatprep.subr.msk.mxu1 %vm333_vm1, %v1304_v34  ;;  %v1755_v31 = vld [vmem:[#allocation2 + $0x100] sm:$0xff]  ;;  %v1754_v32 = vld [vmem:[#allocation2 + $0xf8] sm:$0xff] }
 0x7b4   :  { %15542 = vmatprep.subr.mxu0 %v1308_v36  ;;  %15550 = vmatpush3.xpose.msk.msra.mxu1 %vm333_vm1, %v1304_v34  ;;  %v1753_v34 = vld [vmem:[#allocation2 + $0xf0] sm:$0xff] }
 0x7b5   :  { %15543 = vmatpush3.msra.mxu0 %v1308_v36  ;;  %15551 = vmatprep.subr.msk.mxu1 %vm333_vm1, %v1299_v39 }
 0x7b6   :  { %15544 = vmatprep.subr.mxu0 %v1307_v40 }
 0x7b7   :  { %15545 = vmatpush3.msra.mxu0 %v1307_v40 }
 0x7b8   :  { %15547 = vmatmul.mubr.msk.f32.vlgmr.msra.gmra.mxu0 %vm35_vm0, %v17117_v38  ;;  %15552 = vmatpush3.xpose.msk.msra.mxu1 %vm333_vm1, %v1299_v39 }
 0x7b9   :  { %15563 = vmatprep.subr.mxu1 %v1585_v12 }
 0x868   :  { %v17201_v41 = vpop.f32.mrf.mxu0 }
 0x86a   :  { %v17203_v42 = vpop.f32.mrf.mxu0 }
 0x870   :  { %v15526_v43 = vpop.f32.mrf.mxu0 }
 0x871   :  { %v1220_v47 = vadd.f32 %v15526_v43, %v14217_v44  ;;  %v14240_v43 = vld [vmem:[#allocation2 + $0x19b] ss:$0 sm:$0xff] }
 0x872   :  { %v1214_v45 = vpop.f32.mrf.mxu0 }
 0x873   :  { %v1215_v46 = vadd.f32 %v14217_v44, %v1214_v45 }
 0x875   :  { %15553 = vmatprep.mubr.msk.f32.mxu1 %vm333_vm1, %v1215_v46 }
 0x876   :  { %15554 = vmatmul.mubr.msk.f32.vlgmr.msra.gmra.mxu1 %vm333_vm1, %v1220_v47  ;;  %v1136_v47 = vadd.f32 %v17187_v27, %v17201_v41 }
 0x877   :  { %15564 = vmatpush3.msra.mxu1 %v1585_v12 }
 0x878   :  { %v15548_v49 = vpop.f32.mrf.mxu0  ;;  %15579 = vmatprep.subr.mxu1 %v1756_v26 }
 0x879   :  { %v1388_v50 = vadd.f32 %v15548_v49, %v14223_v48 }
 0x87a   :  { %v1382_v51 = vpop.f32.mrf.mxu0 }
 0x87b   :  { %v1383_v52 = vadd.f32 %v14223_v48, %v1382_v51  ;;  %15556 = vmatprep.subr.mxu0 %v1388_v50  ;;  %v14237_v51 = vld [vmem:[#allocation2 + $0x113] ss:$0 sm:$0xff] }
 0x87c   :  { %15557 = vmatpush3.msra.mxu0 %v1388_v50 }
 0x87d   :  { %15558 = vmatprep.subr.mxu0 %v1383_v52 }
 0x87e   :  { %15559 = vmatpush3.msra.mxu0 %v1383_v52 }
 0x87f   :  { %15568 = vmatprep.subr.mxu0 %v1672_v11 }
 0x936   :  { %v15555_v53 = vpop.f32.mrf.mxu1 }
 0x937   :  { %v1479_v54 = vmul.f32 0.35355338, %v15555_v53 }
 0x938   :  { %v1469_v55 = vpop.f32.mrf.mxu1 }
 0x939   :  { %v1478_v56 = vmul.f32 0.35355338, %v1469_v55  ;;  %v1481_v57 = vadd.f32 %v1479_v54, %v17144_v4 }
 0x93b   :  { %v1485_v58 = vsel %vm425_vm2, %v1481_v57, -inf  ;;  %v1480_v59 = vadd.f32 %v1478_v56, %v17149_v7 }
 0x93c   :  { %1486 = vmax.xlane.f32.xlu1 %v1485_v58 }
 0x93d   :  { %v1482_v60 = vsel %vm425_vm2, %v1480_v59, -inf }
 0x93e   :  { %1483 = vmax.xlane.f32.xlu0 %v1482_v60 }
 0x9c5   :  { %v1487_v61 = vpop.xlane.xlu1 %1486 }
 0x9c6   :  { %v1489_v62 = vsub.f32 %v1481_v57, %v1487_v61 }
 0x9c7   :  { %v1484_v63 = vpop.xlane.xlu0 %1483 }
 0x9c8   :  { %v1492_v2 = vmul.f32 1.442695, %v1489_v62  ;;  %v1488_v3 = vsub.f32 %v1480_v59, %v1484_v63 }
 0x9ca   :  { %16814 = vpow2.f32 %v1492_v2  ;;  %v1490_v5 = vmul.f32 1.442695, %v1488_v3 }
 0x9cc   :  { %16816 = vpow2.f32 %v1490_v5 }
 0x9d7   :  { %v16815_v6 = vpop.eup %16814 }
 0x9d8   :  { %v1497_v8 = vsel %vm425_vm2, %v16815_v6, 0.0 }
 0x9d9   :  { %v16817_v9 = vpop.eup %16816  ;;  %1498 = vadd.xlane.f32.xlu1 %v1497_v8 }
 0x9da   :  { %v1494_v10 = vsel %vm425_vm2, %v16817_v9, 0.0 }
 0x9db   :  { %1495 = vadd.xlane.f32.xlu0 %v1494_v10 }
 0xa62   :  { %v1499_v13 = vpop.xlane.xlu1 %1498 }
 0xa63   :  { %16818 = vrcp.f32 %v1499_v13 }
 0xa64   :  { %v1496_v14 = vpop.xlane.xlu0 %1495 }
 0xa65   :  { %16820 = vrcp.f32 %v1496_v14 }
 0xa70   :  { %v16819_v15 = vpop.eup %16818 }
 0xa71   :  { %v1503_v18 = vmul.f32 %v16819_v15, %v16815_v6 }
 0xa72   :  { %v16821_v16 = vpop.eup %16820 }
 0xa73   :  { %v1501_v17 = vmul.f32 %v16821_v16, %v16817_v9 }
 0xa75   :  { %15560 = vmatprep.mubr.msk.f32.mxu0 %vm425_vm2, %v1501_v17 }
 0xa76   :  { %15561 = vmatmul.mubr.msk.f32.vlgmr.msra.gmra.mxu0 %vm425_vm2, %v1503_v18  ;;  %v1131_v18 = vadd.f32 %v17189_v30, %v17203_v42 }
 0xa77   :  { %15569 = vmatpush3.msra.mxu0 %v1672_v11  ;;  %15576 = vmatprep.mubr.msk.f32.mxu0 %vm35_vm0, %v17111_v35 }
 0xa78   :  { %15570 = vmatprep.subr.mxu0 %v1671_v19 }
 0xa79   :  { %15571 = vmatpush3.msra.mxu0 %v1671_v19 }
 0xa7a   :  { %15572 = vmatprep.subr.mxu0 %v1670_v20 }
 0xa7b   :  { %15573 = vmatpush3.msra.mxu0 %v1670_v20  ;;  %v14251_v20 = vld [vmem:[#allocation2 + $0x1c0] ss:$0 sm:$0xff] }
 0xa7c   :  { %15574 = vmatprep.subr.mxu0 %v1669_v21 }
 0xa7d   :  { %15575 = vmatpush3.msra.mxu0 %v1669_v21 }
 0xa7e   :  { %15577 = vmatmul.mubr.msk.f32.vlgmr.msra.gmra.mxu0 %vm35_vm0, %v17117_v38  ;;  %15590 = vmatprep.subr.mxu0 %v1840_v22 }
 0xa7f   :  { %15591 = vmatpush3.msra.mxu0 %v1840_v22  ;;  %15598 = vmatprep.mubr.msk.f32.mxu0 %vm35_vm0, %v17111_v35 }
 0xa80   :  { %15592 = vmatprep.subr.mxu0 %v1839_v23 }
 0xa81   :  { %15593 = vmatpush3.msra.mxu0 %v1839_v23 }
 0xa82   :  { %15594 = vmatprep.subr.mxu0 %v1838_v24 }
 0xa83   :  { %15595 = vmatpush3.msra.mxu0 %v1838_v24 }
 0xa84   :  { %15596 = vmatprep.subr.mxu0 %v1837_v25 }
 0xa85   :  { %15597 = vmatpush3.msra.mxu0 %v1837_v25 }
 0xa86   :  { %15599 = vmatmul.mubr.msk.f32.vlgmr.msra.gmra.mxu0 %vm35_vm0, %v17117_v38 }
 0xb36   :  { %v15562_v28 = vpop.f32.mrf.mxu0 }
 0xb38   :  { %v1576_v29 = vpop.f32.mrf.mxu0 }
 0xb39   :  { %15565 = vmatprep.mubr.msk.f32.mxu1 %vm333_vm1, %v1576_v29 }
 0xb3a   :  { %15566 = vmatmul.mubr.msk.f32.vlgmr.msra.gmra.mxu1 %vm333_vm1, %v15562_v28 }
 0xb3b   :  { %15580 = vmatpush3.msra.mxu1 %v1756_v26  ;;  %15587 = vmatprep.mubr.msk.f32.mxu1 %vm35_vm0, %v17111_v35 }
 0xb3c   :  { %15581 = vmatprep.subr.mxu1 %v1755_v31 }
 0xb3d   :  { %15582 = vmatpush3.msra.mxu1 %v1755_v31 }
 0xb3e   :  { %v15578_v36 = vpop.f32.mrf.mxu0  ;;  %15583 = vmatprep.subr.mxu1 %v1754_v32 }
 0xb3f   :  { %v1750_v37 = vadd.f32 %v15578_v36, %v14234_v33  ;;  %15584 = vmatpush3.msra.mxu1 %v1754_v32 }
 0xb40   :  { %v1744_v39 = vpop.f32.mrf.mxu0  ;;  %15585 = vmatprep.subr.mxu1 %v1753_v34 }
 0xb41   :  { %v1745_v40 = vadd.f32 %v14234_v33, %v1744_v39  ;;  %15586 = vmatpush3.msra.mxu1 %v1753_v34 }
 0xb42   :  { %15588 = vmatmul.mubr.msk.f32.vlgmr.msra.gmra.mxu1 %vm35_vm0, %v17117_v38 }
 0xb43   :  { %15605 = vmatprep.mubr.msk.f32.mxu1 %vm333_vm1, %v1745_v40 }
 0xb46   :  { %v15600_v35 = vpop.f32.mrf.mxu0 }
 0xb47   :  { %v1918_v44 = vadd.f32 %v15600_v35, %v14240_v43  ;;  %v2250_v35 = vld [vmem:[#allocation2 + $0x1e0] sm:$0xff] }
 0xb48   :  { %v1912_v45 = vpop.f32.mrf.mxu0 }
 0xb49   :  { %v1913_v46 = vadd.f32 %v14240_v43, %v1912_v45  ;;  %15608 = vmatprep.subr.mxu0 %v1918_v44  ;;  %v2251_v43 = vld [vmem:[#allocation2 + $0x1e8] sm:$0xff]  ;;  %v2248_v45 = vld [vmem:[#allocation2 + $0x1d0] sm:$0xff] }
 0xb4a   :  { %15609 = vmatpush3.msra.mxu0 %v1918_v44  ;;  %v2249_v44 = vld [vmem:[#allocation2 + $0x1d8] sm:$0xff] }
 0xb4b   :  { %15610 = vmatprep.subr.mxu0 %v1913_v46 }
 0xb4c   :  { %15611 = vmatpush3.msra.mxu0 %v1913_v46  ;;  %v2347_v46 = vld [vmem:[#allocation2 + $0x230] sm:$0xff] }
 0xb4d   :  { %15620 = vmatprep.subr.mxu0 %v2251_v43 }
 0xbfa   :  { %v15567_v48 = vpop.f32.mrf.mxu1 }
 0xbfb   :  { %v1668_v49 = vadd.f32 %v15567_v48, %v1136_v47  ;;  %v2346_v47 = vld [vmem:[#allocation2 + $0x228] sm:$0xff]  ;;  %v2345_v48 = vld [vmem:[#allocation2 + $0x220] sm:$0xff] }
 0xbfc   :  { %v1658_v50 = vpop.f32.mrf.mxu1 }
 0xbfd   :  { %v1667_v21 = vadd.f32 %v1658_v50, %v1131_v18 }
 0xc02   :  { %v15589_v52 = vpop.f32.mrf.mxu1 }
 0xc03   :  { %v1834_v38 = vadd.f32 %v15589_v52, %v14237_v51 }
 0xc04   :  { %v1828_v53 = vpop.f32.mrf.mxu1 }
 0xc05   :  { %v1829_v54 = vadd.f32 %v14237_v51, %v1828_v53  ;;  %15601 = vmatprep.subr.msk.mxu1 %vm333_vm1, %v1834_v38 }
 0xc06   :  { %15602 = vmatpush3.xpose.msk.msra.mxu1 %vm333_vm1, %v1834_v38 }
 0xc07   :  { %15603 = vmatprep.subr.msk.mxu1 %vm333_vm1, %v1829_v54 }
 0xc0a   :  { %15604 = vmatpush3.xpose.msk.msra.mxu1 %vm333_vm1, %v1829_v54 }
 0xc0d   :  { %15606 = vmatmul.mubr.msk.f32.vlgmr.msra.gmra.mxu1 %vm333_vm1, %v1750_v37 }
 0xccd   :  { %v15607_v55 = vpop.f32.mrf.mxu1 }
 0xcce   :  { %v2009_v27 = vmul.f32 0.35355338, %v15607_v55 }
 0xccf   :  { %v1999_v41 = vpop.f32.mrf.mxu1 }
 0xcd0   :  { %v2008_v56 = vmul.f32 0.35355338, %v1999_v41  ;;  %v2011_v57 = vadd.f32 %v2009_v27, %v17144_v4  ;;  %v14252_v27 = vld [vmem:[#allocation2 + $0x1c8] ss:$0 sm:$0xff] }
 0xcd2   :  { %v2015_v58 = vsel %vm425_vm2, %v2011_v57, -inf  ;;  %v2010_v59 = vadd.f32 %v2008_v56, %v17149_v7  ;;  %v2115_v7 = vld [vmem:[#allocation2 + $0x1b8] sm:$0xff] }
 0xcd3   :  { %2016 = vmax.xlane.f32.xlu1 %v2015_v58  ;;  %15615 = vmatprep.subr.mxu1 %v2115_v7 }
 0xcd4   :  { %v2012_v60 = vsel %vm425_vm2, %v2010_v59, -inf  ;;  %15616 = vmatpush3.msra.mxu1 %v2115_v7 }
 0xcd5   :  { %2013 = vmax.xlane.f32.xlu0 %v2012_v60  ;;  %15631 = vmatprep.subr.mxu1 %v2347_v46 }
 0xd5c   :  { %v2017_v61 = vpop.xlane.xlu1 %2016 }
 0xd5d   :  { %v2019_v62 = vsub.f32 %v2011_v57, %v2017_v61 }
 0xd5e   :  { %v2014_v63 = vpop.xlane.xlu0 %2013 }
 0xd5f   :  { %v2022_v2 = vmul.f32 1.442695, %v2019_v62  ;;  %v2018_v3 = vsub.f32 %v2010_v59, %v2014_v63  ;;  %v14253_v59 = vld [vmem:[#allocation2 + $0x1c9] ss:$0 sm:$0xff]  ;;  %v2343_v63 = vld [vmem:[#allocation2 + $0x210] sm:$0xff] }
 0xd61   :  { %16822 = vpow2.f32 %v2022_v2  ;;  %v2020_v5 = vmul.f32 1.442695, %v2018_v3  ;;  %v2342_v2 = vld [vmem:[#allocation2 + $0x208] sm:$0xff]  ;;  %v2341_v3 = vld [vmem:[#allocation2 + $0x200] sm:$0xff] }
 0xd63   :  { %16824 = vpow2.f32 %v2020_v5  ;;  %v2340_v5 = vld [vmem:[#allocation2 + $0x1f8] sm:$0xff] }
 0xd6e   :  { %v16823_v6 = vpop.eup %16822 }
 0xd6f   :  { %v2027_v8 = vsel %vm425_vm2, %v16823_v6, 0.0 }
 0xd70   :  { %v16825_v4 = vpop.eup %16824  ;;  %2028 = vadd.xlane.f32.xlu1 %v2027_v8 }
 0xd71   :  { %v2024_v9 = vsel %vm425_vm2, %v16825_v4, 0.0 }
 0xd72   :  { %2025 = vadd.xlane.f32.xlu0 %v2024_v9 }
 0xdf9   :  { %v2029_v10 = vpop.xlane.xlu1 %2028 }
 0xdfa   :  { %16826 = vrcp.f32 %v2029_v10 }
 0xdfb   :  { %v2026_v11 = vpop.xlane.xlu0 %2025 }
 0xdfc   :  { %16828 = vrcp.f32 %v2026_v11 }
 0xe07   :  { %v16827_v12 = vpop.eup %16826 }
 0xe08   :  { %v2033_v15 = vmul.f32 %v16827_v12, %v16823_v6  ;;  %v14254_v6 = vld [vmem:[#allocation2 + $0x1f0] ss:$0 sm:$0xff]  ;;  %v14257_v12 = vld [vmem:[#allocation2 + $0x238] ss:$0 sm:$0xff] }
 0xe09   :  { %v16829_v13 = vpop.eup %16828 }
 0xe0a   :  { %v2031_v14 = vmul.f32 %v16829_v13, %v16825_v4 }
 0xe0c   :  { %15612 = vmatprep.mubr.msk.f32.mxu0 %vm425_vm2, %v2031_v14 }
 0xe0d   :  { %15613 = vmatmul.mubr.msk.f32.vlgmr.msra.gmra.mxu0 %vm425_vm2, %v2033_v15 }
 0xe0e   :  { %15621 = vmatpush3.msra.mxu0 %v2251_v43 }
 0xe0f   :  { %15622 = vmatprep.subr.mxu0 %v2250_v35 }
 0xe10   :  { %15623 = vmatpush3.msra.mxu0 %v2250_v35 }
 0xe11   :  { %15624 = vmatprep.subr.mxu0 %v2249_v44 }
 0xe12   :  { %15625 = vmatpush3.msra.mxu0 %v2249_v44 }
 0xe13   :  { %15626 = vmatprep.subr.mxu0 %v2248_v45 }
 0xe14   :  { %15627 = vmatpush3.msra.mxu0 %v2248_v45 }
 0xecd   :  { %v15614_v16 = vpop.f32.mrf.mxu0 }
 0xecf   :  { %v2106_v17 = vpop.f32.mrf.mxu0 }
 0xed0   :  { %15617 = vmatprep.mubr.msk.f32.mxu1 %vm333_vm1, %v2106_v17 }
 0xed1   :  { %15618 = vmatmul.mubr.msk.f32.vlgmr.msra.gmra.mxu1 %vm333_vm1, %v15614_v16 }
 0xed2   :  { %15632 = vmatpush3.msra.mxu1 %v2347_v46 }
 0xed3   :  { %15633 = vmatprep.subr.mxu1 %v2346_v47 }
 0xed4   :  { %15634 = vmatpush3.msra.mxu1 %v2346_v47 }
 0xed5   :  { %15635 = vmatprep.subr.mxu1 %v2345_v48 }
 0xed6   :  { %15636 = vmatpush3.msra.mxu1 %v2345_v48  ;;  %v14260_v48 = vld [vmem:[#allocation2 + $0x240] ss:$0 sm:$0xff] }
 0xf91   :  { %v15619_v19 = vpop.f32.mrf.mxu1 }
 0xf92   :  { %v2198_v22 = vadd.f32 %v15619_v19, %v1668_v49  ;;  %v2344_v49 = vld [vmem:[#allocation2 + $0x218] sm:$0xff] }
 0xf93   :  { %v2188_v23 = vpop.f32.mrf.mxu1  ;;  %15637 = vmatprep.subr.mxu1 %v2344_v49 }
 0xf94   :  { %v2205_v24 = vadd.f32 %v14251_v20, %v2198_v22  ;;  %v2197_v25 = vadd.f32 %v2188_v23, %v1667_v21  ;;  %15638 = vmatpush3.msra.mxu1 %v2344_v49 }
 0xf95   :  { %15639 = vmatprep.subr.mxu1 %v2343_v63 }
 0xf96   :  { %v17250_v26 = vadd.f32 %v2205_v24, %v17101_v1  ;;  %v2204_v28 = vadd.f32 %v14251_v20, %v2197_v25  ;;  %15640 = vmatpush3.msra.mxu1 %v2343_v63 }
 0xf97   :  { %15641 = vmatprep.subr.mxu1 %v2342_v2 }
 0xf98   :  { %v2213_v29 = vsel %vm35_vm0, %v17250_v26, 0.0  ;;  %v17255_v31 = vadd.f32 %v2204_v28, %v17096_v0  ;;  %15642 = vmatpush3.msra.mxu1 %v2342_v2 }
 0xf99   :  { %2214 = vadd.xlane.f32.xlu1 %v2213_v29  ;;  %15643 = vmatprep.subr.mxu1 %v2341_v3 }
 0xf9a   :  { %v2210_v30 = vsel %vm35_vm0, %v17255_v31, 0.0  ;;  %15644 = vmatpush3.msra.mxu1 %v2341_v3 }
 0xf9b   :  { %2211 = vadd.xlane.f32.xlu0 %v2210_v30  ;;  %15645 = vmatprep.subr.mxu1 %v2340_v5 }
 0xf9c   :  { %15646 = vmatpush3.msra.mxu1 %v2340_v5  ;;  %v14265_v5 = vld [vmem:[#allocation2 + $0x350] ss:$0 sm:$0xff] }
0x1022   :  { %v2215_v42 = vpop.xlane.xlu1 %2214 }
0x1023   :  { %v2217_v32 = vmul.f32 0.03125, %v2215_v42  ;;  %v2480_v42 = vld [vmem:[#allocation2 + $0x260] sm:$0xff] }
0x1024   :  { %v2212_v33 = vpop.xlane.xlu0 %2211  ;;  %15650 = vmatprep.subr.mxu0 %v2480_v42 }
0x1025   :  { %v2219_v34 = vsub.f32 %v17250_v26, %v2217_v32  ;;  %v2216_v36 = vmul.f32 0.03125, %v2212_v33  ;;  %v2654_v32 = vld [vmem:[#allocation2 + $0x370] sm:$0xff]  ;;  %v2479_v33 = vld [vmem:[#allocation2 + $0x258] sm:$0xff] }
0x1026   :  { %15672 = vmatprep.subr.mxu1 %v2654_v32 }
0x1027   :  { %v2218_v1 = vsub.f32 %v17255_v31, %v2216_v36  ;;  %v2221_v37 = vmul.f32 %v2219_v34, %v2219_v34  ;;  %v2478_v36 = vld [vmem:[#allocation2 + $0x250] sm:$0xff] }
0x1029   :  { %v2225_v39 = vsel %vm35_vm0, %v2221_v37, 0.0  ;;  %v2220_v40 = vmul.f32 %v2218_v1, %v2218_v1  ;;  %v2477_v37 = vld [vmem:[#allocation2 + $0x248] sm:$0xff] }
0x102a   :  { %2226 = vadd.xlane.f32.xlu1 %v2225_v39  ;;  %v2651_v39 = vld [vmem:[#allocation2 + $0x358] sm:$0xff] }
0x102b   :  { %v2222_v0 = vsel %vm35_vm0, %v2220_v40, 0.0  ;;  %v2570_v40 = vld [vmem:[#allocation2 + $0x2e8] sm:$0xff] }
0x102c   :  { %2223 = vadd.xlane.f32.xlu0 %v2222_v0 }
0x10b3   :  { %v2227_v50 = vpop.xlane.xlu1 %2226 }
0x10b4   :  { %v2229_v51 = vmul.f32 0.03125, %v2227_v50 }
0x10b5   :  { %v2224_v52 = vpop.xlane.xlu0 %2223 }
0x10b6   :  { %v2231_v38 = vadd.f32 1e-05, %v2229_v51  ;;  %v2228_v53 = vmul.f32 0.03125, %v2224_v52 }
0x10b8   :  { %16830 = vrsqrt.f32 %v2231_v38  ;;  %v2230_v54 = vadd.f32 1e-05, %v2228_v53  ;;  %v14261_v38 = vld [vmem:[#allocation2 + $0x241] ss:$0 sm:$0xff] }
0x10ba   :  { %16832 = vrsqrt.f32 %v2230_v54 }
0x10c5   :  { %v16831_v55 = vpop.eup %16830 }
0x10c6   :  { %v2235_v41 = vmul.f32 %v16831_v55, %v2219_v34  ;;  %v2653_v34 = vld [vmem:[#allocation2 + $0x368] sm:$0xff] }
0x10c7   :  { %v16833_v56 = vpop.eup %16832 }
0x10c8   :  { %v2234_v57 = vmul.f32 %v16833_v56, %v2218_v1  ;;  %v2241_v58 = vmul.f32 %v14252_v27, %v2235_v41  ;;  %v2652_v1 = vld [vmem:[#allocation2 + $0x360] sm:$0xff]  ;;  %v2568_v41 = vld [vmem:[#allocation2 + $0x2d8] sm:$0xff]  ;;  %v2567_v56 = vld [vmem:[#allocation2 + $0x2d0] sm:$0xff] }
0x10ca   :  { %v2240_v60 = vmul.f32 %v14252_v27, %v2234_v57  ;;  %v2247_v62 = vadd.f32 %v14253_v59, %v2241_v58  ;;  %v2569_v27 = vld [vmem:[#allocation2 + $0x2e0] sm:$0xff]  ;;  %v14268_v57 = vld [vmem:[#allocation2 + $0x3d8] ss:$0 sm:$0xff] }
0x10cc   :  { %v2246_v61 = vadd.f32 %v14253_v59, %v2240_v60 }
0x10ce   :  { %15628 = vmatprep.mubr.msk.f32.mxu0 %vm35_vm0, %v2246_v61  ;;  %v14262_v61 = vld [vmem:[#allocation2 + $0x2c8] ss:$0 sm:$0xff] }
0x10cf   :  { %15629 = vmatmul.mubr.msk.f32.vlgmr.msra.gmra.mxu0 %vm35_vm0, %v2247_v62 }
0x10d0   :  { %15651 = vmatpush3.msra.mxu0 %v2480_v42 }
0x10d1   :  { %15652 = vmatprep.subr.mxu0 %v2479_v33 }
0x10d2   :  { %15653 = vmatpush3.msra.mxu0 %v2479_v33 }
0x10d3   :  { %15654 = vmatprep.subr.mxu0 %v2478_v36 }
0x10d4   :  { %15655 = vmatpush3.msra.mxu0 %v2478_v36 }
0x10d5   :  { %15656 = vmatprep.subr.mxu0 %v2477_v37 }
0x10d6   :  { %15657 = vmatpush3.msra.mxu0 %v2477_v37 }
0x10d7   :  { %15661 = vmatprep.subr.mxu0 %v2570_v40 }
0x118f   :  { %v15630_v8 = vpop.f32.mrf.mxu0 }
0x1190   :  { %v2335_v4 = vadd.f32 %v15630_v8, %v14254_v6 }
0x1191   :  { %v2329_v9 = vpop.f32.mrf.mxu0 }
0x1192   :  { %v2330_v7 = vadd.f32 %v14254_v6, %v2329_v9  ;;  %v2339_v11 = vmax.f32 %v2335_v4, 0.0 }
0x1194   :  { %v2338_v10 = vmax.f32 %v2330_v7, 0.0  ;;  %v3017_v7 = vld [vmem:[#allocation2 + $0x308] sm:$0xff] }
0x1196   :  { %15647 = vmatprep.mubr.msk.f32.mxu1 %vm2353_vm3, %v2338_v10 }
0x1197   :  { %15648 = vmatmul.mubr.msk.f32.vlgmr.msra.gmra.mxu1 %vm2353_vm3, %v2339_v11  ;;  %v3016_v11 = vld [vmem:[#allocation2 + $0x300] sm:$0xff] }
0x1198   :  { %15673 = vmatpush3.msra.mxu1 %v2654_v32 }
0x1199   :  { %15674 = vmatprep.subr.mxu1 %v2653_v34 }
0x119a   :  { %15675 = vmatpush3.msra.mxu1 %v2653_v34 }
0x119b   :  { %15676 = vmatprep.subr.mxu1 %v2652_v1 }
0x119c   :  { %15677 = vmatpush3.msra.mxu1 %v2652_v1 }
0x119d   :  { %15678 = vmatprep.subr.mxu1 %v2651_v39 }
0x119e   :  { %15679 = vmatpush3.msra.mxu1 %v2651_v39 }
0x1257   :  { %v15649_v13 = vpop.f32.mrf.mxu1 }
0x1258   :  { %v2432_v14 = vadd.f32 %v15649_v13, %v14257_v12  ;;  %v3014_v13 = vld [vmem:[#allocation2 + $0x2f0] sm:$0xff] }
0x1259   :  { %v2426_v15 = vpop.f32.mrf.mxu1 }
0x125a   :  { %v17268_v16 = vadd.f32 %v2432_v14, %v17250_v26  ;;  %v2427_v17 = vadd.f32 %v14257_v12, %v2426_v15  ;;  %v3015_v12 = vld [vmem:[#allocation2 + $0x2f8] sm:$0xff] }
0x125c   :  { %v17271_v18 = vadd.f32 %v2427_v17, %v17255_v31  ;;  %v2442_v19 = vsel %vm35_vm0, %v17268_v16, 0.0 }
0x125d   :  { %2443 = vadd.xlane.f32.xlu1 %v2442_v19 }
0x125e   :  { %v2439_v20 = vsel %vm35_vm0, %v17271_v18, 0.0 }
0x125f   :  { %2440 = vadd.xlane.f32.xlu0 %v2439_v20  ;;  %v17310_v20 = vld [vmem:[%s18143_s0 + $0x28] sm:$0xff] }
0x12e6   :  { %v2444_v21 = vpop.xlane.xlu1 %2443 }
0x12e7   :  { %v2446_v22 = vmul.f32 0.03125, %v2444_v21 }
0x12e8   :  { %v2441_v23 = vpop.xlane.xlu0 %2440 }
0x12e9   :  { %v2448_v24 = vsub.f32 %v17268_v16, %v2446_v22  ;;  %v2445_v25 = vmul.f32 0.03125, %v2441_v23  ;;  %v17317_v23 = vld [vmem:[%s18143_s0 + $0x20] sm:$0xff] }
0x12eb   :  { %v2447_v26 = vsub.f32 %v17271_v18, %v2445_v25  ;;  %v2450_v28 = vmul.f32 %v2448_v24, %v2448_v24  ;;  %v14280_v25 = vld [vmem:[#allocation2 + $0x351] ss:$0 sm:$0xff] }
0x12ed   :  { %v2454_v29 = vsel %vm35_vm0, %v2450_v28, 0.0  ;;  %v2449_v31 = vmul.f32 %v2447_v26, %v2447_v26 }
0x12ee   :  { %2455 = vadd.xlane.f32.xlu1 %v2454_v29 }
0x12ef   :  { %v2451_v30 = vsel %vm35_vm0, %v2449_v31, 0.0 }
0x12f0   :  { %2452 = vadd.xlane.f32.xlu0 %v2451_v30 }
0x1377   :  { %v2456_v0 = vpop.xlane.xlu1 %2455 }
0x1378   :  { %v2458_v43 = vmul.f32 0.03125, %v2456_v0 }
0x1379   :  { %v2453_v35 = vpop.xlane.xlu0 %2452 }
0x137a   :  { %v2460_v44 = vadd.f32 1e-05, %v2458_v43  ;;  %v2457_v45 = vmul.f32 0.03125, %v2453_v35  ;;  %v2933_v43 = vld [vmem:[#allocation2 + $0x280] sm:$0xff] }
0x137c   :  { %16834 = vrsqrt.f32 %v2460_v44  ;;  %v2459_v46 = vadd.f32 1e-05, %v2457_v45 }
0x137e   :  { %16836 = vrsqrt.f32 %v2459_v46 }
0x1389   :  { %v16835_v47 = vpop.eup %16834 }
0x138a   :  { %v2464_v49 = vmul.f32 %v16835_v47, %v2448_v24 }
0x138b   :  { %v16837_v50 = vpop.eup %16836 }
0x138c   :  { %v2463_v51 = vmul.f32 %v16837_v50, %v2447_v26  ;;  %v2470_v52 = vmul.f32 %v14260_v48, %v2464_v49  ;;  %v2932_v49 = vld [vmem:[#allocation2 + $0x278] sm:$0xff]  ;;  %v2931_v50 = vld [vmem:[#allocation2 + $0x270] sm:$0xff] }
0x138e   :  { %v2469_v53 = vmul.f32 %v14260_v48, %v2463_v51  ;;  %v17283_v55 = vadd.f32 %v14261_v38, %v2470_v52  ;;  %v2930_v51 = vld [vmem:[#allocation2 + $0x268] sm:$0xff]  ;;  %v3101_v52 = vld [vmem:[#allocation2 + $0x390] sm:$0xff] }
0x1390   :  { %v17281_v54 = vadd.f32 %v14261_v38, %v2469_v53  ;;  %v3100_v38 = vld [vmem:[#allocation2 + $0x388] sm:$0xff]  ;;  %v3099_v53 = vld [vmem:[#allocation2 + $0x380] sm:$0xff] }
0x1392   :  { %15658 = vmatprep.mubr.msk.f32.mxu0 %vm35_vm0, %v17281_v54  ;;  %15680 = vmatprep.mubr.msk.f32.mxu1 %vm35_vm0, %v17281_v54 }
0x1393   :  { %15659 = vmatmul.mubr.msk.f32.vlgmr.msra.gmra.mxu0 %vm35_vm0, %v17283_v55  ;;  %15681 = vmatmul.mubr.msk.f32.vlgmr.msra.gmra.mxu1 %vm35_vm0, %v17283_v55 }
0x1394   :  { %15662 = vmatpush3.msra.mxu0 %v2570_v40  ;;  %15669 = vmatprep.mubr.msk.f32.mxu0 %vm35_vm0, %v17281_v54 }
0x1395   :  { %15663 = vmatprep.subr.mxu0 %v2569_v27 }
0x1396   :  { %15664 = vmatpush3.msra.mxu0 %v2569_v27  ;;  %v3098_v27 = vld [vmem:[#allocation2 + $0x378] sm:$0xff] }
0x1397   :  { %15665 = vmatprep.subr.mxu0 %v2568_v41 }
0x1398   :  { %15666 = vmatpush3.msra.mxu0 %v2568_v41 }
0x1399   :  { %15667 = vmatprep.subr.mxu0 %v2567_v56 }
0x139a   :  { %15668 = vmatpush3.msra.mxu0 %v2567_v56 }
0x139b   :  { %15670 = vmatmul.mubr.msk.f32.vlgmr.msra.gmra.mxu0 %vm35_vm0, %v17283_v55 }
0x1453   :  { %v15660_v58 = vpop.f32.mrf.mxu0  ;;  %v15682_v59 = vpop.f32.mrf.mxu1 }
0x1454   :  { %v2732_v60 = vadd.f32 %v15682_v59, %v14268_v57  ;;  %v2564_v10 = vadd.f32 %v15660_v58, %v14262_v61  ;;  %v14277_v58 = vld [vmem:[#allocation2 + $0x2c9] ss:$0 sm:$0xff] }
0x1455   :  { %v2558_v62 = vpop.f32.mrf.mxu0  ;;  %v2726_v63 = vpop.f32.mrf.mxu1 }
0x1456   :  { %v2559_v2 = vadd.f32 %v14262_v61, %v2558_v62  ;;  %v2727_v3 = vadd.f32 %v14268_v57, %v2726_v63  ;;  %15690 = vmatprep.subr.mxu1 %v2732_v60  ;;  %v14283_v62 = vld [vmem:[#allocation2 + $0x3d9] ss:$0 sm:$0xff] }
0x1457   :  { %15691 = vmatpush3.msra.mxu1 %v2732_v60 }
0x1458   :  { %15687 = vmatprep.mubr.msk.f32.mxu0 %vm333_vm1, %v2559_v2  ;;  %15692 = vmatprep.subr.mxu1 %v2727_v3 }
0x1459   :  { %15693 = vmatpush3.msra.mxu1 %v2727_v3 }
0x145a   :  { %15697 = vmatprep.subr.mxu1 %v2933_v43 }
0x145b   :  { %v15671_v6 = vpop.f32.mrf.mxu0 }
0x145c   :  { %v2648_v8 = vadd.f32 %v15671_v6, %v14265_v5 }
0x145d   :  { %v2642_v4 = vpop.f32.mrf.mxu0 }
0x145e   :  { %v2643_v9 = vadd.f32 %v14265_v5, %v2642_v4  ;;  %15683 = vmatprep.subr.msk.mxu0 %vm333_vm1, %v2648_v8 }
0x145f   :  { %15684 = vmatpush3.xpose.msk.msra.mxu0 %vm333_vm1, %v2648_v8 }
0x1460   :  { %15685 = vmatprep.subr.msk.mxu0 %vm333_vm1, %v2643_v9 }
0x1463   :  { %15686 = vmatpush3.xpose.msk.msra.mxu0 %vm333_vm1, %v2643_v9 }
0x1464   :  { %15708 = vmatprep.subr.mxu0 %v3017_v7 }
0x1466   :  { %15688 = vmatmul.mubr.msk.f32.vlgmr.msra.gmra.mxu0 %vm333_vm1, %v2564_v10 }
0x1467   :  { %15709 = vmatpush3.msra.mxu0 %v3017_v7  ;;  %15716 = vmatprep.mubr.msk.f32.mxu0 %vm35_vm0, %v17281_v54 }
0x1468   :  { %15710 = vmatprep.subr.mxu0 %v3016_v11 }
0x1469   :  { %15711 = vmatpush3.msra.mxu0 %v3016_v11 }
0x146a   :  { %15712 = vmatprep.subr.mxu0 %v3015_v12 }
0x146b   :  { %15713 = vmatpush3.msra.mxu0 %v3015_v12 }
0x146c   :  { %15714 = vmatprep.subr.mxu0 %v3014_v13 }
0x146d   :  { %15715 = vmatpush3.msra.mxu0 %v3014_v13 }
0x146e   :  { %15717 = vmatmul.mubr.msk.f32.vlgmr.msra.gmra.mxu0 %vm35_vm0, %v17283_v55 }
0x1526   :  { %v15689_v14 = vpop.f32.mrf.mxu0 }
0x1527   :  { %v2823_v15 = vmul.f32 0.35355338, %v15689_v14 }
0x1528   :  { %v2813_v17 = vpop.f32.mrf.mxu0 }
0x1529   :  { %v2822_v19 = vmul.f32 0.35355338, %v2813_v17  ;;  %v2825_v21 = vadd.f32 %v17310_v20, %v2823_v15 }
0x152b   :  { %v2829_v22 = vsel %vm425_vm2, %v2825_v21, -inf  ;;  %v2824_v24 = vadd.f32 %v17317_v23, %v2822_v19 }
0x152c   :  { %2830 = vmax.xlane.f32.xlu1 %v2829_v22 }
0x152d   :  { %v2826_v26 = vsel %vm425_vm2, %v2824_v24, -inf }
0x152e   :  { %v15718_v28 = vpop.f32.mrf.mxu0  ;;  %2827 = vmax.xlane.f32.xlu0 %v2826_v26 }
0x152f   :  { %v3095_v29 = vadd.f32 %v15718_v28, %v14280_v25  ;;  %v2929_v28 = vld [vmem:[#allocation2 + $0x3e0] sm:$0xff] }
0x1530   :  { %v3089_v31 = vpop.f32.mrf.mxu0 }
0x1531   :  { %v3090_v30 = vadd.f32 %v14280_v25, %v3089_v31  ;;  %15730 = vmatprep.subr.msk.mxu0 %vm333_vm1, %v3095_v29 }
0x1532   :  { %15731 = vmatpush3.xpose.msk.msra.mxu0 %vm333_vm1, %v3095_v29  ;;  %v3376_v29 = vld [vmem:[#allocation2 + $0x3e8] sm:$0xff] }
0x1533   :  { %15732 = vmatprep.subr.msk.mxu0 %vm333_vm1, %v3090_v30 }
0x1536   :  { %15733 = vmatpush3.xpose.msk.msra.mxu0 %vm333_vm1, %v3090_v30 }
0x1537   :  { %15744 = vmatprep.subr.mxu0 %v3376_v29 }
0x15b5   :  { %v2831_v42 = vpop.xlane.xlu1 %2830 }
0x15b6   :  { %v2833_v32 = vsub.f32 %v2825_v21, %v2831_v42 }
0x15b7   :  { %v2828_v33 = vpop.xlane.xlu0 %2827 }
0x15b8   :  { %v2836_v34 = vmul.f32 1.442695, %v2833_v32  ;;  %v2832_v36 = vsub.f32 %v2824_v24, %v2828_v33 }
0x15ba   :  { %16838 = vpow2.f32 %v2836_v34  ;;  %v2834_v1 = vmul.f32 1.442695, %v2832_v36  ;;  %v3626_v36 = vld [vmem:[#allocation2 + $0x328] sm:$0xff] }
0x15bc   :  { %16840 = vpow2.f32 %v2834_v1  ;;  %v3625_v1 = vld [vmem:[#allocation2 + $0x320] sm:$0xff] }
0x15c7   :  { %v16839_v37 = vpop.eup %16838 }
0x15c8   :  { %v2841_v39 = vsel %vm425_vm2, %v16839_v37, 0.0 }
0x15c9   :  { %v16841_v40 = vpop.eup %16840  ;;  %2842 = vadd.xlane.f32.xlu1 %v2841_v39  ;;  %v3623_v39 = vld [vmem:[#allocation2 + $0x310] sm:$0xff] }
0x15ca   :  { %v2838_v0 = vsel %vm425_vm2, %v16841_v40, 0.0 }
0x15cb   :  { %2839 = vadd.xlane.f32.xlu0 %v2838_v0 }
0x1652   :  { %v2843_v35 = vpop.xlane.xlu1 %2842 }
0x1653   :  { %16842 = vrcp.f32 %v2843_v35  ;;  %v3541_v35 = vld [vmem:[#allocation2 + $0x298] sm:$0xff] }
0x1654   :  { %v2840_v44 = vpop.xlane.xlu0 %2839 }
0x1655   :  { %16844 = vrcp.f32 %v2840_v44  ;;  %v3540_v44 = vld [vmem:[#allocation2 + $0x290] sm:$0xff] }
0x1660   :  { %v16843_v45 = vpop.eup %16842 }
0x1661   :  { %v2847_v48 = vmul.f32 %v16843_v45, %v16839_v37  ;;  %v3624_v37 = vld [vmem:[#allocation2 + $0x318] sm:$0xff] }
0x1662   :  { %v16845_v46 = vpop.eup %16844 }
0x1663   :  { %v2845_v47 = vmul.f32 %v16845_v46, %v16841_v40  ;;  %v3542_v40 = vld [vmem:[#allocation2 + $0x2a0] sm:$0xff]  ;;  %v3539_v46 = vld [vmem:[#allocation2 + $0x288] sm:$0xff] }
0x1665   :  { %15694 = vmatprep.mubr.msk.f32.mxu1 %vm425_vm2, %v2845_v47  ;;  %v3710_v47 = vld [vmem:[#allocation2 + $0x3b0] sm:$0xff] }
0x1666   :  { %15695 = vmatmul.mubr.msk.f32.vlgmr.msra.gmra.mxu1 %vm425_vm2, %v2847_v48 }
0x1667   :  { %15698 = vmatpush3.msra.mxu1 %v2933_v43  ;;  %15705 = vmatprep.mubr.msk.f32.mxu1 %vm35_vm0, %v17281_v54 }
0x1668   :  { %15699 = vmatprep.subr.mxu1 %v2932_v49 }
0x1669   :  { %15700 = vmatpush3.msra.mxu1 %v2932_v49  ;;  %v14299_v49 = vld [vmem:[#allocation2 + $0x352] ss:$0 sm:$0xff] }
0x166a   :  { %15701 = vmatprep.subr.mxu1 %v2931_v50 }
0x166b   :  { %15702 = vmatpush3.msra.mxu1 %v2931_v50  ;;  %v3709_v50 = vld [vmem:[#allocation2 + $0x3a8] sm:$0xff] }
0x166c   :  { %15703 = vmatprep.subr.mxu1 %v2930_v51 }
0x166d   :  { %15704 = vmatpush3.msra.mxu1 %v2930_v51 }
0x166e   :  { %15706 = vmatmul.mubr.msk.f32.vlgmr.msra.gmra.mxu1 %vm35_vm0, %v17283_v55  ;;  %15719 = vmatprep.subr.mxu1 %v3101_v52 }
0x166f   :  { %15720 = vmatpush3.msra.mxu1 %v3101_v52  ;;  %15727 = vmatprep.mubr.msk.f32.mxu1 %vm35_vm0, %v17281_v54 }
0x1670   :  { %15721 = vmatprep.subr.mxu1 %v3100_v38 }
0x1671   :  { %15722 = vmatpush3.msra.mxu1 %v3100_v38  ;;  %v3708_v38 = vld [vmem:[#allocation2 + $0x3a0] sm:$0xff] }
0x1672   :  { %15723 = vmatprep.subr.mxu1 %v3099_v53 }
0x1673   :  { %15724 = vmatpush3.msra.mxu1 %v3099_v53 }
0x1674   :  { %15725 = vmatprep.subr.mxu1 %v3098_v27 }
0x1675   :  { %15726 = vmatpush3.msra.mxu1 %v3098_v27 }
0x1676   :  { %15728 = vmatmul.mubr.msk.f32.vlgmr.msra.gmra.mxu1 %vm35_vm0, %v17283_v55 }
0x1726   :  { %v15696_v41 = vpop.f32.mrf.mxu1 }
0x1728   :  { %v2920_v56 = vpop.f32.mrf.mxu1 }
0x172e   :  { %v15707_v57 = vpop.f32.mrf.mxu1 }
0x172f   :  { %v3011_v61 = vadd.f32 %v15707_v57, %v14277_v58 }
0x1730   :  { %v3005_v59 = vpop.f32.mrf.mxu1 }
0x1731   :  { %v3006_v60 = vadd.f32 %v14277_v58, %v3005_v59  ;;  %v14296_v59 = vld [vmem:[#allocation2 + $0x2ca] ss:$0 sm:$0xff] }
0x1733   :  { %15734 = vmatprep.mubr.msk.f32.mxu0 %vm333_vm1, %v3006_v60 }
0x1734   :  { %15735 = vmatmul.mubr.msk.f32.vlgmr.msra.gmra.mxu0 %vm333_vm1, %v3011_v61 }
0x1735   :  { %15745 = vmatpush3.msra.mxu0 %v3376_v29  ;;  %v4072_v29 = vld [vmem:[#allocation2 + $0x2c0] sm:$0xff] }
0x1736   :  { %v15729_v63 = vpop.f32.mrf.mxu1  ;;  %15754 = vmatprep.subr.mxu0 %v3542_v40 }
0x1737   :  { %v3179_v2 = vadd.f32 %v15729_v63, %v14283_v62  ;;  %v14302_v63 = vld [vmem:[#allocation2 + $0x3da] ss:$0 sm:$0xff] }
0x1738   :  { %v3173_v3 = vpop.f32.mrf.mxu1 }
0x1739   :  { %v3174_v5 = vadd.f32 %v14283_v62, %v3173_v3  ;;  %15737 = vmatprep.subr.mxu1 %v3179_v2 }
0x173a   :  { %15738 = vmatpush3.msra.mxu1 %v3179_v2 }
0x173b   :  { %15739 = vmatprep.subr.mxu1 %v3174_v5 }
0x173c   :  { %15740 = vmatpush3.msra.mxu1 %v3174_v5 }
0x173d   :  { %15749 = vmatprep.subr.mxu1 %v2929_v28 }
0x17f4   :  { %v15736_v6 = vpop.f32.mrf.mxu0 }
0x17f5   :  { %v3270_v8 = vmul.f32 0.35355338, %v15736_v6 }
0x17f6   :  { %v3260_v4 = vpop.f32.mrf.mxu0 }
0x17f7   :  { %v3269_v9 = vmul.f32 0.35355338, %v3260_v4  ;;  %v3272_v7 = vadd.f32 %v17310_v20, %v3270_v8 }
0x17f9   :  { %v3276_v10 = vsel %vm425_vm2, %v3272_v7, -inf  ;;  %v3271_v11 = vadd.f32 %v17317_v23, %v3269_v9 }
0x17fa   :  { %3277 = vmax.xlane.f32.xlu1 %v3276_v10 }
0x17fb   :  { %v3273_v12 = vsel %vm425_vm2, %v3271_v11, -inf }
0x17fc   :  { %3274 = vmax.xlane.f32.xlu0 %v3273_v12 }
0x1883   :  { %v3278_v13 = vpop.xlane.xlu1 %3277 }
0x1884   :  { %v3280_v14 = vsub.f32 %v3272_v7, %v3278_v13 }
0x1885   :  { %v3275_v15 = vpop.xlane.xlu0 %3274 }
0x1886   :  { %v3283_v17 = vmul.f32 1.442695, %v3280_v14  ;;  %v3279_v19 = vsub.f32 %v3271_v11, %v3275_v15 }
0x1888   :  { %16846 = vpow2.f32 %v3283_v17  ;;  %v3281_v21 = vmul.f32 1.442695, %v3279_v19 }
0x188a   :  { %16848 = vpow2.f32 %v3281_v21 }
0x1895   :  { %v16847_v22 = vpop.eup %16846 }
0x1896   :  { %v3288_v24 = vsel %vm425_vm2, %v16847_v22, 0.0 }
0x1897   :  { %v16849_v25 = vpop.eup %16848  ;;  %3289 = vadd.xlane.f32.xlu1 %v3288_v24 }
0x1898   :  { %v3285_v26 = vsel %vm425_vm2, %v16849_v25, 0.0 }
0x1899   :  { %3286 = vadd.xlane.f32.xlu0 %v3285_v26 }
0x1920   :  { %v3290_v31 = vpop.xlane.xlu1 %3289 }
0x1921   :  { %16850 = vrcp.f32 %v3290_v31  ;;  %v3985_v31 = vld [vmem:[#allocation2 + $0x3f0] sm:$0xff] }
0x1922   :  { %v3287_v30 = vpop.xlane.xlu0 %3286 }
0x1923   :  { %16852 = vrcp.f32 %v3287_v30 }
0x192e   :  { %v16851_v42 = vpop.eup %16850 }
0x192f   :  { %v3294_v34 = vmul.f32 %v16851_v42, %v16847_v22 }
0x1930   :  { %v16853_v32 = vpop.eup %16852 }
0x1931   :  { %v3292_v33 = vmul.f32 %v16853_v32, %v16849_v25 }
0x1933   :  { %15741 = vmatprep.mubr.msk.f32.mxu1 %vm425_vm2, %v3292_v33 }
0x1934   :  { %15742 = vmatmul.mubr.msk.f32.vlgmr.msra.gmra.mxu1 %vm425_vm2, %v3294_v34 }
0x1935   :  { %15751 = vmatprep.mubr.msk.f32.mxu1 %vm333_vm1, %v2920_v56  ;;  %15750 = vmatpush3.msra.mxu1 %v2929_v28 }
0x1936   :  { %15765 = vmatprep.subr.mxu1 %v3626_v36 }
0x1938   :  { %15752 = vmatmul.mubr.msk.f32.vlgmr.msra.gmra.mxu1 %vm333_vm1, %v15696_v41  ;;  %v3707_v41 = vld [vmem:[#allocation2 + $0x398] sm:$0xff] }
0x1939   :  { %15766 = vmatpush3.msra.mxu1 %v3626_v36  ;;  %15773 = vmatprep.mubr.msk.f32.mxu1 %vm35_vm0, %v17281_v54 }
0x193a   :  { %15767 = vmatprep.subr.mxu1 %v3625_v1 }
0x193b   :  { %15768 = vmatpush3.msra.mxu1 %v3625_v1  ;;  %v4071_v1 = vld [vmem:[#allocation2 + $0x2b8] sm:$0xff] }
0x193c   :  { %15769 = vmatprep.subr.mxu1 %v3624_v37 }
0x193d   :  { %15770 = vmatpush3.msra.mxu1 %v3624_v37  ;;  %v4070_v37 = vld [vmem:[#allocation2 + $0x2b0] sm:$0xff] }
0x193e   :  { %15771 = vmatprep.subr.mxu1 %v3623_v39 }
0x193f   :  { %15772 = vmatpush3.msra.mxu1 %v3623_v39  ;;  %v4069_v39 = vld [vmem:[#allocation2 + $0x2a8] sm:$0xff] }
0x1940   :  { %15774 = vmatmul.mubr.msk.f32.vlgmr.msra.gmra.mxu1 %vm35_vm0, %v17283_v55 }
0x19f4   :  { %v15743_v0 = vpop.f32.mrf.mxu1 }
0x19f6   :  { %v3367_v43 = vpop.f32.mrf.mxu1 }
0x19f7   :  { %15746 = vmatprep.mubr.msk.f32.mxu0 %vm333_vm1, %v3367_v43  ;;  %v4238_v43 = vld [vmem:[#allocation2 + $0x3c0] sm:$0xff] }
0x19f8   :  { %15747 = vmatmul.mubr.msk.f32.vlgmr.msra.gmra.mxu0 %vm333_vm1, %v15743_v0  ;;  %v17357_v45 = vpop.f32.mrf.mxu1  ;;  %v4239_v0 = vld [vmem:[#allocation2 + $0x3c8] sm:$0xff] }
0x19f9   :  { %15755 = vmatpush3.msra.mxu0 %v3542_v40  ;;  %15762 = vmatprep.mubr.msk.f32.mxu0 %vm35_vm0, %v17281_v54  ;;  %v4240_v40 = vld [vmem:[#allocation2 + $0x3d0] sm:$0xff] }
0x19fa   :  { %15756 = vmatprep.subr.mxu0 %v3541_v35  ;;  %v17359_v48 = vpop.f32.mrf.mxu1 }
0x19fb   :  { %15757 = vmatpush3.msra.mxu0 %v3541_v35  ;;  %v4237_v35 = vld [vmem:[#allocation2 + $0x3b8] sm:$0xff] }
0x19fc   :  { %15758 = vmatprep.subr.mxu0 %v3540_v44 }
0x19fd   :  { %15759 = vmatpush3.msra.mxu0 %v3540_v44  ;;  %v4156_v44 = vld [vmem:[#allocation2 + $0x348] sm:$0xff] }
0x19fe   :  { %15760 = vmatprep.subr.mxu0 %v3539_v46 }
0x19ff   :  { %15761 = vmatpush3.msra.mxu0 %v3539_v46 }
0x1a00   :  { %15763 = vmatmul.mubr.msk.f32.vlgmr.msra.gmra.mxu0 %vm35_vm0, %v17283_v55  ;;  %v15775_v51 = vpop.f32.mrf.mxu1  ;;  %15776 = vmatprep.subr.mxu0 %v3710_v47 }
0x1a01   :  { %v3704_v52 = vadd.f32 %v15775_v51, %v14299_v49  ;;  %15777 = vmatpush3.msra.mxu0 %v3710_v47  ;;  %15784 = vmatprep.mubr.msk.f32.mxu0 %vm35_vm0, %v17281_v54  ;;  %v14313_v51 = vld [vmem:[#allocation2 + $0x2cb] ss:$0 sm:$0xff] }
0x1a02   :  { %v3698_v53 = vpop.f32.mrf.mxu1  ;;  %15778 = vmatprep.subr.mxu0 %v3709_v50 }
0x1a03   :  { %v3699_v27 = vadd.f32 %v14299_v49, %v3698_v53  ;;  %15779 = vmatpush3.msra.mxu0 %v3709_v50  ;;  %15787 = vmatprep.subr.msk.mxu1 %vm333_vm1, %v3704_v52  ;;  %v4155_v49 = vld [vmem:[#allocation2 + $0x340] sm:$0xff]  ;;  %v4154_v50 = vld [vmem:[#allocation2 + $0x338] sm:$0xff] }
0x1a04   :  { %15780 = vmatprep.subr.mxu0 %v3708_v38  ;;  %15788 = vmatpush3.xpose.msk.msra.mxu1 %vm333_vm1, %v3704_v52  ;;  %v4153_v52 = vld [vmem:[#allocation2 + $0x330] sm:$0xff] }
0x1a05   :  { %15781 = vmatpush3.msra.mxu0 %v3708_v38  ;;  %15789 = vmatprep.subr.msk.mxu1 %vm333_vm1, %v3699_v27 }
0x1a06   :  { %15782 = vmatprep.subr.mxu0 %v3707_v41 }
0x1a07   :  { %15783 = vmatpush3.msra.mxu0 %v3707_v41 }
0x1a08   :  { %15785 = vmatmul.mubr.msk.f32.vlgmr.msra.gmra.mxu0 %vm35_vm0, %v17283_v55  ;;  %15790 = vmatpush3.xpose.msk.msra.mxu1 %vm333_vm1, %v3699_v27 }
0x1a09   :  { %15801 = vmatprep.subr.mxu1 %v3985_v31 }
0x1ab8   :  { %v17371_v56 = vpop.f32.mrf.mxu0 }
0x1aba   :  { %v17373_v57 = vpop.f32.mrf.mxu0 }
0x1ac0   :  { %v15764_v58 = vpop.f32.mrf.mxu0 }
0x1ac1   :  { %v3620_v62 = vadd.f32 %v15764_v58, %v14296_v59  ;;  %v14319_v58 = vld [vmem:[#allocation2 + $0x3db] ss:$0 sm:$0xff] }
0x1ac2   :  { %v3614_v60 = vpop.f32.mrf.mxu0 }
0x1ac3   :  { %v3615_v61 = vadd.f32 %v14296_v59, %v3614_v60 }
0x1ac5   :  { %15791 = vmatprep.mubr.msk.f32.mxu1 %vm333_vm1, %v3615_v61 }
0x1ac6   :  { %15792 = vmatmul.mubr.msk.f32.vlgmr.msra.gmra.mxu1 %vm333_vm1, %v3620_v62  ;;  %v3536_v62 = vadd.f32 %v17357_v45, %v17371_v56 }
0x1ac7   :  { %15802 = vmatpush3.msra.mxu1 %v3985_v31 }
0x1ac8   :  { %v15786_v2 = vpop.f32.mrf.mxu0  ;;  %15817 = vmatprep.subr.mxu1 %v4156_v44 }
0x1ac9   :  { %v3788_v3 = vadd.f32 %v15786_v2, %v14302_v63 }
0x1aca   :  { %v3782_v5 = vpop.f32.mrf.mxu0 }
0x1acb   :  { %v3783_v6 = vadd.f32 %v14302_v63, %v3782_v5  ;;  %15794 = vmatprep.subr.mxu0 %v3788_v3  ;;  %v14316_v5 = vld [vmem:[#allocation2 + $0x353] ss:$0 sm:$0xff] }
0x1acc   :  { %15795 = vmatpush3.msra.mxu0 %v3788_v3 }
0x1acd   :  { %15796 = vmatprep.subr.mxu0 %v3783_v6 }
0x1ace   :  { %15797 = vmatpush3.msra.mxu0 %v3783_v6 }
0x1acf   :  { %15806 = vmatprep.subr.mxu0 %v4072_v29 }
0x1b86   :  { %v15793_v8 = vpop.f32.mrf.mxu1 }
0x1b87   :  { %v3879_v4 = vmul.f32 0.35355338, %v15793_v8 }
0x1b88   :  { %v3869_v9 = vpop.f32.mrf.mxu1 }
0x1b89   :  { %v3878_v7 = vmul.f32 0.35355338, %v3869_v9  ;;  %v3881_v10 = vadd.f32 %v17310_v20, %v3879_v4 }
0x1b8b   :  { %v3885_v11 = vsel %vm425_vm2, %v3881_v10, -inf  ;;  %v3880_v12 = vadd.f32 %v17317_v23, %v3878_v7 }
0x1b8c   :  { %3886 = vmax.xlane.f32.xlu1 %v3885_v11 }
0x1b8d   :  { %v3882_v13 = vsel %vm425_vm2, %v3880_v12, -inf }
0x1b8e   :  { %3883 = vmax.xlane.f32.xlu0 %v3882_v13 }
0x1c15   :  { %v3887_v14 = vpop.xlane.xlu1 %3886 }
0x1c16   :  { %v3889_v15 = vsub.f32 %v3881_v10, %v3887_v14 }
0x1c17   :  { %v3884_v17 = vpop.xlane.xlu0 %3883 }
0x1c18   :  { %v3892_v19 = vmul.f32 1.442695, %v3889_v15  ;;  %v3888_v21 = vsub.f32 %v3880_v12, %v3884_v17 }
0x1c1a   :  { %16854 = vpow2.f32 %v3892_v19  ;;  %v3890_v22 = vmul.f32 1.442695, %v3888_v21 }
0x1c1c   :  { %16856 = vpow2.f32 %v3890_v22 }
0x1c27   :  { %v16855_v24 = vpop.eup %16854 }
0x1c28   :  { %v3897_v25 = vsel %vm425_vm2, %v16855_v24, 0.0 }
0x1c29   :  { %v16857_v26 = vpop.eup %16856  ;;  %3898 = vadd.xlane.f32.xlu1 %v3897_v25 }
0x1c2a   :  { %v3894_v28 = vsel %vm425_vm2, %v16857_v26, 0.0 }
0x1c2b   :  { %3895 = vadd.xlane.f32.xlu0 %v3894_v28 }
0x1cb2   :  { %v3899_v30 = vpop.xlane.xlu1 %3898 }
0x1cb3   :  { %16858 = vrcp.f32 %v3899_v30 }
0x1cb4   :  { %v3896_v42 = vpop.xlane.xlu0 %3895 }
0x1cb5   :  { %16860 = vrcp.f32 %v3896_v42 }
0x1cc0   :  { %v16859_v32 = vpop.eup %16858 }
0x1cc1   :  { %v3903_v36 = vmul.f32 %v16859_v32, %v16855_v24 }
0x1cc2   :  { %v16861_v33 = vpop.eup %16860 }
0x1cc3   :  { %v3901_v34 = vmul.f32 %v16861_v33, %v16857_v26 }
0x1cc5   :  { %15798 = vmatprep.mubr.msk.f32.mxu0 %vm425_vm2, %v3901_v34 }
0x1cc6   :  { %15799 = vmatmul.mubr.msk.f32.vlgmr.msra.gmra.mxu0 %vm425_vm2, %v3903_v36  ;;  %v3531_v36 = vadd.f32 %v17359_v48, %v17373_v57  ;;  %v4876_v57 = vld [vmem:[%s18143_s0 + $0x10] sm:$0xff] }
0x1cc7   :  { %15807 = vmatpush3.msra.mxu0 %v4072_v29  ;;  %15814 = vmatprep.mubr.msk.f32.mxu0 %vm35_vm0, %v17281_v54 }
0x1cc8   :  { %15808 = vmatprep.subr.mxu0 %v4071_v1 }
0x1cc9   :  { %15809 = vmatpush3.msra.mxu0 %v4071_v1 }
0x1cca   :  { %15810 = vmatprep.subr.mxu0 %v4070_v37 }
0x1ccb   :  { %15811 = vmatpush3.msra.mxu0 %v4070_v37  ;;  %v14330_v37 = vld [vmem:[#allocation2 + $0x400] ss:$0 sm:$0xff] }
0x1ccc   :  { %15812 = vmatprep.subr.mxu0 %v4069_v39 }
0x1ccd   :  { %15813 = vmatpush3.msra.mxu0 %v4069_v39 }
0x1cce   :  { %15815 = vmatmul.mubr.msk.f32.vlgmr.msra.gmra.mxu0 %vm35_vm0, %v17283_v55  ;;  %15828 = vmatprep.subr.mxu0 %v4240_v40 }
0x1ccf   :  { %15829 = vmatpush3.msra.mxu0 %v4240_v40  ;;  %15836 = vmatprep.mubr.msk.f32.mxu0 %vm35_vm0, %v17281_v54 }
0x1cd0   :  { %15830 = vmatprep.subr.mxu0 %v4239_v0 }
0x1cd1   :  { %15831 = vmatpush3.msra.mxu0 %v4239_v0 }
0x1cd2   :  { %15832 = vmatprep.subr.mxu0 %v4238_v43 }
0x1cd3   :  { %15833 = vmatpush3.msra.mxu0 %v4238_v43 }
0x1cd4   :  { %15834 = vmatprep.subr.mxu0 %v4237_v35 }
0x1cd5   :  { %15835 = vmatpush3.msra.mxu0 %v4237_v35 }
0x1cd6   :  { %15837 = vmatmul.mubr.msk.f32.vlgmr.msra.gmra.mxu0 %vm35_vm0, %v17283_v55 }
0x1d86   :  { %v15800_v46 = vpop.f32.mrf.mxu0 }
0x1d88   :  { %v3976_v47 = vpop.f32.mrf.mxu0 }
0x1d89   :  { %15803 = vmatprep.mubr.msk.f32.mxu1 %vm333_vm1, %v3976_v47  ;;  %v4877_v47 = vld [vmem:[%s18143_s0 + $0x18] sm:$0xff] }
0x1d8a   :  { %15804 = vmatmul.mubr.msk.f32.vlgmr.msra.gmra.mxu1 %vm333_vm1, %v15800_v46 }
0x1d8b   :  { %15818 = vmatpush3.msra.mxu1 %v4156_v44  ;;  %15825 = vmatprep.mubr.msk.f32.mxu1 %vm35_vm0, %v17281_v54 }
0x1d8c   :  { %15819 = vmatprep.subr.mxu1 %v4155_v49 }
0x1d8d   :  { %15820 = vmatpush3.msra.mxu1 %v4155_v49 }
0x1d8e   :  { %v15816_v38 = vpop.f32.mrf.mxu0  ;;  %15821 = vmatprep.subr.mxu1 %v4154_v50 }
0x1d8f   :  { %v4150_v53 = vadd.f32 %v15816_v38, %v14313_v51  ;;  %15822 = vmatpush3.msra.mxu1 %v4154_v50  ;;  %v4883_v50 = vsel %vm35_vm0, %v4877_v47, 0.0 }
0x1d90   :  { %v4144_v27 = vpop.f32.mrf.mxu0  ;;  %15823 = vmatprep.subr.mxu1 %v4153_v52 }
0x1d91   :  { %v4145_v41 = vadd.f32 %v14313_v51, %v4144_v27  ;;  %15824 = vmatpush3.msra.mxu1 %v4153_v52  ;;  %v4880_v51 = vsel %vm35_vm0, %v4876_v57, 0.0 }
0x1d92   :  { %15826 = vmatmul.mubr.msk.f32.vlgmr.msra.gmra.mxu1 %vm35_vm0, %v17283_v55 }
0x1d93   :  { %15843 = vmatprep.mubr.msk.f32.mxu1 %vm333_vm1, %v4145_v41 }
0x1d96   :  { %v15838_v54 = vpop.f32.mrf.mxu0 }
0x1d97   :  { %v4318_v59 = vadd.f32 %v15838_v54, %v14319_v58 }
0x1d98   :  { %v4312_v60 = vpop.f32.mrf.mxu0 }
0x1d99   :  { %v4313_v61 = vadd.f32 %v14319_v58, %v4312_v60  ;;  %15846 = vmatprep.subr.mxu0 %v4318_v59 }
0x1d9a   :  { %15847 = vmatpush3.msra.mxu0 %v4318_v59 }
0x1d9b   :  { %15848 = vmatprep.subr.mxu0 %v4313_v61 }
0x1d9c   :  { %15849 = vmatpush3.msra.mxu0 %v4313_v61 }
0x1e4a   :  { %v15805_v63 = vpop.f32.mrf.mxu1 }
0x1e4b   :  { %v4068_v2 = vadd.f32 %v15805_v63, %v3536_v62 }
0x1e4c   :  { %v4058_v3 = vpop.f32.mrf.mxu1 }
0x1e4d   :  { %v4067_v39 = vadd.f32 %v4058_v3, %v3531_v36 }
0x1e52   :  { %v15827_v6 = vpop.f32.mrf.mxu1 }
0x1e53   :  { %v4234_v55 = vadd.f32 %v15827_v6, %v14316_v5 }
0x1e54   :  { %v4228_v8 = vpop.f32.mrf.mxu1 }
0x1e55   :  { %v4229_v4 = vadd.f32 %v14316_v5, %v4228_v8  ;;  %15839 = vmatprep.subr.msk.mxu1 %vm333_vm1, %v4234_v55 }
0x1e56   :  { %15840 = vmatpush3.xpose.msk.msra.mxu1 %vm333_vm1, %v4234_v55 }
0x1e57   :  { %15841 = vmatprep.subr.msk.mxu1 %vm333_vm1, %v4229_v4 }
0x1e5a   :  { %15842 = vmatpush3.xpose.msk.msra.mxu1 %vm333_vm1, %v4229_v4 }
0x1e5d   :  { %15844 = vmatmul.mubr.msk.f32.vlgmr.msra.gmra.mxu1 %vm333_vm1, %v4150_v53 }
0x1f1d   :  { %v15845_v9 = vpop.f32.mrf.mxu1 }
0x1f1e   :  { %v4409_v45 = vmul.f32 0.35355338, %v15845_v9  ;;  %v4651_v9 = vld [vmem:[#allocation2 + $0x428] sm:$0xff] }
0x1f1f   :  { %v4399_v56 = vpop.f32.mrf.mxu1  ;;  %15858 = vmatprep.subr.mxu0 %v4651_v9 }
0x1f20   :  { %v4408_v7 = vmul.f32 0.35355338, %v4399_v56  ;;  %v4411_v10 = vadd.f32 %v17310_v20, %v4409_v45  ;;  %v4650_v45 = vld [vmem:[#allocation2 + $0x420] sm:$0xff]  ;;  %v4649_v56 = vld [vmem:[#allocation2 + $0x418] sm:$0xff] }
0x1f22   :  { %v4415_v11 = vsel %vm425_vm2, %v4411_v10, -inf  ;;  %v4410_v12 = vadd.f32 %v17317_v23, %v4408_v7  ;;  %v4515_v23 = vld [vmem:[#allocation2 + $0x3f8] sm:$0xff]  ;;  %v4648_v7 = vld [vmem:[#allocation2 + $0x410] sm:$0xff] }
0x1f23   :  { %4416 = vmax.xlane.f32.xlu1 %v4415_v11  ;;  %15853 = vmatprep.subr.mxu1 %v4515_v23  ;;  %v4747_v11 = vld [vmem:[#allocation2 + $0x470] sm:$0xff] }
0x1f24   :  { %v4412_v13 = vsel %vm425_vm2, %v4410_v12, -inf  ;;  %15854 = vmatpush3.msra.mxu1 %v4515_v23 }
0x1f25   :  { %4413 = vmax.xlane.f32.xlu0 %v4412_v13  ;;  %15869 = vmatprep.subr.mxu1 %v4747_v11  ;;  %v4745_v13 = vld [vmem:[#allocation2 + $0x460] sm:$0xff] }
0x1fac   :  { %v4417_v14 = vpop.xlane.xlu1 %4416 }
0x1fad   :  { %v4419_v15 = vsub.f32 %v4411_v10, %v4417_v14  ;;  %v4921_v10 = vld [vmem:[#allocation2 + $0x4a8] sm:$0xff]  ;;  %v4744_v14 = vld [vmem:[#allocation2 + $0x458] sm:$0xff] }
0x1fae   :  { %v4414_v17 = vpop.xlane.xlu0 %4413 }
0x1faf   :  { %v4422_v19 = vmul.f32 1.442695, %v4419_v15  ;;  %v4418_v21 = vsub.f32 %v4410_v12, %v4414_v17  ;;  %v4746_v12 = vld [vmem:[#allocation2 + $0x468] sm:$0xff]  ;;  %v4743_v15 = vld [vmem:[#allocation2 + $0x450] sm:$0xff] }
0x1fb1   :  { %16862 = vpow2.f32 %v4422_v19  ;;  %v4420_v22 = vmul.f32 1.442695, %v4418_v21 }
0x1fb3   :  { %16864 = vpow2.f32 %v4420_v22 }
0x1fbe   :  { %v16863_v24 = vpop.eup %16862 }
0x1fbf   :  { %v4427_v25 = vsel %vm425_vm2, %v16863_v24, 0.0 }
0x1fc0   :  { %v16865_v20 = vpop.eup %16864  ;;  %4428 = vadd.xlane.f32.xlu1 %v4427_v25 }
0x1fc1   :  { %v4424_v26 = vsel %vm425_vm2, %v16865_v20, 0.0 }
0x1fc2   :  { %4425 = vadd.xlane.f32.xlu0 %v4424_v26 }
0x2049   :  { %v4429_v28 = vpop.xlane.xlu1 %4428 }
0x204a   :  { %16866 = vrcp.f32 %v4429_v28 }
0x204b   :  { %v4426_v29 = vpop.xlane.xlu0 %4425 }
0x204c   :  { %16868 = vrcp.f32 %v4426_v29 }
0x2057   :  { %v16867_v31 = vpop.eup %16866 }
0x2058   :  { %v4433_v32 = vmul.f32 %v16867_v31, %v16863_v24 }
0x2059   :  { %v16869_v30 = vpop.eup %16868 }
0x205a   :  { %v4431_v42 = vmul.f32 %v16869_v30, %v16865_v20 }
0x205c   :  { %15850 = vmatprep.mubr.msk.f32.mxu0 %vm425_vm2, %v4431_v42  ;;  %v14331_v42 = vld [vmem:[#allocation2 + $0x408] ss:$0 sm:$0xff] }
0x205d   :  { %15851 = vmatmul.mubr.msk.f32.vlgmr.msra.gmra.mxu0 %vm425_vm2, %v4433_v32 }
0x205e   :  { %15859 = vmatpush3.msra.mxu0 %v4651_v9  ;;  %v5093_v9 = vld [vmem:[#allocation2 + $0x5a8] sm:$0xff] }
0x205f   :  { %15860 = vmatprep.subr.mxu0 %v4650_v45 }
0x2060   :  { %15861 = vmatpush3.msra.mxu0 %v4650_v45  ;;  %v14343_v45 = vld [vmem:[#allocation2 + $0x510] ss:$0 sm:$0xff] }
0x2061   :  { %15862 = vmatprep.subr.mxu0 %v4649_v56 }
0x2062   :  { %15863 = vmatpush3.msra.mxu0 %v4649_v56 }
0x2063   :  { %15864 = vmatprep.subr.mxu0 %v4648_v7 }
0x2064   :  { %15865 = vmatpush3.msra.mxu0 %v4648_v7 }
0x2065   :  { %15888 = vmatprep.subr.mxu0 %v4921_v10 }
0x211d   :  { %v15852_v33 = vpop.f32.mrf.mxu0 }
0x211f   :  { %v4506_v34 = vpop.f32.mrf.mxu0 }
0x2120   :  { %15855 = vmatprep.mubr.msk.f32.mxu1 %vm333_vm1, %v4506_v34 }
0x2121   :  { %15856 = vmatmul.mubr.msk.f32.vlgmr.msra.gmra.mxu1 %vm333_vm1, %v15852_v33 }
0x2122   :  { %15870 = vmatpush3.msra.mxu1 %v4747_v11  ;;  %v14346_v11 = vld [vmem:[#allocation2 + $0x598] ss:$0 sm:$0xff] }
0x2123   :  { %15871 = vmatprep.subr.mxu1 %v4746_v12 }
0x2124   :  { %15872 = vmatpush3.msra.mxu1 %v4746_v12 }
0x2125   :  { %15873 = vmatprep.subr.mxu1 %v4745_v13 }
0x2126   :  { %15874 = vmatpush3.msra.mxu1 %v4745_v13 }
0x2127   :  { %15875 = vmatprep.subr.mxu1 %v4744_v14 }
0x2128   :  { %15876 = vmatpush3.msra.mxu1 %v4744_v14 }
0x2129   :  { %15877 = vmatprep.subr.mxu1 %v4743_v15 }
0x212a   :  { %15878 = vmatpush3.msra.mxu1 %v4743_v15 }
0x21e1   :  { %v15857_v1 = vpop.f32.mrf.mxu1 }
0x21e2   :  { %v4598_v40 = vadd.f32 %v15857_v1, %v4068_v2 }
0x21e3   :  { %v4588_v0 = vpop.f32.mrf.mxu1 }
0x21e4   :  { %v4605_v43 = vadd.f32 %v14330_v37, %v4598_v40  ;;  %v4597_v35 = vadd.f32 %v4588_v0, %v4067_v39 }
0x21e6   :  { %v17420_v44 = vadd.f32 %v4605_v43, %v17268_v16  ;;  %v4604_v46 = vadd.f32 %v14330_v37, %v4597_v35  ;;  %v14332_v37 = vld [vmem:[#allocation2 + $0x409] ss:$0 sm:$0xff]  ;;  %v14341_v35 = vld [vmem:[#allocation2 + $0x488] ss:$0 sm:$0xff] }
0x21e8   :  { %v17426_v49 = vadd.f32 %v4604_v46, %v17271_v18  ;;  %v4613_v48 = vsel %vm35_vm0, %v17420_v44, 0.0 }
0x21e9   :  { %4614 = vadd.xlane.f32.xlu1 %v4613_v48 }
0x21ea   :  { %v4610_v16 = vsel %vm35_vm0, %v17426_v49, 0.0 }
0x21eb   :  { %4611 = vadd.xlane.f32.xlu0 %v4610_v16  ;;  %v14342_v16 = vld [vmem:[#allocation2 + $0x489] ss:$0 sm:$0xff] }
0x21ed   :  { %4884 = vadd.xlane.f32.xlu1 %v4883_v50 }
0x21ef   :  { %4881 = vadd.xlane.f32.xlu0 %v4880_v51  ;;  %v4919_v51 = vld [vmem:[#allocation2 + $0x498] sm:$0xff] }
0x2272   :  { %v4615_v18 = vpop.xlane.xlu1 %4614 }
0x2273   :  { %v4617_v52 = vmul.f32 0.03125, %v4615_v18 }
0x2274   :  { %v4612_v38 = vpop.xlane.xlu0 %4611 }
0x2275   :  { %v17438_v53 = vsub.f32 %v17420_v44, %v4617_v52  ;;  %v4616_v27 = vmul.f32 0.03125, %v4612_v38  ;;  %v4918_v52 = vld [vmem:[#allocation2 + $0x490] sm:$0xff] }
0x2276   :  { %v4885_v41 = vpop.xlane.xlu1 %4884  ;;  %v5011_v38 = vld [vmem:[#allocation2 + $0x530] sm:$0xff] }
0x2277   :  { %v17441_v58 = vsub.f32 %v17426_v49, %v4616_v27  ;;  %v4887_v54 = vmul.f32 0.03125, %v4885_v41  ;;  %v4621_v59 = vmul.f32 %v17438_v53, %v17438_v53  ;;  %v5010_v27 = vld [vmem:[#allocation2 + $0x528] sm:$0xff]  ;;  %v5009_v41 = vld [vmem:[#allocation2 + $0x520] sm:$0xff] }
0x2278   :  { %v4882_v60 = vpop.xlane.xlu0 %4881 }
0x2279   :  { %v17445_v61 = vsub.f32 %v4877_v47, %v4887_v54  ;;  %v4886_v62 = vmul.f32 0.03125, %v4882_v60  ;;  %v4625_v63 = vsel %vm35_vm0, %v4621_v59, 0.0  ;;  %v4620_v2 = vmul.f32 %v17441_v58, %v17441_v58  ;;  %v4742_v54 = vld [vmem:[#allocation2 + $0x448] sm:$0xff]  ;;  %v4741_v59 = vld [vmem:[#allocation2 + $0x440] sm:$0xff]  ;;  %v4740_v60 = vld [vmem:[#allocation2 + $0x438] sm:$0xff] }
0x227a   :  { %4626 = vadd.xlane.f32.xlu1 %v4625_v63  ;;  %15879 = vmatprep.subr.mxu1 %v4742_v54 }
0x227b   :  { %v17450_v3 = vsub.f32 %v4876_v57, %v4886_v62  ;;  %v4622_v5 = vsel %vm35_vm0, %v4620_v2, 0.0  ;;  %v4891_v6 = vmul.f32 %v17445_v61, %v17445_v61  ;;  %v4920_v57 = vld [vmem:[#allocation2 + $0x4a0] sm:$0xff]  ;;  %15880 = vmatpush3.msra.mxu1 %v4742_v54  ;;  %v14333_v62 = vld [vmem:[#allocation2 + $0x430] ss:$0 sm:$0xff]  ;;  %v5374_v54 = vld [vmem:[#allocation2 + $0x4c8] sm:$0xff] }
0x227c   :  { %4623 = vadd.xlane.f32.xlu0 %v4622_v5  ;;  %15881 = vmatprep.subr.mxu1 %v4741_v59 }
0x227d   :  { %v4895_v55 = vsel %vm35_vm0, %v4891_v6, 0.0  ;;  %v4890_v8 = vmul.f32 %v17450_v3, %v17450_v3  ;;  %15882 = vmatpush3.msra.mxu1 %v4741_v59 }
0x227e   :  { %4896 = vadd.xlane.f32.xlu1 %v4895_v55  ;;  %15883 = vmatprep.subr.mxu1 %v4740_v60 }
0x227f   :  { %v4892_v4 = vsel %vm35_vm0, %v4890_v8, 0.0  ;;  %15884 = vmatpush3.msra.mxu1 %v4740_v60  ;;  %v5094_v8 = vld [vmem:[#allocation2 + $0x5b0] sm:$0xff] }
0x2280   :  { %4893 = vadd.xlane.f32.xlu0 %v4892_v4 }
0x2303   :  { %v4627_v17 = vpop.xlane.xlu1 %4626 }
0x2304   :  { %v4629_v19 = vmul.f32 0.03125, %v4627_v17  ;;  %v5458_v17 = vld [vmem:[#allocation2 + $0x550] sm:$0xff] }
0x2305   :  { %v4624_v21 = vpop.xlane.xlu0 %4623 }
0x2306   :  { %v4631_v22 = vadd.f32 1e-05, %v4629_v19  ;;  %v4628_v24 = vmul.f32 0.03125, %v4624_v21  ;;  %v5457_v21 = vld [vmem:[#allocation2 + $0x548] sm:$0xff] }
0x2307   :  { %v4897_v25 = vpop.xlane.xlu1 %4896 }
0x2308   :  { %16870 = vrsqrt.f32 %v4631_v22  ;;  %v4630_v20 = vadd.f32 1e-05, %v4628_v24  ;;  %v4899_v26 = vmul.f32 0.03125, %v4897_v25  ;;  %v5456_v22 = vld [vmem:[#allocation2 + $0x540] sm:$0xff]  ;;  %v5455_v24 = vld [vmem:[#allocation2 + $0x538] sm:$0xff] }
0x2309   :  { %v4894_v23 = vpop.xlane.xlu0 %4893 }
0x230a   :  { %16872 = vrsqrt.f32 %v4630_v20  ;;  %v4901_v28 = vadd.f32 1e-05, %v4899_v26  ;;  %v4898_v29 = vmul.f32 0.03125, %v4894_v23  ;;  %v14349_v26 = vld [vmem:[#allocation2 + $0x620] ss:$0 sm:$0xff] }
0x230c   :  { %v4900_v31 = vadd.f32 1e-05, %v4898_v29  ;;  %16874 = vrsqrt.f32 %v4901_v28 }
0x230e   :  { %16876 = vrsqrt.f32 %v4900_v31 }
0x2315   :  { %v16871_v30 = vpop.eup %16870 }
0x2316   :  { %v4635_v32 = vmul.f32 %v16871_v30, %v17438_v53 }
0x2317   :  { %v16873_v33 = vpop.eup %16872 }
0x2318   :  { %v4634_v34 = vmul.f32 %v16873_v33, %v17441_v58  ;;  %v4641_v36 = vmul.f32 %v14331_v42, %v4635_v32  ;;  %v5008_v58 = vld [vmem:[#allocation2 + $0x518] sm:$0xff] }
0x2319   :  { %v16875_v1 = vpop.eup %16874 }
0x231a   :  { %v4640_v39 = vmul.f32 %v14331_v42, %v4634_v34  ;;  %v4905_v46 = vmul.f32 %v16875_v1, %v17445_v61  ;;  %v4647_v47 = vadd.f32 %v14332_v37, %v4641_v36  ;;  %v5095_v61 = vld [vmem:[#allocation2 + $0x5b8] sm:$0xff]  ;;  %v17505_v34 = vld [vmem:[%s18143_s0 + $0x30] sm:$0xff] }
0x231b   :  { %v16877_v40 = vpop.eup %16876  ;;  %15910 = vmatprep.subr.mxu1 %v5095_v61  ;;  %v17500_v42 = vld [vmem:[%s18143_s0 + $0x38] sm:$0xff] }
0x231c   :  { %v4904_v0 = vmul.f32 %v16877_v40, %v17450_v3  ;;  %v4646_v43 = vadd.f32 %v14332_v37, %v4640_v39  ;;  %v4911_v18 = vmul.f32 %v14341_v35, %v4905_v46  ;;  %v14361_v40 = vld [vmem:[#allocation2 + $0x599] ss:$0 sm:$0xff] }
0x231e   :  { %v4910_v48 = vmul.f32 %v14341_v35, %v4904_v0  ;;  %15866 = vmatprep.mubr.msk.f32.mxu0 %vm35_vm0, %v4646_v43  ;;  %v17469_v53 = vadd.f32 %v14342_v16, %v4911_v18 }
0x231f   :  { %15867 = vmatmul.mubr.msk.f32.vlgmr.msra.gmra.mxu0 %vm35_vm0, %v4647_v47 }
0x2320   :  { %v17465_v50 = vadd.f32 %v14342_v16, %v4910_v48  ;;  %15889 = vmatpush3.msra.mxu0 %v4921_v10  ;;  %v5092_v10 = vld [vmem:[#allocation2 + $0x5a0] sm:$0xff] }
0x2321   :  { %15890 = vmatprep.subr.mxu0 %v4920_v57 }
0x2322   :  { %15891 = vmatpush3.msra.mxu0 %v4920_v57  ;;  %15896 = vmatprep.mubr.msk.f32.mxu0 %vm35_vm0, %v17465_v50 }
0x2323   :  { %15892 = vmatprep.subr.mxu0 %v4919_v51 }
0x2324   :  { %15893 = vmatpush3.msra.mxu0 %v4919_v51 }
0x2325   :  { %15894 = vmatprep.subr.mxu0 %v4918_v52 }
0x2326   :  { %15895 = vmatpush3.msra.mxu0 %v4918_v52 }
0x2327   :  { %15897 = vmatmul.mubr.msk.f32.vlgmr.msra.gmra.mxu0 %vm35_vm0, %v17469_v53  ;;  %15899 = vmatprep.subr.mxu0 %v5011_v38 }
0x2328   :  { %15900 = vmatpush3.msra.mxu0 %v5011_v38  ;;  %15907 = vmatprep.mubr.msk.f32.mxu0 %vm35_vm0, %v17465_v50 }
0x2329   :  { %15901 = vmatprep.subr.mxu0 %v5010_v27 }
0x232a   :  { %15902 = vmatpush3.msra.mxu0 %v5010_v27 }
0x232b   :  { %15903 = vmatprep.subr.mxu0 %v5009_v41 }
0x232c   :  { %15904 = vmatpush3.msra.mxu0 %v5009_v41 }
0x232d   :  { %15905 = vmatprep.subr.mxu0 %v5008_v58 }
0x232e   :  { %15906 = vmatpush3.msra.mxu0 %v5008_v58 }
0x232f   :  { %15908 = vmatmul.mubr.msk.f32.vlgmr.msra.gmra.mxu0 %vm35_vm0, %v17469_v53 }
0x23df   :  { %v15868_v63 = vpop.f32.mrf.mxu0 }
0x23e0   :  { %v4735_v2 = vadd.f32 %v15868_v63, %v14333_v62 }
0x23e1   :  { %v4729_v3 = vpop.f32.mrf.mxu0 }
0x23e2   :  { %v4730_v5 = vadd.f32 %v14333_v62, %v4729_v3  ;;  %v4739_v55 = vmax.f32 %v4735_v2, 0.0  ;;  %v5373_v3 = vld [vmem:[#allocation2 + $0x4c0] sm:$0xff] }
0x23e4   :  { %v4738_v6 = vmax.f32 %v4730_v5, 0.0  ;;  %v5372_v5 = vld [vmem:[#allocation2 + $0x4b8] sm:$0xff] }
0x23e6   :  { %15885 = vmatprep.mubr.msk.f32.mxu1 %vm2353_vm3, %v4738_v6  ;;  %v5371_v6 = vld [vmem:[#allocation2 + $0x4b0] sm:$0xff] }
0x23e7   :  { %v15898_v4 = vpop.f32.mrf.mxu0  ;;  %15886 = vmatmul.mubr.msk.f32.vlgmr.msra.gmra.mxu1 %vm2353_vm3, %v4739_v55  ;;  %v5542_v55 = vld [vmem:[#allocation2 + $0x5d8] sm:$0xff] }
0x23e8   :  { %15911 = vmatpush3.msra.mxu1 %v5095_v61  ;;  %15918 = vmatprep.mubr.msk.f32.mxu1 %vm35_vm0, %v17465_v50  ;;  %v5005_v19 = vadd.f32 %v15898_v4, %v14343_v45  ;;  %v5540_v4 = vld [vmem:[#allocation2 + $0x5c8] sm:$0xff] }
0x23e9   :  { %v4999_v56 = vpop.f32.mrf.mxu0  ;;  %15912 = vmatprep.subr.mxu1 %v5094_v8 }
0x23ea   :  { %v5000_v7 = vadd.f32 %v14343_v45, %v4999_v56  ;;  %15913 = vmatpush3.msra.mxu1 %v5094_v8  ;;  %v5541_v8 = vld [vmem:[#allocation2 + $0x5d0] sm:$0xff] }
0x23eb   :  { %15914 = vmatprep.subr.mxu1 %v5093_v9 }
0x23ec   :  { %15915 = vmatpush3.msra.mxu1 %v5093_v9  ;;  %15925 = vmatprep.mubr.msk.f32.mxu0 %vm333_vm1, %v5000_v7  ;;  %v5539_v9 = vld [vmem:[#allocation2 + $0x5c0] sm:$0xff] }
0x23ed   :  { %15916 = vmatprep.subr.mxu1 %v5092_v10 }
0x23ee   :  { %15917 = vmatpush3.msra.mxu1 %v5092_v10  ;;  %v14358_v10 = vld [vmem:[#allocation2 + $0x511] ss:$0 sm:$0xff] }
0x23ef   :  { %v15909_v12 = vpop.f32.mrf.mxu0  ;;  %15919 = vmatmul.mubr.msk.f32.vlgmr.msra.gmra.mxu1 %vm35_vm0, %v17469_v53 }
0x23f0   :  { %v5089_v13 = vadd.f32 %v15909_v12, %v14346_v11 }
0x23f1   :  { %v5083_v14 = vpop.f32.mrf.mxu0 }
0x23f2   :  { %v5084_v15 = vadd.f32 %v14346_v11, %v5083_v14  ;;  %15921 = vmatprep.subr.msk.mxu0 %vm333_vm1, %v5089_v13  ;;  %v14364_v14 = vld [vmem:[#allocation2 + $0x621] ss:$0 sm:$0xff] }
0x23f3   :  { %15922 = vmatpush3.xpose.msk.msra.mxu0 %vm333_vm1, %v5089_v13 }
0x23f4   :  { %15923 = vmatprep.subr.msk.mxu0 %vm333_vm1, %v5084_v15 }
0x23f7   :  { %15924 = vmatpush3.xpose.msk.msra.mxu0 %vm333_vm1, %v5084_v15 }
0x23f8   :  { %15946 = vmatprep.subr.mxu0 %v5458_v17 }
0x23fa   :  { %15926 = vmatmul.mubr.msk.f32.vlgmr.msra.gmra.mxu0 %vm333_vm1, %v5005_v19 }
0x23fb   :  { %15947 = vmatpush3.msra.mxu0 %v5458_v17  ;;  %15954 = vmatprep.mubr.msk.f32.mxu0 %vm35_vm0, %v17465_v50 }
0x23fc   :  { %15948 = vmatprep.subr.mxu0 %v5457_v21 }
0x23fd   :  { %15949 = vmatpush3.msra.mxu0 %v5457_v21 }
0x23fe   :  { %15950 = vmatprep.subr.mxu0 %v5456_v22 }
0x23ff   :  { %15951 = vmatpush3.msra.mxu0 %v5456_v22 }
0x2400   :  { %15952 = vmatprep.subr.mxu0 %v5455_v24 }
0x2401   :  { %15953 = vmatpush3.msra.mxu0 %v5455_v24 }
0x2402   :  { %15955 = vmatmul.mubr.msk.f32.vlgmr.msra.gmra.mxu0 %vm35_vm0, %v17469_v53 }
0x24a7   :  { %v17493_v25 = vpop.f32.mrf.mxu1 }
0x24a9   :  { %v17495_v20 = vpop.f32.mrf.mxu1 }
0x24af   :  { %v15920_v23 = vpop.f32.mrf.mxu1 }
0x24b0   :  { %v5173_v28 = vadd.f32 %v15920_v23, %v14349_v26 }
0x24b1   :  { %v5167_v29 = vpop.f32.mrf.mxu1 }
0x24b2   :  { %v5168_v31 = vadd.f32 %v14349_v26, %v5167_v29  ;;  %15928 = vmatprep.subr.mxu1 %v5173_v28 }
0x24b3   :  { %15929 = vmatpush3.msra.mxu1 %v5173_v28 }
0x24b4   :  { %15930 = vmatprep.subr.mxu1 %v5168_v31 }
0x24b5   :  { %15931 = vmatpush3.msra.mxu1 %v5168_v31 }
0x24b6   :  { %15935 = vmatprep.subr.mxu1 %v5374_v54 }
0x24ba   :  { %v15927_v30 = vpop.f32.mrf.mxu0 }
0x24bb   :  { %v5264_v32 = vmul.f32 0.35355338, %v15927_v30 }
0x24bc   :  { %v5254_v33 = vpop.f32.mrf.mxu0 }
0x24bd   :  { %v5263_v36 = vmul.f32 0.35355338, %v5254_v33  ;;  %v5266_v1 = vadd.f32 %v5264_v32, %v17500_v42 }
0x24bf   :  { %v5270_v37 = vsel %vm425_vm2, %v5266_v1, -inf  ;;  %v5265_v39 = vadd.f32 %v5263_v36, %v17505_v34 }
0x24c0   :  { %5271 = vmax.xlane.f32.xlu1 %v5270_v37 }
0x24c1   :  { %v5267_v0 = vsel %vm425_vm2, %v5265_v39, -inf }
0x24c2   :  { %v15956_v43 = vpop.f32.mrf.mxu0  ;;  %5268 = vmax.xlane.f32.xlu0 %v5267_v0 }
0x24c3   :  { %v5536_v35 = vadd.f32 %v15956_v43, %v14361_v40 }
0x24c4   :  { %v5530_v46 = vpop.f32.mrf.mxu0 }
0x24c5   :  { %v5531_v47 = vadd.f32 %v14361_v40, %v5530_v46  ;;  %15968 = vmatprep.subr.msk.mxu0 %vm333_vm1, %v5536_v35  ;;  %v5370_v46 = vld [vmem:[#allocation2 + $0x628] sm:$0xff] }
0x24c6   :  { %15969 = vmatpush3.xpose.msk.msra.mxu0 %vm333_vm1, %v5536_v35 }
0x24c7   :  { %15970 = vmatprep.subr.msk.mxu0 %vm333_vm1, %v5531_v47 }
0x24ca   :  { %15971 = vmatpush3.xpose.msk.msra.mxu0 %vm333_vm1, %v5531_v47  ;;  %v5817_v47 = vld [vmem:[#allocation2 + $0x630] sm:$0xff] }
0x24cb   :  { %15982 = vmatprep.subr.mxu0 %v5817_v47 }
0x2549   :  { %v5272_v48 = vpop.xlane.xlu1 %5271 }
0x254a   :  { %v5274_v57 = vsub.f32 %v5266_v1, %v5272_v48 }
0x254b   :  { %v5269_v16 = vpop.xlane.xlu0 %5268 }
0x254c   :  { %v5277_v51 = vmul.f32 1.442695, %v5274_v57  ;;  %v5273_v18 = vsub.f32 %v5265_v39, %v5269_v16 }
0x254e   :  { %16878 = vpow2.f32 %v5277_v51  ;;  %v5275_v52 = vmul.f32 1.442695, %v5273_v18 }
0x2550   :  { %16880 = vpow2.f32 %v5275_v52 }
0x255b   :  { %v16879_v38 = vpop.eup %16878 }
0x255c   :  { %v5282_v27 = vsel %vm425_vm2, %v16879_v38, 0.0 }
0x255d   :  { %v16881_v41 = vpop.eup %16880  ;;  %5283 = vadd.xlane.f32.xlu1 %v5282_v27  ;;  %v6066_v27 = vld [vmem:[#allocation2 + $0x568] sm:$0xff] }
0x255e   :  { %v5279_v58 = vsel %vm425_vm2, %v16881_v41, 0.0 }
0x255f   :  { %5280 = vadd.xlane.f32.xlu0 %v5279_v58  ;;  %v6064_v58 = vld [vmem:[#allocation2 + $0x558] sm:$0xff] }
0x25e6   :  { %v5284_v59 = vpop.xlane.xlu1 %5283 }
0x25e7   :  { %16882 = vrcp.f32 %v5284_v59 }
0x25e8   :  { %v5281_v60 = vpop.xlane.xlu0 %5280 }
0x25e9   :  { %16884 = vrcp.f32 %v5281_v60 }
0x25f4   :  { %v16883_v61 = vpop.eup %16882 }
0x25f5   :  { %v5288_v2 = vmul.f32 %v16883_v61, %v16879_v38  ;;  %v6067_v38 = vld [vmem:[#allocation2 + $0x570] sm:$0xff]  ;;  %v5982_v61 = vld [vmem:[#allocation2 + $0x4e0] sm:$0xff] }
0x25f6   :  { %v16885_v62 = vpop.eup %16884 }
0x25f7   :  { %v5286_v63 = vmul.f32 %v16885_v62, %v16881_v41  ;;  %v6065_v41 = vld [vmem:[#allocation2 + $0x560] sm:$0xff]  ;;  %v5981_v62 = vld [vmem:[#allocation2 + $0x4d8] sm:$0xff] }
0x25f9   :  { %15932 = vmatprep.mubr.msk.f32.mxu1 %vm425_vm2, %v5286_v63 }
0x25fa   :  { %15933 = vmatmul.mubr.msk.f32.vlgmr.msra.gmra.mxu1 %vm425_vm2, %v5288_v2  ;;  %v5980_v2 = vld [vmem:[#allocation2 + $0x4d0] sm:$0xff] }
0x25fb   :  { %15936 = vmatpush3.msra.mxu1 %v5374_v54  ;;  %15943 = vmatprep.mubr.msk.f32.mxu1 %vm35_vm0, %v17465_v50  ;;  %v5983_v54 = vld [vmem:[#allocation2 + $0x4e8] sm:$0xff] }
0x25fc   :  { %15937 = vmatprep.subr.mxu1 %v5373_v3 }
0x25fd   :  { %15938 = vmatpush3.msra.mxu1 %v5373_v3  ;;  %v6151_v3 = vld [vmem:[#allocation2 + $0x5f8] sm:$0xff] }
0x25fe   :  { %15939 = vmatprep.subr.mxu1 %v5372_v5 }
0x25ff   :  { %15940 = vmatpush3.msra.mxu1 %v5372_v5 }
0x2600   :  { %15941 = vmatprep.subr.mxu1 %v5371_v6 }
0x2601   :  { %15942 = vmatpush3.msra.mxu1 %v5371_v6  ;;  %v14380_v6 = vld [vmem:[#allocation2 + $0x59a] ss:$0 sm:$0xff] }
0x2602   :  { %15944 = vmatmul.mubr.msk.f32.vlgmr.msra.gmra.mxu1 %vm35_vm0, %v17469_v53  ;;  %15957 = vmatprep.subr.mxu1 %v5542_v55 }
0x2603   :  { %15958 = vmatpush3.msra.mxu1 %v5542_v55  ;;  %15965 = vmatprep.mubr.msk.f32.mxu1 %vm35_vm0, %v17465_v50  ;;  %v6150_v55 = vld [vmem:[#allocation2 + $0x5f0] sm:$0xff] }
0x2604   :  { %15959 = vmatprep.subr.mxu1 %v5541_v8 }
0x2605   :  { %15960 = vmatpush3.msra.mxu1 %v5541_v8 }
0x2606   :  { %15961 = vmatprep.subr.mxu1 %v5540_v4 }
0x2607   :  { %15962 = vmatpush3.msra.mxu1 %v5540_v4 }
0x2608   :  { %15963 = vmatprep.subr.mxu1 %v5539_v9 }
0x2609   :  { %15964 = vmatpush3.msra.mxu1 %v5539_v9  ;;  %v6149_v9 = vld [vmem:[#allocation2 + $0x5e8] sm:$0xff] }
0x260a   :  { %15966 = vmatmul.mubr.msk.f32.vlgmr.msra.gmra.mxu1 %vm35_vm0, %v17469_v53 }
0x26ba   :  { %v15934_v45 = vpop.f32.mrf.mxu1 }
0x26bc   :  { %v5361_v56 = vpop.f32.mrf.mxu1 }
0x26c2   :  { %v15945_v7 = vpop.f32.mrf.mxu1 }
0x26c3   :  { %v5452_v13 = vadd.f32 %v15945_v7, %v14358_v10  ;;  %v6148_v7 = vld [vmem:[#allocation2 + $0x5e0] sm:$0xff] }
0x26c4   :  { %v5446_v11 = vpop.f32.mrf.mxu1 }
0x26c5   :  { %v5447_v12 = vadd.f32 %v14358_v10, %v5446_v11 }
0x26c7   :  { %15972 = vmatprep.mubr.msk.f32.mxu0 %vm333_vm1, %v5447_v12 }
0x26c8   :  { %15973 = vmatmul.mubr.msk.f32.vlgmr.msra.gmra.mxu0 %vm333_vm1, %v5452_v13  ;;  %v14377_v13 = vld [vmem:[#allocation2 + $0x512] ss:$0 sm:$0xff] }
0x26c9   :  { %15983 = vmatpush3.msra.mxu0 %v5817_v47 }
0x26ca   :  { %v15967_v15 = vpop.f32.mrf.mxu1  ;;  %15992 = vmatprep.subr.mxu0 %v5983_v54 }
0x26cb   :  { %v5620_v17 = vadd.f32 %v15967_v15, %v14364_v14 }
0x26cc   :  { %v5614_v19 = vpop.f32.mrf.mxu1 }
0x26cd   :  { %v5615_v21 = vadd.f32 %v14364_v14, %v5614_v19  ;;  %15975 = vmatprep.subr.mxu1 %v5620_v17  ;;  %v14383_v19 = vld [vmem:[#allocation2 + $0x622] ss:$0 sm:$0xff] }
0x26ce   :  { %15976 = vmatpush3.msra.mxu1 %v5620_v17 }
0x26cf   :  { %15977 = vmatprep.subr.mxu1 %v5615_v21 }
0x26d0   :  { %15978 = vmatpush3.msra.mxu1 %v5615_v21 }
0x26d1   :  { %15987 = vmatprep.subr.mxu1 %v5370_v46 }
0x2788   :  { %v15974_v22 = vpop.f32.mrf.mxu0 }
0x2789   :  { %v5711_v24 = vmul.f32 0.35355338, %v15974_v22 }
0x278a   :  { %v5701_v26 = vpop.f32.mrf.mxu0 }
0x278b   :  { %v5710_v23 = vmul.f32 0.35355338, %v5701_v26  ;;  %v5713_v28 = vadd.f32 %v5711_v24, %v17500_v42 }
0x278d   :  { %v5717_v29 = vsel %vm425_vm2, %v5713_v28, -inf  ;;  %v5712_v31 = vadd.f32 %v5710_v23, %v17505_v34 }
0x278e   :  { %5718 = vmax.xlane.f32.xlu1 %v5717_v29 }
0x278f   :  { %v5714_v30 = vsel %vm425_vm2, %v5712_v31, -inf }
0x2790   :  { %5715 = vmax.xlane.f32.xlu0 %v5714_v30 }
0x2817   :  { %v5719_v32 = vpop.xlane.xlu1 %5718 }
0x2818   :  { %v5721_v33 = vsub.f32 %v5713_v28, %v5719_v32 }
0x2819   :  { %v5716_v36 = vpop.xlane.xlu0 %5715 }
0x281a   :  { %v5724_v1 = vmul.f32 1.442695, %v5721_v33  ;;  %v5720_v37 = vsub.f32 %v5712_v31, %v5716_v36 }
0x281c   :  { %16886 = vpow2.f32 %v5724_v1  ;;  %v5722_v39 = vmul.f32 1.442695, %v5720_v37 }
0x281e   :  { %16888 = vpow2.f32 %v5722_v39 }
0x2829   :  { %v16887_v40 = vpop.eup %16886 }
0x282a   :  { %v5729_v0 = vsel %vm425_vm2, %v16887_v40, 0.0 }
0x282b   :  { %v16889_v43 = vpop.eup %16888  ;;  %5730 = vadd.xlane.f32.xlu1 %v5729_v0 }
0x282c   :  { %v5726_v35 = vsel %vm425_vm2, %v16889_v43, 0.0 }
0x282d   :  { %5727 = vadd.xlane.f32.xlu0 %v5726_v35 }
0x28b4   :  { %v5731_v48 = vpop.xlane.xlu1 %5730 }
0x28b5   :  { %16890 = vrcp.f32 %v5731_v48 }
0x28b6   :  { %v5728_v57 = vpop.xlane.xlu0 %5727 }
0x28b7   :  { %16892 = vrcp.f32 %v5728_v57  ;;  %v6513_v57 = vld [vmem:[#allocation2 + $0x508] sm:$0xff] }
0x28c2   :  { %v16891_v16 = vpop.eup %16890 }
0x28c3   :  { %v5735_v52 = vmul.f32 %v16891_v16, %v16887_v40  ;;  %v6426_v16 = vld [vmem:[#allocation2 + $0x638] sm:$0xff] }
0x28c4   :  { %v16893_v51 = vpop.eup %16892 }
0x28c5   :  { %v5733_v18 = vmul.f32 %v16893_v51, %v16889_v43 }
0x28c7   :  { %15979 = vmatprep.mubr.msk.f32.mxu1 %vm425_vm2, %v5733_v18 }
0x28c8   :  { %15980 = vmatmul.mubr.msk.f32.vlgmr.msra.gmra.mxu1 %vm425_vm2, %v5735_v52 }
0x28c9   :  { %15989 = vmatprep.mubr.msk.f32.mxu1 %vm333_vm1, %v5361_v56  ;;  %15988 = vmatpush3.msra.mxu1 %v5370_v46 }
0x28ca   :  { %16003 = vmatprep.subr.mxu1 %v6067_v38 }
0x28cc   :  { %15990 = vmatmul.mubr.msk.f32.vlgmr.msra.gmra.mxu1 %vm333_vm1, %v15934_v45 }
0x28cd   :  { %16004 = vmatpush3.msra.mxu1 %v6067_v38  ;;  %16011 = vmatprep.mubr.msk.f32.mxu1 %vm35_vm0, %v17465_v50 }
0x28ce   :  { %16005 = vmatprep.subr.mxu1 %v6066_v27 }
0x28cf   :  { %16006 = vmatpush3.msra.mxu1 %v6066_v27 }
0x28d0   :  { %16007 = vmatprep.subr.mxu1 %v6065_v41 }
0x28d1   :  { %16008 = vmatpush3.msra.mxu1 %v6065_v41 }
0x28d2   :  { %16009 = vmatprep.subr.mxu1 %v6064_v58 }
0x28d3   :  { %16010 = vmatpush3.msra.mxu1 %v6064_v58  ;;  %v6512_v58 = vld [vmem:[#allocation2 + $0x500] sm:$0xff] }
0x28d4   :  { %16012 = vmatmul.mubr.msk.f32.vlgmr.msra.gmra.mxu1 %vm35_vm0, %v17469_v53 }
0x2988   :  { %v15981_v59 = vpop.f32.mrf.mxu1 }
0x298a   :  { %v5808_v60 = vpop.f32.mrf.mxu1 }
0x298b   :  { %15984 = vmatprep.mubr.msk.f32.mxu0 %vm333_vm1, %v5808_v60  ;;  %v6681_v60 = vld [vmem:[#allocation2 + $0x618] sm:$0xff] }
0x298c   :  { %15985 = vmatmul.mubr.msk.f32.vlgmr.msra.gmra.mxu0 %vm333_vm1, %v15981_v59  ;;  %v17547_v63 = vpop.f32.mrf.mxu1  ;;  %v6510_v59 = vld [vmem:[#allocation2 + $0x4f0] sm:$0xff] }
0x298d   :  { %15993 = vmatpush3.msra.mxu0 %v5983_v54  ;;  %16000 = vmatprep.mubr.msk.f32.mxu0 %vm35_vm0, %v17465_v50  ;;  %v6511_v54 = vld [vmem:[#allocation2 + $0x4f8] sm:$0xff] }
0x298e   :  { %15994 = vmatprep.subr.mxu0 %v5982_v61  ;;  %v17549_v5 = vpop.f32.mrf.mxu1 }
0x298f   :  { %15995 = vmatpush3.msra.mxu0 %v5982_v61  ;;  %v6680_v61 = vld [vmem:[#allocation2 + $0x610] sm:$0xff] }
0x2990   :  { %15996 = vmatprep.subr.mxu0 %v5981_v62 }
0x2991   :  { %15997 = vmatpush3.msra.mxu0 %v5981_v62  ;;  %v6679_v62 = vld [vmem:[#allocation2 + $0x608] sm:$0xff] }
0x2992   :  { %15998 = vmatprep.subr.mxu0 %v5980_v2 }
0x2993   :  { %15999 = vmatpush3.msra.mxu0 %v5980_v2  ;;  %v6678_v2 = vld [vmem:[#allocation2 + $0x600] sm:$0xff] }
0x2994   :  { %16001 = vmatmul.mubr.msk.f32.vlgmr.msra.gmra.mxu0 %vm35_vm0, %v17469_v53  ;;  %v16013_v8 = vpop.f32.mrf.mxu1  ;;  %16014 = vmatprep.subr.mxu0 %v6151_v3 }
0x2995   :  { %v6145_v4 = vadd.f32 %v16013_v8, %v14380_v6  ;;  %16015 = vmatpush3.msra.mxu0 %v6151_v3  ;;  %16022 = vmatprep.mubr.msk.f32.mxu0 %vm35_vm0, %v17465_v50  ;;  %v6597_v3 = vld [vmem:[#allocation2 + $0x590] sm:$0xff]  ;;  %v6596_v8 = vld [vmem:[#allocation2 + $0x588] sm:$0xff] }
0x2996   :  { %v6139_v45 = vpop.f32.mrf.mxu1  ;;  %16016 = vmatprep.subr.mxu0 %v6150_v55 }
0x2997   :  { %v6140_v56 = vadd.f32 %v14380_v6, %v6139_v45  ;;  %16017 = vmatpush3.msra.mxu0 %v6150_v55  ;;  %16025 = vmatprep.subr.msk.mxu1 %vm333_vm1, %v6145_v4  ;;  %v6594_v45 = vld [vmem:[#allocation2 + $0x578] sm:$0xff] }
0x2998   :  { %16018 = vmatprep.subr.mxu0 %v6149_v9  ;;  %16026 = vmatpush3.xpose.msk.msra.mxu1 %vm333_vm1, %v6145_v4  ;;  %v6595_v4 = vld [vmem:[#allocation2 + $0x580] sm:$0xff] }
0x2999   :  { %16019 = vmatpush3.msra.mxu0 %v6149_v9  ;;  %16027 = vmatprep.subr.msk.mxu1 %vm333_vm1, %v6140_v56  ;;  %v14394_v9 = vld [vmem:[#allocation2 + $0x513] ss:$0 sm:$0xff] }
0x299a   :  { %16020 = vmatprep.subr.mxu0 %v6148_v7 }
0x299b   :  { %16021 = vmatpush3.msra.mxu0 %v6148_v7 }
0x299c   :  { %16023 = vmatmul.mubr.msk.f32.vlgmr.msra.gmra.mxu0 %vm35_vm0, %v17469_v53  ;;  %16028 = vmatpush3.xpose.msk.msra.mxu1 %vm333_vm1, %v6140_v56 }
0x299d   :  { %16039 = vmatprep.subr.mxu1 %v6426_v16 }
0x2a4c   :  { %v17561_v10 = vpop.f32.mrf.mxu0 }
0x2a4e   :  { %v17563_v11 = vpop.f32.mrf.mxu0 }
0x2a54   :  { %v16002_v12 = vpop.f32.mrf.mxu0 }
0x2a55   :  { %v6061_v17 = vadd.f32 %v16002_v12, %v14377_v13 }
0x2a56   :  { %v6055_v14 = vpop.f32.mrf.mxu0 }
0x2a57   :  { %v6056_v15 = vadd.f32 %v14377_v13, %v6055_v14  ;;  %v14400_v14 = vld [vmem:[#allocation2 + $0x623] ss:$0 sm:$0xff] }
0x2a59   :  { %16029 = vmatprep.mubr.msk.f32.mxu1 %vm333_vm1, %v6056_v15 }
0x2a5a   :  { %16030 = vmatmul.mubr.msk.f32.vlgmr.msra.gmra.mxu1 %vm333_vm1, %v6061_v17 }
0x2a5b   :  { %16040 = vmatpush3.msra.mxu1 %v6426_v16 }
0x2a5c   :  { %v16024_v21 = vpop.f32.mrf.mxu0  ;;  %16055 = vmatprep.subr.mxu1 %v6597_v3 }
0x2a5d   :  { %v6229_v22 = vadd.f32 %v16024_v21, %v14383_v19  ;;  %v5977_v21 = vadd.f32 %v17547_v63, %v17561_v10 }
0x2a5e   :  { %v6223_v24 = vpop.f32.mrf.mxu0 }
0x2a5f   :  { %v6224_v26 = vadd.f32 %v14383_v19, %v6223_v24  ;;  %16032 = vmatprep.subr.mxu0 %v6229_v22  ;;  %v5972_v24 = vadd.f32 %v17549_v5, %v17563_v11 }
0x2a60   :  { %16033 = vmatpush3.msra.mxu0 %v6229_v22 }
0x2a61   :  { %16034 = vmatprep.subr.mxu0 %v6224_v26 }
0x2a62   :  { %16035 = vmatpush3.msra.mxu0 %v6224_v26 }
0x2a63   :  { %16044 = vmatprep.subr.mxu0 %v6513_v57 }
0x2b1a   :  { %v16031_v23 = vpop.f32.mrf.mxu1 }
0x2b1b   :  { %v6320_v28 = vmul.f32 0.35355338, %v16031_v23 }
0x2b1c   :  { %v6310_v29 = vpop.f32.mrf.mxu1 }
0x2b1d   :  { %v6319_v31 = vmul.f32 0.35355338, %v6310_v29  ;;  %v6322_v30 = vadd.f32 %v6320_v28, %v17500_v42  ;;  %v14397_v28 = vld [vmem:[#allocation2 + $0x59b] ss:$0 sm:$0xff] }
0x2b1f   :  { %v6326_v32 = vsel %vm425_vm2, %v6322_v30, -inf  ;;  %v6321_v33 = vadd.f32 %v6319_v31, %v17505_v34 }
0x2b20   :  { %6327 = vmax.xlane.f32.xlu1 %v6326_v32 }
0x2b21   :  { %v6323_v36 = vsel %vm425_vm2, %v6321_v33, -inf }
0x2b22   :  { %6324 = vmax.xlane.f32.xlu0 %v6323_v36 }
0x2ba9   :  { %v6328_v1 = vpop.xlane.xlu1 %6327 }
0x2baa   :  { %v6330_v37 = vsub.f32 %v6322_v30, %v6328_v1 }
0x2bab   :  { %v6325_v39 = vpop.xlane.xlu0 %6324 }
0x2bac   :  { %v6333_v40 = vmul.f32 1.442695, %v6330_v37  ;;  %v6329_v0 = vsub.f32 %v6321_v33, %v6325_v39 }
0x2bae   :  { %16894 = vpow2.f32 %v6333_v40  ;;  %v6331_v43 = vmul.f32 1.442695, %v6329_v0 }
0x2bb0   :  { %16896 = vpow2.f32 %v6331_v43 }
0x2bbb   :  { %v16895_v35 = vpop.eup %16894 }
0x2bbc   :  { %v6338_v46 = vsel %vm425_vm2, %v16895_v35, 0.0 }
0x2bbd   :  { %v16897_v47 = vpop.eup %16896  ;;  %6339 = vadd.xlane.f32.xlu1 %v6338_v46 }
0x2bbe   :  { %v6335_v48 = vsel %vm425_vm2, %v16897_v47, 0.0 }
0x2bbf   :  { %6336 = vadd.xlane.f32.xlu0 %v6335_v48 }
0x2c46   :  { %v6340_v51 = vpop.xlane.xlu1 %6339 }
0x2c47   :  { %16898 = vrcp.f32 %v6340_v51 }
0x2c48   :  { %v6337_v18 = vpop.xlane.xlu0 %6336 }
0x2c49   :  { %16900 = vrcp.f32 %v6337_v18 }
0x2c54   :  { %v16899_v52 = vpop.eup %16898 }
0x2c55   :  { %v6344_v41 = vmul.f32 %v16899_v52, %v16895_v35 }
0x2c56   :  { %v16901_v38 = vpop.eup %16900 }
0x2c57   :  { %v6342_v27 = vmul.f32 %v16901_v38, %v16897_v47  ;;  %v14336_v47 = vld [vmem:[#allocation2 + $0x478] ss:$0 sm:$0xff] }
0x2c58   :  { %v4831_v48 = vadd.f32 %v17493_v25, %v14336_v47  ;;  %v6956_v25 = vld [vmem:[#allocation2 + $0x640] sm:$0xff] }
0x2c59   :  { %16036 = vmatprep.mubr.msk.f32.mxu0 %vm425_vm2, %v6342_v27 }
0x2c5a   :  { %16037 = vmatmul.mubr.msk.f32.vlgmr.msra.gmra.mxu0 %vm425_vm2, %v6344_v41  ;;  %v4835_v16 = vadd.f32 %v4831_v48, %v17420_v44 }
0x2c5b   :  { %16045 = vmatpush3.msra.mxu0 %v6513_v57  ;;  %16052 = vmatprep.mubr.msk.f32.mxu0 %vm35_vm0, %v17465_v50 }
0x2c5c   :  { %16046 = vmatprep.subr.mxu0 %v6512_v58  ;;  %v4841_v38 = vsel %vm35_vm0, %v4835_v16, 0.0 }
0x2c5d   :  { %16047 = vmatpush3.msra.mxu0 %v6512_v58 }
0x2c5e   :  { %16048 = vmatprep.subr.mxu0 %v6511_v54 }
0x2c5f   :  { %16049 = vmatpush3.msra.mxu0 %v6511_v54 }
0x2c60   :  { %16050 = vmatprep.subr.mxu0 %v6510_v59 }
0x2c61   :  { %16051 = vmatpush3.msra.mxu0 %v6510_v59 }
0x2c62   :  { %16053 = vmatmul.mubr.msk.f32.vlgmr.msra.gmra.mxu0 %vm35_vm0, %v17469_v53  ;;  %16066 = vmatprep.subr.mxu0 %v6681_v60 }
0x2c63   :  { %16067 = vmatpush3.msra.mxu0 %v6681_v60  ;;  %16074 = vmatprep.mubr.msk.f32.mxu0 %vm35_vm0, %v17465_v50 }
0x2c64   :  { %16068 = vmatprep.subr.mxu0 %v6680_v61 }
0x2c65   :  { %16069 = vmatpush3.msra.mxu0 %v6680_v61 }
0x2c66   :  { %16070 = vmatprep.subr.mxu0 %v6679_v62 }
0x2c67   :  { %16071 = vmatpush3.msra.mxu0 %v6679_v62 }
0x2c68   :  { %16072 = vmatprep.subr.mxu0 %v6678_v2 }
0x2c69   :  { %16073 = vmatpush3.msra.mxu0 %v6678_v2 }
0x2c6a   :  { %16075 = vmatmul.mubr.msk.f32.vlgmr.msra.gmra.mxu0 %vm35_vm0, %v17469_v53 }
0x2d1a   :  { %v16038_v6 = vpop.f32.mrf.mxu0 }
0x2d1c   :  { %v6417_v55 = vpop.f32.mrf.mxu0 }
0x2d1d   :  { %16041 = vmatprep.mubr.msk.f32.mxu1 %vm333_vm1, %v6417_v55 }
0x2d1e   :  { %16042 = vmatmul.mubr.msk.f32.vlgmr.msra.gmra.mxu1 %vm333_vm1, %v16038_v6  ;;  %v14411_v6 = vld [vmem:[#allocation2 + $0x648] ss:$0 sm:$0xff] }
0x2d1f   :  { %16056 = vmatpush3.msra.mxu1 %v6597_v3  ;;  %16063 = vmatprep.mubr.msk.f32.mxu1 %vm35_vm0, %v17465_v50 }
0x2d20   :  { %16057 = vmatprep.subr.mxu1 %v6596_v8 }
0x2d21   :  { %16058 = vmatpush3.msra.mxu1 %v6596_v8 }
0x2d22   :  { %v16054_v56 = vpop.f32.mrf.mxu0  ;;  %16059 = vmatprep.subr.mxu1 %v6595_v4 }
0x2d23   :  { %v6591_v7 = vadd.f32 %v16054_v56, %v14394_v9  ;;  %16060 = vmatpush3.msra.mxu1 %v6595_v4 }
0x2d24   :  { %v6585_v12 = vpop.f32.mrf.mxu0  ;;  %16061 = vmatprep.subr.mxu1 %v6594_v45 }
0x2d25   :  { %v6586_v13 = vadd.f32 %v14394_v9, %v6585_v12  ;;  %16062 = vmatpush3.msra.mxu1 %v6594_v45  ;;  %v17044_v12 = vld [vmem:[%s18143_s0 + $0x18] sm:$0xff] }
0x2d26   :  { %16064 = vmatmul.mubr.msk.f32.vlgmr.msra.gmra.mxu1 %vm35_vm0, %v17469_v53 }
0x2d27   :  { %16081 = vmatprep.mubr.msk.f32.mxu1 %vm333_vm1, %v6586_v13 }
0x2d2a   :  { %v16076_v50 = vpop.f32.mrf.mxu0 }
0x2d2b   :  { %v6759_v15 = vadd.f32 %v16076_v50, %v14400_v14  ;;  %v17045_v50 = vld [vmem:[%s18143_s0 + $0x10] sm:$0xff] }
0x2d2c   :  { %v6753_v17 = vpop.f32.mrf.mxu0 }
0x2d2d   :  { %v6754_v19 = vadd.f32 %v14400_v14, %v6753_v17  ;;  %16084 = vmatprep.subr.mxu0 %v6759_v15 }
0x2d2e   :  { %16085 = vmatpush3.msra.mxu0 %v6759_v15 }
0x2d2f   :  { %16086 = vmatprep.subr.mxu0 %v6754_v19 }
0x2d30   :  { %16087 = vmatpush3.msra.mxu0 %v6754_v19 }
0x2dde   :  { %v16043_v22 = vpop.f32.mrf.mxu1 }
0x2ddf   :  { %v17594_v26 = vadd.f32 %v16043_v22, %v5977_v21 }
0x2de0   :  { %v6499_v53 = vpop.f32.mrf.mxu1 }
0x2de1   :  { %v17596_v23 = vadd.f32 %v6499_v53, %v5972_v24  ;;  %v7182_v53 = vld [vmem:[#allocation2 + $0x6f8] sm:$0xff] }
0x2de6   :  { %v16065_v29 = vpop.f32.mrf.mxu1 }
0x2de7   :  { %v6675_v31 = vadd.f32 %v16065_v29, %v14397_v28  ;;  %v7179_v29 = vld [vmem:[#allocation2 + $0x6e0] sm:$0xff] }
0x2de8   :  { %v6669_v30 = vpop.f32.mrf.mxu1 }
0x2de9   :  { %v6670_v32 = vadd.f32 %v14397_v28, %v6669_v30  ;;  %16077 = vmatprep.subr.msk.mxu1 %vm333_vm1, %v6675_v31  ;;  %v7180_v28 = vld [vmem:[#allocation2 + $0x6e8] sm:$0xff] }
0x2dea   :  { %16078 = vmatpush3.xpose.msk.msra.mxu1 %vm333_vm1, %v6675_v31 }
0x2deb   :  { %16079 = vmatprep.subr.msk.mxu1 %vm333_vm1, %v6670_v32 }
0x2dee   :  { %16080 = vmatpush3.xpose.msk.msra.mxu1 %vm333_vm1, %v6670_v32 }
0x2def   :  { %16091 = vmatprep.subr.mxu1 %v6956_v25 }
0x2df1   :  { %16082 = vmatmul.mubr.msk.f32.vlgmr.msra.gmra.mxu1 %vm333_vm1, %v6591_v7 }
0x2df2   :  { %16092 = vmatpush3.msra.mxu1 %v6956_v25 }
0x2df3   :  { %16107 = vmatprep.subr.mxu1 %v7182_v53 }
0x2eb1   :  { %v16083_v63 = vpop.f32.mrf.mxu1 }
0x2eb2   :  { %v6850_v5 = vmul.f32 0.35355338, %v16083_v63 }
0x2eb3   :  { %v6840_v10 = vpop.f32.mrf.mxu1 }
0x2eb4   :  { %v6849_v11 = vmul.f32 0.35355338, %v6840_v10  ;;  %v6852_v33 = vadd.f32 %v6850_v5, %v17500_v42  ;;  %v4826_v42 = vadd.f32 %v14336_v47, %v17495_v20  ;;  %v14339_v47 = vld [vmem:[#allocation2 + $0x480] ss:$0 sm:$0xff] }
0x2eb6   :  { %v6856_v36 = vsel %vm425_vm2, %v6852_v33, -inf  ;;  %v6851_v1 = vadd.f32 %v6849_v11, %v17505_v34  ;;  %v4834_v52 = vadd.f32 %v4826_v42, %v17426_v49 }
0x2eb7   :  { %6857 = vmax.xlane.f32.xlu1 %v6856_v36 }
0x2eb8   :  { %v6853_v37 = vsel %vm425_vm2, %v6851_v1, -inf  ;;  %v4838_v27 = vsel %vm35_vm0, %v4834_v52, 0.0 }
0x2eb9   :  { %6854 = vmax.xlane.f32.xlu0 %v6853_v37 }
0x2f40   :  { %v6858_v39 = vpop.xlane.xlu1 %6857 }
0x2f41   :  { %v6860_v40 = vsub.f32 %v6852_v33, %v6858_v39 }
0x2f42   :  { %v6855_v0 = vpop.xlane.xlu0 %6854 }
0x2f43   :  { %v6863_v43 = vmul.f32 1.442695, %v6860_v40  ;;  %v6859_v35 = vsub.f32 %v6851_v1, %v6855_v0 }
0x2f45   :  { %16902 = vpow2.f32 %v6863_v43  ;;  %v6861_v46 = vmul.f32 1.442695, %v6859_v35 }
0x2f47   :  { %16904 = vpow2.f32 %v6861_v46 }
0x2f52   :  { %v16903_v57 = vpop.eup %16902 }
0x2f53   :  { %v6868_v34 = vsel %vm425_vm2, %v16903_v57, 0.0 }
0x2f54   :  { %v16905_v51 = vpop.eup %16904  ;;  %6869 = vadd.xlane.f32.xlu1 %v6868_v34  ;;  %v7091_v34 = vld [vmem:[#allocation2 + $0x668] sm:$0xff] }
0x2f55   :  { %v6865_v18 = vsel %vm425_vm2, %v16905_v51, 0.0 }
0x2f56   :  { %6866 = vadd.xlane.f32.xlu0 %v6865_v18  ;;  %v7090_v18 = vld [vmem:[#allocation2 + $0x660] sm:$0xff] }
0x2f58   :  { %4842 = vadd.xlane.f32.xlu1 %v4841_v38 }
0x2f5a   :  { %4839 = vadd.xlane.f32.xlu0 %v4838_v27  ;;  %v7089_v27 = vld [vmem:[#allocation2 + $0x658] sm:$0xff] }
0x2fdd   :  { %v6870_v20 = vpop.xlane.xlu1 %6869 }
0x2fde   :  { %16906 = vrcp.f32 %v6870_v20 }
0x2fdf   :  { %v6867_v41 = vpop.xlane.xlu0 %6866 }
0x2fe0   :  { %16908 = vrcp.f32 %v6867_v41  ;;  %v7272_v41 = vld [vmem:[#allocation2 + $0x780] sm:$0xff] }
0x2fe1   :  { %v4843_v61 = vpop.xlane.xlu1 %4842 }
0x2fe2   :  { %v4845_v2 = vmul.f32 0.03125, %v4843_v61 }
0x2fe3   :  { %v4840_v62 = vpop.xlane.xlu0 %4839 }
0x2fe4   :  { %v4844_v55 = vmul.f32 0.03125, %v4840_v62  ;;  %v4847_v9 = vsub.f32 %v4835_v16, %v4845_v2  ;;  %v14412_v62 = vld [vmem:[#allocation2 + $0x650] ss:$0 sm:$0xff] }
0x2fe6   :  { %v4846_v7 = vsub.f32 %v4834_v52, %v4844_v55  ;;  %v4849_v19 = vmul.f32 %v4847_v9, %v4847_v9  ;;  %v14340_v52 = vld [vmem:[#allocation2 + $0x481] ss:$0 sm:$0xff] }
0x2fe8   :  { %v4848_v22 = vmul.f32 %v4846_v7, %v4846_v7  ;;  %v4853_v24 = vsel %vm35_vm0, %v4849_v19, 0.0 }
0x2feb   :  { %v16907_v44 = vpop.eup %16906 }
0x2fec   :  { %v6874_v59 = vmul.f32 %v16907_v44, %v16903_v57  ;;  %v7092_v57 = vld [vmem:[#allocation2 + $0x670] sm:$0xff] }
0x2fed   :  { %v16909_v58 = vpop.eup %16908  ;;  %16096 = vmatprep.subr.mxu0 %v7092_v57 }
0x2fee   :  { %v6872_v54 = vmul.f32 %v16909_v58, %v16905_v51 }
0x2ff0   :  { %16088 = vmatprep.mubr.msk.f32.mxu0 %vm425_vm2, %v6872_v54 }
0x2ff1   :  { %16089 = vmatmul.mubr.msk.f32.vlgmr.msra.gmra.mxu0 %vm425_vm2, %v6874_v59 }
0x2ff2   :  { %16097 = vmatpush3.msra.mxu0 %v7092_v57  ;;  %v14429_v57 = vld [vmem:[#allocation2 + $0x6d9] ss:$0 sm:$0xff] }
0x2ff3   :  { %16098 = vmatprep.subr.mxu0 %v7091_v34 }
0x2ff4   :  { %16099 = vmatpush3.msra.mxu0 %v7091_v34 }
0x2ff5   :  { %16100 = vmatprep.subr.mxu0 %v7090_v18 }
0x2ff6   :  { %16101 = vmatpush3.msra.mxu0 %v7090_v18 }
0x2ff7   :  { %16102 = vmatprep.subr.mxu0 %v7089_v27 }
0x2ff8   :  { %16103 = vmatpush3.msra.mxu0 %v7089_v27 }
0x2ff9   :  { %16118 = vmatprep.subr.mxu0 %v7272_v41 }
0x30b1   :  { %v16090_v49 = vpop.f32.mrf.mxu0 }
0x30b3   :  { %v6947_v60 = vpop.f32.mrf.mxu0 }
0x30b4   :  { %16093 = vmatprep.mubr.msk.f32.mxu1 %vm333_vm1, %v6947_v60 }
0x30b5   :  { %16094 = vmatmul.mubr.msk.f32.vlgmr.msra.gmra.mxu1 %vm333_vm1, %v16090_v49 }
0x30b6   :  { %16108 = vmatpush3.msra.mxu1 %v7182_v53 }
0x3175   :  { %v16095_v3 = vpop.f32.mrf.mxu1 }
0x3176   :  { %v7039_v8 = vadd.f32 %v16095_v3, %v17594_v26  ;;  %v4850_v26 = vsel %vm35_vm0, %v4848_v22, 0.0  ;;  %v7551_v22 = vld [vmem:[#allocation2 + $0x690] sm:$0xff] }
0x3177   :  { %v7029_v4 = vpop.f32.mrf.mxu1 }
0x3178   :  { %v7046_v45 = vadd.f32 %v14411_v6, %v7039_v8  ;;  %v7038_v56 = vadd.f32 %v7029_v4, %v17596_v23  ;;  %v7181_v23 = vld [vmem:[#allocation2 + $0x6f0] sm:$0xff] }
0x3179   :  { %16109 = vmatprep.subr.mxu1 %v7181_v23  ;;  %v14413_v8 = vld [vmem:[#allocation2 + $0x651] ss:$0 sm:$0xff] }
0x317a   :  { %v17624_v13 = vadd.f32 %v17044_v12, %v7046_v45  ;;  %v7045_v14 = vadd.f32 %v14411_v6, %v7038_v56  ;;  %16110 = vmatpush3.msra.mxu1 %v7181_v23  ;;  %v7271_v56 = vld [vmem:[#allocation2 + $0x778] sm:$0xff]  ;;  %v7269_v12 = vld [vmem:[#allocation2 + $0x768] sm:$0xff] }
0x317b   :  { %16111 = vmatprep.subr.mxu1 %v7180_v28 }
0x317c   :  { %v17629_v15 = vadd.f32 %v17045_v50, %v7045_v14  ;;  %v7054_v17 = vsel %vm35_vm0, %v17624_v13, 0.0  ;;  %16112 = vmatpush3.msra.mxu1 %v7180_v28  ;;  %v14417_v14 = vld [vmem:[#allocation2 + $0x760] ss:$0 sm:$0xff] }
0x317d   :  { %7055 = vadd.xlane.f32.xlu1 %v7054_v17  ;;  %16113 = vmatprep.subr.mxu1 %v7179_v29 }
0x317e   :  { %v7051_v21 = vsel %vm35_vm0, %v17629_v15, 0.0  ;;  %16114 = vmatpush3.msra.mxu1 %v7179_v29  ;;  %v7550_v29 = vld [vmem:[#allocation2 + $0x688] sm:$0xff] }
0x317f   :  { %7052 = vadd.xlane.f32.xlu0 %v7051_v21 }
0x3181   :  { %4854 = vadd.xlane.f32.xlu1 %v4853_v24 }
0x3183   :  { %4851 = vadd.xlane.f32.xlu0 %v4850_v26  ;;  %v14414_v26 = vld [vmem:[#allocation2 + $0x6d8] ss:$0 sm:$0xff] }
0x3206   :  { %v7056_v31 = vpop.xlane.xlu1 %7055 }
0x3207   :  { %v7058_v30 = vmul.f32 0.03125, %v7056_v31  ;;  %v14420_v31 = vld [vmem:[#allocation2 + $0x7e8] ss:$0 sm:$0xff] }
0x3208   :  { %v7053_v32 = vpop.xlane.xlu0 %7052 }
0x3209   :  { %v7060_v63 = vsub.f32 %v17624_v13, %v7058_v30  ;;  %v7057_v5 = vmul.f32 0.03125, %v7053_v32  ;;  %v7549_v30 = vld [vmem:[#allocation2 + $0x680] sm:$0xff] }
0x320a   :  { %v4855_v10 = vpop.xlane.xlu1 %4854 }
0x320b   :  { %v7059_v11 = vsub.f32 %v17629_v15, %v7057_v5  ;;  %v4857_v33 = vmul.f32 0.03125, %v4855_v10  ;;  %v7062_v36 = vmul.f32 %v7060_v63, %v7060_v63  ;;  %v7548_v5 = vld [vmem:[#allocation2 + $0x678] sm:$0xff] }
0x320c   :  { %v4852_v1 = vpop.xlane.xlu0 %4851 }
0x320d   :  { %v4859_v37 = vadd.f32 1e-05, %v4857_v33  ;;  %v4856_v39 = vmul.f32 0.03125, %v4852_v1  ;;  %v7066_v40 = vsel %vm35_vm0, %v7062_v36, 0.0  ;;  %v7061_v0 = vmul.f32 %v7059_v11, %v7059_v11  ;;  %v7719_v33 = vld [vmem:[#allocation2 + $0x7a0] sm:$0xff]  ;;  %v7718_v36 = vld [vmem:[#allocation2 + $0x798] sm:$0xff] }
0x320e   :  { %7067 = vadd.xlane.f32.xlu1 %v7066_v40  ;;  %v7717_v1 = vld [vmem:[#allocation2 + $0x790] sm:$0xff]  ;;  %v17678_v40 = vld [vmem:[%s18143_s0 + $0x48] sm:$0xff] }
0x320f   :  { %16910 = vrsqrt.f32 %v4859_v37  ;;  %v4858_v43 = vadd.f32 1e-05, %v4856_v39  ;;  %v7063_v35 = vsel %vm35_vm0, %v7061_v0, 0.0  ;;  %v7716_v37 = vld [vmem:[#allocation2 + $0x788] sm:$0xff] }
0x3210   :  { %7064 = vadd.xlane.f32.xlu0 %v7063_v35  ;;  %v17683_v35 = vld [vmem:[%s18143_s0 + $0x40] sm:$0xff] }
0x3211   :  { %16912 = vrsqrt.f32 %v4858_v43 }
0x321c   :  { %v16911_v46 = vpop.eup %16910 }
0x321d   :  { %v4863_v48 = vmul.f32 %v16911_v46, %v4847_v9 }
0x321e   :  { %v16913_v42 = vpop.eup %16912 }
0x321f   :  { %v4862_v16 = vmul.f32 %v16913_v42, %v4846_v7  ;;  %v4869_v51 = vmul.f32 %v14339_v47, %v4863_v48  ;;  %v7270_v7 = vld [vmem:[#allocation2 + $0x770] sm:$0xff] }
0x3221   :  { %v4868_v38 = vmul.f32 %v14339_v47, %v4862_v16  ;;  %v17643_v20 = vadd.f32 %v14340_v52, %v4869_v51 }
0x3223   :  { %v17641_v25 = vadd.f32 %v14340_v52, %v4868_v38  ;;  %v14435_v52 = vld [vmem:[#allocation2 + $0x7e9] ss:$0 sm:$0xff] }
0x3225   :  { %16115 = vmatprep.mubr.msk.f32.mxu1 %vm35_vm0, %v17641_v25 }
0x3226   :  { %16116 = vmatmul.mubr.msk.f32.vlgmr.msra.gmra.mxu1 %vm35_vm0, %v17643_v20 }
0x3297   :  { %v7068_v44 = vpop.xlane.xlu1 %7067 }
0x3298   :  { %v7070_v58 = vmul.f32 0.03125, %v7068_v44 }
0x3299   :  { %v7065_v54 = vpop.xlane.xlu0 %7064 }
0x329a   :  { %v7072_v59 = vadd.f32 1e-05, %v7070_v58  ;;  %v7069_v49 = vmul.f32 0.03125, %v7065_v54 }
0x329c   :  { %16914 = vrsqrt.f32 %v7072_v59  ;;  %v7071_v60 = vadd.f32 1e-05, %v7069_v49 }
0x329e   :  { %16916 = vrsqrt.f32 %v7071_v60 }
0x32a9   :  { %v16915_v61 = vpop.eup %16914 }
0x32aa   :  { %v7076_v2 = vmul.f32 %v16915_v61, %v7060_v63 }
0x32ab   :  { %v16917_v3 = vpop.eup %16916 }
0x32ac   :  { %v7075_v6 = vmul.f32 %v16917_v3, %v7059_v11  ;;  %v7082_v55 = vmul.f32 %v14412_v62, %v7076_v2 }
0x32ae   :  { %v7081_v4 = vmul.f32 %v14412_v62, %v7075_v6  ;;  %v17651_v45 = vadd.f32 %v14413_v8, %v7082_v55  ;;  %v7635_v55 = vld [vmem:[#allocation2 + $0x718] sm:$0xff] }
0x32b0   :  { %v17649_v9 = vadd.f32 %v14413_v8, %v7081_v4 }
0x32b2   :  { %16104 = vmatprep.mubr.msk.f32.mxu0 %vm35_vm0, %v17649_v9 }
0x32b3   :  { %16105 = vmatmul.mubr.msk.f32.vlgmr.msra.gmra.mxu0 %vm35_vm0, %v17651_v45 }
0x32b4   :  { %16119 = vmatpush3.msra.mxu0 %v7272_v41  ;;  %16126 = vmatprep.mubr.msk.f32.mxu0 %vm35_vm0, %v17641_v25 }
0x32b5   :  { %16120 = vmatprep.subr.mxu0 %v7271_v56 }
0x32b6   :  { %16121 = vmatpush3.msra.mxu0 %v7271_v56 }
0x32b7   :  { %16122 = vmatprep.subr.mxu0 %v7270_v7 }
0x32b8   :  { %16123 = vmatpush3.msra.mxu0 %v7270_v7 }
0x32b9   :  { %16124 = vmatprep.subr.mxu0 %v7269_v12 }
0x32ba   :  { %16125 = vmatpush3.msra.mxu0 %v7269_v12 }
0x32bb   :  { %16127 = vmatmul.mubr.msk.f32.vlgmr.msra.gmra.mxu0 %vm35_vm0, %v17643_v20 }
0x32e6   :  { %v16117_v50 = vpop.f32.mrf.mxu1 }
0x32e7   :  { %v7266_v17 = vadd.f32 %v16117_v50, %v14417_v14  ;;  %v7634_v50 = vld [vmem:[#allocation2 + $0x710] sm:$0xff] }
0x32e8   :  { %v7260_v19 = vpop.f32.mrf.mxu1 }
0x32e9   :  { %v7261_v21 = vadd.f32 %v14417_v14, %v7260_v19  ;;  %16129 = vmatprep.subr.msk.mxu1 %vm333_vm1, %v7266_v17  ;;  %v7632_v19 = vld [vmem:[#allocation2 + $0x700] sm:$0xff] }
0x32ea   :  { %16130 = vmatpush3.xpose.msk.msra.mxu1 %vm333_vm1, %v7266_v17  ;;  %v7633_v17 = vld [vmem:[#allocation2 + $0x708] sm:$0xff] }
0x32eb   :  { %16131 = vmatprep.subr.msk.mxu1 %vm333_vm1, %v7261_v21 }
0x32ee   :  { %16132 = vmatpush3.xpose.msk.msra.mxu1 %vm333_vm1, %v7261_v21 }
0x32ef   :  { %16143 = vmatprep.subr.mxu1 %v7551_v22 }
0x3373   :  { %v16106_v24 = vpop.f32.mrf.mxu0 }
0x3374   :  { %v7176_v28 = vadd.f32 %v16106_v24, %v14414_v26 }
0x3375   :  { %v7170_v53 = vpop.f32.mrf.mxu0 }
0x3376   :  { %v7171_v23 = vadd.f32 %v14414_v26, %v7170_v53  ;;  %v14432_v26 = vld [vmem:[#allocation2 + $0x761] ss:$0 sm:$0xff] }
0x3378   :  { %16133 = vmatprep.mubr.msk.f32.mxu1 %vm333_vm1, %v7171_v23 }
0x3379   :  { %16134 = vmatmul.mubr.msk.f32.vlgmr.msra.gmra.mxu1 %vm333_vm1, %v7176_v28 }
0x337a   :  { %16144 = vmatpush3.msra.mxu1 %v7551_v22  ;;  %16151 = vmatprep.mubr.msk.f32.mxu1 %vm35_vm0, %v17649_v9 }
0x337b   :  { %v16128_v32 = vpop.f32.mrf.mxu0  ;;  %16145 = vmatprep.subr.mxu1 %v7550_v29 }
0x337c   :  { %v7350_v63 = vadd.f32 %v16128_v32, %v14420_v31  ;;  %16146 = vmatpush3.msra.mxu1 %v7550_v29 }
0x337d   :  { %v7344_v10 = vpop.f32.mrf.mxu0  ;;  %16147 = vmatprep.subr.mxu1 %v7549_v30 }
0x337e   :  { %v7345_v11 = vadd.f32 %v14420_v31, %v7344_v10  ;;  %16136 = vmatprep.subr.mxu0 %v7350_v63  ;;  %16148 = vmatpush3.msra.mxu1 %v7549_v30 }
0x337f   :  { %16137 = vmatpush3.msra.mxu0 %v7350_v63  ;;  %16149 = vmatprep.subr.mxu1 %v7548_v5 }
0x3380   :  { %16138 = vmatprep.subr.mxu0 %v7345_v11  ;;  %16150 = vmatpush3.msra.mxu1 %v7548_v5 }
0x3381   :  { %16139 = vmatpush3.msra.mxu0 %v7345_v11  ;;  %16152 = vmatmul.mubr.msk.f32.vlgmr.msra.gmra.mxu1 %vm35_vm0, %v17651_v45 }
0x3382   :  { %16165 = vmatprep.subr.mxu1 %v7719_v33  ;;  %16173 = vmatprep.mubr.msk.f32.mxu1 %vm35_vm0, %v17641_v25 }
0x3383   :  { %16166 = vmatpush3.msra.mxu1 %v7719_v33  ;;  %16154 = vmatprep.subr.mxu0 %v7635_v55 }
0x3384   :  { %16167 = vmatprep.subr.mxu1 %v7718_v36 }
0x3385   :  { %16168 = vmatpush3.msra.mxu1 %v7718_v36 }
0x3386   :  { %16169 = vmatprep.subr.mxu1 %v7717_v1 }
0x3387   :  { %16170 = vmatpush3.msra.mxu1 %v7717_v1 }
0x3388   :  { %16171 = vmatprep.subr.mxu1 %v7716_v37 }
0x3389   :  { %16172 = vmatpush3.msra.mxu1 %v7716_v37 }
0x338a   :  { %16174 = vmatmul.mubr.msk.f32.vlgmr.msra.gmra.mxu1 %vm35_vm0, %v17643_v20 }
0x3439   :  { %v16135_v39 = vpop.f32.mrf.mxu1 }
0x343a   :  { %v7441_v0 = vmul.f32 0.35355338, %v16135_v39 }
0x343b   :  { %v7431_v43 = vpop.f32.mrf.mxu1 }
0x343c   :  { %v7440_v46 = vmul.f32 0.35355338, %v7431_v43  ;;  %v7443_v47 = vadd.f32 %v7441_v0, %v17678_v40 }
0x343e   :  { %v7447_v48 = vsel %vm425_vm2, %v7443_v47, -inf  ;;  %v7442_v42 = vadd.f32 %v7440_v46, %v17683_v35 }
0x343f   :  { %7448 = vmax.xlane.f32.xlu1 %v7447_v48 }
0x3440   :  { %v7444_v34 = vsel %vm425_vm2, %v7442_v42, -inf }
0x3441   :  { %v16153_v16 = vpop.f32.mrf.mxu1  ;;  %7445 = vmax.xlane.f32.xlu0 %v7444_v34  ;;  %v7994_v34 = vld [vmem:[#allocation2 + $0x7f8] sm:$0xff] }
0x3442   :  { %v7629_v51 = vadd.f32 %v16153_v16, %v14429_v57 }
0x3443   :  { %v7623_v18 = vpop.f32.mrf.mxu1 }
0x3444   :  { %v7624_v21 = vadd.f32 %v14429_v57, %v7623_v18  ;;  %v7547_v57 = vld [vmem:[#allocation2 + $0x7f0] sm:$0xff] }
0x344a   :  { %v16175_v38 = vpop.f32.mrf.mxu1 }
0x344b   :  { %v7797_v27 = vadd.f32 %v16175_v38, %v14435_v52 }
0x344c   :  { %v7791_v41 = vpop.f32.mrf.mxu1 }
0x344d   :  { %v7792_v44 = vadd.f32 %v14435_v52, %v7791_v41  ;;  %16183 = vmatprep.subr.mxu1 %v7797_v27  ;;  %v8244_v41 = vld [vmem:[#allocation2 + $0x738] sm:$0xff] }
0x344e   :  { %16184 = vmatpush3.msra.mxu1 %v7797_v27 }
0x344f   :  { %16185 = vmatprep.subr.mxu1 %v7792_v44 }
0x3450   :  { %16186 = vmatpush3.msra.mxu1 %v7792_v44  ;;  %v8243_v44 = vld [vmem:[#allocation2 + $0x730] sm:$0xff] }
0x3451   :  { %16195 = vmatprep.subr.mxu1 %v7547_v57 }
0x34c8   :  { %v7449_v58 = vpop.xlane.xlu1 %7448 }
0x34c9   :  { %v7451_v54 = vsub.f32 %v7443_v47, %v7449_v58  ;;  %v8242_v58 = vld [vmem:[#allocation2 + $0x728] sm:$0xff] }
0x34ca   :  { %v7446_v59 = vpop.xlane.xlu0 %7445 }
0x34cb   :  { %v7454_v49 = vmul.f32 1.442695, %v7451_v54  ;;  %v7450_v60 = vsub.f32 %v7442_v42, %v7446_v59  ;;  %v8241_v54 = vld [vmem:[#allocation2 + $0x720] sm:$0xff]  ;;  %v8160_v59 = vld [vmem:[#allocation2 + $0x6b0] sm:$0xff] }
0x34cd   :  { %16918 = vpow2.f32 %v7454_v49  ;;  %v7452_v61 = vmul.f32 1.442695, %v7450_v60 }
0x34cf   :  { %16920 = vpow2.f32 %v7452_v61  ;;  %v8159_v61 = vld [vmem:[#allocation2 + $0x6a8] sm:$0xff] }
0x34da   :  { %v16919_v62 = vpop.eup %16918 }
0x34db   :  { %v7459_v2 = vsel %vm425_vm2, %v16919_v62, 0.0 }
0x34dc   :  { %v16921_v3 = vpop.eup %16920  ;;  %7460 = vadd.xlane.f32.xlu1 %v7459_v2 }
0x34dd   :  { %v7456_v6 = vsel %vm425_vm2, %v16921_v3, 0.0 }
0x34de   :  { %7457 = vadd.xlane.f32.xlu0 %v7456_v6  ;;  %v8328_v6 = vld [vmem:[#allocation2 + $0x7c0] sm:$0xff] }
0x3565   :  { %v7461_v8 = vpop.xlane.xlu1 %7460 }
0x3566   :  { %16922 = vrcp.f32 %v7461_v8  ;;  %v14451_v8 = vld [vmem:[#allocation2 + $0x762] ss:$0 sm:$0xff] }
0x3567   :  { %v7458_v4 = vpop.xlane.xlu0 %7457 }
0x3568   :  { %16924 = vrcp.f32 %v7458_v4  ;;  %v8327_v4 = vld [vmem:[#allocation2 + $0x7b8] sm:$0xff] }
0x3573   :  { %v16923_v56 = vpop.eup %16922 }
0x3574   :  { %v7465_v14 = vmul.f32 %v16923_v56, %v16919_v62  ;;  %v8158_v62 = vld [vmem:[#allocation2 + $0x6a0] sm:$0xff] }
0x3575   :  { %v16925_v7 = vpop.eup %16924 }
0x3576   :  { %v7463_v12 = vmul.f32 %v16925_v7, %v16921_v3  ;;  %v8157_v3 = vld [vmem:[#allocation2 + $0x698] sm:$0xff] }
0x3578   :  { %16140 = vmatprep.mubr.msk.f32.mxu0 %vm425_vm2, %v7463_v12  ;;  %v8326_v12 = vld [vmem:[#allocation2 + $0x7b0] sm:$0xff] }
0x3579   :  { %16141 = vmatmul.mubr.msk.f32.vlgmr.msra.gmra.mxu0 %vm425_vm2, %v7465_v14 }
0x357a   :  { %16155 = vmatpush3.msra.mxu0 %v7635_v55  ;;  %16162 = vmatprep.mubr.msk.f32.mxu0 %vm35_vm0, %v17641_v25 }
0x357b   :  { %16156 = vmatprep.subr.mxu0 %v7634_v50 }
0x357c   :  { %16157 = vmatpush3.msra.mxu0 %v7634_v50 }
0x357d   :  { %16158 = vmatprep.subr.mxu0 %v7633_v17 }
0x357e   :  { %16159 = vmatpush3.msra.mxu0 %v7633_v17  ;;  %v8325_v17 = vld [vmem:[#allocation2 + $0x7a8] sm:$0xff] }
0x357f   :  { %16160 = vmatprep.subr.mxu0 %v7632_v19 }
0x3580   :  { %16161 = vmatpush3.msra.mxu0 %v7632_v19 }
0x3581   :  { %16163 = vmatmul.mubr.msk.f32.vlgmr.msra.gmra.mxu0 %vm35_vm0, %v17643_v20 }
0x3582   :  { %16180 = vmatprep.mubr.msk.f32.mxu0 %vm333_vm1, %v7624_v21 }
0x3639   :  { %v16142_v22 = vpop.f32.mrf.mxu0 }
0x363b   :  { %v7538_v24 = vpop.f32.mrf.mxu0 }
0x3641   :  { %v16164_v53 = vpop.f32.mrf.mxu0 }
0x3642   :  { %v7713_v23 = vadd.f32 %v16164_v53, %v14432_v26 }
0x3643   :  { %v7707_v28 = vpop.f32.mrf.mxu0 }
0x3644   :  { %v7708_v29 = vadd.f32 %v14432_v26, %v7707_v28  ;;  %16176 = vmatprep.subr.msk.mxu0 %vm333_vm1, %v7713_v23  ;;  %v14454_v28 = vld [vmem:[#allocation2 + $0x7ea] ss:$0 sm:$0xff] }
0x3645   :  { %16177 = vmatpush3.xpose.msk.msra.mxu0 %vm333_vm1, %v7713_v23 }
0x3646   :  { %16178 = vmatprep.subr.msk.mxu0 %vm333_vm1, %v7708_v29 }
0x3649   :  { %16179 = vmatpush3.xpose.msk.msra.mxu0 %vm333_vm1, %v7708_v29 }
0x364a   :  { %16190 = vmatprep.subr.mxu0 %v7994_v34 }
0x364c   :  { %16181 = vmatmul.mubr.msk.f32.vlgmr.msra.gmra.mxu0 %vm333_vm1, %v7629_v51 }
0x364d   :  { %16191 = vmatpush3.msra.mxu0 %v7994_v34 }
0x364e   :  { %16200 = vmatprep.subr.mxu0 %v8160_v59 }
0x370c   :  { %v16182_v31 = vpop.f32.mrf.mxu0 }
0x370d   :  { %v7888_v30 = vmul.f32 0.35355338, %v16182_v31 }
0x370e   :  { %v7878_v32 = vpop.f32.mrf.mxu0 }
0x370f   :  { %v7887_v63 = vmul.f32 0.35355338, %v7878_v32  ;;  %v7890_v5 = vadd.f32 %v7888_v30, %v17678_v40 }
0x3711   :  { %v7894_v10 = vsel %vm425_vm2, %v7890_v5, -inf  ;;  %v7889_v11 = vadd.f32 %v7887_v63, %v17683_v35 }
0x3712   :  { %7895 = vmax.xlane.f32.xlu1 %v7894_v10 }
0x3713   :  { %v7891_v33 = vsel %vm425_vm2, %v7889_v11, -inf }
0x3714   :  { %7892 = vmax.xlane.f32.xlu0 %v7891_v33 }
0x379b   :  { %v7896_v36 = vpop.xlane.xlu1 %7895 }
0x379c   :  { %v7898_v1 = vsub.f32 %v7890_v5, %v7896_v36 }
0x379d   :  { %v7893_v37 = vpop.xlane.xlu0 %7892 }
0x379e   :  { %v7901_v39 = vmul.f32 1.442695, %v7898_v1  ;;  %v7897_v0 = vsub.f32 %v7889_v11, %v7893_v37 }
0x37a0   :  { %16926 = vpow2.f32 %v7901_v39  ;;  %v7899_v43 = vmul.f32 1.442695, %v7897_v0 }
0x37a2   :  { %16928 = vpow2.f32 %v7899_v43 }
0x37ad   :  { %v16927_v46 = vpop.eup %16926 }
0x37ae   :  { %v7906_v47 = vsel %vm425_vm2, %v16927_v46, 0.0 }
0x37af   :  { %v16929_v48 = vpop.eup %16928  ;;  %7907 = vadd.xlane.f32.xlu1 %v7906_v47 }
0x37b0   :  { %v7903_v42 = vsel %vm425_vm2, %v16929_v48, 0.0 }
0x37b1   :  { %7904 = vadd.xlane.f32.xlu0 %v7903_v42 }
0x3838   :  { %v7908_v16 = vpop.xlane.xlu1 %7907 }
0x3839   :  { %16930 = vrcp.f32 %v7908_v16 }
0x383a   :  { %v7905_v51 = vpop.xlane.xlu0 %7904 }
0x383b   :  { %16932 = vrcp.f32 %v7905_v51  ;;  %v8690_v51 = vld [vmem:[#allocation2 + $0x6d0] sm:$0xff] }
0x3846   :  { %v16931_v18 = vpop.eup %16930 }
0x3847   :  { %v7912_v27 = vmul.f32 %v16931_v18, %v16927_v46  ;;  %v8603_v18 = vld [vmem:[#allocation2 + $0x800] sm:$0xff] }
0x3848   :  { %v16933_v52 = vpop.eup %16932 }
0x3849   :  { %v7910_v38 = vmul.f32 %v16933_v52, %v16929_v48 }
0x384b   :  { %16187 = vmatprep.mubr.msk.f32.mxu1 %vm425_vm2, %v7910_v38 }
0x384c   :  { %16188 = vmatmul.mubr.msk.f32.vlgmr.msra.gmra.mxu1 %vm425_vm2, %v7912_v27 }
0x384d   :  { %16197 = vmatprep.mubr.msk.f32.mxu1 %vm333_vm1, %v7538_v24  ;;  %16196 = vmatpush3.msra.mxu1 %v7547_v57  ;;  %v14448_v24 = vld [vmem:[#allocation2 + $0x6da] ss:$0 sm:$0xff] }
0x384e   :  { %16211 = vmatprep.subr.mxu1 %v8244_v41 }
0x3850   :  { %16198 = vmatmul.mubr.msk.f32.vlgmr.msra.gmra.mxu1 %vm333_vm1, %v16142_v22 }
0x3851   :  { %16212 = vmatpush3.msra.mxu1 %v8244_v41  ;;  %16219 = vmatprep.mubr.msk.f32.mxu1 %vm35_vm0, %v17641_v25 }
0x3852   :  { %16213 = vmatprep.subr.mxu1 %v8243_v44 }
0x3853   :  { %16214 = vmatpush3.msra.mxu1 %v8243_v44 }
0x3854   :  { %16215 = vmatprep.subr.mxu1 %v8242_v58 }
0x3855   :  { %16216 = vmatpush3.msra.mxu1 %v8242_v58 }
0x3856   :  { %16217 = vmatprep.subr.mxu1 %v8241_v54 }
0x3857   :  { %16218 = vmatpush3.msra.mxu1 %v8241_v54  ;;  %v8689_v54 = vld [vmem:[#allocation2 + $0x6c8] sm:$0xff] }
0x3858   :  { %16220 = vmatmul.mubr.msk.f32.vlgmr.msra.gmra.mxu1 %vm35_vm0, %v17643_v20 }
0x390c   :  { %v16189_v49 = vpop.f32.mrf.mxu1 }
0x390e   :  { %v7985_v60 = vpop.f32.mrf.mxu1 }
0x390f   :  { %16192 = vmatprep.mubr.msk.f32.mxu0 %vm333_vm1, %v7985_v60  ;;  %v8858_v60 = vld [vmem:[#allocation2 + $0x7e0] sm:$0xff] }
0x3910   :  { %16193 = vmatmul.mubr.msk.f32.vlgmr.msra.gmra.mxu0 %vm333_vm1, %v16189_v49  ;;  %v17721_v2 = vpop.f32.mrf.mxu1  ;;  %v8687_v49 = vld [vmem:[#allocation2 + $0x6b8] sm:$0xff] }
0x3911   :  { %16201 = vmatpush3.msra.mxu0 %v8160_v59  ;;  %16208 = vmatprep.mubr.msk.f32.mxu0 %vm35_vm0, %v17649_v9  ;;  %v8688_v59 = vld [vmem:[#allocation2 + $0x6c0] sm:$0xff] }
0x3912   :  { %16202 = vmatprep.subr.mxu0 %v8159_v61  ;;  %v17723_v55 = vpop.f32.mrf.mxu1 }
0x3913   :  { %16203 = vmatpush3.msra.mxu0 %v8159_v61  ;;  %v8857_v61 = vld [vmem:[#allocation2 + $0x7d8] sm:$0xff] }
0x3914   :  { %16204 = vmatprep.subr.mxu0 %v8158_v62 }
0x3915   :  { %16205 = vmatpush3.msra.mxu0 %v8158_v62  ;;  %v8856_v62 = vld [vmem:[#allocation2 + $0x7d0] sm:$0xff] }
0x3916   :  { %16206 = vmatprep.subr.mxu0 %v8157_v3 }
0x3917   :  { %16207 = vmatpush3.msra.mxu0 %v8157_v3  ;;  %v8774_v3 = vld [vmem:[#allocation2 + $0x758] sm:$0xff] }
0x3918   :  { %16209 = vmatmul.mubr.msk.f32.vlgmr.msra.gmra.mxu0 %vm35_vm0, %v17651_v45  ;;  %v16221_v56 = vpop.f32.mrf.mxu1  ;;  %16222 = vmatprep.subr.mxu0 %v8328_v6 }
0x3919   :  { %v8322_v7 = vadd.f32 %v16221_v56, %v14451_v8  ;;  %16223 = vmatpush3.msra.mxu0 %v8328_v6  ;;  %16230 = vmatprep.mubr.msk.f32.mxu0 %vm35_vm0, %v17641_v25  ;;  %v14465_v56 = vld [vmem:[#allocation2 + $0x6db] ss:$0 sm:$0xff] }
0x391a   :  { %v8316_v14 = vpop.f32.mrf.mxu1  ;;  %16224 = vmatprep.subr.mxu0 %v8327_v4 }
0x391b   :  { %v8317_v50 = vadd.f32 %v14451_v8, %v8316_v14  ;;  %16225 = vmatpush3.msra.mxu0 %v8327_v4  ;;  %16233 = vmatprep.subr.msk.mxu1 %vm333_vm1, %v8322_v7  ;;  %v8773_v8 = vld [vmem:[#allocation2 + $0x750] sm:$0xff]  ;;  %v8772_v4 = vld [vmem:[#allocation2 + $0x748] sm:$0xff] }
0x391c   :  { %16226 = vmatprep.subr.mxu0 %v8326_v12  ;;  %16234 = vmatpush3.xpose.msk.msra.mxu1 %vm333_vm1, %v8322_v7  ;;  %v8771_v7 = vld [vmem:[#allocation2 + $0x740] sm:$0xff] }
0x391d   :  { %16227 = vmatpush3.msra.mxu0 %v8326_v12  ;;  %16235 = vmatprep.subr.msk.mxu1 %vm333_vm1, %v8317_v50 }
0x391e   :  { %16228 = vmatprep.subr.mxu0 %v8325_v17 }
0x391f   :  { %16229 = vmatpush3.msra.mxu0 %v8325_v17 }
0x3920   :  { %16231 = vmatmul.mubr.msk.f32.vlgmr.msra.gmra.mxu0 %vm35_vm0, %v17643_v20  ;;  %16236 = vmatpush3.xpose.msk.msra.mxu1 %vm333_vm1, %v8317_v50 }
0x3921   :  { %16247 = vmatprep.subr.mxu1 %v8603_v18 }
0x39d0   :  { %v17735_v19 = vpop.f32.mrf.mxu0 }
0x39d2   :  { %v17737_v21 = vpop.f32.mrf.mxu0 }
0x39d8   :  { %v16210_v22 = vpop.f32.mrf.mxu0 }
0x39d9   :  { %v8238_v23 = vadd.f32 %v16210_v22, %v14448_v24  ;;  %v14471_v22 = vld [vmem:[#allocation2 + $0x7eb] ss:$0 sm:$0xff] }
0x39da   :  { %v8232_v26 = vpop.f32.mrf.mxu0 }
0x39db   :  { %v8233_v53 = vadd.f32 %v14448_v24, %v8232_v26 }
0x39dd   :  { %16237 = vmatprep.mubr.msk.f32.mxu1 %vm333_vm1, %v8233_v53 }
0x39de   :  { %16238 = vmatmul.mubr.msk.f32.vlgmr.msra.gmra.mxu1 %vm333_vm1, %v8238_v23 }
0x39df   :  { %16248 = vmatpush3.msra.mxu1 %v8603_v18 }
0x39e0   :  { %v16232_v29 = vpop.f32.mrf.mxu0  ;;  %16263 = vmatprep.subr.mxu1 %v8774_v3 }
0x39e1   :  { %v8406_v31 = vadd.f32 %v16232_v29, %v14454_v28 }
0x39e2   :  { %v8400_v30 = vpop.f32.mrf.mxu0 }
0x39e3   :  { %v8401_v32 = vadd.f32 %v14454_v28, %v8400_v30  ;;  %16240 = vmatprep.subr.mxu0 %v8406_v31  ;;  %v8154_v28 = vadd.f32 %v17721_v2, %v17735_v19 }
0x39e4   :  { %16241 = vmatpush3.msra.mxu0 %v8406_v31  ;;  %v8149_v31 = vadd.f32 %v17723_v55, %v17737_v21 }
0x39e5   :  { %16242 = vmatprep.subr.mxu0 %v8401_v32 }
0x39e6   :  { %16243 = vmatpush3.msra.mxu0 %v8401_v32 }
0x39e7   :  { %16252 = vmatprep.subr.mxu0 %v8690_v51 }
0x3a9e   :  { %v16239_v63 = vpop.f32.mrf.mxu1 }
0x3a9f   :  { %v8497_v5 = vmul.f32 0.35355338, %v16239_v63 }
0x3aa0   :  { %v8487_v10 = vpop.f32.mrf.mxu1 }
0x3aa1   :  { %v8496_v11 = vmul.f32 0.35355338, %v8487_v10  ;;  %v8499_v33 = vadd.f32 %v8497_v5, %v17678_v40  ;;  %v14468_v5 = vld [vmem:[#allocation2 + $0x763] ss:$0 sm:$0xff] }
0x3aa3   :  { %v8503_v36 = vsel %vm425_vm2, %v8499_v33, -inf  ;;  %v8498_v1 = vadd.f32 %v8496_v11, %v17683_v35 }
0x3aa4   :  { %8504 = vmax.xlane.f32.xlu1 %v8503_v36 }
0x3aa5   :  { %v8500_v37 = vsel %vm425_vm2, %v8498_v1, -inf }
0x3aa6   :  { %8501 = vmax.xlane.f32.xlu0 %v8500_v37 }
0x3b2d   :  { %v8505_v39 = vpop.xlane.xlu1 %8504 }
0x3b2e   :  { %v8507_v0 = vsub.f32 %v8499_v33, %v8505_v39 }
0x3b2f   :  { %v8502_v43 = vpop.xlane.xlu0 %8501 }
0x3b30   :  { %v8510_v46 = vmul.f32 1.442695, %v8507_v0  ;;  %v8506_v47 = vsub.f32 %v8498_v1, %v8502_v43 }
0x3b32   :  { %16934 = vpow2.f32 %v8510_v46  ;;  %v8508_v48 = vmul.f32 1.442695, %v8506_v47 }
0x3b34   :  { %16936 = vpow2.f32 %v8508_v48 }
0x3b3f   :  { %v16935_v42 = vpop.eup %16934 }
0x3b40   :  { %v8515_v57 = vsel %vm425_vm2, %v16935_v42, 0.0 }
0x3b41   :  { %v16937_v34 = vpop.eup %16936  ;;  %8516 = vadd.xlane.f32.xlu1 %v8515_v57 }
0x3b42   :  { %v8512_v16 = vsel %vm425_vm2, %v16937_v34, 0.0 }
0x3b43   :  { %8513 = vadd.xlane.f32.xlu0 %v8512_v16 }
0x3bca   :  { %v8517_v52 = vpop.xlane.xlu1 %8516 }
0x3bcb   :  { %16938 = vrcp.f32 %v8517_v52 }
0x3bcc   :  { %v8514_v38 = vpop.xlane.xlu0 %8513 }
0x3bcd   :  { %16940 = vrcp.f32 %v8514_v38 }
0x3bd8   :  { %v16939_v27 = vpop.eup %16938 }
0x3bd9   :  { %v8521_v58 = vmul.f32 %v16939_v27, %v16935_v42 }
0x3bda   :  { %v16941_v41 = vpop.eup %16940 }
0x3bdb   :  { %v8519_v44 = vmul.f32 %v16941_v41, %v16937_v34 }
0x3bdd   :  { %16244 = vmatprep.mubr.msk.f32.mxu0 %vm425_vm2, %v8519_v44 }
0x3bde   :  { %16245 = vmatmul.mubr.msk.f32.vlgmr.msra.gmra.mxu0 %vm425_vm2, %v8521_v58 }
0x3bdf   :  { %16253 = vmatpush3.msra.mxu0 %v8690_v51  ;;  %16260 = vmatprep.mubr.msk.f32.mxu0 %vm35_vm0, %v17649_v9  ;;  %v8855_v9 = vld [vmem:[#allocation2 + $0x7c8] sm:$0xff] }
0x3be0   :  { %16254 = vmatprep.subr.mxu0 %v8689_v54 }
0x3be1   :  { %16255 = vmatpush3.msra.mxu0 %v8689_v54 }
0x3be2   :  { %16256 = vmatprep.subr.mxu0 %v8688_v59 }
0x3be3   :  { %16257 = vmatpush3.msra.mxu0 %v8688_v59 }
0x3be4   :  { %16258 = vmatprep.subr.mxu0 %v8687_v49 }
0x3be5   :  { %16259 = vmatpush3.msra.mxu0 %v8687_v49  ;;  %v14482_v49 = vld [vmem:[#allocation2 + $0x810] ss:$0 sm:$0xff] }
0x3be6   :  { %16261 = vmatmul.mubr.msk.f32.vlgmr.msra.gmra.mxu0 %vm35_vm0, %v17651_v45  ;;  %16274 = vmatprep.subr.mxu0 %v8858_v60 }
0x3be7   :  { %16275 = vmatpush3.msra.mxu0 %v8858_v60  ;;  %16282 = vmatprep.mubr.msk.f32.mxu0 %vm35_vm0, %v17641_v25 }
0x3be8   :  { %16276 = vmatprep.subr.mxu0 %v8857_v61 }
0x3be9   :  { %16277 = vmatpush3.msra.mxu0 %v8857_v61 }
0x3bea   :  { %16278 = vmatprep.subr.mxu0 %v8856_v62 }
0x3beb   :  { %16279 = vmatpush3.msra.mxu0 %v8856_v62 }
0x3bec   :  { %16280 = vmatprep.subr.mxu0 %v8855_v9 }
0x3bed   :  { %16281 = vmatpush3.msra.mxu0 %v8855_v9 }
0x3bee   :  { %16283 = vmatmul.mubr.msk.f32.vlgmr.msra.gmra.mxu0 %vm35_vm0, %v17643_v20 }
0x3c9e   :  { %v16246_v6 = vpop.f32.mrf.mxu0 }
0x3ca0   :  { %v8594_v45 = vpop.f32.mrf.mxu0 }
0x3ca1   :  { %16249 = vmatprep.mubr.msk.f32.mxu1 %vm333_vm1, %v8594_v45 }
0x3ca2   :  { %16250 = vmatmul.mubr.msk.f32.vlgmr.msra.gmra.mxu1 %vm333_vm1, %v16246_v6 }
0x3ca3   :  { %16264 = vmatpush3.msra.mxu1 %v8774_v3  ;;  %16271 = vmatprep.mubr.msk.f32.mxu1 %vm35_vm0, %v17641_v25 }
0x3ca4   :  { %16265 = vmatprep.subr.mxu1 %v8773_v8 }
0x3ca5   :  { %16266 = vmatpush3.msra.mxu1 %v8773_v8 }
0x3ca6   :  { %v16262_v12 = vpop.f32.mrf.mxu0  ;;  %16267 = vmatprep.subr.mxu1 %v8772_v4 }
0x3ca7   :  { %v8768_v14 = vadd.f32 %v16262_v12, %v14465_v56  ;;  %16268 = vmatpush3.msra.mxu1 %v8772_v4 }
0x3ca8   :  { %v8762_v50 = vpop.f32.mrf.mxu0  ;;  %16269 = vmatprep.subr.mxu1 %v8771_v7 }
0x3ca9   :  { %v8763_v17 = vadd.f32 %v14465_v56, %v8762_v50  ;;  %16270 = vmatpush3.msra.mxu1 %v8771_v7 }
0x3caa   :  { %16272 = vmatmul.mubr.msk.f32.vlgmr.msra.gmra.mxu1 %vm35_vm0, %v17643_v20 }
0x3cab   :  { %16289 = vmatprep.mubr.msk.f32.mxu1 %vm333_vm1, %v8763_v17 }
0x3cae   :  { %v16284_v24 = vpop.f32.mrf.mxu0 }
0x3caf   :  { %v8936_v26 = vadd.f32 %v16284_v24, %v14471_v22 }
0x3cb0   :  { %v8930_v53 = vpop.f32.mrf.mxu0 }
0x3cb1   :  { %v8931_v23 = vadd.f32 %v14471_v22, %v8930_v53  ;;  %16292 = vmatprep.subr.mxu0 %v8936_v26  ;;  %v9268_v53 = vld [vmem:[#allocation2 + $0x830] sm:$0xff] }
0x3cb2   :  { %16293 = vmatpush3.msra.mxu0 %v8936_v26  ;;  %v9269_v26 = vld [vmem:[#allocation2 + $0x838] sm:$0xff] }
0x3cb3   :  { %16294 = vmatprep.subr.mxu0 %v8931_v23 }
0x3cb4   :  { %16295 = vmatpush3.msra.mxu0 %v8931_v23  ;;  %v9267_v23 = vld [vmem:[#allocation2 + $0x828] sm:$0xff] }
0x3cb5   :  { %16304 = vmatprep.subr.mxu0 %v9269_v26 }
0x3d62   :  { %v16251_v29 = vpop.f32.mrf.mxu1 }
0x3d63   :  { %v8686_v30 = vadd.f32 %v16251_v29, %v8154_v28  ;;  %v9266_v28 = vld [vmem:[#allocation2 + $0x820] sm:$0xff] }
0x3d64   :  { %v8676_v32 = vpop.f32.mrf.mxu1  ;;  %v9365_v29 = vld [vmem:[#allocation2 + $0x880] sm:$0xff] }
0x3d65   :  { %v8685_v63 = vadd.f32 %v8676_v32, %v8149_v31  ;;  %v9364_v31 = vld [vmem:[#allocation2 + $0x878] sm:$0xff]  ;;  %v9362_v32 = vld [vmem:[#allocation2 + $0x868] sm:$0xff] }
0x3d6a   :  { %v16273_v10 = vpop.f32.mrf.mxu1 }
0x3d6b   :  { %v8852_v11 = vadd.f32 %v16273_v10, %v14468_v5 }
0x3d6c   :  { %v8846_v33 = vpop.f32.mrf.mxu1 }
0x3d6d   :  { %v8847_v36 = vadd.f32 %v14468_v5, %v8846_v33  ;;  %16285 = vmatprep.subr.msk.mxu1 %vm333_vm1, %v8852_v11 }
0x3d6e   :  { %16286 = vmatpush3.xpose.msk.msra.mxu1 %vm333_vm1, %v8852_v11 }
0x3d6f   :  { %16287 = vmatprep.subr.msk.mxu1 %vm333_vm1, %v8847_v36 }
0x3d72   :  { %16288 = vmatpush3.xpose.msk.msra.mxu1 %vm333_vm1, %v8847_v36 }
0x3d75   :  { %16290 = vmatmul.mubr.msk.f32.vlgmr.msra.gmra.mxu1 %vm333_vm1, %v8768_v14 }
0x3e35   :  { %v16291_v2 = vpop.f32.mrf.mxu1 }
0x3e36   :  { %v9027_v55 = vmul.f32 0.35355338, %v16291_v2 }
0x3e37   :  { %v9017_v19 = vpop.f32.mrf.mxu1 }
0x3e38   :  { %v9026_v21 = vmul.f32 0.35355338, %v9017_v19  ;;  %v9029_v1 = vadd.f32 %v9027_v55, %v17678_v40  ;;  %v14483_v55 = vld [vmem:[#allocation2 + $0x818] ss:$0 sm:$0xff] }
0x3e3a   :  { %v9033_v37 = vsel %vm425_vm2, %v9029_v1, -inf  ;;  %v9028_v39 = vadd.f32 %v9026_v21, %v17683_v35  ;;  %v9133_v35 = vld [vmem:[#allocation2 + $0x808] sm:$0xff] }
0x3e3b   :  { %9034 = vmax.xlane.f32.xlu1 %v9033_v37  ;;  %16299 = vmatprep.subr.mxu1 %v9133_v35 }
0x3e3c   :  { %v9030_v0 = vsel %vm425_vm2, %v9028_v39, -inf  ;;  %16300 = vmatpush3.msra.mxu1 %v9133_v35 }
0x3e3d   :  { %9031 = vmax.xlane.f32.xlu0 %v9030_v0  ;;  %16315 = vmatprep.subr.mxu1 %v9365_v29 }
0x3ec4   :  { %v9035_v43 = vpop.xlane.xlu1 %9034 }
0x3ec5   :  { %v9037_v46 = vsub.f32 %v9029_v1, %v9035_v43 }
0x3ec6   :  { %v9032_v47 = vpop.xlane.xlu0 %9031 }
0x3ec7   :  { %v9040_v48 = vmul.f32 1.442695, %v9037_v46  ;;  %v9036_v42 = vsub.f32 %v9028_v39, %v9032_v47  ;;  %v14484_v39 = vld [vmem:[#allocation2 + $0x819] ss:$0 sm:$0xff]  ;;  %v9361_v47 = vld [vmem:[#allocation2 + $0x860] sm:$0xff] }
0x3ec9   :  { %16942 = vpow2.f32 %v9040_v48  ;;  %v9038_v57 = vmul.f32 1.442695, %v9036_v42  ;;  %v9360_v48 = vld [vmem:[#allocation2 + $0x858] sm:$0xff]  ;;  %v9359_v42 = vld [vmem:[#allocation2 + $0x850] sm:$0xff] }
0x3ecb   :  { %16944 = vpow2.f32 %v9038_v57  ;;  %v9358_v57 = vld [vmem:[#allocation2 + $0x848] sm:$0xff] }
0x3ed6   :  { %v16943_v34 = vpop.eup %16942 }
0x3ed7   :  { %v9045_v16 = vsel %vm425_vm2, %v16943_v34, 0.0 }
0x3ed8   :  { %v16945_v40 = vpop.eup %16944  ;;  %9046 = vadd.xlane.f32.xlu1 %v9045_v16 }
0x3ed9   :  { %v9042_v51 = vsel %vm425_vm2, %v16945_v40, 0.0 }
0x3eda   :  { %9043 = vadd.xlane.f32.xlu0 %v9042_v51 }
0x3f61   :  { %v9047_v18 = vpop.xlane.xlu1 %9046 }
0x3f62   :  { %16946 = vrcp.f32 %v9047_v18 }
0x3f63   :  { %v9044_v52 = vpop.xlane.xlu0 %9043 }
0x3f64   :  { %16948 = vrcp.f32 %v9044_v52 }
0x3f6f   :  { %v16947_v38 = vpop.eup %16946 }
0x3f70   :  { %v9051_v44 = vmul.f32 %v16947_v38, %v16943_v34  ;;  %v14485_v34 = vld [vmem:[#allocation2 + $0x840] ss:$0 sm:$0xff]  ;;  %v14488_v38 = vld [vmem:[#allocation2 + $0x888] ss:$0 sm:$0xff] }
0x3f71   :  { %v16949_v27 = vpop.eup %16948 }
0x3f72   :  { %v9049_v41 = vmul.f32 %v16949_v27, %v16945_v40 }
0x3f74   :  { %16296 = vmatprep.mubr.msk.f32.mxu0 %vm425_vm2, %v9049_v41 }
0x3f75   :  { %16297 = vmatmul.mubr.msk.f32.vlgmr.msra.gmra.mxu0 %vm425_vm2, %v9051_v44 }
0x3f76   :  { %16305 = vmatpush3.msra.mxu0 %v9269_v26  ;;  %v9587_v26 = vld [vmem:[#allocation2 + $0x938] sm:$0xff] }
0x3f77   :  { %16306 = vmatprep.subr.mxu0 %v9268_v53 }
0x3f78   :  { %16307 = vmatpush3.msra.mxu0 %v9268_v53 }
0x3f79   :  { %16308 = vmatprep.subr.mxu0 %v9267_v23 }
0x3f7a   :  { %16309 = vmatpush3.msra.mxu0 %v9267_v23 }
0x3f7b   :  { %16310 = vmatprep.subr.mxu0 %v9266_v28 }
0x3f7c   :  { %16311 = vmatpush3.msra.mxu0 %v9266_v28 }
0x4035   :  { %v16298_v58 = vpop.f32.mrf.mxu0 }
0x4037   :  { %v9124_v54 = vpop.f32.mrf.mxu0 }
0x4038   :  { %16301 = vmatprep.mubr.msk.f32.mxu1 %vm333_vm1, %v9124_v54 }
0x4039   :  { %16302 = vmatmul.mubr.msk.f32.vlgmr.msra.gmra.mxu1 %vm333_vm1, %v16298_v58 }
0x403a   :  { %16316 = vmatpush3.msra.mxu1 %v9365_v29 }
0x403b   :  { %16317 = vmatprep.subr.mxu1 %v9364_v31 }
0x403c   :  { %16318 = vmatpush3.msra.mxu1 %v9364_v31 }
0x40f9   :  { %v16303_v59 = vpop.f32.mrf.mxu1 }
0x40fa   :  { %v9216_v60 = vadd.f32 %v16303_v59, %v8686_v30  ;;  %v9363_v30 = vld [vmem:[#allocation2 + $0x870] sm:$0xff] }
0x40fb   :  { %v9206_v61 = vpop.f32.mrf.mxu1  ;;  %16319 = vmatprep.subr.mxu1 %v9363_v30 }
0x40fc   :  { %v9223_v62 = vadd.f32 %v14482_v49, %v9216_v60  ;;  %v9215_v9 = vadd.f32 %v9206_v61, %v8685_v63  ;;  %16320 = vmatpush3.msra.mxu1 %v9363_v30 }
0x40fd   :  { %16321 = vmatprep.subr.mxu1 %v9362_v32 }
0x40fe   :  { %v17784_v3 = vadd.f32 %v9223_v62, %v17624_v13  ;;  %v9222_v6 = vadd.f32 %v14482_v49, %v9215_v9  ;;  %16322 = vmatpush3.msra.mxu1 %v9362_v32 }
0x40ff   :  { %16323 = vmatprep.subr.mxu1 %v9361_v47 }
0x4100   :  { %v17787_v45 = vadd.f32 %v9222_v6, %v17629_v15  ;;  %v9231_v8 = vsel %vm35_vm0, %v17784_v3, 0.0  ;;  %16324 = vmatpush3.msra.mxu1 %v9361_v47  ;;  %v14493_v47 = vld [vmem:[#allocation2 + $0x918] ss:$0 sm:$0xff] }
0x4101   :  { %9232 = vadd.xlane.f32.xlu1 %v9231_v8  ;;  %16325 = vmatprep.subr.mxu1 %v9360_v48 }
0x4102   :  { %v9228_v4 = vsel %vm35_vm0, %v17787_v45, 0.0  ;;  %16326 = vmatpush3.msra.mxu1 %v9360_v48 }
0x4103   :  { %9229 = vadd.xlane.f32.xlu0 %v9228_v4  ;;  %16327 = vmatprep.subr.mxu1 %v9359_v42 }
0x4104   :  { %16328 = vmatpush3.msra.mxu1 %v9359_v42 }
0x4105   :  { %16329 = vmatprep.subr.mxu1 %v9358_v57 }
0x4106   :  { %16330 = vmatpush3.msra.mxu1 %v9358_v57 }
0x418a   :  { %v9233_v56 = vpop.xlane.xlu1 %9232 }
0x418b   :  { %v9235_v7 = vmul.f32 0.03125, %v9233_v56 }
0x418c   :  { %v9230_v12 = vpop.xlane.xlu0 %9229 }
0x418d   :  { %v9237_v14 = vsub.f32 %v17784_v3, %v9235_v7  ;;  %v9234_v50 = vmul.f32 0.03125, %v9230_v12  ;;  %v9497_v12 = vld [vmem:[#allocation2 + $0x8b0] sm:$0xff] }
0x418e   :  { %16334 = vmatprep.subr.mxu0 %v9497_v12 }
0x418f   :  { %v9236_v13 = vsub.f32 %v17787_v45, %v9234_v50  ;;  %v9239_v17 = vmul.f32 %v9237_v14, %v9237_v14  ;;  %v9496_v50 = vld [vmem:[#allocation2 + $0x8a8] sm:$0xff] }
0x4191   :  { %v9243_v15 = vsel %vm35_vm0, %v9239_v17, 0.0  ;;  %v9238_v22 = vmul.f32 %v9236_v13, %v9236_v13  ;;  %v9495_v17 = vld [vmem:[#allocation2 + $0x8a0] sm:$0xff] }
0x4192   :  { %9244 = vadd.xlane.f32.xlu1 %v9243_v15  ;;  %v9669_v15 = vld [vmem:[#allocation2 + $0x9b0] sm:$0xff] }
0x4193   :  { %v9240_v24 = vsel %vm35_vm0, %v9238_v22, 0.0  ;;  %v9494_v22 = vld [vmem:[#allocation2 + $0x898] sm:$0xff] }
0x4194   :  { %9241 = vadd.xlane.f32.xlu0 %v9240_v24  ;;  %v9668_v24 = vld [vmem:[#allocation2 + $0x9a8] sm:$0xff] }
0x421b   :  { %v9245_v63 = vpop.xlane.xlu1 %9244 }
0x421c   :  { %v9247_v5 = vmul.f32 0.03125, %v9245_v63  ;;  %v14491_v63 = vld [vmem:[#allocation2 + $0x890] ss:$0 sm:$0xff] }
0x421d   :  { %v9242_v10 = vpop.xlane.xlu0 %9241 }
0x421e   :  { %v9249_v11 = vadd.f32 1e-05, %v9247_v5  ;;  %v9246_v33 = vmul.f32 0.03125, %v9242_v10 }
0x4220   :  { %16950 = vrsqrt.f32 %v9249_v11  ;;  %v9248_v36 = vadd.f32 1e-05, %v9246_v33 }
0x4222   :  { %16952 = vrsqrt.f32 %v9248_v36  ;;  %v14492_v36 = vld [vmem:[#allocation2 + $0x891] ss:$0 sm:$0xff] }
0x422d   :  { %v16951_v2 = vpop.eup %16950 }
0x422e   :  { %v9253_v19 = vmul.f32 %v16951_v2, %v9237_v14  ;;  %v9671_v14 = vld [vmem:[#allocation2 + $0x9c0] sm:$0xff] }
0x422f   :  { %v16953_v21 = vpop.eup %16952  ;;  %16356 = vmatprep.subr.mxu1 %v9671_v14 }
0x4230   :  { %v9252_v1 = vmul.f32 %v16953_v21, %v9236_v13  ;;  %v9259_v37 = vmul.f32 %v14483_v55, %v9253_v19  ;;  %v9670_v13 = vld [vmem:[#allocation2 + $0x9b8] sm:$0xff]  ;;  %v9586_v21 = vld [vmem:[#allocation2 + $0x930] sm:$0xff] }
0x4232   :  { %v9258_v0 = vmul.f32 %v14483_v55, %v9252_v1  ;;  %v9265_v46 = vadd.f32 %v14484_v39, %v9259_v37  ;;  %v9585_v1 = vld [vmem:[#allocation2 + $0x928] sm:$0xff]  ;;  %v9584_v37 = vld [vmem:[#allocation2 + $0x920] sm:$0xff] }
0x4234   :  { %v9264_v43 = vadd.f32 %v14484_v39, %v9258_v0  ;;  %v14499_v39 = vld [vmem:[#allocation2 + $0xa28] ss:$0 sm:$0xff] }
0x4236   :  { %16312 = vmatprep.mubr.msk.f32.mxu0 %vm35_vm0, %v9264_v43 }
0x4237   :  { %16313 = vmatmul.mubr.msk.f32.vlgmr.msra.gmra.mxu0 %vm35_vm0, %v9265_v46 }
0x4238   :  { %16335 = vmatpush3.msra.mxu0 %v9497_v12 }
0x4239   :  { %16336 = vmatprep.subr.mxu0 %v9496_v50 }
0x423a   :  { %16337 = vmatpush3.msra.mxu0 %v9496_v50 }
0x423b   :  { %16338 = vmatprep.subr.mxu0 %v9495_v17 }
0x423c   :  { %16339 = vmatpush3.msra.mxu0 %v9495_v17 }
0x423d   :  { %16340 = vmatprep.subr.mxu0 %v9494_v22 }
0x423e   :  { %16341 = vmatpush3.msra.mxu0 %v9494_v22 }
0x423f   :  { %16345 = vmatprep.subr.mxu0 %v9587_v26 }
0x42f7   :  { %v16314_v16 = vpop.f32.mrf.mxu0 }
0x42f8   :  { %v9353_v40 = vadd.f32 %v16314_v16, %v14485_v34  ;;  %v14496_v16 = vld [vmem:[#allocation2 + $0x9a0] ss:$0 sm:$0xff] }
0x42f9   :  { %v9347_v51 = vpop.f32.mrf.mxu0 }
0x42fa   :  { %v9348_v35 = vadd.f32 %v14485_v34, %v9347_v51  ;;  %v9357_v52 = vmax.f32 %v9353_v40, 0.0 }
0x42fc   :  { %v9356_v18 = vmax.f32 %v9348_v35, 0.0 }
0x42fe   :  { %16331 = vmatprep.mubr.msk.f32.mxu1 %vm2353_vm3, %v9356_v18 }
0x42ff   :  { %16332 = vmatmul.mubr.msk.f32.vlgmr.msra.gmra.mxu1 %vm2353_vm3, %v9357_v52  ;;  %v10034_v52 = vld [vmem:[#allocation2 + $0x958] sm:$0xff] }
0x4300   :  { %16357 = vmatpush3.msra.mxu1 %v9671_v14 }
0x4301   :  { %16358 = vmatprep.subr.mxu1 %v9670_v13 }
0x4302   :  { %16359 = vmatpush3.msra.mxu1 %v9670_v13 }
0x4303   :  { %16360 = vmatprep.subr.mxu1 %v9669_v15 }
0x4304   :  { %16361 = vmatpush3.msra.mxu1 %v9669_v15 }
0x4305   :  { %16362 = vmatprep.subr.mxu1 %v9668_v24 }
0x4306   :  { %16363 = vmatpush3.msra.mxu1 %v9668_v24 }
0x43bf   :  { %v16333_v27 = vpop.f32.mrf.mxu1 }
0x43c0   :  { %v9449_v41 = vadd.f32 %v16333_v27, %v14488_v38  ;;  %v10033_v27 = vld [vmem:[#allocation2 + $0x950] sm:$0xff] }
0x43c1   :  { %v9443_v44 = vpop.f32.mrf.mxu1 }
0x43c2   :  { %v17802_v58 = vadd.f32 %v9449_v41, %v17784_v3  ;;  %v9444_v54 = vadd.f32 %v14488_v38, %v9443_v44  ;;  %v10032_v41 = vld [vmem:[#allocation2 + $0x948] sm:$0xff]  ;;  %v10031_v44 = vld [vmem:[#allocation2 + $0x940] sm:$0xff] }
0x43c4   :  { %v17805_v59 = vadd.f32 %v9444_v54, %v17787_v45  ;;  %v9459_v49 = vsel %vm35_vm0, %v17802_v58, 0.0 }
0x43c5   :  { %9460 = vadd.xlane.f32.xlu1 %v9459_v49 }
0x43c6   :  { %v9456_v60 = vsel %vm35_vm0, %v17805_v59, 0.0 }
0x43c7   :  { %9457 = vadd.xlane.f32.xlu0 %v9456_v60 }
0x444e   :  { %v9461_v61 = vpop.xlane.xlu1 %9460 }
0x444f   :  { %v9463_v62 = vmul.f32 0.03125, %v9461_v61  ;;  %v17844_v61 = vld [vmem:[%s18143_s0 + $0x38] sm:$0xff] }
0x4450   :  { %v9458_v9 = vpop.xlane.xlu0 %9457 }
0x4451   :  { %v9465_v6 = vsub.f32 %v17802_v58, %v9463_v62  ;;  %v9462_v8 = vmul.f32 0.03125, %v9458_v9 }
0x4453   :  { %v9464_v3 = vsub.f32 %v17805_v59, %v9462_v8  ;;  %v9467_v4 = vmul.f32 %v9465_v6, %v9465_v6 }
0x4455   :  { %v9471_v45 = vsel %vm35_vm0, %v9467_v4, 0.0  ;;  %v9466_v56 = vmul.f32 %v9464_v3, %v9464_v3  ;;  %v14511_v4 = vld [vmem:[#allocation2 + $0x9a1] ss:$0 sm:$0xff] }
0x4456   :  { %9472 = vadd.xlane.f32.xlu1 %v9471_v45 }
0x4457   :  { %v9468_v7 = vsel %vm35_vm0, %v9466_v56, 0.0 }
0x4458   :  { %9469 = vadd.xlane.f32.xlu0 %v9468_v7 }
0x44df   :  { %v9473_v53 = vpop.xlane.xlu1 %9472 }
0x44e0   :  { %v9475_v23 = vmul.f32 0.03125, %v9473_v53 }
0x44e1   :  { %v9470_v28 = vpop.xlane.xlu0 %9469 }
0x44e2   :  { %v9477_v29 = vadd.f32 1e-05, %v9475_v23  ;;  %v9474_v31 = vmul.f32 0.03125, %v9470_v28 }
0x44e4   :  { %16954 = vrsqrt.f32 %v9477_v29  ;;  %v9476_v30 = vadd.f32 1e-05, %v9474_v31  ;;  %v9950_v29 = vld [vmem:[#allocation2 + $0x8d0] sm:$0xff] }
0x44e6   :  { %16956 = vrsqrt.f32 %v9476_v30 }
0x44f1   :  { %v16955_v32 = vpop.eup %16954 }
0x44f2   :  { %v9481_v5 = vmul.f32 %v16955_v32, %v9465_v6  ;;  %v17850_v6 = vld [vmem:[%s18143_s0 + $0x30] sm:$0xff] }
0x44f3   :  { %v16957_v10 = vpop.eup %16956 }
0x44f4   :  { %v9480_v11 = vmul.f32 %v16957_v10, %v9464_v3  ;;  %v9487_v33 = vmul.f32 %v14491_v63, %v9481_v5 }
0x44f6   :  { %v9486_v2 = vmul.f32 %v14491_v63, %v9480_v11  ;;  %v17817_v19 = vadd.f32 %v14492_v36, %v9487_v33  ;;  %v9949_v11 = vld [vmem:[#allocation2 + $0x8c8] sm:$0xff]  ;;  %v9948_v33 = vld [vmem:[#allocation2 + $0x8c0] sm:$0xff] }
0x44f8   :  { %v17815_v55 = vadd.f32 %v14492_v36, %v9486_v2  ;;  %v9947_v36 = vld [vmem:[#allocation2 + $0x8b8] sm:$0xff]  ;;  %v10118_v2 = vld [vmem:[#allocation2 + $0x9e0] sm:$0xff] }
0x44fa   :  { %16342 = vmatprep.mubr.msk.f32.mxu0 %vm35_vm0, %v17815_v55  ;;  %16364 = vmatprep.mubr.msk.f32.mxu1 %vm35_vm0, %v17815_v55 }
0x44fb   :  { %16343 = vmatmul.mubr.msk.f32.vlgmr.msra.gmra.mxu0 %vm35_vm0, %v17817_v19  ;;  %16365 = vmatmul.mubr.msk.f32.vlgmr.msra.gmra.mxu1 %vm35_vm0, %v17817_v19 }
0x44fc   :  { %16346 = vmatpush3.msra.mxu0 %v9587_v26  ;;  %16353 = vmatprep.mubr.msk.f32.mxu0 %vm35_vm0, %v17815_v55 }
0x44fd   :  { %16347 = vmatprep.subr.mxu0 %v9586_v21 }
0x44fe   :  { %16348 = vmatpush3.msra.mxu0 %v9586_v21  ;;  %v10117_v21 = vld [vmem:[#allocation2 + $0x9d8] sm:$0xff] }
0x44ff   :  { %16349 = vmatprep.subr.mxu0 %v9585_v1 }
0x4500   :  { %16350 = vmatpush3.msra.mxu0 %v9585_v1  ;;  %v10116_v1 = vld [vmem:[#allocation2 + $0x9d0] sm:$0xff] }
0x4501   :  { %16351 = vmatprep.subr.mxu0 %v9584_v37 }
0x4502   :  { %16352 = vmatpush3.msra.mxu0 %v9584_v37  ;;  %v10115_v37 = vld [vmem:[#allocation2 + $0x9c8] sm:$0xff] }
0x4503   :  { %16354 = vmatmul.mubr.msk.f32.vlgmr.msra.gmra.mxu0 %vm35_vm0, %v17817_v19 }
0x45bb   :  { %v16344_v0 = vpop.f32.mrf.mxu0  ;;  %v16366_v43 = vpop.f32.mrf.mxu1 }
0x45bc   :  { %v9749_v46 = vadd.f32 %v16366_v43, %v14499_v39  ;;  %v9581_v38 = vadd.f32 %v16344_v0, %v14493_v47 }
0x45bd   :  { %v9575_v48 = vpop.f32.mrf.mxu0  ;;  %v9743_v42 = vpop.f32.mrf.mxu1 }
0x45be   :  { %v9576_v57 = vadd.f32 %v14493_v47, %v9575_v48  ;;  %v9744_v34 = vadd.f32 %v14499_v39, %v9743_v42  ;;  %16374 = vmatprep.subr.mxu1 %v9749_v46 }
0x45bf   :  { %16375 = vmatpush3.msra.mxu1 %v9749_v46  ;;  %v14508_v46 = vld [vmem:[#allocation2 + $0x919] ss:$0 sm:$0xff] }
0x45c0   :  { %16371 = vmatprep.mubr.msk.f32.mxu0 %vm333_vm1, %v9576_v57  ;;  %16376 = vmatprep.subr.mxu1 %v9744_v34  ;;  %v14514_v57 = vld [vmem:[#allocation2 + $0xa29] ss:$0 sm:$0xff] }
0x45c1   :  { %16377 = vmatpush3.msra.mxu1 %v9744_v34 }
0x45c2   :  { %16381 = vmatprep.subr.mxu1 %v9950_v29 }
0x45c3   :  { %v16355_v40 = vpop.f32.mrf.mxu0 }
0x45c4   :  { %v9665_v51 = vadd.f32 %v16355_v40, %v14496_v16 }
0x45c5   :  { %v9659_v35 = vpop.f32.mrf.mxu0 }
0x45c6   :  { %v9660_v18 = vadd.f32 %v14496_v16, %v9659_v35  ;;  %16367 = vmatprep.subr.msk.mxu0 %vm333_vm1, %v9665_v51 }
0x45c7   :  { %16368 = vmatpush3.xpose.msk.msra.mxu0 %vm333_vm1, %v9665_v51 }
0x45c8   :  { %16369 = vmatprep.subr.msk.mxu0 %vm333_vm1, %v9660_v18 }
0x45cb   :  { %16370 = vmatpush3.xpose.msk.msra.mxu0 %vm333_vm1, %v9660_v18 }
0x45cc   :  { %16392 = vmatprep.subr.mxu0 %v10034_v52 }
0x45ce   :  { %16372 = vmatmul.mubr.msk.f32.vlgmr.msra.gmra.mxu0 %vm333_vm1, %v9581_v38 }
0x45cf   :  { %16393 = vmatpush3.msra.mxu0 %v10034_v52  ;;  %16400 = vmatprep.mubr.msk.f32.mxu0 %vm35_vm0, %v17815_v55 }
0x45d0   :  { %16394 = vmatprep.subr.mxu0 %v10033_v27 }
0x45d1   :  { %16395 = vmatpush3.msra.mxu0 %v10033_v27 }
0x45d2   :  { %16396 = vmatprep.subr.mxu0 %v10032_v41 }
0x45d3   :  { %16397 = vmatpush3.msra.mxu0 %v10032_v41 }
0x45d4   :  { %16398 = vmatprep.subr.mxu0 %v10031_v44 }
0x45d5   :  { %16399 = vmatpush3.msra.mxu0 %v10031_v44 }
0x45d6   :  { %16401 = vmatmul.mubr.msk.f32.vlgmr.msra.gmra.mxu0 %vm35_vm0, %v17817_v19 }
0x468e   :  { %v16373_v54 = vpop.f32.mrf.mxu0 }
0x468f   :  { %v9840_v49 = vmul.f32 0.35355338, %v16373_v54 }
0x4690   :  { %v9830_v60 = vpop.f32.mrf.mxu0 }
0x4691   :  { %v9842_v62 = vadd.f32 %v17844_v61, %v9840_v49  ;;  %v9839_v9 = vmul.f32 0.35355338, %v9830_v60 }
0x4693   :  { %v9841_v8 = vadd.f32 %v17850_v6, %v9839_v9  ;;  %v9846_v3 = vsel %vm425_vm2, %v9842_v62, -inf }
0x4694   :  { %9847 = vmax.xlane.f32.xlu1 %v9846_v3 }
0x4695   :  { %v9843_v45 = vsel %vm425_vm2, %v9841_v8, -inf }
0x4696   :  { %v16402_v56 = vpop.f32.mrf.mxu0  ;;  %9844 = vmax.xlane.f32.xlu0 %v9843_v45 }
0x4697   :  { %v10112_v7 = vadd.f32 %v16402_v56, %v14511_v4 }
0x4698   :  { %v10106_v12 = vpop.f32.mrf.mxu0 }
0x4699   :  { %v10107_v14 = vadd.f32 %v14511_v4, %v10106_v12  ;;  %16414 = vmatprep.subr.msk.mxu0 %vm333_vm1, %v10112_v7  ;;  %v9946_v12 = vld [vmem:[#allocation2 + $0xa30] sm:$0xff] }
0x469a   :  { %16415 = vmatpush3.xpose.msk.msra.mxu0 %vm333_vm1, %v10112_v7 }
0x469b   :  { %16416 = vmatprep.subr.msk.mxu0 %vm333_vm1, %v10107_v14 }
0x469e   :  { %16417 = vmatpush3.xpose.msk.msra.mxu0 %vm333_vm1, %v10107_v14  ;;  %v10393_v14 = vld [vmem:[#allocation2 + $0xa38] sm:$0xff] }
0x469f   :  { %16428 = vmatprep.subr.mxu0 %v10393_v14 }
0x471d   :  { %v9848_v50 = vpop.xlane.xlu1 %9847 }
0x471e   :  { %v9850_v13 = vsub.f32 %v9842_v62, %v9848_v50 }
0x471f   :  { %v9845_v17 = vpop.xlane.xlu0 %9844 }
0x4720   :  { %v9853_v15 = vmul.f32 1.442695, %v9850_v13  ;;  %v9849_v22 = vsub.f32 %v9841_v8, %v9845_v17 }
0x4722   :  { %16958 = vpow2.f32 %v9853_v15  ;;  %v9851_v24 = vmul.f32 1.442695, %v9849_v22 }
0x4724   :  { %16960 = vpow2.f32 %v9851_v24 }
0x472f   :  { %v16959_v26 = vpop.eup %16958 }
0x4730   :  { %v9858_v53 = vsel %vm425_vm2, %v16959_v26, 0.0 }
0x4731   :  { %v16961_v23 = vpop.eup %16960  ;;  %9859 = vadd.xlane.f32.xlu1 %v9858_v53  ;;  %v10642_v53 = vld [vmem:[#allocation2 + $0x970] sm:$0xff] }
0x4732   :  { %v9855_v28 = vsel %vm425_vm2, %v16961_v23, 0.0 }
0x4733   :  { %9856 = vadd.xlane.f32.xlu0 %v9855_v28  ;;  %v10640_v28 = vld [vmem:[#allocation2 + $0x960] sm:$0xff] }
0x47ba   :  { %v9860_v31 = vpop.xlane.xlu1 %9859 }
0x47bb   :  { %16962 = vrcp.f32 %v9860_v31 }
0x47bc   :  { %v9857_v30 = vpop.xlane.xlu0 %9856 }
0x47bd   :  { %16964 = vrcp.f32 %v9857_v30 }
0x47c8   :  { %v16963_v32 = vpop.eup %16962 }
0x47c9   :  { %v9864_v10 = vmul.f32 %v16963_v32, %v16959_v26  ;;  %v10643_v26 = vld [vmem:[#allocation2 + $0x978] sm:$0xff]  ;;  %v10558_v32 = vld [vmem:[#allocation2 + $0x8e8] sm:$0xff] }
0x47ca   :  { %v16965_v63 = vpop.eup %16964 }
0x47cb   :  { %v9862_v5 = vmul.f32 %v16965_v63, %v16961_v23  ;;  %v10641_v23 = vld [vmem:[#allocation2 + $0x968] sm:$0xff]  ;;  %v10557_v63 = vld [vmem:[#allocation2 + $0x8e0] sm:$0xff] }
0x47cd   :  { %16378 = vmatprep.mubr.msk.f32.mxu1 %vm425_vm2, %v9862_v5 }
0x47ce   :  { %16379 = vmatmul.mubr.msk.f32.vlgmr.msra.gmra.mxu1 %vm425_vm2, %v9864_v10  ;;  %v10556_v10 = vld [vmem:[#allocation2 + $0x8d8] sm:$0xff] }
0x47cf   :  { %16382 = vmatpush3.msra.mxu1 %v9950_v29  ;;  %16389 = vmatprep.mubr.msk.f32.mxu1 %vm35_vm0, %v17815_v55  ;;  %v10559_v29 = vld [vmem:[#allocation2 + $0x8f0] sm:$0xff] }
0x47d0   :  { %16383 = vmatprep.subr.mxu1 %v9949_v11 }
0x47d1   :  { %16384 = vmatpush3.msra.mxu1 %v9949_v11  ;;  %v10727_v11 = vld [vmem:[#allocation2 + $0xa00] sm:$0xff] }
0x47d2   :  { %16385 = vmatprep.subr.mxu1 %v9948_v33 }
0x47d3   :  { %16386 = vmatpush3.msra.mxu1 %v9948_v33 }
0x47d4   :  { %16387 = vmatprep.subr.mxu1 %v9947_v36 }
0x47d5   :  { %16388 = vmatpush3.msra.mxu1 %v9947_v36  ;;  %v14530_v36 = vld [vmem:[#allocation2 + $0x9a2] ss:$0 sm:$0xff] }
0x47d6   :  { %16390 = vmatmul.mubr.msk.f32.vlgmr.msra.gmra.mxu1 %vm35_vm0, %v17817_v19  ;;  %16403 = vmatprep.subr.mxu1 %v10118_v2 }
0x47d7   :  { %16404 = vmatpush3.msra.mxu1 %v10118_v2  ;;  %16411 = vmatprep.mubr.msk.f32.mxu1 %vm35_vm0, %v17815_v55  ;;  %v10726_v2 = vld [vmem:[#allocation2 + $0x9f8] sm:$0xff] }
0x47d8   :  { %16405 = vmatprep.subr.mxu1 %v10117_v21 }
0x47d9   :  { %16406 = vmatpush3.msra.mxu1 %v10117_v21 }
0x47da   :  { %16407 = vmatprep.subr.mxu1 %v10116_v1 }
0x47db   :  { %16408 = vmatpush3.msra.mxu1 %v10116_v1 }
0x47dc   :  { %16409 = vmatprep.subr.mxu1 %v10115_v37 }
0x47dd   :  { %16410 = vmatpush3.msra.mxu1 %v10115_v37  ;;  %v10725_v37 = vld [vmem:[#allocation2 + $0x9f0] sm:$0xff] }
0x47de   :  { %16412 = vmatmul.mubr.msk.f32.vlgmr.msra.gmra.mxu1 %vm35_vm0, %v17817_v19 }
0x488e   :  { %v16380_v39 = vpop.f32.mrf.mxu1 }
0x4890   :  { %v9937_v0 = vpop.f32.mrf.mxu1 }
0x4896   :  { %v16391_v43 = vpop.f32.mrf.mxu1 }
0x4897   :  { %v10028_v42 = vadd.f32 %v16391_v43, %v14508_v46  ;;  %v10724_v43 = vld [vmem:[#allocation2 + $0x9e8] sm:$0xff] }
0x4898   :  { %v10022_v47 = vpop.f32.mrf.mxu1 }
0x4899   :  { %v10023_v48 = vadd.f32 %v14508_v46, %v10022_v47 }
0x489b   :  { %16418 = vmatprep.mubr.msk.f32.mxu0 %vm333_vm1, %v10023_v48 }
0x489c   :  { %16419 = vmatmul.mubr.msk.f32.vlgmr.msra.gmra.mxu0 %vm333_vm1, %v10028_v42  ;;  %v14527_v42 = vld [vmem:[#allocation2 + $0x91a] ss:$0 sm:$0xff] }
0x489d   :  { %16429 = vmatpush3.msra.mxu0 %v10393_v14 }
0x489e   :  { %v16413_v34 = vpop.f32.mrf.mxu1  ;;  %16438 = vmatprep.subr.mxu0 %v10559_v29 }
0x489f   :  { %v10196_v16 = vadd.f32 %v16413_v34, %v14514_v57 }
0x48a0   :  { %v10190_v40 = vpop.f32.mrf.mxu1 }
0x48a1   :  { %v10191_v51 = vadd.f32 %v14514_v57, %v10190_v40  ;;  %16421 = vmatprep.subr.mxu1 %v10196_v16  ;;  %v14533_v40 = vld [vmem:[#allocation2 + $0xa2a] ss:$0 sm:$0xff] }
0x48a2   :  { %16422 = vmatpush3.msra.mxu1 %v10196_v16 }
0x48a3   :  { %16423 = vmatprep.subr.mxu1 %v10191_v51 }
0x48a4   :  { %16424 = vmatpush3.msra.mxu1 %v10191_v51 }
0x48a5   :  { %16433 = vmatprep.subr.mxu1 %v9946_v12 }
0x495c   :  { %v16420_v35 = vpop.f32.mrf.mxu0 }
0x495d   :  { %v10287_v18 = vmul.f32 0.35355338, %v16420_v35 }
0x495e   :  { %v10277_v52 = vpop.f32.mrf.mxu0 }
0x495f   :  { %v10289_v38 = vadd.f32 %v17844_v61, %v10287_v18  ;;  %v10286_v27 = vmul.f32 0.35355338, %v10277_v52 }
0x4961   :  { %v10288_v41 = vadd.f32 %v17850_v6, %v10286_v27  ;;  %v10293_v44 = vsel %vm425_vm2, %v10289_v38, -inf }
0x4962   :  { %10294 = vmax.xlane.f32.xlu1 %v10293_v44 }
0x4963   :  { %v10290_v54 = vsel %vm425_vm2, %v10288_v41, -inf }
0x4964   :  { %10291 = vmax.xlane.f32.xlu0 %v10290_v54 }
0x49eb   :  { %v10295_v49 = vpop.xlane.xlu1 %10294 }
0x49ec   :  { %v10297_v60 = vsub.f32 %v10289_v38, %v10295_v49 }
0x49ed   :  { %v10292_v62 = vpop.xlane.xlu0 %10291 }
0x49ee   :  { %v10300_v9 = vmul.f32 1.442695, %v10297_v60  ;;  %v10296_v8 = vsub.f32 %v10288_v41, %v10292_v62 }
0x49f0   :  { %16966 = vpow2.f32 %v10300_v9  ;;  %v10298_v3 = vmul.f32 1.442695, %v10296_v8 }
0x49f2   :  { %16968 = vpow2.f32 %v10298_v3 }
0x49fd   :  { %v16967_v4 = vpop.eup %16966 }
0x49fe   :  { %v10305_v45 = vsel %vm425_vm2, %v16967_v4, 0.0 }
0x49ff   :  { %v16969_v56 = vpop.eup %16968  ;;  %10306 = vadd.xlane.f32.xlu1 %v10305_v45 }
0x4a00   :  { %v10302_v7 = vsel %vm425_vm2, %v16969_v56, 0.0 }
0x4a01   :  { %10303 = vadd.xlane.f32.xlu0 %v10302_v7 }
0x4a88   :  { %v10307_v50 = vpop.xlane.xlu1 %10306 }
0x4a89   :  { %16970 = vrcp.f32 %v10307_v50 }
0x4a8a   :  { %v10304_v13 = vpop.xlane.xlu0 %10303 }
0x4a8b   :  { %16972 = vrcp.f32 %v10304_v13  ;;  %v11089_v13 = vld [vmem:[#allocation2 + $0x910] sm:$0xff] }
0x4a96   :  { %v16971_v17 = vpop.eup %16970 }
0x4a97   :  { %v10311_v24 = vmul.f32 %v16971_v17, %v16967_v4  ;;  %v11002_v17 = vld [vmem:[#allocation2 + $0xa40] sm:$0xff] }
0x4a98   :  { %v16973_v15 = vpop.eup %16972 }
0x4a99   :  { %v10309_v22 = vmul.f32 %v16973_v15, %v16969_v56 }
0x4a9b   :  { %16425 = vmatprep.mubr.msk.f32.mxu1 %vm425_vm2, %v10309_v22 }
0x4a9c   :  { %16426 = vmatmul.mubr.msk.f32.vlgmr.msra.gmra.mxu1 %vm425_vm2, %v10311_v24 }
0x4a9d   :  { %16435 = vmatprep.mubr.msk.f32.mxu1 %vm333_vm1, %v9937_v0  ;;  %16434 = vmatpush3.msra.mxu1 %v9946_v12 }
0x4a9e   :  { %16449 = vmatprep.subr.mxu1 %v10643_v26 }
0x4aa0   :  { %16436 = vmatmul.mubr.msk.f32.vlgmr.msra.gmra.mxu1 %vm333_vm1, %v16380_v39 }
0x4aa1   :  { %16450 = vmatpush3.msra.mxu1 %v10643_v26  ;;  %16457 = vmatprep.mubr.msk.f32.mxu1 %vm35_vm0, %v17815_v55 }
0x4aa2   :  { %16451 = vmatprep.subr.mxu1 %v10642_v53 }
0x4aa3   :  { %16452 = vmatpush3.msra.mxu1 %v10642_v53 }
0x4aa4   :  { %16453 = vmatprep.subr.mxu1 %v10641_v23 }
0x4aa5   :  { %16454 = vmatpush3.msra.mxu1 %v10641_v23 }
0x4aa6   :  { %16455 = vmatprep.subr.mxu1 %v10640_v28 }
0x4aa7   :  { %16456 = vmatpush3.msra.mxu1 %v10640_v28  ;;  %v11088_v28 = vld [vmem:[#allocation2 + $0x908] sm:$0xff] }
0x4aa8   :  { %16458 = vmatmul.mubr.msk.f32.vlgmr.msra.gmra.mxu1 %vm35_vm0, %v17817_v19 }
0x4b5c   :  { %v16427_v31 = vpop.f32.mrf.mxu1 }
0x4b5e   :  { %v10384_v30 = vpop.f32.mrf.mxu1 }
0x4b5f   :  { %16430 = vmatprep.mubr.msk.f32.mxu0 %vm333_vm1, %v10384_v30  ;;  %v11257_v30 = vld [vmem:[#allocation2 + $0xa20] sm:$0xff] }
0x4b60   :  { %16431 = vmatmul.mubr.msk.f32.vlgmr.msra.gmra.mxu0 %vm333_vm1, %v16427_v31  ;;  %v17891_v5 = vpop.f32.mrf.mxu1  ;;  %v11086_v31 = vld [vmem:[#allocation2 + $0x8f8] sm:$0xff] }
0x4b61   :  { %16439 = vmatpush3.msra.mxu0 %v10559_v29  ;;  %16446 = vmatprep.mubr.msk.f32.mxu0 %vm35_vm0, %v17815_v55  ;;  %v11087_v29 = vld [vmem:[#allocation2 + $0x900] sm:$0xff] }
0x4b62   :  { %16440 = vmatprep.subr.mxu0 %v10558_v32  ;;  %v17893_v33 = vpop.f32.mrf.mxu1 }
0x4b63   :  { %16441 = vmatpush3.msra.mxu0 %v10558_v32  ;;  %v11256_v32 = vld [vmem:[#allocation2 + $0xa18] sm:$0xff] }
0x4b64   :  { %16442 = vmatprep.subr.mxu0 %v10557_v63 }
0x4b65   :  { %16443 = vmatpush3.msra.mxu0 %v10557_v63  ;;  %v11255_v63 = vld [vmem:[#allocation2 + $0xa10] sm:$0xff] }
0x4b66   :  { %16444 = vmatprep.subr.mxu0 %v10556_v10 }
0x4b67   :  { %16445 = vmatpush3.msra.mxu0 %v10556_v10  ;;  %v11254_v10 = vld [vmem:[#allocation2 + $0xa08] sm:$0xff] }
0x4b68   :  { %16447 = vmatmul.mubr.msk.f32.vlgmr.msra.gmra.mxu0 %vm35_vm0, %v17817_v19  ;;  %v16459_v21 = vpop.f32.mrf.mxu1  ;;  %16460 = vmatprep.subr.mxu0 %v10727_v11 }
0x4b69   :  { %v10721_v1 = vadd.f32 %v16459_v21, %v14530_v36  ;;  %16461 = vmatpush3.msra.mxu0 %v10727_v11  ;;  %16468 = vmatprep.mubr.msk.f32.mxu0 %vm35_vm0, %v17815_v55  ;;  %v11173_v11 = vld [vmem:[#allocation2 + $0x998] sm:$0xff]  ;;  %v11172_v21 = vld [vmem:[#allocation2 + $0x990] sm:$0xff] }
0x4b6a   :  { %v10715_v39 = vpop.f32.mrf.mxu1  ;;  %16462 = vmatprep.subr.mxu0 %v10726_v2 }
0x4b6b   :  { %v10716_v0 = vadd.f32 %v14530_v36, %v10715_v39  ;;  %16463 = vmatpush3.msra.mxu0 %v10726_v2  ;;  %16471 = vmatprep.subr.msk.mxu1 %vm333_vm1, %v10721_v1  ;;  %v11170_v39 = vld [vmem:[#allocation2 + $0x980] sm:$0xff] }
0x4b6c   :  { %16464 = vmatprep.subr.mxu0 %v10725_v37  ;;  %16472 = vmatpush3.xpose.msk.msra.mxu1 %vm333_vm1, %v10721_v1  ;;  %v11171_v1 = vld [vmem:[#allocation2 + $0x988] sm:$0xff] }
0x4b6d   :  { %16465 = vmatpush3.msra.mxu0 %v10725_v37  ;;  %16473 = vmatprep.subr.msk.mxu1 %vm333_vm1, %v10716_v0  ;;  %v14544_v37 = vld [vmem:[#allocation2 + $0x91b] ss:$0 sm:$0xff] }
0x4b6e   :  { %16466 = vmatprep.subr.mxu0 %v10724_v43 }
0x4b6f   :  { %16467 = vmatpush3.msra.mxu0 %v10724_v43 }
0x4b70   :  { %16469 = vmatmul.mubr.msk.f32.vlgmr.msra.gmra.mxu0 %vm35_vm0, %v17817_v19  ;;  %16474 = vmatpush3.xpose.msk.msra.mxu1 %vm333_vm1, %v10716_v0 }
0x4b71   :  { %16485 = vmatprep.subr.mxu1 %v11002_v17 }
0x4c20   :  { %v17905_v46 = vpop.f32.mrf.mxu0 }
0x4c22   :  { %v17907_v47 = vpop.f32.mrf.mxu0 }
0x4c28   :  { %v16448_v48 = vpop.f32.mrf.mxu0 }
0x4c29   :  { %v10637_v16 = vadd.f32 %v16448_v48, %v14527_v42 }
0x4c2a   :  { %v10631_v57 = vpop.f32.mrf.mxu0 }
0x4c2b   :  { %v10632_v34 = vadd.f32 %v14527_v42, %v10631_v57  ;;  %v14550_v57 = vld [vmem:[#allocation2 + $0xa2b] ss:$0 sm:$0xff] }
0x4c2d   :  { %16475 = vmatprep.mubr.msk.f32.mxu1 %vm333_vm1, %v10632_v34 }
0x4c2e   :  { %16476 = vmatmul.mubr.msk.f32.vlgmr.msra.gmra.mxu1 %vm333_vm1, %v10637_v16 }
0x4c2f   :  { %16486 = vmatpush3.msra.mxu1 %v11002_v17 }
0x4c30   :  { %v16470_v51 = vpop.f32.mrf.mxu0  ;;  %16501 = vmatprep.subr.mxu1 %v11173_v11 }
0x4c31   :  { %v10805_v35 = vadd.f32 %v16470_v51, %v14533_v40  ;;  %v10553_v51 = vadd.f32 %v17891_v5, %v17905_v46 }
0x4c32   :  { %v10799_v18 = vpop.f32.mrf.mxu0 }
0x4c33   :  { %v10800_v52 = vadd.f32 %v14533_v40, %v10799_v18  ;;  %16478 = vmatprep.subr.mxu0 %v10805_v35  ;;  %v10548_v18 = vadd.f32 %v17893_v33, %v17907_v47 }
0x4c34   :  { %16479 = vmatpush3.msra.mxu0 %v10805_v35 }
0x4c35   :  { %16480 = vmatprep.subr.mxu0 %v10800_v52 }
0x4c36   :  { %16481 = vmatpush3.msra.mxu0 %v10800_v52 }
0x4c37   :  { %16490 = vmatprep.subr.mxu0 %v11089_v13 }
0x4cee   :  { %v16477_v38 = vpop.f32.mrf.mxu1 }
0x4cef   :  { %v10896_v27 = vmul.f32 0.35355338, %v16477_v38 }
0x4cf0   :  { %v10886_v41 = vpop.f32.mrf.mxu1 }
0x4cf1   :  { %v10898_v44 = vadd.f32 %v17844_v61, %v10896_v27  ;;  %v10895_v54 = vmul.f32 0.35355338, %v10886_v41  ;;  %v14547_v27 = vld [vmem:[#allocation2 + $0x9a3] ss:$0 sm:$0xff] }
0x4cf3   :  { %v10897_v49 = vadd.f32 %v17850_v6, %v10895_v54  ;;  %v10902_v60 = vsel %vm425_vm2, %v10898_v44, -inf }
0x4cf4   :  { %10903 = vmax.xlane.f32.xlu1 %v10902_v60 }
0x4cf5   :  { %v10899_v62 = vsel %vm425_vm2, %v10897_v49, -inf }
0x4cf6   :  { %10900 = vmax.xlane.f32.xlu0 %v10899_v62 }
0x4d7d   :  { %v10904_v9 = vpop.xlane.xlu1 %10903 }
0x4d7e   :  { %v10906_v8 = vsub.f32 %v10898_v44, %v10904_v9 }
0x4d7f   :  { %v10901_v3 = vpop.xlane.xlu0 %10900 }
0x4d80   :  { %v10909_v4 = vmul.f32 1.442695, %v10906_v8  ;;  %v10905_v45 = vsub.f32 %v10897_v49, %v10901_v3 }
0x4d82   :  { %16974 = vpow2.f32 %v10909_v4  ;;  %v10907_v56 = vmul.f32 1.442695, %v10905_v45 }
0x4d84   :  { %16976 = vpow2.f32 %v10907_v56 }
0x4d8f   :  { %v16975_v7 = vpop.eup %16974 }
0x4d90   :  { %v10914_v12 = vsel %vm425_vm2, %v16975_v7, 0.0 }
0x4d91   :  { %v16977_v14 = vpop.eup %16976  ;;  %10915 = vadd.xlane.f32.xlu1 %v10914_v12 }
0x4d92   :  { %v10911_v50 = vsel %vm425_vm2, %v16977_v14, 0.0 }
0x4d93   :  { %10912 = vadd.xlane.f32.xlu0 %v10911_v50 }
0x4e1a   :  { %v10916_v15 = vpop.xlane.xlu1 %10915 }
0x4e1b   :  { %16978 = vrcp.f32 %v10916_v15 }
0x4e1c   :  { %v10913_v22 = vpop.xlane.xlu0 %10912 }
0x4e1d   :  { %16980 = vrcp.f32 %v10913_v22 }
0x4e28   :  { %v16979_v24 = vpop.eup %16978 }
0x4e29   :  { %v10920_v23 = vmul.f32 %v16979_v24, %v16975_v7 }
0x4e2a   :  { %v16981_v26 = vpop.eup %16980 }
0x4e2b   :  { %v10918_v53 = vmul.f32 %v16981_v26, %v16977_v14 }
0x4e2d   :  { %16482 = vmatprep.mubr.msk.f32.mxu0 %vm425_vm2, %v10918_v53 }
0x4e2e   :  { %16483 = vmatmul.mubr.msk.f32.vlgmr.msra.gmra.mxu0 %vm425_vm2, %v10920_v23  ;;  %v11758_v23 = vld [vmem:[#allocation2 + $0xb00] sm:$0xff] }
0x4e2f   :  { %16491 = vmatpush3.msra.mxu0 %v11089_v13  ;;  %16498 = vmatprep.mubr.msk.f32.mxu0 %vm35_vm0, %v17815_v55  ;;  %v11532_v13 = vld [vmem:[#allocation2 + $0xa48] sm:$0xff] }
0x4e30   :  { %16492 = vmatprep.subr.mxu0 %v11088_v28 }
0x4e31   :  { %16493 = vmatpush3.msra.mxu0 %v11088_v28 }
0x4e32   :  { %16494 = vmatprep.subr.mxu0 %v11087_v29 }
0x4e33   :  { %16495 = vmatpush3.msra.mxu0 %v11087_v29 }
0x4e34   :  { %16496 = vmatprep.subr.mxu0 %v11086_v31 }
0x4e35   :  { %16497 = vmatpush3.msra.mxu0 %v11086_v31  ;;  %v11757_v31 = vld [vmem:[#allocation2 + $0xaf8] sm:$0xff] }
0x4e36   :  { %16499 = vmatmul.mubr.msk.f32.vlgmr.msra.gmra.mxu0 %vm35_vm0, %v17817_v19  ;;  %16512 = vmatprep.subr.mxu0 %v11257_v30 }
0x4e37   :  { %16513 = vmatpush3.msra.mxu0 %v11257_v30  ;;  %16520 = vmatprep.mubr.msk.f32.mxu0 %vm35_vm0, %v17815_v55  ;;  %v11756_v30 = vld [vmem:[#allocation2 + $0xaf0] sm:$0xff] }
0x4e38   :  { %16514 = vmatprep.subr.mxu0 %v11256_v32 }
0x4e39   :  { %16515 = vmatpush3.msra.mxu0 %v11256_v32  ;;  %v11755_v32 = vld [vmem:[#allocation2 + $0xae8] sm:$0xff] }
0x4e3a   :  { %16516 = vmatprep.subr.mxu0 %v11255_v63 }
0x4e3b   :  { %16517 = vmatpush3.msra.mxu0 %v11255_v63 }
0x4e3c   :  { %16518 = vmatprep.subr.mxu0 %v11254_v10 }
0x4e3d   :  { %16519 = vmatpush3.msra.mxu0 %v11254_v10  ;;  %v14561_v10 = vld [vmem:[#allocation2 + $0xa50] ss:$0 sm:$0xff] }
0x4e3e   :  { %16521 = vmatmul.mubr.msk.f32.vlgmr.msra.gmra.mxu0 %vm35_vm0, %v17817_v19 }
0x4eee   :  { %v16484_v36 = vpop.f32.mrf.mxu0 }
0x4ef0   :  { %v10993_v2 = vpop.f32.mrf.mxu0 }
0x4ef1   :  { %16487 = vmatprep.mubr.msk.f32.mxu1 %vm333_vm1, %v10993_v2 }
0x4ef2   :  { %16488 = vmatmul.mubr.msk.f32.vlgmr.msra.gmra.mxu1 %vm333_vm1, %v16484_v36 }
0x4ef3   :  { %16502 = vmatpush3.msra.mxu1 %v11173_v11  ;;  %16509 = vmatprep.mubr.msk.f32.mxu1 %vm35_vm0, %v17815_v55 }
0x4ef4   :  { %16503 = vmatprep.subr.mxu1 %v11172_v21 }
0x4ef5   :  { %16504 = vmatpush3.msra.mxu1 %v11172_v21 }
0x4ef6   :  { %v16500_v0 = vpop.f32.mrf.mxu0  ;;  %16505 = vmatprep.subr.mxu1 %v11171_v1 }
0x4ef7   :  { %v11167_v43 = vadd.f32 %v16500_v0, %v14544_v37  ;;  %16506 = vmatpush3.msra.mxu1 %v11171_v1 }
0x4ef8   :  { %v11161_v48 = vpop.f32.mrf.mxu0  ;;  %16507 = vmatprep.subr.mxu1 %v11170_v39 }
0x4ef9   :  { %v11162_v42 = vadd.f32 %v14544_v37, %v11161_v48  ;;  %16508 = vmatpush3.msra.mxu1 %v11170_v39  ;;  %v14567_v39 = vld [vmem:[#allocation2 + $0xb68] ss:$0 sm:$0xff] }
0x4efa   :  { %16510 = vmatmul.mubr.msk.f32.vlgmr.msra.gmra.mxu1 %vm35_vm0, %v17817_v19 }
0x4efb   :  { %16527 = vmatprep.mubr.msk.f32.mxu1 %vm333_vm1, %v11162_v42 }
0x4efe   :  { %v16522_v55 = vpop.f32.mrf.mxu0 }
0x4eff   :  { %v11335_v34 = vadd.f32 %v16522_v55, %v14550_v57 }
0x4f00   :  { %v11329_v16 = vpop.f32.mrf.mxu0 }
0x4f01   :  { %v11330_v40 = vadd.f32 %v14550_v57, %v11329_v16  ;;  %16530 = vmatprep.subr.mxu0 %v11335_v34 }
0x4f02   :  { %16531 = vmatpush3.msra.mxu0 %v11335_v34 }
0x4f03   :  { %16532 = vmatprep.subr.mxu0 %v11330_v40 }
0x4f04   :  { %16533 = vmatpush3.msra.mxu0 %v11330_v40 }
0x4fb2   :  { %v16489_v35 = vpop.f32.mrf.mxu1 }
0x4fb3   :  { %v17938_v52 = vadd.f32 %v16489_v35, %v10553_v51 }
0x4fb4   :  { %v11075_v19 = vpop.f32.mrf.mxu1 }
0x4fb5   :  { %v17940_v38 = vadd.f32 %v11075_v19, %v10548_v18 }
0x4fba   :  { %v16511_v41 = vpop.f32.mrf.mxu1 }
0x4fbb   :  { %v11251_v44 = vadd.f32 %v16511_v41, %v14547_v27  ;;  %v11667_v41 = vld [vmem:[#allocation2 + $0xa70] sm:$0xff] }
0x4fbc   :  { %v11245_v54 = vpop.f32.mrf.mxu1 }
0x4fbd   :  { %v11246_v49 = vadd.f32 %v14547_v27, %v11245_v54  ;;  %16523 = vmatprep.subr.msk.mxu1 %vm333_vm1, %v11251_v44  ;;  %v11668_v27 = vld [vmem:[#allocation2 + $0xa78] sm:$0xff]  ;;  %v11665_v54 = vld [vmem:[#allocation2 + $0xa60] sm:$0xff] }
0x4fbe   :  { %16524 = vmatpush3.xpose.msk.msra.mxu1 %vm333_vm1, %v11251_v44  ;;  %16542 = vmatprep.subr.mxu0 %v11668_v27  ;;  %v11666_v44 = vld [vmem:[#allocation2 + $0xa68] sm:$0xff] }
0x4fbf   :  { %16525 = vmatprep.subr.msk.mxu1 %vm333_vm1, %v11246_v49 }
0x4fc2   :  { %16526 = vmatpush3.xpose.msk.msra.mxu1 %vm333_vm1, %v11246_v49  ;;  %v11842_v49 = vld [vmem:[#allocation2 + $0xb88] sm:$0xff] }
0x4fc3   :  { %16537 = vmatprep.subr.mxu1 %v11532_v13 }
0x4fc5   :  { %16528 = vmatmul.mubr.msk.f32.vlgmr.msra.gmra.mxu1 %vm333_vm1, %v11167_v43 }
0x4fc6   :  { %16538 = vmatpush3.msra.mxu1 %v11532_v13  ;;  %v11839_v13 = vld [vmem:[#allocation2 + $0xb70] sm:$0xff] }
0x4fc7   :  { %16553 = vmatprep.subr.mxu1 %v11758_v23 }
0x5085   :  { %v16529_v5 = vpop.f32.mrf.mxu1 }
0x5086   :  { %v11426_v33 = vmul.f32 0.35355338, %v16529_v5 }
0x5087   :  { %v11416_v46 = vpop.f32.mrf.mxu1 }
0x5088   :  { %v11428_v47 = vadd.f32 %v17844_v61, %v11426_v33  ;;  %v11425_v60 = vmul.f32 0.35355338, %v11416_v46 }
0x508a   :  { %v11427_v62 = vadd.f32 %v17850_v6, %v11425_v60  ;;  %v11432_v9 = vsel %vm425_vm2, %v11428_v47, -inf }
0x508b   :  { %11433 = vmax.xlane.f32.xlu1 %v11432_v9 }
0x508c   :  { %v11429_v8 = vsel %vm425_vm2, %v11427_v62, -inf }
0x508d   :  { %11430 = vmax.xlane.f32.xlu0 %v11429_v8  ;;  %v14562_v8 = vld [vmem:[#allocation2 + $0xa58] ss:$0 sm:$0xff] }
0x5114   :  { %v11434_v3 = vpop.xlane.xlu1 %11433 }
0x5115   :  { %v11436_v4 = vsub.f32 %v11428_v47, %v11434_v3 }
0x5116   :  { %v11431_v45 = vpop.xlane.xlu0 %11430 }
0x5117   :  { %v11439_v56 = vmul.f32 1.442695, %v11436_v4  ;;  %v11435_v7 = vsub.f32 %v11427_v62, %v11431_v45 }
0x5119   :  { %16982 = vpow2.f32 %v11439_v56  ;;  %v11437_v12 = vmul.f32 1.442695, %v11435_v7  ;;  %v14563_v7 = vld [vmem:[#allocation2 + $0xa59] ss:$0 sm:$0xff] }
0x511b   :  { %16984 = vpow2.f32 %v11437_v12 }
0x5126   :  { %v16983_v14 = vpop.eup %16982 }
0x5127   :  { %v11444_v61 = vsel %vm425_vm2, %v16983_v14, 0.0 }
0x5128   :  { %v16985_v50 = vpop.eup %16984  ;;  %11445 = vadd.xlane.f32.xlu1 %v11444_v61 }
0x5129   :  { %v11441_v6 = vsel %vm425_vm2, %v16985_v50, 0.0 }
0x512a   :  { %11442 = vadd.xlane.f32.xlu0 %v11441_v6  ;;  %v11840_v6 = vld [vmem:[#allocation2 + $0xb78] sm:$0xff] }
0x51b1   :  { %v11446_v17 = vpop.xlane.xlu1 %11445 }
0x51b2   :  { %16986 = vrcp.f32 %v11446_v17  ;;  %v12121_v17 = vld [vmem:[#allocation2 + $0xa98] sm:$0xff] }
0x51b3   :  { %v11443_v15 = vpop.xlane.xlu0 %11442 }
0x51b4   :  { %16988 = vrcp.f32 %v11443_v15 }
0x51bf   :  { %v16987_v22 = vpop.eup %16986 }
0x51c0   :  { %v11450_v53 = vmul.f32 %v16987_v22, %v16983_v14  ;;  %v14564_v22 = vld [vmem:[#allocation2 + $0xae0] ss:$0 sm:$0xff] }
0x51c1   :  { %v16989_v24 = vpop.eup %16988 }
0x51c2   :  { %v11448_v26 = vmul.f32 %v16989_v24, %v16985_v50  ;;  %v11841_v50 = vld [vmem:[#allocation2 + $0xb80] sm:$0xff] }
0x51c4   :  { %16534 = vmatprep.mubr.msk.f32.mxu0 %vm425_vm2, %v11448_v26 }
0x51c5   :  { %16535 = vmatmul.mubr.msk.f32.vlgmr.msra.gmra.mxu0 %vm425_vm2, %v11450_v53 }
0x51c6   :  { %16543 = vmatpush3.msra.mxu0 %v11668_v27 }
0x51c7   :  { %16544 = vmatprep.subr.mxu0 %v11667_v41 }
0x51c8   :  { %16545 = vmatpush3.msra.mxu0 %v11667_v41 }
0x51c9   :  { %16546 = vmatprep.subr.mxu0 %v11666_v44 }
0x51ca   :  { %16547 = vmatpush3.msra.mxu0 %v11666_v44 }
0x51cb   :  { %16548 = vmatprep.subr.mxu0 %v11665_v54 }
0x51cc   :  { %16549 = vmatpush3.msra.mxu0 %v11665_v54 }
0x51cd   :  { %16564 = vmatprep.subr.mxu0 %v11842_v49 }
0x5285   :  { %v16536_v28 = vpop.f32.mrf.mxu0 }
0x5287   :  { %v11523_v29 = vpop.f32.mrf.mxu0 }
0x5288   :  { %16539 = vmatprep.mubr.msk.f32.mxu1 %vm333_vm1, %v11523_v29  ;;  %v12119_v29 = vld [vmem:[#allocation2 + $0xa88] sm:$0xff] }
0x5289   :  { %16540 = vmatmul.mubr.msk.f32.vlgmr.msra.gmra.mxu1 %vm333_vm1, %v16536_v28  ;;  %v14570_v28 = vld [vmem:[#allocation2 + $0xbf0] ss:$0 sm:$0xff] }
0x528a   :  { %16554 = vmatpush3.msra.mxu1 %v11758_v23  ;;  %16561 = vmatprep.mubr.msk.f32.mxu1 %vm35_vm0, %v17641_v25  ;;  %v12120_v23 = vld [vmem:[#allocation2 + $0xa90] sm:$0xff] }
0x528b   :  { %16555 = vmatprep.subr.mxu1 %v11757_v31 }
0x528c   :  { %16556 = vmatpush3.msra.mxu1 %v11757_v31 }
0x528d   :  { %16557 = vmatprep.subr.mxu1 %v11756_v30 }
0x528e   :  { %16558 = vmatpush3.msra.mxu1 %v11756_v30 }
0x528f   :  { %16559 = vmatprep.subr.mxu1 %v11755_v32 }
0x5290   :  { %16560 = vmatpush3.msra.mxu1 %v11755_v32  ;;  %v12118_v32 = vld [vmem:[#allocation2 + $0xa80] sm:$0xff] }
0x5291   :  { %16562 = vmatmul.mubr.msk.f32.vlgmr.msra.gmra.mxu1 %vm35_vm0, %v17643_v20 }
0x5349   :  { %v16541_v63 = vpop.f32.mrf.mxu1 }
0x534a   :  { %v11615_v11 = vadd.f32 %v16541_v63, %v17938_v52 }
0x534b   :  { %v11605_v36 = vpop.f32.mrf.mxu1 }
0x534c   :  { %v11622_v2 = vadd.f32 %v14561_v10, %v11615_v11  ;;  %v11614_v21 = vadd.f32 %v11605_v36, %v17940_v38  ;;  %v12289_v11 = vld [vmem:[#allocation2 + $0xba8] sm:$0xff]  ;;  %v12288_v36 = vld [vmem:[#allocation2 + $0xba0] sm:$0xff] }
0x534e   :  { %v17964_v1 = vadd.f32 %v11622_v2, %v17802_v58  ;;  %v11621_v37 = vadd.f32 %v14561_v10, %v11614_v21  ;;  %v12287_v2 = vld [vmem:[#allocation2 + $0xb98] sm:$0xff]  ;;  %v12286_v21 = vld [vmem:[#allocation2 + $0xb90] sm:$0xff] }
0x5350   :  { %v17967_v0 = vadd.f32 %v11621_v37, %v17805_v59  ;;  %v11630_v43 = vsel %vm35_vm0, %v17964_v1, 0.0 }
0x5351   :  { %v16563_v48 = vpop.f32.mrf.mxu1  ;;  %11631 = vadd.xlane.f32.xlu1 %v11630_v43 }
0x5352   :  { %v11836_v42 = vadd.f32 %v16563_v48, %v14567_v39  ;;  %v11627_v57 = vsel %vm35_vm0, %v17967_v0, 0.0  ;;  %v18006_v48 = vld [vmem:[%s18143_s0 + $0x48] sm:$0xff] }
0x5353   :  { %v11830_v55 = vpop.f32.mrf.mxu1  ;;  %11628 = vadd.xlane.f32.xlu0 %v11627_v57 }
0x5354   :  { %v11831_v34 = vadd.f32 %v14567_v39, %v11830_v55  ;;  %16575 = vmatprep.subr.msk.mxu1 %vm333_vm1, %v11836_v42  ;;  %v18012_v55 = vld [vmem:[%s18143_s0 + $0x40] sm:$0xff] }
0x5355   :  { %16576 = vmatpush3.xpose.msk.msra.mxu1 %vm333_vm1, %v11836_v42 }
0x5356   :  { %16577 = vmatprep.subr.msk.mxu1 %vm333_vm1, %v11831_v34 }
0x5359   :  { %16578 = vmatpush3.xpose.msk.msra.mxu1 %vm333_vm1, %v11831_v34 }
0x535a   :  { %16589 = vmatprep.subr.mxu1 %v12121_v17 }
0x53da   :  { %v11632_v58 = vpop.xlane.xlu1 %11631 }
0x53db   :  { %v11634_v59 = vmul.f32 0.03125, %v11632_v58 }
0x53dc   :  { %v11629_v16 = vpop.xlane.xlu0 %11628 }
0x53dd   :  { %v11636_v40 = vsub.f32 %v17964_v1, %v11634_v59  ;;  %v11633_v51 = vmul.f32 0.03125, %v11629_v16  ;;  %v14579_v59 = vld [vmem:[#allocation2 + $0xae1] ss:$0 sm:$0xff] }
0x53df   :  { %v11635_v35 = vsub.f32 %v17967_v0, %v11633_v51  ;;  %v11638_v18 = vmul.f32 %v11636_v40, %v11636_v40 }
0x53e1   :  { %v11642_v52 = vsel %vm35_vm0, %v11638_v18, 0.0  ;;  %v11637_v19 = vmul.f32 %v11635_v35, %v11635_v35  ;;  %v14585_v18 = vld [vmem:[#allocation2 + $0xbf1] ss:$0 sm:$0xff] }
0x53e2   :  { %11643 = vadd.xlane.f32.xlu1 %v11642_v52 }
0x53e3   :  { %v11639_v38 = vsel %vm35_vm0, %v11637_v19, 0.0 }
0x53e4   :  { %11640 = vadd.xlane.f32.xlu0 %v11639_v38 }
0x546b   :  { %v11644_v5 = vpop.xlane.xlu1 %11643 }
0x546c   :  { %v11646_v33 = vmul.f32 0.03125, %v11644_v5 }
0x546d   :  { %v11641_v46 = vpop.xlane.xlu0 %11640 }
0x546e   :  { %v11648_v47 = vadd.f32 1e-05, %v11646_v33  ;;  %v11645_v60 = vmul.f32 0.03125, %v11641_v46 }
0x5470   :  { %16990 = vrsqrt.f32 %v11648_v47  ;;  %v11647_v62 = vadd.f32 1e-05, %v11645_v60 }
0x5472   :  { %16992 = vrsqrt.f32 %v11647_v62 }
0x547d   :  { %v16991_v9 = vpop.eup %16990 }
0x547e   :  { %v11652_v3 = vmul.f32 %v16991_v9, %v11636_v40  ;;  %v12205_v9 = vld [vmem:[#allocation2 + $0xb20] sm:$0xff] }
0x547f   :  { %v16993_v4 = vpop.eup %16992 }
0x5480   :  { %v11651_v45 = vmul.f32 %v16993_v4, %v11635_v35  ;;  %v11658_v56 = vmul.f32 %v14562_v8, %v11652_v3 }
0x5482   :  { %v11657_v12 = vmul.f32 %v14562_v8, %v11651_v45  ;;  %v17983_v61 = vadd.f32 %v14563_v7, %v11658_v56 }
0x5484   :  { %v17981_v14 = vadd.f32 %v14563_v7, %v11657_v12  ;;  %v12204_v12 = vld [vmem:[#allocation2 + $0xb18] sm:$0xff] }
0x5486   :  { %16550 = vmatprep.mubr.msk.f32.mxu0 %vm35_vm0, %v17981_v14 }
0x5487   :  { %16551 = vmatmul.mubr.msk.f32.vlgmr.msra.gmra.mxu0 %vm35_vm0, %v17983_v61 }
0x5488   :  { %16565 = vmatpush3.msra.mxu0 %v11842_v49  ;;  %16572 = vmatprep.mubr.msk.f32.mxu0 %vm35_vm0, %v17641_v25 }
0x5489   :  { %16566 = vmatprep.subr.mxu0 %v11841_v50 }
0x548a   :  { %16567 = vmatpush3.msra.mxu0 %v11841_v50  ;;  %v12203_v50 = vld [vmem:[#allocation2 + $0xb10] sm:$0xff] }
0x548b   :  { %16568 = vmatprep.subr.mxu0 %v11840_v6 }
0x548c   :  { %16569 = vmatpush3.msra.mxu0 %v11840_v6  ;;  %v12202_v6 = vld [vmem:[#allocation2 + $0xb08] sm:$0xff] }
0x548d   :  { %16570 = vmatprep.subr.mxu0 %v11839_v13 }
0x548e   :  { %16571 = vmatpush3.msra.mxu0 %v11839_v13 }
0x548f   :  { %16573 = vmatmul.mubr.msk.f32.vlgmr.msra.gmra.mxu0 %vm35_vm0, %v17643_v20 }
0x5547   :  { %v16552_v15 = vpop.f32.mrf.mxu0 }
0x5548   :  { %v11752_v53 = vadd.f32 %v16552_v15, %v14564_v22 }
0x5549   :  { %v11746_v24 = vpop.f32.mrf.mxu0 }
0x554a   :  { %v11747_v26 = vadd.f32 %v14564_v22, %v11746_v24  ;;  %v14582_v22 = vld [vmem:[#allocation2 + $0xb69] ss:$0 sm:$0xff] }
0x554c   :  { %16579 = vmatprep.mubr.msk.f32.mxu1 %vm333_vm1, %v11747_v26 }
0x554d   :  { %16580 = vmatmul.mubr.msk.f32.vlgmr.msra.gmra.mxu1 %vm333_vm1, %v11752_v53 }
0x554e   :  { %16590 = vmatpush3.msra.mxu1 %v12121_v17  ;;  %16597 = vmatprep.mubr.msk.f32.mxu1 %vm35_vm0, %v17981_v14 }
0x554f   :  { %v16574_v31 = vpop.f32.mrf.mxu0  ;;  %16591 = vmatprep.subr.mxu1 %v12120_v23 }
0x5550   :  { %v11920_v30 = vadd.f32 %v16574_v31, %v14570_v28  ;;  %16592 = vmatpush3.msra.mxu1 %v12120_v23 }
0x5551   :  { %v11914_v63 = vpop.f32.mrf.mxu0  ;;  %16593 = vmatprep.subr.mxu1 %v12119_v29 }
0x5552   :  { %v11915_v10 = vadd.f32 %v14570_v28, %v11914_v63  ;;  %16582 = vmatprep.subr.mxu0 %v11920_v30  ;;  %16594 = vmatpush3.msra.mxu1 %v12119_v29 }
0x5553   :  { %16583 = vmatpush3.msra.mxu0 %v11920_v30  ;;  %16595 = vmatprep.subr.mxu1 %v12118_v32 }
0x5554   :  { %16584 = vmatprep.subr.mxu0 %v11915_v10  ;;  %16596 = vmatpush3.msra.mxu1 %v12118_v32 }
0x5555   :  { %16585 = vmatpush3.msra.mxu0 %v11915_v10  ;;  %16598 = vmatmul.mubr.msk.f32.vlgmr.msra.gmra.mxu1 %vm35_vm0, %v17983_v61 }
0x5556   :  { %16611 = vmatprep.subr.mxu1 %v12289_v11  ;;  %16619 = vmatprep.mubr.msk.f32.mxu1 %vm35_vm0, %v17641_v25 }
0x5557   :  { %16612 = vmatpush3.msra.mxu1 %v12289_v11  ;;  %16600 = vmatprep.subr.mxu0 %v12205_v9 }
0x5558   :  { %16613 = vmatprep.subr.mxu1 %v12288_v36 }
0x5559   :  { %16614 = vmatpush3.msra.mxu1 %v12288_v36 }
0x555a   :  { %16615 = vmatprep.subr.mxu1 %v12287_v2 }
0x555b   :  { %16616 = vmatpush3.msra.mxu1 %v12287_v2 }
0x555c   :  { %16617 = vmatprep.subr.mxu1 %v12286_v21 }
0x555d   :  { %16618 = vmatpush3.msra.mxu1 %v12286_v21 }
0x555e   :  { %16620 = vmatmul.mubr.msk.f32.vlgmr.msra.gmra.mxu1 %vm35_vm0, %v17643_v20 }
0x560d   :  { %v16581_v37 = vpop.f32.mrf.mxu1 }
0x560e   :  { %v12011_v39 = vmul.f32 0.35355338, %v16581_v37 }
0x560f   :  { %v12001_v43 = vpop.f32.mrf.mxu1 }
0x5610   :  { %v12013_v42 = vadd.f32 %v18006_v48, %v12011_v39  ;;  %v12010_v57 = vmul.f32 0.35355338, %v12001_v43 }
0x5612   :  { %v12012_v34 = vadd.f32 %v18012_v55, %v12010_v57  ;;  %v12017_v58 = vsel %vm425_vm2, %v12013_v42, -inf }
0x5613   :  { %12018 = vmax.xlane.f32.xlu1 %v12017_v58 }
0x5614   :  { %v12014_v16 = vsel %vm425_vm2, %v12012_v34, -inf }
0x5615   :  { %v16599_v40 = vpop.f32.mrf.mxu1  ;;  %12015 = vmax.xlane.f32.xlu0 %v12014_v16  ;;  %v12564_v16 = vld [vmem:[#allocation2 + $0xc00] sm:$0xff] }
0x5616   :  { %v12199_v51 = vadd.f32 %v16599_v40, %v14579_v59 }
0x5617   :  { %v12193_v35 = vpop.f32.mrf.mxu1 }
0x5618   :  { %v12194_v13 = vadd.f32 %v14579_v59, %v12193_v35  ;;  %v12117_v59 = vld [vmem:[#allocation2 + $0xbf8] sm:$0xff] }
0x561e   :  { %v16621_v52 = vpop.f32.mrf.mxu1 }
0x561f   :  { %v12367_v19 = vadd.f32 %v16621_v52, %v14585_v18 }
0x5620   :  { %v12361_v38 = vpop.f32.mrf.mxu1 }
0x5621   :  { %v12362_v27 = vadd.f32 %v14585_v18, %v12361_v38  ;;  %16629 = vmatprep.subr.mxu1 %v12367_v19  ;;  %v12814_v38 = vld [vmem:[#allocation2 + $0xb40] sm:$0xff] }
0x5622   :  { %16630 = vmatpush3.msra.mxu1 %v12367_v19 }
0x5623   :  { %16631 = vmatprep.subr.mxu1 %v12362_v27 }
0x5624   :  { %16632 = vmatpush3.msra.mxu1 %v12362_v27  ;;  %v12813_v27 = vld [vmem:[#allocation2 + $0xb38] sm:$0xff] }
0x5625   :  { %16641 = vmatprep.subr.mxu1 %v12117_v59 }
0x569c   :  { %v12019_v41 = vpop.xlane.xlu1 %12018 }
0x569d   :  { %v12021_v44 = vsub.f32 %v12013_v42, %v12019_v41  ;;  %v12812_v41 = vld [vmem:[#allocation2 + $0xb30] sm:$0xff] }
0x569e   :  { %v12016_v54 = vpop.xlane.xlu0 %12015 }
0x569f   :  { %v12024_v49 = vmul.f32 1.442695, %v12021_v44  ;;  %v12020_v5 = vsub.f32 %v12012_v34, %v12016_v54  ;;  %v12811_v44 = vld [vmem:[#allocation2 + $0xb28] sm:$0xff]  ;;  %v12730_v54 = vld [vmem:[#allocation2 + $0xab8] sm:$0xff] }
0x56a1   :  { %16994 = vpow2.f32 %v12024_v49  ;;  %v12022_v33 = vmul.f32 1.442695, %v12020_v5 }
0x56a3   :  { %16996 = vpow2.f32 %v12022_v33  ;;  %v12729_v33 = vld [vmem:[#allocation2 + $0xab0] sm:$0xff] }
0x56ae   :  { %v16995_v46 = vpop.eup %16994 }
0x56af   :  { %v12029_v47 = vsel %vm425_vm2, %v16995_v46, 0.0 }
0x56b0   :  { %v16997_v60 = vpop.eup %16996  ;;  %12030 = vadd.xlane.f32.xlu1 %v12029_v47 }
0x56b1   :  { %v12026_v62 = vsel %vm425_vm2, %v16997_v60, 0.0 }
0x56b2   :  { %12027 = vadd.xlane.f32.xlu0 %v12026_v62  ;;  %v12898_v62 = vld [vmem:[#allocation2 + $0xbc8] sm:$0xff] }
0x5739   :  { %v12031_v8 = vpop.xlane.xlu1 %12030 }
0x573a   :  { %16998 = vrcp.f32 %v12031_v8  ;;  %v14601_v8 = vld [vmem:[#allocation2 + $0xb6a] ss:$0 sm:$0xff] }
0x573b   :  { %v12028_v3 = vpop.xlane.xlu0 %12027 }
0x573c   :  { %17000 = vrcp.f32 %v12028_v3  ;;  %v12897_v3 = vld [vmem:[#allocation2 + $0xbc0] sm:$0xff] }
0x5747   :  { %v16999_v4 = vpop.eup %16998 }
0x5748   :  { %v12035_v7 = vmul.f32 %v16999_v4, %v16995_v46  ;;  %v12728_v46 = vld [vmem:[#allocation2 + $0xaa8] sm:$0xff] }
0x5749   :  { %v17001_v45 = vpop.eup %17000 }
0x574a   :  { %v12033_v56 = vmul.f32 %v17001_v45, %v16997_v60  ;;  %v12727_v60 = vld [vmem:[#allocation2 + $0xaa0] sm:$0xff] }
0x574c   :  { %16586 = vmatprep.mubr.msk.f32.mxu0 %vm425_vm2, %v12033_v56  ;;  %v12896_v56 = vld [vmem:[#allocation2 + $0xbb8] sm:$0xff] }
0x574d   :  { %16587 = vmatmul.mubr.msk.f32.vlgmr.msra.gmra.mxu0 %vm425_vm2, %v12035_v7 }
0x574e   :  { %16601 = vmatpush3.msra.mxu0 %v12205_v9  ;;  %16608 = vmatprep.mubr.msk.f32.mxu0 %vm35_vm0, %v17641_v25 }
0x574f   :  { %16602 = vmatprep.subr.mxu0 %v12204_v12 }
0x5750   :  { %16603 = vmatpush3.msra.mxu0 %v12204_v12 }
0x5751   :  { %16604 = vmatprep.subr.mxu0 %v12203_v50 }
0x5752   :  { %16605 = vmatpush3.msra.mxu0 %v12203_v50  ;;  %v12895_v50 = vld [vmem:[#allocation2 + $0xbb0] sm:$0xff] }
0x5753   :  { %16606 = vmatprep.subr.mxu0 %v12202_v6 }
0x5754   :  { %16607 = vmatpush3.msra.mxu0 %v12202_v6 }
0x5755   :  { %16609 = vmatmul.mubr.msk.f32.vlgmr.msra.gmra.mxu0 %vm35_vm0, %v17643_v20 }
0x5756   :  { %16626 = vmatprep.mubr.msk.f32.mxu0 %vm333_vm1, %v12194_v13 }
0x580d   :  { %v16588_v17 = vpop.f32.mrf.mxu0 }
0x580f   :  { %v12108_v15 = vpop.f32.mrf.mxu0 }
0x5815   :  { %v16610_v24 = vpop.f32.mrf.mxu0 }
0x5816   :  { %v12283_v26 = vadd.f32 %v16610_v24, %v14582_v22 }
0x5817   :  { %v12277_v53 = vpop.f32.mrf.mxu0 }
0x5818   :  { %v12278_v23 = vadd.f32 %v14582_v22, %v12277_v53  ;;  %16622 = vmatprep.subr.msk.mxu0 %vm333_vm1, %v12283_v26  ;;  %v14604_v53 = vld [vmem:[#allocation2 + $0xbf2] ss:$0 sm:$0xff] }
0x5819   :  { %16623 = vmatpush3.xpose.msk.msra.mxu0 %vm333_vm1, %v12283_v26 }
0x581a   :  { %16624 = vmatprep.subr.msk.mxu0 %vm333_vm1, %v12278_v23 }
0x581d   :  { %16625 = vmatpush3.xpose.msk.msra.mxu0 %vm333_vm1, %v12278_v23 }
0x581e   :  { %16636 = vmatprep.subr.mxu0 %v12564_v16 }
0x5820   :  { %16627 = vmatmul.mubr.msk.f32.vlgmr.msra.gmra.mxu0 %vm333_vm1, %v12199_v51 }
0x5821   :  { %16637 = vmatpush3.msra.mxu0 %v12564_v16 }
0x5822   :  { %16646 = vmatprep.subr.mxu0 %v12730_v54 }
0x58e0   :  { %v16628_v28 = vpop.f32.mrf.mxu0 }
0x58e1   :  { %v12458_v29 = vmul.f32 0.35355338, %v16628_v28 }
0x58e2   :  { %v12448_v31 = vpop.f32.mrf.mxu0 }
0x58e3   :  { %v12460_v30 = vadd.f32 %v18006_v48, %v12458_v29  ;;  %v12457_v32 = vmul.f32 0.35355338, %v12448_v31 }
0x58e5   :  { %v12459_v63 = vadd.f32 %v18012_v55, %v12457_v32  ;;  %v12464_v10 = vsel %vm425_vm2, %v12460_v30, -inf }
0x58e6   :  { %12465 = vmax.xlane.f32.xlu1 %v12464_v10 }
0x58e7   :  { %v12461_v11 = vsel %vm425_vm2, %v12459_v63, -inf }
0x58e8   :  { %12462 = vmax.xlane.f32.xlu0 %v12461_v11 }
0x596f   :  { %v12466_v36 = vpop.xlane.xlu1 %12465 }
0x5970   :  { %v12468_v2 = vsub.f32 %v12460_v30, %v12466_v36 }
0x5971   :  { %v12463_v21 = vpop.xlane.xlu0 %12462 }
0x5972   :  { %v12471_v37 = vmul.f32 1.442695, %v12468_v2  ;;  %v12467_v39 = vsub.f32 %v12459_v63, %v12463_v21 }
0x5974   :  { %17002 = vpow2.f32 %v12471_v37  ;;  %v12469_v43 = vmul.f32 1.442695, %v12467_v39 }
0x5976   :  { %17004 = vpow2.f32 %v12469_v43 }
0x5981   :  { %v17003_v42 = vpop.eup %17002 }
0x5982   :  { %v12476_v57 = vsel %vm425_vm2, %v17003_v42, 0.0 }
0x5983   :  { %v17005_v34 = vpop.eup %17004  ;;  %12477 = vadd.xlane.f32.xlu1 %v12476_v57 }
0x5984   :  { %v12473_v58 = vsel %vm425_vm2, %v17005_v34, 0.0 }
0x5985   :  { %12474 = vadd.xlane.f32.xlu0 %v12473_v58 }
0x5a0c   :  { %v12478_v40 = vpop.xlane.xlu1 %12477 }
0x5a0d   :  { %17006 = vrcp.f32 %v12478_v40 }
0x5a0e   :  { %v12475_v51 = vpop.xlane.xlu0 %12474 }
0x5a0f   :  { %17008 = vrcp.f32 %v12475_v51  ;;  %v13260_v51 = vld [vmem:[#allocation2 + $0xad8] sm:$0xff] }
0x5a1a   :  { %v17007_v35 = vpop.eup %17006 }
0x5a1b   :  { %v12482_v19 = vmul.f32 %v17007_v35, %v17003_v42  ;;  %v13173_v35 = vld [vmem:[#allocation2 + $0xc08] sm:$0xff] }
0x5a1c   :  { %v17009_v18 = vpop.eup %17008 }
0x5a1d   :  { %v12480_v52 = vmul.f32 %v17009_v18, %v17005_v34 }
0x5a1f   :  { %16633 = vmatprep.mubr.msk.f32.mxu1 %vm425_vm2, %v12480_v52 }
0x5a20   :  { %16634 = vmatmul.mubr.msk.f32.vlgmr.msra.gmra.mxu1 %vm425_vm2, %v12482_v19 }
0x5a21   :  { %16643 = vmatprep.mubr.msk.f32.mxu1 %vm333_vm1, %v12108_v15  ;;  %16642 = vmatpush3.msra.mxu1 %v12117_v59  ;;  %v14598_v15 = vld [vmem:[#allocation2 + $0xae2] ss:$0 sm:$0xff] }
0x5a22   :  { %16657 = vmatprep.subr.mxu1 %v12814_v38 }
0x5a24   :  { %16644 = vmatmul.mubr.msk.f32.vlgmr.msra.gmra.mxu1 %vm333_vm1, %v16588_v17 }
0x5a25   :  { %16658 = vmatpush3.msra.mxu1 %v12814_v38  ;;  %16665 = vmatprep.mubr.msk.f32.mxu1 %vm35_vm0, %v17641_v25 }
0x5a26   :  { %16659 = vmatprep.subr.mxu1 %v12813_v27 }
0x5a27   :  { %16660 = vmatpush3.msra.mxu1 %v12813_v27 }
0x5a28   :  { %16661 = vmatprep.subr.mxu1 %v12812_v41 }
0x5a29   :  { %16662 = vmatpush3.msra.mxu1 %v12812_v41 }
0x5a2a   :  { %16663 = vmatprep.subr.mxu1 %v12811_v44 }
0x5a2b   :  { %16664 = vmatpush3.msra.mxu1 %v12811_v44  ;;  %v13259_v44 = vld [vmem:[#allocation2 + $0xad0] sm:$0xff] }
0x5a2c   :  { %16666 = vmatmul.mubr.msk.f32.vlgmr.msra.gmra.mxu1 %vm35_vm0, %v17643_v20 }
0x5ae0   :  { %v16635_v49 = vpop.f32.mrf.mxu1 }
0x5ae2   :  { %v12555_v5 = vpop.f32.mrf.mxu1 }
0x5ae3   :  { %16638 = vmatprep.mubr.msk.f32.mxu0 %vm333_vm1, %v12555_v5  ;;  %v13428_v5 = vld [vmem:[#allocation2 + $0xbe8] sm:$0xff] }
0x5ae4   :  { %16639 = vmatmul.mubr.msk.f32.vlgmr.msra.gmra.mxu0 %vm333_vm1, %v16635_v49  ;;  %v18049_v47 = vpop.f32.mrf.mxu1  ;;  %v13257_v49 = vld [vmem:[#allocation2 + $0xac0] sm:$0xff] }
0x5ae5   :  { %16647 = vmatpush3.msra.mxu0 %v12730_v54  ;;  %16654 = vmatprep.mubr.msk.f32.mxu0 %vm35_vm0, %v17981_v14  ;;  %v13258_v54 = vld [vmem:[#allocation2 + $0xac8] sm:$0xff] }
0x5ae6   :  { %16648 = vmatprep.subr.mxu0 %v12729_v33  ;;  %v18051_v9 = vpop.f32.mrf.mxu1 }
0x5ae7   :  { %16649 = vmatpush3.msra.mxu0 %v12729_v33  ;;  %v13427_v33 = vld [vmem:[#allocation2 + $0xbe0] sm:$0xff] }
0x5ae8   :  { %16650 = vmatprep.subr.mxu0 %v12728_v46 }
0x5ae9   :  { %16651 = vmatpush3.msra.mxu0 %v12728_v46  ;;  %v13426_v46 = vld [vmem:[#allocation2 + $0xbd8] sm:$0xff] }
0x5aea   :  { %16652 = vmatprep.subr.mxu0 %v12727_v60 }
0x5aeb   :  { %16653 = vmatpush3.msra.mxu0 %v12727_v60  ;;  %v13344_v60 = vld [vmem:[#allocation2 + $0xb60] sm:$0xff] }
0x5aec   :  { %16655 = vmatmul.mubr.msk.f32.vlgmr.msra.gmra.mxu0 %vm35_vm0, %v17983_v61  ;;  %v16667_v4 = vpop.f32.mrf.mxu1  ;;  %16668 = vmatprep.subr.mxu0 %v12898_v62 }
0x5aed   :  { %v12892_v45 = vadd.f32 %v16667_v4, %v14601_v8  ;;  %16669 = vmatpush3.msra.mxu0 %v12898_v62  ;;  %16676 = vmatprep.mubr.msk.f32.mxu0 %vm35_vm0, %v17641_v25  ;;  %v14615_v4 = vld [vmem:[#allocation2 + $0xae3] ss:$0 sm:$0xff] }
0x5aee   :  { %v12886_v7 = vpop.f32.mrf.mxu1  ;;  %16670 = vmatprep.subr.mxu0 %v12897_v3 }
0x5aef   :  { %v12887_v12 = vadd.f32 %v14601_v8, %v12886_v7  ;;  %16671 = vmatpush3.msra.mxu0 %v12897_v3  ;;  %16679 = vmatprep.subr.msk.mxu1 %vm333_vm1, %v12892_v45  ;;  %v13343_v8 = vld [vmem:[#allocation2 + $0xb58] sm:$0xff]  ;;  %v13342_v3 = vld [vmem:[#allocation2 + $0xb50] sm:$0xff] }
0x5af0   :  { %16672 = vmatprep.subr.mxu0 %v12896_v56  ;;  %16680 = vmatpush3.xpose.msk.msra.mxu1 %vm333_vm1, %v12892_v45  ;;  %v13341_v45 = vld [vmem:[#allocation2 + $0xb48] sm:$0xff] }
0x5af1   :  { %16673 = vmatpush3.msra.mxu0 %v12896_v56  ;;  %16681 = vmatprep.subr.msk.mxu1 %vm333_vm1, %v12887_v12 }
0x5af2   :  { %16674 = vmatprep.subr.mxu0 %v12895_v50 }
0x5af3   :  { %16675 = vmatpush3.msra.mxu0 %v12895_v50 }
0x5af4   :  { %16677 = vmatmul.mubr.msk.f32.vlgmr.msra.gmra.mxu0 %vm35_vm0, %v17643_v20  ;;  %16682 = vmatpush3.xpose.msk.msra.mxu1 %vm333_vm1, %v12887_v12 }
0x5af5   :  { %16693 = vmatprep.subr.mxu1 %v13173_v35 }
0x5ba4   :  { %v18063_v6 = vpop.f32.mrf.mxu0 }
0x5ba6   :  { %v18065_v13 = vpop.f32.mrf.mxu0 }
0x5bac   :  { %v16656_v17 = vpop.f32.mrf.mxu0 }
0x5bad   :  { %v12808_v26 = vadd.f32 %v16656_v17, %v14598_v15  ;;  %v14621_v17 = vld [vmem:[#allocation2 + $0xbf3] ss:$0 sm:$0xff] }
0x5bae   :  { %v12802_v22 = vpop.f32.mrf.mxu0 }
0x5baf   :  { %v12803_v24 = vadd.f32 %v14598_v15, %v12802_v22 }
0x5bb1   :  { %16683 = vmatprep.mubr.msk.f32.mxu1 %vm333_vm1, %v12803_v24 }
0x5bb2   :  { %16684 = vmatmul.mubr.msk.f32.vlgmr.msra.gmra.mxu1 %vm333_vm1, %v12808_v26  ;;  %v12724_v26 = vadd.f32 %v18049_v47, %v18063_v6 }
0x5bb3   :  { %16694 = vmatpush3.msra.mxu1 %v13173_v35 }
0x5bb4   :  { %v16678_v23 = vpop.f32.mrf.mxu0  ;;  %16709 = vmatprep.subr.mxu1 %v13344_v60 }
0x5bb5   :  { %v12976_v28 = vadd.f32 %v16678_v23, %v14604_v53  ;;  %v12719_v23 = vadd.f32 %v18051_v9, %v18065_v13 }
0x5bb6   :  { %v12970_v29 = vpop.f32.mrf.mxu0 }
0x5bb7   :  { %v12971_v31 = vadd.f32 %v14604_v53, %v12970_v29  ;;  %16686 = vmatprep.subr.mxu0 %v12976_v28 }
0x5bb8   :  { %16687 = vmatpush3.msra.mxu0 %v12976_v28 }
0x5bb9   :  { %16688 = vmatprep.subr.mxu0 %v12971_v31 }
0x5bba   :  { %16689 = vmatpush3.msra.mxu0 %v12971_v31  ;;  %v14618_v31 = vld [vmem:[#allocation2 + $0xb6b] ss:$0 sm:$0xff] }
0x5bbb   :  { %16698 = vmatprep.subr.mxu0 %v13260_v51 }
0x5c72   :  { %v16685_v30 = vpop.f32.mrf.mxu1 }
0x5c73   :  { %v13067_v32 = vmul.f32 0.35355338, %v16685_v30 }
0x5c74   :  { %v13057_v63 = vpop.f32.mrf.mxu1 }
0x5c75   :  { %v13069_v10 = vadd.f32 %v18006_v48, %v13067_v32  ;;  %v13066_v11 = vmul.f32 0.35355338, %v13057_v63 }
0x5c77   :  { %v13068_v36 = vadd.f32 %v18012_v55, %v13066_v11  ;;  %v13073_v2 = vsel %vm425_vm2, %v13069_v10, -inf }
0x5c78   :  { %13074 = vmax.xlane.f32.xlu1 %v13073_v2 }
0x5c79   :  { %v13070_v21 = vsel %vm425_vm2, %v13068_v36, -inf }
0x5c7a   :  { %13071 = vmax.xlane.f32.xlu0 %v13070_v21 }
0x5d01   :  { %v13075_v37 = vpop.xlane.xlu1 %13074 }
0x5d02   :  { %v13077_v39 = vsub.f32 %v13069_v10, %v13075_v37 }
0x5d03   :  { %v13072_v43 = vpop.xlane.xlu0 %13071 }
0x5d04   :  { %v13080_v42 = vmul.f32 1.442695, %v13077_v39  ;;  %v13076_v57 = vsub.f32 %v13068_v36, %v13072_v43 }
0x5d06   :  { %17010 = vpow2.f32 %v13080_v42  ;;  %v13078_v34 = vmul.f32 1.442695, %v13076_v57 }
0x5d08   :  { %17012 = vpow2.f32 %v13078_v34 }
0x5d13   :  { %v17011_v58 = vpop.eup %17010 }
0x5d14   :  { %v13085_v59 = vsel %vm425_vm2, %v17011_v58, 0.0 }
0x5d15   :  { %v17013_v16 = vpop.eup %17012  ;;  %13086 = vadd.xlane.f32.xlu1 %v13085_v59 }
0x5d16   :  { %v13082_v40 = vsel %vm425_vm2, %v17013_v16, 0.0 }
0x5d17   :  { %13083 = vadd.xlane.f32.xlu0 %v13082_v40 }
0x5d9e   :  { %v13087_v18 = vpop.xlane.xlu1 %13086 }
0x5d9f   :  { %17014 = vrcp.f32 %v13087_v18 }
0x5da0   :  { %v13084_v52 = vpop.xlane.xlu0 %13083 }
0x5da1   :  { %17016 = vrcp.f32 %v13084_v52 }
0x5dac   :  { %v17015_v19 = vpop.eup %17014 }
0x5dad   :  { %v13091_v41 = vmul.f32 %v17015_v19, %v17011_v58 }
0x5dae   :  { %v17017_v38 = vpop.eup %17016 }
0x5daf   :  { %v13089_v27 = vmul.f32 %v17017_v38, %v17013_v16  ;;  %v13703_v16 = vld [vmem:[#allocation2 + $0xc10] sm:$0xff] }
0x5db1   :  { %16690 = vmatprep.mubr.msk.f32.mxu0 %vm425_vm2, %v13089_v27 }
0x5db2   :  { %16691 = vmatmul.mubr.msk.f32.vlgmr.msra.gmra.mxu0 %vm425_vm2, %v13091_v41 }
0x5db3   :  { %16699 = vmatpush3.msra.mxu0 %v13260_v51  ;;  %16706 = vmatprep.mubr.msk.f32.mxu0 %vm35_vm0, %v17981_v14  ;;  %v13425_v14 = vld [vmem:[#allocation2 + $0xbd0] sm:$0xff] }
0x5db4   :  { %16700 = vmatprep.subr.mxu0 %v13259_v44 }
0x5db5   :  { %16701 = vmatpush3.msra.mxu0 %v13259_v44  ;;  %v14632_v44 = vld [vmem:[#allocation2 + $0xc18] ss:$0 sm:$0xff] }
0x5db6   :  { %16702 = vmatprep.subr.mxu0 %v13258_v54 }
0x5db7   :  { %16703 = vmatpush3.msra.mxu0 %v13258_v54 }
0x5db8   :  { %16704 = vmatprep.subr.mxu0 %v13257_v49 }
0x5db9   :  { %16705 = vmatpush3.msra.mxu0 %v13257_v49 }
0x5dba   :  { %16707 = vmatmul.mubr.msk.f32.vlgmr.msra.gmra.mxu0 %vm35_vm0, %v17983_v61  ;;  %16720 = vmatprep.subr.mxu0 %v13428_v5 }
0x5dbb   :  { %16721 = vmatpush3.msra.mxu0 %v13428_v5  ;;  %16728 = vmatprep.mubr.msk.f32.mxu0 %vm35_vm0, %v17641_v25 }
0x5dbc   :  { %16722 = vmatprep.subr.mxu0 %v13427_v33 }
0x5dbd   :  { %16723 = vmatpush3.msra.mxu0 %v13427_v33 }
0x5dbe   :  { %16724 = vmatprep.subr.mxu0 %v13426_v46 }
0x5dbf   :  { %16725 = vmatpush3.msra.mxu0 %v13426_v46 }
0x5dc0   :  { %16726 = vmatprep.subr.mxu0 %v13425_v14 }
0x5dc1   :  { %16727 = vmatpush3.msra.mxu0 %v13425_v14 }
0x5dc2   :  { %16729 = vmatmul.mubr.msk.f32.vlgmr.msra.gmra.mxu0 %vm35_vm0, %v17643_v20 }
0x5e72   :  { %v16692_v62 = vpop.f32.mrf.mxu0 }
0x5e74   :  { %v13164_v61 = vpop.f32.mrf.mxu0 }
0x5e75   :  { %16695 = vmatprep.mubr.msk.f32.mxu1 %vm333_vm1, %v13164_v61 }
0x5e76   :  { %16696 = vmatmul.mubr.msk.f32.vlgmr.msra.gmra.mxu1 %vm333_vm1, %v16692_v62 }
0x5e77   :  { %16710 = vmatpush3.msra.mxu1 %v13344_v60  ;;  %16717 = vmatprep.mubr.msk.f32.mxu1 %vm35_vm0, %v17641_v25 }
0x5e78   :  { %16711 = vmatprep.subr.mxu1 %v13343_v8 }
0x5e79   :  { %16712 = vmatpush3.msra.mxu1 %v13343_v8 }
0x5e7a   :  { %v16708_v56 = vpop.f32.mrf.mxu0  ;;  %16713 = vmatprep.subr.mxu1 %v13342_v3 }
0x5e7b   :  { %v13338_v7 = vadd.f32 %v16708_v56, %v14615_v4  ;;  %16714 = vmatpush3.msra.mxu1 %v13342_v3 }
0x5e7c   :  { %v13332_v12 = vpop.f32.mrf.mxu0  ;;  %16715 = vmatprep.subr.mxu1 %v13341_v45 }
0x5e7d   :  { %v13333_v50 = vadd.f32 %v14615_v4, %v13332_v12  ;;  %16716 = vmatpush3.msra.mxu1 %v13341_v45 }
0x5e7e   :  { %16718 = vmatmul.mubr.msk.f32.vlgmr.msra.gmra.mxu1 %vm35_vm0, %v17643_v20 }
0x5e7f   :  { %16735 = vmatprep.mubr.msk.f32.mxu1 %vm333_vm1, %v13333_v50 }
0x5e82   :  { %v16730_v25 = vpop.f32.mrf.mxu0 }
0x5e83   :  { %v13506_v15 = vadd.f32 %v16730_v25, %v14621_v17  ;;  %v13838_v25 = vld [vmem:[#allocation2 + $0xc38] sm:$0xff] }
0x5e84   :  { %v13500_v22 = vpop.f32.mrf.mxu0 }
0x5e85   :  { %v13501_v24 = vadd.f32 %v14621_v17, %v13500_v22  ;;  %16738 = vmatprep.subr.mxu0 %v13506_v15  ;;  %v13839_v17 = vld [vmem:[#allocation2 + $0xc40] sm:$0xff]  ;;  %v13836_v22 = vld [vmem:[#allocation2 + $0xc28] sm:$0xff] }
0x5e86   :  { %16739 = vmatpush3.msra.mxu0 %v13506_v15  ;;  %v13837_v15 = vld [vmem:[#allocation2 + $0xc30] sm:$0xff] }
0x5e87   :  { %16740 = vmatprep.subr.mxu0 %v13501_v24 }
0x5e88   :  { %16741 = vmatpush3.msra.mxu0 %v13501_v24  ;;  %v13935_v24 = vld [vmem:[#allocation2 + $0xc88] sm:$0xff] }
0x5e89   :  { %16750 = vmatprep.subr.mxu0 %v13839_v17 }
0x5f36   :  { %v16697_v53 = vpop.f32.mrf.mxu1 }
0x5f37   :  { %v13256_v28 = vadd.f32 %v16697_v53, %v12724_v26  ;;  %v13934_v26 = vld [vmem:[#allocation2 + $0xc80] sm:$0xff]  ;;  %v13933_v53 = vld [vmem:[#allocation2 + $0xc78] sm:$0xff] }
0x5f38   :  { %v13246_v20 = vpop.f32.mrf.mxu1 }
0x5f39   :  { %v13255_v29 = vadd.f32 %v13246_v20, %v12719_v23  ;;  %v13932_v23 = vld [vmem:[#allocation2 + $0xc70] sm:$0xff] }
0x5f3e   :  { %v16719_v30 = vpop.f32.mrf.mxu1 }
0x5f3f   :  { %v13422_v32 = vadd.f32 %v16719_v30, %v14618_v31 }
0x5f40   :  { %v13416_v63 = vpop.f32.mrf.mxu1 }
0x5f41   :  { %v13417_v10 = vadd.f32 %v14618_v31, %v13416_v63  ;;  %16731 = vmatprep.subr.msk.mxu1 %vm333_vm1, %v13422_v32 }
0x5f42   :  { %16732 = vmatpush3.xpose.msk.msra.mxu1 %vm333_vm1, %v13422_v32 }
0x5f43   :  { %16733 = vmatprep.subr.msk.mxu1 %vm333_vm1, %v13417_v10 }
0x5f46   :  { %16734 = vmatpush3.xpose.msk.msra.mxu1 %vm333_vm1, %v13417_v10  ;;  %v14633_v10 = vld [vmem:[#allocation2 + $0xc20] ss:$0 sm:$0xff] }
0x5f47   :  { %16745 = vmatprep.subr.mxu1 %v13703_v16 }
0x5f49   :  { %16736 = vmatmul.mubr.msk.f32.vlgmr.msra.gmra.mxu1 %vm333_vm1, %v13338_v7 }
0x5f4a   :  { %16746 = vmatpush3.msra.mxu1 %v13703_v16 }
0x5f4b   :  { %16761 = vmatprep.subr.mxu1 %v13935_v24 }
0x6009   :  { %v16737_v47 = vpop.f32.mrf.mxu1 }
0x600a   :  { %v13597_v9 = vmul.f32 0.35355338, %v16737_v47 }
0x600b   :  { %v13587_v6 = vpop.f32.mrf.mxu1 }
0x600c   :  { %v13599_v13 = vadd.f32 %v18006_v48, %v13597_v9  ;;  %v13596_v11 = vmul.f32 0.35355338, %v13587_v6 }
0x600e   :  { %v13598_v36 = vadd.f32 %v18012_v55, %v13596_v11  ;;  %v13603_v2 = vsel %vm425_vm2, %v13599_v13, -inf  ;;  %v14634_v11 = vld [vmem:[#allocation2 + $0xc21] ss:$0 sm:$0xff] }
0x600f   :  { %13604 = vmax.xlane.f32.xlu1 %v13603_v2 }
0x6010   :  { %v13600_v21 = vsel %vm425_vm2, %v13598_v36, -inf }
0x6011   :  { %13601 = vmax.xlane.f32.xlu0 %v13600_v21 }
0x6098   :  { %v13605_v37 = vpop.xlane.xlu1 %13604 }
0x6099   :  { %v13607_v39 = vsub.f32 %v13599_v13, %v13605_v37  ;;  %v13931_v37 = vld [vmem:[#allocation2 + $0xc68] sm:$0xff] }
0x609a   :  { %v13602_v43 = vpop.xlane.xlu0 %13601 }
0x609b   :  { %v13610_v42 = vmul.f32 1.442695, %v13607_v39  ;;  %v13606_v57 = vsub.f32 %v13598_v36, %v13602_v43  ;;  %v13930_v39 = vld [vmem:[#allocation2 + $0xc60] sm:$0xff]  ;;  %v13929_v43 = vld [vmem:[#allocation2 + $0xc58] sm:$0xff] }
0x609d   :  { %17018 = vpow2.f32 %v13610_v42  ;;  %v13608_v34 = vmul.f32 1.442695, %v13606_v57  ;;  %v13928_v42 = vld [vmem:[#allocation2 + $0xc50] sm:$0xff]  ;;  %v14635_v57 = vld [vmem:[#allocation2 + $0xc48] ss:$0 sm:$0xff] }
0x609f   :  { %17020 = vpow2.f32 %v13608_v34 }
0x60aa   :  { %v17019_v58 = vpop.eup %17018 }
0x60ab   :  { %v13615_v48 = vsel %vm425_vm2, %v17019_v58, 0.0 }
0x60ac   :  { %v17021_v59 = vpop.eup %17020  ;;  %13616 = vadd.xlane.f32.xlu1 %v13615_v48 }
0x60ad   :  { %v13612_v55 = vsel %vm425_vm2, %v17021_v59, 0.0 }
0x60ae   :  { %13613 = vadd.xlane.f32.xlu0 %v13612_v55 }
0x6135   :  { %v13617_v40 = vpop.xlane.xlu1 %13616 }
0x6136   :  { %17022 = vrcp.f32 %v13617_v40  ;;  %v14638_v40 = vld [vmem:[#allocation2 + $0xc90] ss:$0 sm:$0xff] }
0x6137   :  { %v13614_v51 = vpop.xlane.xlu0 %13613 }
0x6138   :  { %17024 = vrcp.f32 %v13614_v51 }
0x6143   :  { %v17023_v35 = vpop.eup %17022 }
0x6144   :  { %v13621_v19 = vmul.f32 %v17023_v35, %v17019_v58 }
0x6145   :  { %v17025_v18 = vpop.eup %17024 }
0x6146   :  { %v13619_v52 = vmul.f32 %v17025_v18, %v17021_v59 }
0x6148   :  { %16742 = vmatprep.mubr.msk.f32.mxu0 %vm425_vm2, %v13619_v52 }
0x6149   :  { %16743 = vmatmul.mubr.msk.f32.vlgmr.msra.gmra.mxu0 %vm425_vm2, %v13621_v19 }
0x614a   :  { %16751 = vmatpush3.msra.mxu0 %v13839_v17 }
0x614b   :  { %16752 = vmatprep.subr.mxu0 %v13838_v25 }
0x614c   :  { %16753 = vmatpush3.msra.mxu0 %v13838_v25  ;;  %v14641_v25 = vld [vmem:[#allocation2 + $0xc98] ss:$0 sm:$0xff] }
0x614d   :  { %16754 = vmatprep.subr.mxu0 %v13837_v15 }
0x614e   :  { %16755 = vmatpush3.msra.mxu0 %v13837_v15 }
0x614f   :  { %16756 = vmatprep.subr.mxu0 %v13836_v22 }
0x6150   :  { %16757 = vmatpush3.msra.mxu0 %v13836_v22 }
0x6209   :  { %v16744_v38 = vpop.f32.mrf.mxu0 }
0x620b   :  { %v13694_v27 = vpop.f32.mrf.mxu0 }
0x620c   :  { %16747 = vmatprep.mubr.msk.f32.mxu1 %vm333_vm1, %v13694_v27 }
0x620d   :  { %16748 = vmatmul.mubr.msk.f32.vlgmr.msra.gmra.mxu1 %vm333_vm1, %v16744_v38 }
0x620e   :  { %16762 = vmatpush3.msra.mxu1 %v13935_v24 }
0x620f   :  { %16763 = vmatprep.subr.mxu1 %v13934_v26 }
0x6210   :  { %16764 = vmatpush3.msra.mxu1 %v13934_v26 }
0x6211   :  { %16765 = vmatprep.subr.mxu1 %v13933_v53 }
0x6212   :  { %16766 = vmatpush3.msra.mxu1 %v13933_v53  ;;  %v14642_v53 = vld [vmem:[#allocation2 + $0xc99] ss:$0 sm:$0xff] }
0x6213   :  { %16767 = vmatprep.subr.mxu1 %v13932_v23 }
0x6214   :  { %16768 = vmatpush3.msra.mxu1 %v13932_v23 }
0x6215   :  { %16769 = vmatprep.subr.mxu1 %v13931_v37 }
0x6216   :  { %16770 = vmatpush3.msra.mxu1 %v13931_v37 }
0x6217   :  { %16771 = vmatprep.subr.mxu1 %v13930_v39 }
0x6218   :  { %16772 = vmatpush3.msra.mxu1 %v13930_v39 }
0x6219   :  { %16773 = vmatprep.subr.mxu1 %v13929_v43 }
0x621a   :  { %16774 = vmatpush3.msra.mxu1 %v13929_v43 }
0x621b   :  { %16775 = vmatprep.subr.mxu1 %v13928_v42 }
0x621c   :  { %16776 = vmatpush3.msra.mxu1 %v13928_v42 }
0x62cd   :  { %v16749_v41 = vpop.f32.mrf.mxu1 }
0x62ce   :  { %v13786_v54 = vadd.f32 %v16749_v41, %v13256_v28 }
0x62cf   :  { %v13776_v49 = vpop.f32.mrf.mxu1 }
0x62d0   :  { %v13793_v5 = vadd.f32 %v14632_v44, %v13786_v54  ;;  %v13785_v33 = vadd.f32 %v13776_v49, %v13255_v29 }
0x62d2   :  { %v18112_v46 = vadd.f32 %v13793_v5, %v17964_v1  ;;  %v13792_v14 = vadd.f32 %v14632_v44, %v13785_v33 }
0x62d4   :  { %v18115_v60 = vadd.f32 %v13792_v14, %v17967_v0  ;;  %v13801_v62 = vsel %vm35_vm0, %v18112_v46, 0.0 }
0x62d5   :  { %13802 = vadd.xlane.f32.xlu1 %v13801_v62 }
0x62d6   :  { %v13798_v61 = vsel %vm35_vm0, %v18115_v60, 0.0 }
0x62d7   :  { %13799 = vadd.xlane.f32.xlu0 %v13798_v61 }
0x635e   :  { %v13803_v8 = vpop.xlane.xlu1 %13802 }
0x635f   :  { %v13805_v3 = vmul.f32 0.03125, %v13803_v8 }
0x6360   :  { %v13800_v4 = vpop.xlane.xlu0 %13799 }
0x6361   :  { %v13807_v45 = vsub.f32 %v18112_v46, %v13805_v3  ;;  %v13804_v56 = vmul.f32 0.03125, %v13800_v4  ;;  %v14066_v3 = vld [vmem:[#allocation2 + $0xcb0] sm:$0xff]  ;;  %v14065_v4 = vld [vmem:[#allocation2 + $0xca8] sm:$0xff] }
0x6363   :  { %v13806_v1 = vsub.f32 %v18115_v60, %v13804_v56  ;;  %v13809_v7 = vmul.f32 %v13807_v45, %v13807_v45 }
0x6365   :  { %v13813_v0 = vsel %vm35_vm0, %v13809_v7, 0.0  ;;  %v13808_v12 = vmul.f32 %v13806_v1, %v13806_v1 }
0x6366   :  { %13814 = vadd.xlane.f32.xlu1 %v13813_v0 }
0x6367   :  { %v13810_v50 = vsel %vm35_vm0, %v13808_v12, 0.0 }
0x6368   :  { %13811 = vadd.xlane.f32.xlu0 %v13810_v50 }
0x63ef   :  { %v13815_v28 = vpop.xlane.xlu1 %13814 }
0x63f0   :  { %v13817_v20 = vmul.f32 0.03125, %v13815_v28 }
0x63f1   :  { %v13812_v29 = vpop.xlane.xlu0 %13811 }
0x63f2   :  { %v13819_v31 = vadd.f32 1e-05, %v13817_v20  ;;  %v13816_v30 = vmul.f32 0.03125, %v13812_v29  ;;  %v14643_v29 = vld [vmem:[#allocation2 + $0xcc0] ss:$0 sm:$0xff] }
0x63f4   :  { %17026 = vrsqrt.f32 %v13819_v31  ;;  %v13818_v32 = vadd.f32 1e-05, %v13816_v30 }
0x63f6   :  { %17028 = vrsqrt.f32 %v13818_v32 }
0x6401   :  { %v17027_v63 = vpop.eup %17026 }
0x6402   :  { %v13823_v47 = vmul.f32 %v17027_v63, %v13807_v45  ;;  %v14064_v45 = vld [vmem:[#allocation2 + $0xca0] sm:$0xff] }
0x6403   :  { %v17029_v9 = vpop.eup %17028 }
0x6404   :  { %v13822_v6 = vmul.f32 %v17029_v9, %v13806_v1  ;;  %v13829_v13 = vmul.f32 %v14633_v10, %v13823_v47 }
0x6406   :  { %v13828_v36 = vmul.f32 %v14633_v10, %v13822_v6  ;;  %v13835_v21 = vadd.f32 %v14634_v11, %v13829_v13 }
0x6408   :  { %v13834_v2 = vadd.f32 %v14634_v11, %v13828_v36 }
0x640a   :  { %16758 = vmatprep.mubr.msk.f32.mxu0 %vm35_vm0, %v13834_v2 }
0x640b   :  { %16759 = vmatmul.mubr.msk.f32.vlgmr.msra.gmra.mxu0 %vm35_vm0, %v13835_v21 }
0x64cb   :  { %v16760_v34 = vpop.f32.mrf.mxu0 }
0x64cc   :  { %v13923_v58 = vadd.f32 %v16760_v34, %v14635_v57 }
0x64cd   :  { %v13917_v48 = vpop.f32.mrf.mxu0 }
0x64ce   :  { %v13918_v59 = vadd.f32 %v14635_v57, %v13917_v48  ;;  %v13927_v16 = vmax.f32 %v13923_v58, 0.0 }
0x64d0   :  { %v13926_v55 = vmax.f32 %v13918_v59, 0.0 }
0x64d2   :  { %16777 = vmatprep.mubr.msk.f32.mxu1 %vm2353_vm3, %v13926_v55 }
0x64d3   :  { %16778 = vmatmul.mubr.msk.f32.vlgmr.msra.gmra.mxu1 %vm2353_vm3, %v13927_v16 }
0x6593   :  { %v16779_v51 = vpop.f32.mrf.mxu1 }
0x6594   :  { %v14019_v35 = vadd.f32 %v16779_v51, %v14638_v40 }
0x6595   :  { %v14013_v18 = vpop.f32.mrf.mxu1 }
0x6596   :  { %v14023_v52 = vadd.f32 %v14019_v35, %v18112_v46  ;;  %v14014_v19 = vadd.f32 %v14638_v40, %v14013_v18 }
0x6598   :  { %v14022_v38 = vadd.f32 %v14014_v19, %v18115_v60  ;;  %v14029_v27 = vsel %vm35_vm0, %v14023_v52, 0.0  ;;  %v14067_v60 = vld [vmem:[#allocation2 + $0xcb8] sm:$0xff] }
0x6599   :  { %14030 = vadd.xlane.f32.xlu1 %v14029_v27  ;;  %16780 = vmatprep.subr.mxu0 %v14067_v60 }
0x659a   :  { %v14026_v41 = vsel %vm35_vm0, %v14022_v38, 0.0  ;;  %16781 = vmatpush3.msra.mxu0 %v14067_v60 }
0x659b   :  { %14027 = vadd.xlane.f32.xlu0 %v14026_v41  ;;  %16782 = vmatprep.subr.mxu0 %v14066_v3 }
0x659c   :  { %16783 = vmatpush3.msra.mxu0 %v14066_v3 }
0x659d   :  { %16784 = vmatprep.subr.mxu0 %v14065_v4 }
0x659e   :  { %16785 = vmatpush3.msra.mxu0 %v14065_v4 }
0x659f   :  { %16786 = vmatprep.subr.mxu0 %v14064_v45 }
0x65a0   :  { %16787 = vmatpush3.msra.mxu0 %v14064_v45 }
0x6622   :  { %v14031_v44 = vpop.xlane.xlu1 %14030 }
0x6623   :  { %v14033_v54 = vmul.f32 0.03125, %v14031_v44 }
0x6624   :  { %v14028_v49 = vpop.xlane.xlu0 %14027 }
0x6625   :  { %v14035_v5 = vsub.f32 %v14023_v52, %v14033_v54  ;;  %v14032_v33 = vmul.f32 0.03125, %v14028_v49 }
0x6627   :  { %v14034_v14 = vsub.f32 %v14022_v38, %v14032_v33  ;;  %v14037_v62 = vmul.f32 %v14035_v5, %v14035_v5 }
0x6629   :  { %v14041_v61 = vsel %vm35_vm0, %v14037_v62, 0.0  ;;  %v14036_v8 = vmul.f32 %v14034_v14, %v14034_v14 }
0x662a   :  { %14042 = vadd.xlane.f32.xlu1 %v14041_v61 }
0x662b   :  { %v14038_v46 = vsel %vm35_vm0, %v14036_v8, 0.0 }
0x662c   :  { %14039 = vadd.xlane.f32.xlu0 %v14038_v46 }
0x66b3   :  { %v14043_v56 = vpop.xlane.xlu1 %14042 }
0x66b4   :  { %v14045_v1 = vmul.f32 0.03125, %v14043_v56 }
0x66b5   :  { %v14040_v7 = vpop.xlane.xlu0 %14039 }
0x66b6   :  { %v14047_v0 = vadd.f32 1e-05, %v14045_v1  ;;  %v14044_v12 = vmul.f32 0.03125, %v14040_v7 }
0x66b8   :  { %17030 = vrsqrt.f32 %v14047_v0  ;;  %v14046_v50 = vadd.f32 1e-05, %v14044_v12 }
0x66ba   :  { %17032 = vrsqrt.f32 %v14046_v50 }
0x66c5   :  { %v17031_v17 = vpop.eup %17030 }
0x66c6   :  { %v14051_v15 = vmul.f32 %v17031_v17, %v14035_v5 }
0x66c7   :  { %v17033_v22 = vpop.eup %17032 }
0x66c8   :  { %v14050_v24 = vmul.f32 %v17033_v22, %v14034_v14  ;;  %v14057_v26 = vmul.f32 %v14641_v25, %v14051_v15 }
0x66ca   :  { %v14056_v23 = vmul.f32 %v14641_v25, %v14050_v24  ;;  %v14063_v20 = vadd.f32 %v14642_v53, %v14057_v26 }
0x66cc   :  { %v14062_v28 = vadd.f32 %v14642_v53, %v14056_v23 }
0x66ce   :  { %16788 = vmatprep.mubr.msk.f32.mxu0 %vm35_vm0, %v14062_v28 }
0x66cf   :  { %16789 = vmatmul.mubr.msk.f32.vlgmr.msra.gmra.mxu0 %vm35_vm0, %v14063_v20 }
0x678f   :  { %v16790_v31 = vpop.f32.mrf.mxu0 }
0x6790   :  { %v14151_v30 = vadd.f32 %v16790_v31, %v14643_v29 }
0x6791   :  { %v14145_v32 = vpop.f32.mrf.mxu0 }
0x6792   :  { %v14146_v63 = vadd.f32 %v14643_v29, %v14145_v32  ;;  %14156 = vmax.xlane.f32.xlu1 %v14151_v30 }
0x6794   :  { %14154 = vmax.xlane.f32.xlu0 %v14146_v63 }
0x681b   :  { %v14157_v10 = vpop.xlane.xlu1 %14156 }
0x681c   :  { %v14159_v47 = vsub.f32 %v14151_v30, %v14157_v10 }
0x681d   :  { %v14155_v9 = vpop.xlane.xlu0 %14154 }
0x681e   :  { %v14162_v6 = vmul.f32 1.442695, %v14159_v47  ;;  %v14158_v13 = vsub.f32 %v14146_v63, %v14155_v9 }
0x6820   :  { %17034 = vpow2.f32 %v14162_v6  ;;  %v14160_v11 = vmul.f32 1.442695, %v14158_v13 }
0x6822   :  { %17036 = vpow2.f32 %v14160_v11 }
0x682d   :  { %v17035_v36 = vpop.eup %17034 }
0x682e   :  { %14166 = vadd.xlane.f32.xlu1 %v17035_v36 }
0x682f   :  { %v17037_v2 = vpop.eup %17036 }
0x6830   :  { %14164 = vadd.xlane.f32.xlu0 %v17037_v2 }
0x68b7   :  { %v14167_v21 = vpop.xlane.xlu1 %14166 }
0x68b8   :  { %17038 = vlog2.f32 %v14167_v21 }
0x68b9   :  { %v14165_v37 = vpop.xlane.xlu0 %14164 }
0x68ba   :  { %17040 = vlog2.f32 %v14165_v37 }
0x68c5   :  { %v17039_v39 = vpop.eup %17038 }
0x68c6   :  { %v14171_v43 = vmul.f32 0.6931472, %v17039_v39 }
0x68c7   :  { %v17041_v42 = vpop.eup %17040 }
0x68c8   :  { %v14173_v57 = vsub.f32 %v14159_v47, %v14171_v43  ;;  %v14169_v34 = vmul.f32 0.6931472, %v17041_v42 }
0x68ca   :  { %14175 = vst [vmem:[%s18145_s2 + $0x8] sm:$0xff] %v14173_v57  ;;  %v14172_v58 = vsub.f32 %v14158_v13, %v14169_v34 }
0x68cc   :  { %14174 = vst [vmem:[%s18145_s2] sm:$0xff] %v14172_v58 }
0x68cd   :  { %14180 = vsyncpa [#allocation3], 1 }

</bundles_post_ra>
